<compile_context>
chip_gen: v6e
topology: v6e:2x2x1
jax: 0.10.0
libtpu: 0.0.40
codegen_flags: <defaults>
</compile_context>

<pallas_src>
import functools

import numpy as np
import jax
import jax.numpy as jnp
from jax import lax
from jax.experimental import pallas as pl
from jax.experimental.pallas import tpu as pltpu

EPS = 1e-5


def _round_up(v, m):
    return (v + m - 1) // m * m


# ------------------------------------------------------------- fused kernel ---
def _encoding_block_kernel(
        xc_ref, w1_ref, b1_ref, g1_ref, be1_ref, s1_ref, t1_ref,
        w2_ref, b2_ref, g2_ref, be2_ref, s2_ref, t2_ref, mask_ref,
        o_ref, pad_ref, p_ref,
        *, n_tot, n_batch, n_vox, c1, c2, pad_l, taps):
    """Whole EncodingBlocks forward on one lane-dense (C, B*D*H*W) slab."""
    inv_n = 1.0 / n_tot

    # One-time zero fills:
    #  - pad_ref borders stay zero (its centre is overwritten before each conv);
    #  - p_ref K-tail rows stay zero (their weight columns are zero too, but
    #    uninitialised VMEM could hold NaN and 0 * NaN = NaN).
    pad_ref[...] = jnp.zeros_like(pad_ref)
    p_ref[...] = jnp.zeros_like(p_ref)

    def conv_bn(cin, w_ref_, b_ref_, g_ref_, be_ref_):
        # im2col: 27 statically shifted (cin, n_tot) windows of the flat padded
        # activation, boundary-masked, packed into the (Kp, n_tot) patch matrix.
        for t, off in enumerate(taps):                     # static Python loop
            start = pad_l + off
            win = pad_ref[0:cin, start:start + n_tot]
            p_ref[t * cin:(t + 1) * cin, :] = win * mask_ref[t:t + 1, :]
        # One MXU matmul; both operands are (8,128)-tile aligned.
        y = jnp.dot(w_ref_[...], p_ref[...],
                    preferred_element_type=jnp.float32) + b_ref_[...]
        # training-mode BatchNorm3d: per-channel batch stats, biased variance.
        mean = jnp.sum(y, axis=1, keepdims=True) * inv_n
        var = jnp.sum(y * y, axis=1, keepdims=True) * inv_n - mean * mean
        scale = g_ref_[...] * lax.rsqrt(var + EPS)
        shift = be_ref_[...] - mean * scale
        return y * scale + shift

    # ---- EncodeConv1: Conv3d -> BN, then FiLM1 + the leading ReLU of EncodeConv2.
    pad_ref[0:c1, pad_l:pad_l + n_tot] = xc_ref[...]
    y = conv_bn(c1, w1_ref, b1_ref, g1_ref, be1_ref)
    for b in range(n_batch):                               # static per-batch FiLM
        seg = y[:, b * n_vox:(b + 1) * n_vox]
        seg = seg * s1_ref[:, b:b + 1] + t1_ref[:, b:b + 1]   # scale already holds the +1
        pad_ref[0:c2, pad_l + b * n_vox:pad_l + (b + 1) * n_vox] = jnp.maximum(seg, 0.0)

    # ---- EncodeConv2: Conv3d -> BN -> ReLU, then FiLM2 straight into the output.
    y = conv_bn(c2, w2_ref, b2_ref, g2_ref, be2_ref)
    y = jnp.maximum(y, 0.0)
    for b in range(n_batch):
        seg = y[:, b * n_vox:(b + 1) * n_vox]
        o_ref[:, b * n_vox:(b + 1) * n_vox] = seg * s2_ref[:, b:b + 1] + t2_ref[:, b:b + 1]


# ----------------------------------------------------- tiny embedding MLP ---
def embed_mlp(z, w1, b1, w2, b2, C):
    """Embeding_Layer MLP: Linear(5,10) -> SiLU -> Linear(10, 2C); returns (scale, shift)."""
    h = z @ w1.T + b1
    h = h * jax.nn.sigmoid(h)           # SiLU
    e = h @ w2.T + b2                   # (B, 2C)
    return e[:, :C], e[:, C:]


# ----------------------------------------------------------- full forward ---
def encoding_blocks_pallas(x, z, p):
    """x: (B, D, H, W, Cin) f32, z: (B, 5) f32 -> (B, D, H, W, Cout) f32."""
    B, D, H, W, Cin = x.shape
    Cout = p["conv1_w"].shape[-1]
    HW, L = H * W, D * H * W
    n_tot = B * L
    assert n_tot % 128 == 0, "B*D*H*W must be a multiple of 128 (lane-dense layout)"
    assert Cout % 8 == 0, "num_out must be a multiple of 8 (sublane granularity)"

    c1 = _round_up(Cin, 8)                 # pad Cin so per-tap row blocks are 8-aligned
    c2 = Cout
    cmax = max(c1, c2)
    kp = _round_up(27 * cmax, 128)         # 128-aligned matmul contraction dim
    pad_l = _round_up(HW + W + 1, 128)     # lane-aligned centre offset of flat pad buffer
    pad_w = 2 * pad_l + n_tot

    # channel-major, lane-dense activation: (C, B*L), zero-padded channels
    xc = jnp.transpose(x, (4, 0, 1, 2, 3)).reshape(Cin, n_tot)
    xc = jnp.pad(xc, ((0, c1 - Cin), (0, 0)))

    # packed conv weights: (Cout, Kp); rows are tap-major, channel-minor; zero K-tail
    w1p = jnp.pad(p["conv1_w"], ((0, 0), (0, 0), (0, 0), (0, c1 - Cin), (0, 0)))
    w1m = jnp.pad(w1p.reshape(27 * c1, Cout).T, ((0, 0), (0, kp - 27 * c1)))
    w2m = jnp.pad(p["conv2_w"].reshape(27 * c2, Cout).T, ((0, 0), (0, kp - 27 * c2)))

    # static lane offsets + boundary-validity masks for the 27 taps
    li = np.arange(L)
    d_i, h_i, w_i = li // HW, (li // W) % H, li % W
    offs, masks = [], []
    for kd in range(3):
        for kh in range(3):
            for kw in range(3):
                dd, dh, dw = kd - 1, kh - 1, kw - 1
                offs.append(dd * HW + dh * W + dw)
                valid = ((d_i + dd >= 0) & (d_i + dd < D)
                         & (h_i + dh >= 0) & (h_i + dh < H)
                         & (w_i + dw >= 0) & (w_i + dw < W))
                masks.append(np.tile(valid, B))
    mask = jnp.asarray(np.stack(masks).astype(np.float32))       # (27, B*L)

    # FiLM scale/shift, compact (Cout, B); broadcast over voxels happens in-kernel
    sc1, sh1 = embed_mlp(z, p["e1_w1"], p["e1_b1"], p["e1_w2"], p["e1_b2"], Cout)
    sc2, sh2 = embed_mlp(z, p["e2_w1"], p["e2_b1"], p["e2_w2"], p["e2_b2"], Cout)
    fs1, fb1 = (1.0 + sc1).T, sh1.T
    fs2, fb2 = (1.0 + sc2).T, sh2.T

    col = lambda v: v.reshape(Cout, 1)
    full = lambda shape: pl.BlockSpec(shape, lambda i: (0, 0))

    out = pl.pallas_call(
        functools.partial(_encoding_block_kernel, n_tot=n_tot, n_batch=B, n_vox=L,
                          c1=c1, c2=c2, pad_l=pad_l, taps=tuple(offs)),
        out_shape=jax.ShapeDtypeStruct((Cout, n_tot), jnp.float32),
        grid=(1,),
        in_specs=[
            full((c1, n_tot)),                                     # xc
            full((Cout, kp)),                                      # w1m
            full((Cout, 1)), full((Cout, 1)), full((Cout, 1)),     # b1, gamma1, beta1
            full((Cout, B)), full((Cout, B)),                      # FiLM1 scale, shift
            full((Cout, kp)),                                      # w2m
            full((Cout, 1)), full((Cout, 1)), full((Cout, 1)),     # b2, gamma2, beta2
            full((Cout, B)), full((Cout, B)),                      # FiLM2 scale, shift
            full((27, n_tot)),                                     # boundary mask
        ],
        out_specs=full((Cout, n_tot)),
        scratch_shapes=[
            pltpu.VMEM((cmax, pad_w), jnp.float32),                # flat zero-padded activation
            pltpu.VMEM((kp, n_tot), jnp.float32),                  # packed im2col matrix
        ],
        compiler_params=pltpu.CompilerParams(
            dimension_semantics=("arbitrary",)),
    )(xc, w1m, col(p["conv1_b"]), col(p["bn1_gamma"]), col(p["bn1_beta"]),
      fs1, fb1,
      w2m, col(p["conv2_b"]), col(p["bn2_gamma"]), col(p["bn2_beta"]),
      fs2, fb2, mask)

    return jnp.transpose(out.reshape(Cout, B, D, H, W), (1, 2, 3, 4, 0))


# -------------------------------------------------------- pure-JAX reference ---
def encoding_blocks_ref(x, z, p):
    C = p["conv1_w"].shape[-1]

    def conv(x_, w, b):
        return lax.conv_general_dilated(
            x_, w, (1, 1, 1), "SAME",
            dimension_numbers=("NDHWC", "DHWIO", "NDHWC")) + b

    def bn(y, g, be):
        m = jnp.mean(y, axis=(0, 1, 2, 3))
        v = jnp.mean((y - m) ** 2, axis=(0, 1, 2, 3))
        return (y - m) / jnp.sqrt(v + EPS) * g + be

    def film(y, sc, sh):
        return y * (1.0 + sc[:, None, None, None, :]) + sh[:, None, None, None, :]

    y = bn(conv(x, p["conv1_w"], p["conv1_b"]), p["bn1_gamma"], p["bn1_beta"])
    sc, sh = embed_mlp(z, p["e1_w1"], p["e1_b1"], p["e1_w2"], p["e1_b2"], C)
    y = film(y, sc, sh)
    y = jnp.maximum(y, 0.0)
    y = bn(conv(y, p["conv2_w"], p["conv2_b"]), p["bn2_gamma"], p["bn2_beta"])
    y = jnp.maximum(y, 0.0)
    sc, sh = embed_mlp(z, p["e2_w1"], p["e2_b1"], p["e2_w2"], p["e2_b2"], C)
    y = film(y, sc, sh)
    return y


# --------------------------------------------------------------- parameters ---
def init_params(key, num_in, num_out):
    ks = jax.random.split(key, 16)

    def n(k, shape, scale=0.1):
        return scale * jax.random.normal(k, shape, jnp.float32)

    return {
        "conv1_w": n(ks[0], (3, 3, 3, num_in, num_out)),
        "conv1_b": n(ks[1], (num_out,)),
        "bn1_gamma": 1.0 + n(ks[2], (num_out,)),
        "bn1_beta": n(ks[3], (num_out,)),
        "e1_w1": n(ks[4], (10, 5)), "e1_b1": n(ks[5], (10,)),
        "e1_w2": n(ks[6], (2 * num_out, 10)), "e1_b2": n(ks[7], (2 * num_out,)),
        "conv2_w": n(ks[8], (3, 3, 3, num_out, num_out)),
        "conv2_b": n(ks[9], (num_out,)),
        "bn2_gamma": 1.0 + n(ks[10], (num_out,)),
        "bn2_beta": n(ks[11], (num_out,)),
        "e2_w1": n(ks[12], (10, 5)), "e2_b1": n(ks[13], (10,)),
        "e2_w2": n(ks[14], (2 * num_out, 10)), "e2_b2": n(ks[15], (2 * num_out,)),
    }


if __name__ == "__main__":
    num_in, num_out = 4, 8
    B, D, H, W = 2, 8, 8, 8

    key = jax.random.PRNGKey(0)
    kx, kz, kp = jax.random.split(key, 3)
    x = jax.random.normal(kx, (B, D, H, W, num_in), jnp.float32)   # NDHWC
    z_prjs = jax.random.normal(kz, (B, 5), jnp.float32)
    params = init_params(kp, num_in, num_out)

    fwd = jax.jit(encoding_blocks_pallas)
    out = jax.block_until_ready(fwd(x, z_prjs, params))

    ref = encoding_blocks_ref(x, z_prjs, params)
    assert out.shape == (B, D, H, W, num_out), out.shape
    err = float(jnp.max(jnp.abs(out - ref)))
    assert err < 1e-3, "max abs err = %g" % err

    print("KERNEL_OK")
</pallas_src>

<mosaic_0001>
module attributes {stable_mosaic.version = 11 : i64} {
  func.func @_encoding_block_kernel(%arg0: i32, %arg1: memref<8x1024xf32, #tpu.memory_space<vmem>>, %arg2: memref<8x256xf32, #tpu.memory_space<vmem>>, %arg3: memref<8x1xf32, #tpu.memory_space<vmem>>, %arg4: memref<8x1xf32, #tpu.memory_space<vmem>>, %arg5: memref<8x1xf32, #tpu.memory_space<vmem>>, %arg6: memref<8x2xf32, #tpu.memory_space<vmem>>, %arg7: memref<8x2xf32, #tpu.memory_space<vmem>>, %arg8: memref<8x256xf32, #tpu.memory_space<vmem>>, %arg9: memref<8x1xf32, #tpu.memory_space<vmem>>, %arg10: memref<8x1xf32, #tpu.memory_space<vmem>>, %arg11: memref<8x1xf32, #tpu.memory_space<vmem>>, %arg12: memref<8x2xf32, #tpu.memory_space<vmem>>, %arg13: memref<8x2xf32, #tpu.memory_space<vmem>>, %arg14: memref<27x1024xf32, #tpu.memory_space<vmem>>, %arg15: memref<8x1024xf32, #tpu.memory_space<vmem>>, %arg16: memref<8x1280xf32, #tpu.memory_space<vmem>>, %arg17: memref<256x1024xf32, #tpu.memory_space<vmem>>) attributes {dimension_semantics = [#tpu.dimension_semantics<arbitrary>], iteration_bounds = array<i64: 1>, scalar_prefetch = 0 : i64, scratch_operands = 2 : i64, tpu.core_type = #tpu.core_type<tc>, window_params = [{pipeline_mode = #tpu.pipeline_mode<synchronous>, transform_indices = @transform_0, window_bounds = array<i64: 8, 1024>}, {pipeline_mode = #tpu.pipeline_mode<synchronous>, transform_indices = @transform_1, window_bounds = array<i64: 8, 256>}, {pipeline_mode = #tpu.pipeline_mode<synchronous>, transform_indices = @transform_2, window_bounds = array<i64: 8, 1>}, {pipeline_mode = #tpu.pipeline_mode<synchronous>, transform_indices = @transform_3, window_bounds = array<i64: 8, 1>}, {pipeline_mode = #tpu.pipeline_mode<synchronous>, transform_indices = @transform_4, window_bounds = array<i64: 8, 1>}, {pipeline_mode = #tpu.pipeline_mode<synchronous>, transform_indices = @transform_5, window_bounds = array<i64: 8, 2>}, {pipeline_mode = #tpu.pipeline_mode<synchronous>, transform_indices = @transform_6, window_bounds = array<i64: 8, 2>}, {pipeline_mode = #tpu.pipeline_mode<synchronous>, transform_indices = @transform_7, window_bounds = array<i64: 8, 256>}, {pipeline_mode = #tpu.pipeline_mode<synchronous>, transform_indices = @transform_8, window_bounds = array<i64: 8, 1>}, {pipeline_mode = #tpu.pipeline_mode<synchronous>, transform_indices = @transform_9, window_bounds = array<i64: 8, 1>}, {pipeline_mode = #tpu.pipeline_mode<synchronous>, transform_indices = @transform_10, window_bounds = array<i64: 8, 1>}, {pipeline_mode = #tpu.pipeline_mode<synchronous>, transform_indices = @transform_11, window_bounds = array<i64: 8, 2>}, {pipeline_mode = #tpu.pipeline_mode<synchronous>, transform_indices = @transform_12, window_bounds = array<i64: 8, 2>}, {pipeline_mode = #tpu.pipeline_mode<synchronous>, transform_indices = @transform_13, window_bounds = array<i64: 27, 1024>}, {pipeline_mode = #tpu.pipeline_mode<synchronous>, transform_indices = @transform_14, window_bounds = array<i64: 8, 1024>}]} {
    %cst = arith.constant 0.000000e+00 : f32
    %0 = vector.broadcast %cst : f32 to vector<8x1280xf32>
    %c0 = arith.constant 0 : index
    %c0_0 = arith.constant 0 : index
    %1 = vector.load %arg16[%c0, %c0_0] : memref<8x1280xf32, #tpu.memory_space<vmem>>, vector<8x1280xf32>
    tpu.vector_store %arg16[%c0, %c0_0], %0 {strides = array<i32>} : memref<8x1280xf32, #tpu.memory_space<vmem>>, vector<8x1280xf32>,
    %cst_1 = arith.constant 0.000000e+00 : f32
    %2 = vector.broadcast %cst_1 : f32 to vector<256x1024xf32>
    %c0_2 = arith.constant 0 : index
    %c0_3 = arith.constant 0 : index
    %3 = vector.load %arg17[%c0_2, %c0_3] : memref<256x1024xf32, #tpu.memory_space<vmem>>, vector<256x1024xf32>
    tpu.vector_store %arg17[%c0_2, %c0_3], %2 {strides = array<i32>} : memref<256x1024xf32, #tpu.memory_space<vmem>>, vector<256x1024xf32>,
    %c0_4 = arith.constant 0 : index
    %c0_5 = arith.constant 0 : index
    %4 = vector.load %arg1[%c0_4, %c0_5] : memref<8x1024xf32, #tpu.memory_space<vmem>>, vector<8x1024xf32>
    %c0_6 = arith.constant 0 : index
    %c128 = arith.constant 128 : index
    %5 = vector.load %arg16[%c0_6, %c128] : memref<8x1280xf32, #tpu.memory_space<vmem>>, vector<8x1024xf32>
    tpu.vector_store %arg16[%c0_6, %c128], %4 {strides = array<i32>} : memref<8x1280xf32, #tpu.memory_space<vmem>>, vector<8x1024xf32>,
    %c0_7 = arith.constant 0 : index
    %c55 = arith.constant 55 : index
    %6 = vector.load %arg16[%c0_7, %c55] : memref<8x1280xf32, #tpu.memory_space<vmem>>, vector<8x1024xf32>
    %c0_8 = arith.constant 0 : index
    %c0_9 = arith.constant 0 : index
    %7 = vector.load %arg14[%c0_8, %c0_9] : memref<27x1024xf32, #tpu.memory_space<vmem>>, vector<1x1024xf32>
    %8 = vector.broadcast %7 : vector<1x1024xf32> to vector<8x1024xf32>
    %9 = arith.mulf %6, %8 : vector<8x1024xf32>
    %c0_10 = arith.constant 0 : index
    %c0_11 = arith.constant 0 : index
    %10 = vector.load %arg17[%c0_10, %c0_11] : memref<256x1024xf32, #tpu.memory_space<vmem>>, vector<8x1024xf32>
    tpu.vector_store %arg17[%c0_10, %c0_11], %9 {strides = array<i32>} : memref<256x1024xf32, #tpu.memory_space<vmem>>, vector<8x1024xf32>,
    %c0_12 = arith.constant 0 : index
    %c56 = arith.constant 56 : index
    %11 = vector.load %arg16[%c0_12, %c56] : memref<8x1280xf32, #tpu.memory_space<vmem>>, vector<8x1024xf32>
    %c1 = arith.constant 1 : index
    %c0_13 = arith.constant 0 : index
    %12 = vector.load %arg14[%c1, %c0_13] : memref<27x1024xf32, #tpu.memory_space<vmem>>, vector<1x1024xf32>
    %13 = vector.broadcast %12 : vector<1x1024xf32> to vector<8x1024xf32>
    %14 = arith.mulf %11, %13 : vector<8x1024xf32>
    %c8 = arith.constant 8 : index
    %c0_14 = arith.constant 0 : index
    %15 = vector.load %arg17[%c8, %c0_14] : memref<256x1024xf32, #tpu.memory_space<vmem>>, vector<8x1024xf32>
    tpu.vector_store %arg17[%c8, %c0_14], %14 {strides = array<i32>} : memref<256x1024xf32, #tpu.memory_space<vmem>>, vector<8x1024xf32>,
    %c0_15 = arith.constant 0 : index
    %c57 = arith.constant 57 : index
    %16 = vector.load %arg16[%c0_15, %c57] : memref<8x1280xf32, #tpu.memory_space<vmem>>, vector<8x1024xf32>
    %c2 = arith.constant 2 : index
    %c0_16 = arith.constant 0 : index
    %17 = vector.load %arg14[%c2, %c0_16] : memref<27x1024xf32, #tpu.memory_space<vmem>>, vector<1x1024xf32>
    %18 = vector.broadcast %17 : vector<1x1024xf32> to vector<8x1024xf32>
    %19 = arith.mulf %16, %18 : vector<8x1024xf32>
    %c16 = arith.constant 16 : index
    %c0_17 = arith.constant 0 : index
    %20 = vector.load %arg17[%c16, %c0_17] : memref<256x1024xf32, #tpu.memory_space<vmem>>, vector<8x1024xf32>
    tpu.vector_store %arg17[%c16, %c0_17], %19 {strides = array<i32>} : memref<256x1024xf32, #tpu.memory_space<vmem>>, vector<8x1024xf32>,
    %c0_18 = arith.constant 0 : index
    %c63 = arith.constant 63 : index
    %21 = vector.load %arg16[%c0_18, %c63] : memref<8x1280xf32, #tpu.memory_space<vmem>>, vector<8x1024xf32>
    %c3 = arith.constant 3 : index
    %c0_19 = arith.constant 0 : index
    %22 = vector.load %arg14[%c3, %c0_19] : memref<27x1024xf32, #tpu.memory_space<vmem>>, vector<1x1024xf32>
    %23 = vector.broadcast %22 : vector<1x1024xf32> to vector<8x1024xf32>
    %24 = arith.mulf %21, %23 : vector<8x1024xf32>
    %c24 = arith.constant 24 : index
    %c0_20 = arith.constant 0 : index
    %25 = vector.load %arg17[%c24, %c0_20] : memref<256x1024xf32, #tpu.memory_space<vmem>>, vector<8x1024xf32>
    tpu.vector_store %arg17[%c24, %c0_20], %24 {strides = array<i32>} : memref<256x1024xf32, #tpu.memory_space<vmem>>, vector<8x1024xf32>,
    %c0_21 = arith.constant 0 : index
    %c64 = arith.constant 64 : index
    %26 = vector.load %arg16[%c0_21, %c64] : memref<8x1280xf32, #tpu.memory_space<vmem>>, vector<8x1024xf32>
    %c4 = arith.constant 4 : index
    %c0_22 = arith.constant 0 : index
    %27 = vector.load %arg14[%c4, %c0_22] : memref<27x1024xf32, #tpu.memory_space<vmem>>, vector<1x1024xf32>
    %28 = vector.broadcast %27 : vector<1x1024xf32> to vector<8x1024xf32>
    %29 = arith.mulf %26, %28 : vector<8x1024xf32>
    %c32 = arith.constant 32 : index
    %c0_23 = arith.constant 0 : index
    %30 = vector.load %arg17[%c32, %c0_23] : memref<256x1024xf32, #tpu.memory_space<vmem>>, vector<8x1024xf32>
    tpu.vector_store %arg17[%c32, %c0_23], %29 {strides = array<i32>} : memref<256x1024xf32, #tpu.memory_space<vmem>>, vector<8x1024xf32>,
    %c0_24 = arith.constant 0 : index
    %c65 = arith.constant 65 : index
    %31 = vector.load %arg16[%c0_24, %c65] : memref<8x1280xf32, #tpu.memory_space<vmem>>, vector<8x1024xf32>
    %c5 = arith.constant 5 : index
    %c0_25 = arith.constant 0 : index
    %32 = vector.load %arg14[%c5, %c0_25] : memref<27x1024xf32, #tpu.memory_space<vmem>>, vector<1x1024xf32>
    %33 = vector.broadcast %32 : vector<1x1024xf32> to vector<8x1024xf32>
    %34 = arith.mulf %31, %33 : vector<8x1024xf32>
    %c40 = arith.constant 40 : index
    %c0_26 = arith.constant 0 : index
    %35 = vector.load %arg17[%c40, %c0_26] : memref<256x1024xf32, #tpu.memory_space<vmem>>, vector<8x1024xf32>
    tpu.vector_store %arg17[%c40, %c0_26], %34 {strides = array<i32>} : memref<256x1024xf32, #tpu.memory_space<vmem>>, vector<8x1024xf32>,
    %c0_27 = arith.constant 0 : index
    %c71 = arith.constant 71 : index
    %36 = vector.load %arg16[%c0_27, %c71] : memref<8x1280xf32, #tpu.memory_space<vmem>>, vector<8x1024xf32>
    %c6 = arith.constant 6 : index
    %c0_28 = arith.constant 0 : index
    %37 = vector.load %arg14[%c6, %c0_28] : memref<27x1024xf32, #tpu.memory_space<vmem>>, vector<1x1024xf32>
    %38 = vector.broadcast %37 : vector<1x1024xf32> to vector<8x1024xf32>
    %39 = arith.mulf %36, %38 : vector<8x1024xf32>
    %c48 = arith.constant 48 : index
    %c0_29 = arith.constant 0 : index
    %40 = vector.load %arg17[%c48, %c0_29] : memref<256x1024xf32, #tpu.memory_space<vmem>>, vector<8x1024xf32>
    tpu.vector_store %arg17[%c48, %c0_29], %39 {strides = array<i32>} : memref<256x1024xf32, #tpu.memory_space<vmem>>, vector<8x1024xf32>,
    %c0_30 = arith.constant 0 : index
    %c72 = arith.constant 72 : index
    %41 = vector.load %arg16[%c0_30, %c72] : memref<8x1280xf32, #tpu.memory_space<vmem>>, vector<8x1024xf32>
    %c7 = arith.constant 7 : index
    %c0_31 = arith.constant 0 : index
    %42 = vector.load %arg14[%c7, %c0_31] : memref<27x1024xf32, #tpu.memory_space<vmem>>, vector<1x1024xf32>
    %43 = vector.broadcast %42 : vector<1x1024xf32> to vector<8x1024xf32>
    %44 = arith.mulf %41, %43 : vector<8x1024xf32>
    %c56_32 = arith.constant 56 : index
    %c0_33 = arith.constant 0 : index
    %45 = vector.load %arg17[%c56_32, %c0_33] : memref<256x1024xf32, #tpu.memory_space<vmem>>, vector<8x1024xf32>
    tpu.vector_store %arg17[%c56_32, %c0_33], %44 {strides = array<i32>} : memref<256x1024xf32, #tpu.memory_space<vmem>>, vector<8x1024xf32>,
    %c0_34 = arith.constant 0 : index
    %c73 = arith.constant 73 : index
    %46 = vector.load %arg16[%c0_34, %c73] : memref<8x1280xf32, #tpu.memory_space<vmem>>, vector<8x1024xf32>
    %c8_35 = arith.constant 8 : index
    %c0_36 = arith.constant 0 : index
    %47 = vector.load %arg14[%c8_35, %c0_36] : memref<27x1024xf32, #tpu.memory_space<vmem>>, vector<1x1024xf32>
    %48 = vector.broadcast %47 : vector<1x1024xf32> to vector<8x1024xf32>
    %49 = arith.mulf %46, %48 : vector<8x1024xf32>
    %c64_37 = arith.constant 64 : index
    %c0_38 = arith.constant 0 : index
    %50 = vector.load %arg17[%c64_37, %c0_38] : memref<256x1024xf32, #tpu.memory_space<vmem>>, vector<8x1024xf32>
    tpu.vector_store %arg17[%c64_37, %c0_38], %49 {strides = array<i32>} : memref<256x1024xf32, #tpu.memory_space<vmem>>, vector<8x1024xf32>,
    %c0_39 = arith.constant 0 : index
    %c119 = arith.constant 119 : index
    %51 = vector.load %arg16[%c0_39, %c119] : memref<8x1280xf32, #tpu.memory_space<vmem>>, vector<8x1024xf32>
    %c9 = arith.constant 9 : index
    %c0_40 = arith.constant 0 : index
    %52 = vector.load %arg14[%c9, %c0_40] : memref<27x1024xf32, #tpu.memory_space<vmem>>, vector<1x1024xf32>
    %53 = vector.broadcast %52 : vector<1x1024xf32> to vector<8x1024xf32>
    %54 = arith.mulf %51, %53 : vector<8x1024xf32>
    %c72_41 = arith.constant 72 : index
    %c0_42 = arith.constant 0 : index
    %55 = vector.load %arg17[%c72_41, %c0_42] : memref<256x1024xf32, #tpu.memory_space<vmem>>, vector<8x1024xf32>
    tpu.vector_store %arg17[%c72_41, %c0_42], %54 {strides = array<i32>} : memref<256x1024xf32, #tpu.memory_space<vmem>>, vector<8x1024xf32>,
    %c0_43 = arith.constant 0 : index
    %c120 = arith.constant 120 : index
    %56 = vector.load %arg16[%c0_43, %c120] : memref<8x1280xf32, #tpu.memory_space<vmem>>, vector<8x1024xf32>
    %c10 = arith.constant 10 : index
    %c0_44 = arith.constant 0 : index
    %57 = vector.load %arg14[%c10, %c0_44] : memref<27x1024xf32, #tpu.memory_space<vmem>>, vector<1x1024xf32>
    %58 = vector.broadcast %57 : vector<1x1024xf32> to vector<8x1024xf32>
    %59 = arith.mulf %56, %58 : vector<8x1024xf32>
    %c80 = arith.constant 80 : index
    %c0_45 = arith.constant 0 : index
    %60 = vector.load %arg17[%c80, %c0_45] : memref<256x1024xf32, #tpu.memory_space<vmem>>, vector<8x1024xf32>
    tpu.vector_store %arg17[%c80, %c0_45], %59 {strides = array<i32>} : memref<256x1024xf32, #tpu.memory_space<vmem>>, vector<8x1024xf32>,
    %c0_46 = arith.constant 0 : index
    %c121 = arith.constant 121 : index
    %61 = vector.load %arg16[%c0_46, %c121] : memref<8x1280xf32, #tpu.memory_space<vmem>>, vector<8x1024xf32>
    %c11 = arith.constant 11 : index
    %c0_47 = arith.constant 0 : index
    %62 = vector.load %arg14[%c11, %c0_47] : memref<27x1024xf32, #tpu.memory_space<vmem>>, vector<1x1024xf32>
    %63 = vector.broadcast %62 : vector<1x1024xf32> to vector<8x1024xf32>
    %64 = arith.mulf %61, %63 : vector<8x1024xf32>
    %c88 = arith.constant 88 : index
    %c0_48 = arith.constant 0 : index
    %65 = vector.load %arg17[%c88, %c0_48] : memref<256x1024xf32, #tpu.memory_space<vmem>>, vector<8x1024xf32>
    tpu.vector_store %arg17[%c88, %c0_48], %64 {strides = array<i32>} : memref<256x1024xf32, #tpu.memory_space<vmem>>, vector<8x1024xf32>,
    %c0_49 = arith.constant 0 : index
    %c127 = arith.constant 127 : index
    %66 = vector.load %arg16[%c0_49, %c127] : memref<8x1280xf32, #tpu.memory_space<vmem>>, vector<8x1024xf32>
    %c12 = arith.constant 12 : index
    %c0_50 = arith.constant 0 : index
    %67 = vector.load %arg14[%c12, %c0_50] : memref<27x1024xf32, #tpu.memory_space<vmem>>, vector<1x1024xf32>
    %68 = vector.broadcast %67 : vector<1x1024xf32> to vector<8x1024xf32>
    %69 = arith.mulf %66, %68 : vector<8x1024xf32>
    %c96 = arith.constant 96 : index
    %c0_51 = arith.constant 0 : index
    %70 = vector.load %arg17[%c96, %c0_51] : memref<256x1024xf32, #tpu.memory_space<vmem>>, vector<8x1024xf32>
    tpu.vector_store %arg17[%c96, %c0_51], %69 {strides = array<i32>} : memref<256x1024xf32, #tpu.memory_space<vmem>>, vector<8x1024xf32>,
    %c0_52 = arith.constant 0 : index
    %c128_53 = arith.constant 128 : index
    %71 = vector.load %arg16[%c0_52, %c128_53] : memref<8x1280xf32, #tpu.memory_space<vmem>>, vector<8x1024xf32>
    %c13 = arith.constant 13 : index
    %c0_54 = arith.constant 0 : index
    %72 = vector.load %arg14[%c13, %c0_54] : memref<27x1024xf32, #tpu.memory_space<vmem>>, vector<1x1024xf32>
    %73 = vector.broadcast %72 : vector<1x1024xf32> to vector<8x1024xf32>
    %74 = arith.mulf %71, %73 : vector<8x1024xf32>
    %c104 = arith.constant 104 : index
    %c0_55 = arith.constant 0 : index
    %75 = vector.load %arg17[%c104, %c0_55] : memref<256x1024xf32, #tpu.memory_space<vmem>>, vector<8x1024xf32>
    tpu.vector_store %arg17[%c104, %c0_55], %74 {strides = array<i32>} : memref<256x1024xf32, #tpu.memory_space<vmem>>, vector<8x1024xf32>,
    %c0_56 = arith.constant 0 : index
    %c129 = arith.constant 129 : index
    %76 = vector.load %arg16[%c0_56, %c129] : memref<8x1280xf32, #tpu.memory_space<vmem>>, vector<8x1024xf32>
    %c14 = arith.constant 14 : index
    %c0_57 = arith.constant 0 : index
    %77 = vector.load %arg14[%c14, %c0_57] : memref<27x1024xf32, #tpu.memory_space<vmem>>, vector<1x1024xf32>
    %78 = vector.broadcast %77 : vector<1x1024xf32> to vector<8x1024xf32>
    %79 = arith.mulf %76, %78 : vector<8x1024xf32>
    %c112 = arith.constant 112 : index
    %c0_58 = arith.constant 0 : index
    %80 = vector.load %arg17[%c112, %c0_58] : memref<256x1024xf32, #tpu.memory_space<vmem>>, vector<8x1024xf32>
    tpu.vector_store %arg17[%c112, %c0_58], %79 {strides = array<i32>} : memref<256x1024xf32, #tpu.memory_space<vmem>>, vector<8x1024xf32>,
    %c0_59 = arith.constant 0 : index
    %c135 = arith.constant 135 : index
    %81 = vector.load %arg16[%c0_59, %c135] : memref<8x1280xf32, #tpu.memory_space<vmem>>, vector<8x1024xf32>
    %c15 = arith.constant 15 : index
    %c0_60 = arith.constant 0 : index
    %82 = vector.load %arg14[%c15, %c0_60] : memref<27x1024xf32, #tpu.memory_space<vmem>>, vector<1x1024xf32>
    %83 = vector.broadcast %82 : vector<1x1024xf32> to vector<8x1024xf32>
    %84 = arith.mulf %81, %83 : vector<8x1024xf32>
    %c120_61 = arith.constant 120 : index
    %c0_62 = arith.constant 0 : index
    %85 = vector.load %arg17[%c120_61, %c0_62] : memref<256x1024xf32, #tpu.memory_space<vmem>>, vector<8x1024xf32>
    tpu.vector_store %arg17[%c120_61, %c0_62], %84 {strides = array<i32>} : memref<256x1024xf32, #tpu.memory_space<vmem>>, vector<8x1024xf32>,
    %c0_63 = arith.constant 0 : index
    %c136 = arith.constant 136 : index
    %86 = vector.load %arg16[%c0_63, %c136] : memref<8x1280xf32, #tpu.memory_space<vmem>>, vector<8x1024xf32>
    %c16_64 = arith.constant 16 : index
    %c0_65 = arith.constant 0 : index
    %87 = vector.load %arg14[%c16_64, %c0_65] : memref<27x1024xf32, #tpu.memory_space<vmem>>, vector<1x1024xf32>
    %88 = vector.broadcast %87 : vector<1x1024xf32> to vector<8x1024xf32>
    %89 = arith.mulf %86, %88 : vector<8x1024xf32>
    %c128_66 = arith.constant 128 : index
    %c0_67 = arith.constant 0 : index
    %90 = vector.load %arg17[%c128_66, %c0_67] : memref<256x1024xf32, #tpu.memory_space<vmem>>, vector<8x1024xf32>
    tpu.vector_store %arg17[%c128_66, %c0_67], %89 {strides = array<i32>} : memref<256x1024xf32, #tpu.memory_space<vmem>>, vector<8x1024xf32>,
    %c0_68 = arith.constant 0 : index
    %c137 = arith.constant 137 : index
    %91 = vector.load %arg16[%c0_68, %c137] : memref<8x1280xf32, #tpu.memory_space<vmem>>, vector<8x1024xf32>
    %c17 = arith.constant 17 : index
    %c0_69 = arith.constant 0 : index
    %92 = vector.load %arg14[%c17, %c0_69] : memref<27x1024xf32, #tpu.memory_space<vmem>>, vector<1x1024xf32>
    %93 = vector.broadcast %92 : vector<1x1024xf32> to vector<8x1024xf32>
    %94 = arith.mulf %91, %93 : vector<8x1024xf32>
    %c136_70 = arith.constant 136 : index
    %c0_71 = arith.constant 0 : index
    %95 = vector.load %arg17[%c136_70, %c0_71] : memref<256x1024xf32, #tpu.memory_space<vmem>>, vector<8x1024xf32>
    tpu.vector_store %arg17[%c136_70, %c0_71], %94 {strides = array<i32>} : memref<256x1024xf32, #tpu.memory_space<vmem>>, vector<8x1024xf32>,
    %c0_72 = arith.constant 0 : index
    %c183 = arith.constant 183 : index
    %96 = vector.load %arg16[%c0_72, %c183] : memref<8x1280xf32, #tpu.memory_space<vmem>>, vector<8x1024xf32>
    %c18 = arith.constant 18 : index
    %c0_73 = arith.constant 0 : index
    %97 = vector.load %arg14[%c18, %c0_73] : memref<27x1024xf32, #tpu.memory_space<vmem>>, vector<1x1024xf32>
    %98 = vector.broadcast %97 : vector<1x1024xf32> to vector<8x1024xf32>
    %99 = arith.mulf %96, %98 : vector<8x1024xf32>
    %c144 = arith.constant 144 : index
    %c0_74 = arith.constant 0 : index
    %100 = vector.load %arg17[%c144, %c0_74] : memref<256x1024xf32, #tpu.memory_space<vmem>>, vector<8x1024xf32>
    tpu.vector_store %arg17[%c144, %c0_74], %99 {strides = array<i32>} : memref<256x1024xf32, #tpu.memory_space<vmem>>, vector<8x1024xf32>,
    %c0_75 = arith.constant 0 : index
    %c184 = arith.constant 184 : index
    %101 = vector.load %arg16[%c0_75, %c184] : memref<8x1280xf32, #tpu.memory_space<vmem>>, vector<8x1024xf32>
    %c19 = arith.constant 19 : index
    %c0_76 = arith.constant 0 : index
    %102 = vector.load %arg14[%c19, %c0_76] : memref<27x1024xf32, #tpu.memory_space<vmem>>, vector<1x1024xf32>
    %103 = vector.broadcast %102 : vector<1x1024xf32> to vector<8x1024xf32>
    %104 = arith.mulf %101, %103 : vector<8x1024xf32>
    %c152 = arith.constant 152 : index
    %c0_77 = arith.constant 0 : index
    %105 = vector.load %arg17[%c152, %c0_77] : memref<256x1024xf32, #tpu.memory_space<vmem>>, vector<8x1024xf32>
    tpu.vector_store %arg17[%c152, %c0_77], %104 {strides = array<i32>} : memref<256x1024xf32, #tpu.memory_space<vmem>>, vector<8x1024xf32>,
    %c0_78 = arith.constant 0 : index
    %c185 = arith.constant 185 : index
    %106 = vector.load %arg16[%c0_78, %c185] : memref<8x1280xf32, #tpu.memory_space<vmem>>, vector<8x1024xf32>
    %c20 = arith.constant 20 : index
    %c0_79 = arith.constant 0 : index
    %107 = vector.load %arg14[%c20, %c0_79] : memref<27x1024xf32, #tpu.memory_space<vmem>>, vector<1x1024xf32>
    %108 = vector.broadcast %107 : vector<1x1024xf32> to vector<8x1024xf32>
    %109 = arith.mulf %106, %108 : vector<8x1024xf32>
    %c160 = arith.constant 160 : index
    %c0_80 = arith.constant 0 : index
    %110 = vector.load %arg17[%c160, %c0_80] : memref<256x1024xf32, #tpu.memory_space<vmem>>, vector<8x1024xf32>
    tpu.vector_store %arg17[%c160, %c0_80], %109 {strides = array<i32>} : memref<256x1024xf32, #tpu.memory_space<vmem>>, vector<8x1024xf32>,
    %c0_81 = arith.constant 0 : index
    %c191 = arith.constant 191 : index
    %111 = vector.load %arg16[%c0_81, %c191] : memref<8x1280xf32, #tpu.memory_space<vmem>>, vector<8x1024xf32>
    %c21 = arith.constant 21 : index
    %c0_82 = arith.constant 0 : index
    %112 = vector.load %arg14[%c21, %c0_82] : memref<27x1024xf32, #tpu.memory_space<vmem>>, vector<1x1024xf32>
    %113 = vector.broadcast %112 : vector<1x1024xf32> to vector<8x1024xf32>
    %114 = arith.mulf %111, %113 : vector<8x1024xf32>
    %c168 = arith.constant 168 : index
    %c0_83 = arith.constant 0 : index
    %115 = vector.load %arg17[%c168, %c0_83] : memref<256x1024xf32, #tpu.memory_space<vmem>>, vector<8x1024xf32>
    tpu.vector_store %arg17[%c168, %c0_83], %114 {strides = array<i32>} : memref<256x1024xf32, #tpu.memory_space<vmem>>, vector<8x1024xf32>,
    %c0_84 = arith.constant 0 : index
    %c192 = arith.constant 192 : index
    %116 = vector.load %arg16[%c0_84, %c192] : memref<8x1280xf32, #tpu.memory_space<vmem>>, vector<8x1024xf32>
    %c22 = arith.constant 22 : index
    %c0_85 = arith.constant 0 : index
    %117 = vector.load %arg14[%c22, %c0_85] : memref<27x1024xf32, #tpu.memory_space<vmem>>, vector<1x1024xf32>
    %118 = vector.broadcast %117 : vector<1x1024xf32> to vector<8x1024xf32>
    %119 = arith.mulf %116, %118 : vector<8x1024xf32>
    %c176 = arith.constant 176 : index
    %c0_86 = arith.constant 0 : index
    %120 = vector.load %arg17[%c176, %c0_86] : memref<256x1024xf32, #tpu.memory_space<vmem>>, vector<8x1024xf32>
    tpu.vector_store %arg17[%c176, %c0_86], %119 {strides = array<i32>} : memref<256x1024xf32, #tpu.memory_space<vmem>>, vector<8x1024xf32>,
    %c0_87 = arith.constant 0 : index
    %c193 = arith.constant 193 : index
    %121 = vector.load %arg16[%c0_87, %c193] : memref<8x1280xf32, #tpu.memory_space<vmem>>, vector<8x1024xf32>
    %c23 = arith.constant 23 : index
    %c0_88 = arith.constant 0 : index
    %122 = vector.load %arg14[%c23, %c0_88] : memref<27x1024xf32, #tpu.memory_space<vmem>>, vector<1x1024xf32>
    %123 = vector.broadcast %122 : vector<1x1024xf32> to vector<8x1024xf32>
    %124 = arith.mulf %121, %123 : vector<8x1024xf32>
    %c184_89 = arith.constant 184 : index
    %c0_90 = arith.constant 0 : index
    %125 = vector.load %arg17[%c184_89, %c0_90] : memref<256x1024xf32, #tpu.memory_space<vmem>>, vector<8x1024xf32>
    tpu.vector_store %arg17[%c184_89, %c0_90], %124 {strides = array<i32>} : memref<256x1024xf32, #tpu.memory_space<vmem>>, vector<8x1024xf32>,
    %c0_91 = arith.constant 0 : index
    %c199 = arith.constant 199 : index
    %126 = vector.load %arg16[%c0_91, %c199] : memref<8x1280xf32, #tpu.memory_space<vmem>>, vector<8x1024xf32>
    %c24_92 = arith.constant 24 : index
    %c0_93 = arith.constant 0 : index
    %127 = vector.load %arg14[%c24_92, %c0_93] : memref<27x1024xf32, #tpu.memory_space<vmem>>, vector<1x1024xf32>
    %128 = vector.broadcast %127 : vector<1x1024xf32> to vector<8x1024xf32>
    %129 = arith.mulf %126, %128 : vector<8x1024xf32>
    %c192_94 = arith.constant 192 : index
    %c0_95 = arith.constant 0 : index
    %130 = vector.load %arg17[%c192_94, %c0_95] : memref<256x1024xf32, #tpu.memory_space<vmem>>, vector<8x1024xf32>
    tpu.vector_store %arg17[%c192_94, %c0_95], %129 {strides = array<i32>} : memref<256x1024xf32, #tpu.memory_space<vmem>>, vector<8x1024xf32>,
    %c0_96 = arith.constant 0 : index
    %c200 = arith.constant 200 : index
    %131 = vector.load %arg16[%c0_96, %c200] : memref<8x1280xf32, #tpu.memory_space<vmem>>, vector<8x1024xf32>
    %c25 = arith.constant 25 : index
    %c0_97 = arith.constant 0 : index
    %132 = vector.load %arg14[%c25, %c0_97] : memref<27x1024xf32, #tpu.memory_space<vmem>>, vector<1x1024xf32>
    %133 = vector.broadcast %132 : vector<1x1024xf32> to vector<8x1024xf32>
    %134 = arith.mulf %131, %133 : vector<8x1024xf32>
    %c200_98 = arith.constant 200 : index
    %c0_99 = arith.constant 0 : index
    %135 = vector.load %arg17[%c200_98, %c0_99] : memref<256x1024xf32, #tpu.memory_space<vmem>>, vector<8x1024xf32>
    tpu.vector_store %arg17[%c200_98, %c0_99], %134 {strides = array<i32>} : memref<256x1024xf32, #tpu.memory_space<vmem>>, vector<8x1024xf32>,
    %c0_100 = arith.constant 0 : index
    %c201 = arith.constant 201 : index
    %136 = vector.load %arg16[%c0_100, %c201] : memref<8x1280xf32, #tpu.memory_space<vmem>>, vector<8x1024xf32>
    %c26 = arith.constant 26 : index
    %c0_101 = arith.constant 0 : index
    %137 = vector.load %arg14[%c26, %c0_101] : memref<27x1024xf32, #tpu.memory_space<vmem>>, vector<1x1024xf32>
    %138 = vector.broadcast %137 : vector<1x1024xf32> to vector<8x1024xf32>
    %139 = arith.mulf %136, %138 : vector<8x1024xf32>
    %c208 = arith.constant 208 : index
    %c0_102 = arith.constant 0 : index
    %140 = vector.load %arg17[%c208, %c0_102] : memref<256x1024xf32, #tpu.memory_space<vmem>>, vector<8x1024xf32>
    tpu.vector_store %arg17[%c208, %c0_102], %139 {strides = array<i32>} : memref<256x1024xf32, #tpu.memory_space<vmem>>, vector<8x1024xf32>,
    %c0_103 = arith.constant 0 : index
    %c0_104 = arith.constant 0 : index
    %141 = vector.load %arg2[%c0_103, %c0_104] : memref<8x256xf32, #tpu.memory_space<vmem>>, vector<8x256xf32>
    %c0_105 = arith.constant 0 : index
    %c0_106 = arith.constant 0 : index
    %142 = vector.load %arg17[%c0_105, %c0_106] : memref<256x1024xf32, #tpu.memory_space<vmem>>, vector<256x1024xf32>
    %cst_107 = arith.constant dense<0.000000e+00> : vector<8x1024xf32>
    %143 = tpu.matmul %141, %142, %cst_107 {dimension_numbers = #tpu.dot_dimension_numbers<[1], [0], [0], [1], [0, 0, 1, 1], [], []>} : vector<8x256xf32>, vector<256x1024xf32>, vector<8x1024xf32> -> vector<8x1024xf32>
    %c0_108 = arith.constant 0 : index
    %c0_109 = arith.constant 0 : index
    %144 = vector.load %arg3[%c0_108, %c0_109] : memref<8x1xf32, #tpu.memory_space<vmem>>, vector<8x1xf32>
    %145 = vector.broadcast %144 : vector<8x1xf32> to vector<8x1024xf32>
    %146 = arith.addf %143, %145 : vector<8x1024xf32>
    %cst_110 = arith.constant dense<0.000000e+00> : vector<8xf32>
    %147 = vector.multi_reduction <add>, %146, %cst_110 [1] : vector<8x1024xf32> to vector<8xf32>
    %148 = vector.shape_cast %147 : vector<8xf32> to vector<8x1xf32>
    %cst_111 = arith.constant 9.765625E-4 : f32
    %149 = vector.broadcast %cst_111 : f32 to vector<8x1xf32>
    %150 = arith.mulf %148, %149 : vector<8x1xf32>
    %151 = arith.mulf %146, %146 : vector<8x1024xf32>
    %cst_112 = arith.constant dense<0.000000e+00> : vector<8xf32>
    %152 = vector.multi_reduction <add>, %151, %cst_112 [1] : vector<8x1024xf32> to vector<8xf32>
    %153 = vector.shape_cast %152 : vector<8xf32> to vector<8x1xf32>
    %cst_113 = arith.constant 9.765625E-4 : f32
    %154 = vector.broadcast %cst_113 : f32 to vector<8x1xf32>
    %155 = arith.mulf %153, %154 : vector<8x1xf32>
    %156 = arith.mulf %150, %150 : vector<8x1xf32>
    %157 = arith.subf %155, %156 : vector<8x1xf32>
    %c0_114 = arith.constant 0 : index
    %c0_115 = arith.constant 0 : index
    %158 = vector.load %arg4[%c0_114, %c0_115] : memref<8x1xf32, #tpu.memory_space<vmem>>, vector<8x1xf32>
    %cst_116 = arith.constant 9.99999974E-6 : f32
    %159 = vector.broadcast %cst_116 : f32 to vector<8x1xf32>
    %160 = arith.addf %157, %159 : vector<8x1xf32>
    %161 = math.rsqrt %160 : vector<8x1xf32>
    %162 = arith.mulf %158, %161 : vector<8x1xf32>
    %c0_117 = arith.constant 0 : index
    %c0_118 = arith.constant 0 : index
    %163 = vector.load %arg5[%c0_117, %c0_118] : memref<8x1xf32, #tpu.memory_space<vmem>>, vector<8x1xf32>
    %164 = arith.mulf %150, %162 : vector<8x1xf32>
    %165 = arith.subf %163, %164 : vector<8x1xf32>
    %166 = vector.broadcast %162 : vector<8x1xf32> to vector<8x1024xf32>
    %167 = arith.mulf %146, %166 : vector<8x1024xf32>
    %168 = vector.broadcast %165 : vector<8x1xf32> to vector<8x1024xf32>
    %169 = arith.addf %167, %168 : vector<8x1024xf32>
    %170 = vector.extract_strided_slice %169 {offsets = [0, 0], sizes = [8, 512], strides = [1, 1]} : vector<8x1024xf32> to vector<8x512xf32>
    %c0_119 = arith.constant 0 : index
    %c0_120 = arith.constant 0 : index
    %171 = vector.load %arg6[%c0_119, %c0_120] : memref<8x2xf32, #tpu.memory_space<vmem>>, vector<8x1xf32>
    %172 = vector.broadcast %171 : vector<8x1xf32> to vector<8x512xf32>
    %173 = arith.mulf %170, %172 : vector<8x512xf32>
    %c0_121 = arith.constant 0 : index
    %c0_122 = arith.constant 0 : index
    %174 = vector.load %arg7[%c0_121, %c0_122] : memref<8x2xf32, #tpu.memory_space<vmem>>, vector<8x1xf32>
    %175 = vector.broadcast %174 : vector<8x1xf32> to vector<8x512xf32>
    %176 = arith.addf %173, %175 : vector<8x512xf32>
    %cst_123 = arith.constant 0.000000e+00 : f32
    %177 = vector.broadcast %cst_123 : f32 to vector<8x512xf32>
    %178 = arith.maximumf %176, %177 : vector<8x512xf32>
    %c0_124 = arith.constant 0 : index
    %c128_125 = arith.constant 128 : index
    %179 = vector.load %arg16[%c0_124, %c128_125] : memref<8x1280xf32, #tpu.memory_space<vmem>>, vector<8x512xf32>
    tpu.vector_store %arg16[%c0_124, %c128_125], %178 {strides = array<i32>} : memref<8x1280xf32, #tpu.memory_space<vmem>>, vector<8x512xf32>,
    %180 = vector.extract_strided_slice %169 {offsets = [0, 512], sizes = [8, 512], strides = [1, 1]} : vector<8x1024xf32> to vector<8x512xf32>
    %c0_126 = arith.constant 0 : index
    %c1_127 = arith.constant 1 : index
    %181 = vector.load %arg6[%c0_126, %c1_127] : memref<8x2xf32, #tpu.memory_space<vmem>>, vector<8x1xf32>
    %182 = vector.broadcast %181 : vector<8x1xf32> to vector<8x512xf32>
    %183 = arith.mulf %180, %182 : vector<8x512xf32>
    %c0_128 = arith.constant 0 : index
    %c1_129 = arith.constant 1 : index
    %184 = vector.load %arg7[%c0_128, %c1_129] : memref<8x2xf32, #tpu.memory_space<vmem>>, vector<8x1xf32>
    %185 = vector.broadcast %184 : vector<8x1xf32> to vector<8x512xf32>
    %186 = arith.addf %183, %185 : vector<8x512xf32>
    %cst_130 = arith.constant 0.000000e+00 : f32
    %187 = vector.broadcast %cst_130 : f32 to vector<8x512xf32>
    %188 = arith.maximumf %186, %187 : vector<8x512xf32>
    %c0_131 = arith.constant 0 : index
    %c640 = arith.constant 640 : index
    %189 = vector.load %arg16[%c0_131, %c640] : memref<8x1280xf32, #tpu.memory_space<vmem>>, vector<8x512xf32>
    tpu.vector_store %arg16[%c0_131, %c640], %188 {strides = array<i32>} : memref<8x1280xf32, #tpu.memory_space<vmem>>, vector<8x512xf32>,
    %c0_132 = arith.constant 0 : index
    %c55_133 = arith.constant 55 : index
    %190 = vector.load %arg16[%c0_132, %c55_133] : memref<8x1280xf32, #tpu.memory_space<vmem>>, vector<8x1024xf32>
    %c0_134 = arith.constant 0 : index
    %c0_135 = arith.constant 0 : index
    %191 = vector.load %arg14[%c0_134, %c0_135] : memref<27x1024xf32, #tpu.memory_space<vmem>>, vector<1x1024xf32>
    %192 = vector.broadcast %191 : vector<1x1024xf32> to vector<8x1024xf32>
    %193 = arith.mulf %190, %192 : vector<8x1024xf32>
    %c0_136 = arith.constant 0 : index
    %c0_137 = arith.constant 0 : index
    %194 = vector.load %arg17[%c0_136, %c0_137] : memref<256x1024xf32, #tpu.memory_space<vmem>>, vector<8x1024xf32>
    tpu.vector_store %arg17[%c0_136, %c0_137], %193 {strides = array<i32>} : memref<256x1024xf32, #tpu.memory_space<vmem>>, vector<8x1024xf32>,
    %c0_138 = arith.constant 0 : index
    %c56_139 = arith.constant 56 : index
    %195 = vector.load %arg16[%c0_138, %c56_139] : memref<8x1280xf32, #tpu.memory_space<vmem>>, vector<8x1024xf32>
    %c1_140 = arith.constant 1 : index
    %c0_141 = arith.constant 0 : index
    %196 = vector.load %arg14[%c1_140, %c0_141] : memref<27x1024xf32, #tpu.memory_space<vmem>>, vector<1x1024xf32>
    %197 = vector.broadcast %196 : vector<1x1024xf32> to vector<8x1024xf32>
    %198 = arith.mulf %195, %197 : vector<8x1024xf32>
    %c8_142 = arith.constant 8 : index
    %c0_143 = arith.constant 0 : index
    %199 = vector.load %arg17[%c8_142, %c0_143] : memref<256x1024xf32, #tpu.memory_space<vmem>>, vector<8x1024xf32>
    tpu.vector_store %arg17[%c8_142, %c0_143], %198 {strides = array<i32>} : memref<256x1024xf32, #tpu.memory_space<vmem>>, vector<8x1024xf32>,
    %c0_144 = arith.constant 0 : index
    %c57_145 = arith.constant 57 : index
    %200 = vector.load %arg16[%c0_144, %c57_145] : memref<8x1280xf32, #tpu.memory_space<vmem>>, vector<8x1024xf32>
    %c2_146 = arith.constant 2 : index
    %c0_147 = arith.constant 0 : index
    %201 = vector.load %arg14[%c2_146, %c0_147] : memref<27x1024xf32, #tpu.memory_space<vmem>>, vector<1x1024xf32>
    %202 = vector.broadcast %201 : vector<1x1024xf32> to vector<8x1024xf32>
    %203 = arith.mulf %200, %202 : vector<8x1024xf32>
    %c16_148 = arith.constant 16 : index
    %c0_149 = arith.constant 0 : index
    %204 = vector.load %arg17[%c16_148, %c0_149] : memref<256x1024xf32, #tpu.memory_space<vmem>>, vector<8x1024xf32>
    tpu.vector_store %arg17[%c16_148, %c0_149], %203 {strides = array<i32>} : memref<256x1024xf32, #tpu.memory_space<vmem>>, vector<8x1024xf32>,
    %c0_150 = arith.constant 0 : index
    %c63_151 = arith.constant 63 : index
    %205 = vector.load %arg16[%c0_150, %c63_151] : memref<8x1280xf32, #tpu.memory_space<vmem>>, vector<8x1024xf32>
    %c3_152 = arith.constant 3 : index
    %c0_153 = arith.constant 0 : index
    %206 = vector.load %arg14[%c3_152, %c0_153] : memref<27x1024xf32, #tpu.memory_space<vmem>>, vector<1x1024xf32>
    %207 = vector.broadcast %206 : vector<1x1024xf32> to vector<8x1024xf32>
    %208 = arith.mulf %205, %207 : vector<8x1024xf32>
    %c24_154 = arith.constant 24 : index
    %c0_155 = arith.constant 0 : index
    %209 = vector.load %arg17[%c24_154, %c0_155] : memref<256x1024xf32, #tpu.memory_space<vmem>>, vector<8x1024xf32>
    tpu.vector_store %arg17[%c24_154, %c0_155], %208 {strides = array<i32>} : memref<256x1024xf32, #tpu.memory_space<vmem>>, vector<8x1024xf32>,
    %c0_156 = arith.constant 0 : index
    %c64_157 = arith.constant 64 : index
    %210 = vector.load %arg16[%c0_156, %c64_157] : memref<8x1280xf32, #tpu.memory_space<vmem>>, vector<8x1024xf32>
    %c4_158 = arith.constant 4 : index
    %c0_159 = arith.constant 0 : index
    %211 = vector.load %arg14[%c4_158, %c0_159] : memref<27x1024xf32, #tpu.memory_space<vmem>>, vector<1x1024xf32>
    %212 = vector.broadcast %211 : vector<1x1024xf32> to vector<8x1024xf32>
    %213 = arith.mulf %210, %212 : vector<8x1024xf32>
    %c32_160 = arith.constant 32 : index
    %c0_161 = arith.constant 0 : index
    %214 = vector.load %arg17[%c32_160, %c0_161] : memref<256x1024xf32, #tpu.memory_space<vmem>>, vector<8x1024xf32>
    tpu.vector_store %arg17[%c32_160, %c0_161], %213 {strides = array<i32>} : memref<256x1024xf32, #tpu.memory_space<vmem>>, vector<8x1024xf32>,
    %c0_162 = arith.constant 0 : index
    %c65_163 = arith.constant 65 : index
    %215 = vector.load %arg16[%c0_162, %c65_163] : memref<8x1280xf32, #tpu.memory_space<vmem>>, vector<8x1024xf32>
    %c5_164 = arith.constant 5 : index
    %c0_165 = arith.constant 0 : index
    %216 = vector.load %arg14[%c5_164, %c0_165] : memref<27x1024xf32, #tpu.memory_space<vmem>>, vector<1x1024xf32>
    %217 = vector.broadcast %216 : vector<1x1024xf32> to vector<8x1024xf32>
    %218 = arith.mulf %215, %217 : vector<8x1024xf32>
    %c40_166 = arith.constant 40 : index
    %c0_167 = arith.constant 0 : index
    %219 = vector.load %arg17[%c40_166, %c0_167] : memref<256x1024xf32, #tpu.memory_space<vmem>>, vector<8x1024xf32>
    tpu.vector_store %arg17[%c40_166, %c0_167], %218 {strides = array<i32>} : memref<256x1024xf32, #tpu.memory_space<vmem>>, vector<8x1024xf32>,
    %c0_168 = arith.constant 0 : index
    %c71_169 = arith.constant 71 : index
    %220 = vector.load %arg16[%c0_168, %c71_169] : memref<8x1280xf32, #tpu.memory_space<vmem>>, vector<8x1024xf32>
    %c6_170 = arith.constant 6 : index
    %c0_171 = arith.constant 0 : index
    %221 = vector.load %arg14[%c6_170, %c0_171] : memref<27x1024xf32, #tpu.memory_space<vmem>>, vector<1x1024xf32>
    %222 = vector.broadcast %221 : vector<1x1024xf32> to vector<8x1024xf32>
    %223 = arith.mulf %220, %222 : vector<8x1024xf32>
    %c48_172 = arith.constant 48 : index
    %c0_173 = arith.constant 0 : index
    %224 = vector.load %arg17[%c48_172, %c0_173] : memref<256x1024xf32, #tpu.memory_space<vmem>>, vector<8x1024xf32>
    tpu.vector_store %arg17[%c48_172, %c0_173], %223 {strides = array<i32>} : memref<256x1024xf32, #tpu.memory_space<vmem>>, vector<8x1024xf32>,
    %c0_174 = arith.constant 0 : index
    %c72_175 = arith.constant 72 : index
    %225 = vector.load %arg16[%c0_174, %c72_175] : memref<8x1280xf32, #tpu.memory_space<vmem>>, vector<8x1024xf32>
    %c7_176 = arith.constant 7 : index
    %c0_177 = arith.constant 0 : index
    %226 = vector.load %arg14[%c7_176, %c0_177] : memref<27x1024xf32, #tpu.memory_space<vmem>>, vector<1x1024xf32>
    %227 = vector.broadcast %226 : vector<1x1024xf32> to vector<8x1024xf32>
    %228 = arith.mulf %225, %227 : vector<8x1024xf32>
    %c56_178 = arith.constant 56 : index
    %c0_179 = arith.constant 0 : index
    %229 = vector.load %arg17[%c56_178, %c0_179] : memref<256x1024xf32, #tpu.memory_space<vmem>>, vector<8x1024xf32>
    tpu.vector_store %arg17[%c56_178, %c0_179], %228 {strides = array<i32>} : memref<256x1024xf32, #tpu.memory_space<vmem>>, vector<8x1024xf32>,
    %c0_180 = arith.constant 0 : index
    %c73_181 = arith.constant 73 : index
    %230 = vector.load %arg16[%c0_180, %c73_181] : memref<8x1280xf32, #tpu.memory_space<vmem>>, vector<8x1024xf32>
    %c8_182 = arith.constant 8 : index
    %c0_183 = arith.constant 0 : index
    %231 = vector.load %arg14[%c8_182, %c0_183] : memref<27x1024xf32, #tpu.memory_space<vmem>>, vector<1x1024xf32>
    %232 = vector.broadcast %231 : vector<1x1024xf32> to vector<8x1024xf32>
    %233 = arith.mulf %230, %232 : vector<8x1024xf32>
    %c64_184 = arith.constant 64 : index
    %c0_185 = arith.constant 0 : index
    %234 = vector.load %arg17[%c64_184, %c0_185] : memref<256x1024xf32, #tpu.memory_space<vmem>>, vector<8x1024xf32>
    tpu.vector_store %arg17[%c64_184, %c0_185], %233 {strides = array<i32>} : memref<256x1024xf32, #tpu.memory_space<vmem>>, vector<8x1024xf32>,
    %c0_186 = arith.constant 0 : index
    %c119_187 = arith.constant 119 : index
    %235 = vector.load %arg16[%c0_186, %c119_187] : memref<8x1280xf32, #tpu.memory_space<vmem>>, vector<8x1024xf32>
    %c9_188 = arith.constant 9 : index
    %c0_189 = arith.constant 0 : index
    %236 = vector.load %arg14[%c9_188, %c0_189] : memref<27x1024xf32, #tpu.memory_space<vmem>>, vector<1x1024xf32>
    %237 = vector.broadcast %236 : vector<1x1024xf32> to vector<8x1024xf32>
    %238 = arith.mulf %235, %237 : vector<8x1024xf32>
    %c72_190 = arith.constant 72 : index
    %c0_191 = arith.constant 0 : index
    %239 = vector.load %arg17[%c72_190, %c0_191] : memref<256x1024xf32, #tpu.memory_space<vmem>>, vector<8x1024xf32>
    tpu.vector_store %arg17[%c72_190, %c0_191], %238 {strides = array<i32>} : memref<256x1024xf32, #tpu.memory_space<vmem>>, vector<8x1024xf32>,
    %c0_192 = arith.constant 0 : index
    %c120_193 = arith.constant 120 : index
    %240 = vector.load %arg16[%c0_192, %c120_193] : memref<8x1280xf32, #tpu.memory_space<vmem>>, vector<8x1024xf32>
    %c10_194 = arith.constant 10 : index
    %c0_195 = arith.constant 0 : index
    %241 = vector.load %arg14[%c10_194, %c0_195] : memref<27x1024xf32, #tpu.memory_space<vmem>>, vector<1x1024xf32>
    %242 = vector.broadcast %241 : vector<1x1024xf32> to vector<8x1024xf32>
    %243 = arith.mulf %240, %242 : vector<8x1024xf32>
    %c80_196 = arith.constant 80 : index
    %c0_197 = arith.constant 0 : index
    %244 = vector.load %arg17[%c80_196, %c0_197] : memref<256x1024xf32, #tpu.memory_space<vmem>>, vector<8x1024xf32>
    tpu.vector_store %arg17[%c80_196, %c0_197], %243 {strides = array<i32>} : memref<256x1024xf32, #tpu.memory_space<vmem>>, vector<8x1024xf32>,
    %c0_198 = arith.constant 0 : index
    %c121_199 = arith.constant 121 : index
    %245 = vector.load %arg16[%c0_198, %c121_199] : memref<8x1280xf32, #tpu.memory_space<vmem>>, vector<8x1024xf32>
    %c11_200 = arith.constant 11 : index
    %c0_201 = arith.constant 0 : index
    %246 = vector.load %arg14[%c11_200, %c0_201] : memref<27x1024xf32, #tpu.memory_space<vmem>>, vector<1x1024xf32>
    %247 = vector.broadcast %246 : vector<1x1024xf32> to vector<8x1024xf32>
    %248 = arith.mulf %245, %247 : vector<8x1024xf32>
    %c88_202 = arith.constant 88 : index
    %c0_203 = arith.constant 0 : index
    %249 = vector.load %arg17[%c88_202, %c0_203] : memref<256x1024xf32, #tpu.memory_space<vmem>>, vector<8x1024xf32>
    tpu.vector_store %arg17[%c88_202, %c0_203], %248 {strides = array<i32>} : memref<256x1024xf32, #tpu.memory_space<vmem>>, vector<8x1024xf32>,
    %c0_204 = arith.constant 0 : index
    %c127_205 = arith.constant 127 : index
    %250 = vector.load %arg16[%c0_204, %c127_205] : memref<8x1280xf32, #tpu.memory_space<vmem>>, vector<8x1024xf32>
    %c12_206 = arith.constant 12 : index
    %c0_207 = arith.constant 0 : index
    %251 = vector.load %arg14[%c12_206, %c0_207] : memref<27x1024xf32, #tpu.memory_space<vmem>>, vector<1x1024xf32>
    %252 = vector.broadcast %251 : vector<1x1024xf32> to vector<8x1024xf32>
    %253 = arith.mulf %250, %252 : vector<8x1024xf32>
    %c96_208 = arith.constant 96 : index
    %c0_209 = arith.constant 0 : index
    %254 = vector.load %arg17[%c96_208, %c0_209] : memref<256x1024xf32, #tpu.memory_space<vmem>>, vector<8x1024xf32>
    tpu.vector_store %arg17[%c96_208, %c0_209], %253 {strides = array<i32>} : memref<256x1024xf32, #tpu.memory_space<vmem>>, vector<8x1024xf32>,
    %c0_210 = arith.constant 0 : index
    %c128_211 = arith.constant 128 : index
    %255 = vector.load %arg16[%c0_210, %c128_211] : memref<8x1280xf32, #tpu.memory_space<vmem>>, vector<8x1024xf32>
    %c13_212 = arith.constant 13 : index
    %c0_213 = arith.constant 0 : index
    %256 = vector.load %arg14[%c13_212, %c0_213] : memref<27x1024xf32, #tpu.memory_space<vmem>>, vector<1x1024xf32>
    %257 = vector.broadcast %256 : vector<1x1024xf32> to vector<8x1024xf32>
    %258 = arith.mulf %255, %257 : vector<8x1024xf32>
    %c104_214 = arith.constant 104 : index
    %c0_215 = arith.constant 0 : index
    %259 = vector.load %arg17[%c104_214, %c0_215] : memref<256x1024xf32, #tpu.memory_space<vmem>>, vector<8x1024xf32>
    tpu.vector_store %arg17[%c104_214, %c0_215], %258 {strides = array<i32>} : memref<256x1024xf32, #tpu.memory_space<vmem>>, vector<8x1024xf32>,
    %c0_216 = arith.constant 0 : index
    %c129_217 = arith.constant 129 : index
    %260 = vector.load %arg16[%c0_216, %c129_217] : memref<8x1280xf32, #tpu.memory_space<vmem>>, vector<8x1024xf32>
    %c14_218 = arith.constant 14 : index
    %c0_219 = arith.constant 0 : index
    %261 = vector.load %arg14[%c14_218, %c0_219] : memref<27x1024xf32, #tpu.memory_space<vmem>>, vector<1x1024xf32>
    %262 = vector.broadcast %261 : vector<1x1024xf32> to vector<8x1024xf32>
    %263 = arith.mulf %260, %262 : vector<8x1024xf32>
    %c112_220 = arith.constant 112 : index
    %c0_221 = arith.constant 0 : index
    %264 = vector.load %arg17[%c112_220, %c0_221] : memref<256x1024xf32, #tpu.memory_space<vmem>>, vector<8x1024xf32>
    tpu.vector_store %arg17[%c112_220, %c0_221], %263 {strides = array<i32>} : memref<256x1024xf32, #tpu.memory_space<vmem>>, vector<8x1024xf32>,
    %c0_222 = arith.constant 0 : index
    %c135_223 = arith.constant 135 : index
    %265 = vector.load %arg16[%c0_222, %c135_223] : memref<8x1280xf32, #tpu.memory_space<vmem>>, vector<8x1024xf32>
    %c15_224 = arith.constant 15 : index
    %c0_225 = arith.constant 0 : index
    %266 = vector.load %arg14[%c15_224, %c0_225] : memref<27x1024xf32, #tpu.memory_space<vmem>>, vector<1x1024xf32>
    %267 = vector.broadcast %266 : vector<1x1024xf32> to vector<8x1024xf32>
    %268 = arith.mulf %265, %267 : vector<8x1024xf32>
    %c120_226 = arith.constant 120 : index
    %c0_227 = arith.constant 0 : index
    %269 = vector.load %arg17[%c120_226, %c0_227] : memref<256x1024xf32, #tpu.memory_space<vmem>>, vector<8x1024xf32>
    tpu.vector_store %arg17[%c120_226, %c0_227], %268 {strides = array<i32>} : memref<256x1024xf32, #tpu.memory_space<vmem>>, vector<8x1024xf32>,
    %c0_228 = arith.constant 0 : index
    %c136_229 = arith.constant 136 : index
    %270 = vector.load %arg16[%c0_228, %c136_229] : memref<8x1280xf32, #tpu.memory_space<vmem>>, vector<8x1024xf32>
    %c16_230 = arith.constant 16 : index
    %c0_231 = arith.constant 0 : index
    %271 = vector.load %arg14[%c16_230, %c0_231] : memref<27x1024xf32, #tpu.memory_space<vmem>>, vector<1x1024xf32>
    %272 = vector.broadcast %271 : vector<1x1024xf32> to vector<8x1024xf32>
    %273 = arith.mulf %270, %272 : vector<8x1024xf32>
    %c128_232 = arith.constant 128 : index
    %c0_233 = arith.constant 0 : index
    %274 = vector.load %arg17[%c128_232, %c0_233] : memref<256x1024xf32, #tpu.memory_space<vmem>>, vector<8x1024xf32>
    tpu.vector_store %arg17[%c128_232, %c0_233], %273 {strides = array<i32>} : memref<256x1024xf32, #tpu.memory_space<vmem>>, vector<8x1024xf32>,
    %c0_234 = arith.constant 0 : index
    %c137_235 = arith.constant 137 : index
    %275 = vector.load %arg16[%c0_234, %c137_235] : memref<8x1280xf32, #tpu.memory_space<vmem>>, vector<8x1024xf32>
    %c17_236 = arith.constant 17 : index
    %c0_237 = arith.constant 0 : index
    %276 = vector.load %arg14[%c17_236, %c0_237] : memref<27x1024xf32, #tpu.memory_space<vmem>>, vector<1x1024xf32>
    %277 = vector.broadcast %276 : vector<1x1024xf32> to vector<8x1024xf32>
    %278 = arith.mulf %275, %277 : vector<8x1024xf32>
    %c136_238 = arith.constant 136 : index
    %c0_239 = arith.constant 0 : index
    %279 = vector.load %arg17[%c136_238, %c0_239] : memref<256x1024xf32, #tpu.memory_space<vmem>>, vector<8x1024xf32>
    tpu.vector_store %arg17[%c136_238, %c0_239], %278 {strides = array<i32>} : memref<256x1024xf32, #tpu.memory_space<vmem>>, vector<8x1024xf32>,
    %c0_240 = arith.constant 0 : index
    %c183_241 = arith.constant 183 : index
    %280 = vector.load %arg16[%c0_240, %c183_241] : memref<8x1280xf32, #tpu.memory_space<vmem>>, vector<8x1024xf32>
    %c18_242 = arith.constant 18 : index
    %c0_243 = arith.constant 0 : index
    %281 = vector.load %arg14[%c18_242, %c0_243] : memref<27x1024xf32, #tpu.memory_space<vmem>>, vector<1x1024xf32>
    %282 = vector.broadcast %281 : vector<1x1024xf32> to vector<8x1024xf32>
    %283 = arith.mulf %280, %282 : vector<8x1024xf32>
    %c144_244 = arith.constant 144 : index
    %c0_245 = arith.constant 0 : index
    %284 = vector.load %arg17[%c144_244, %c0_245] : memref<256x1024xf32, #tpu.memory_space<vmem>>, vector<8x1024xf32>
    tpu.vector_store %arg17[%c144_244, %c0_245], %283 {strides = array<i32>} : memref<256x1024xf32, #tpu.memory_space<vmem>>, vector<8x1024xf32>,
    %c0_246 = arith.constant 0 : index
    %c184_247 = arith.constant 184 : index
    %285 = vector.load %arg16[%c0_246, %c184_247] : memref<8x1280xf32, #tpu.memory_space<vmem>>, vector<8x1024xf32>
    %c19_248 = arith.constant 19 : index
    %c0_249 = arith.constant 0 : index
    %286 = vector.load %arg14[%c19_248, %c0_249] : memref<27x1024xf32, #tpu.memory_space<vmem>>, vector<1x1024xf32>
    %287 = vector.broadcast %286 : vector<1x1024xf32> to vector<8x1024xf32>
    %288 = arith.mulf %285, %287 : vector<8x1024xf32>
    %c152_250 = arith.constant 152 : index
    %c0_251 = arith.constant 0 : index
    %289 = vector.load %arg17[%c152_250, %c0_251] : memref<256x1024xf32, #tpu.memory_space<vmem>>, vector<8x1024xf32>
    tpu.vector_store %arg17[%c152_250, %c0_251], %288 {strides = array<i32>} : memref<256x1024xf32, #tpu.memory_space<vmem>>, vector<8x1024xf32>,
    %c0_252 = arith.constant 0 : index
    %c185_253 = arith.constant 185 : index
    %290 = vector.load %arg16[%c0_252, %c185_253] : memref<8x1280xf32, #tpu.memory_space<vmem>>, vector<8x1024xf32>
    %c20_254 = arith.constant 20 : index
    %c0_255 = arith.constant 0 : index
    %291 = vector.load %arg14[%c20_254, %c0_255] : memref<27x1024xf32, #tpu.memory_space<vmem>>, vector<1x1024xf32>
    %292 = vector.broadcast %291 : vector<1x1024xf32> to vector<8x1024xf32>
    %293 = arith.mulf %290, %292 : vector<8x1024xf32>
    %c160_256 = arith.constant 160 : index
    %c0_257 = arith.constant 0 : index
    %294 = vector.load %arg17[%c160_256, %c0_257] : memref<256x1024xf32, #tpu.memory_space<vmem>>, vector<8x1024xf32>
    tpu.vector_store %arg17[%c160_256, %c0_257], %293 {strides = array<i32>} : memref<256x1024xf32, #tpu.memory_space<vmem>>, vector<8x1024xf32>,
    %c0_258 = arith.constant 0 : index
    %c191_259 = arith.constant 191 : index
    %295 = vector.load %arg16[%c0_258, %c191_259] : memref<8x1280xf32, #tpu.memory_space<vmem>>, vector<8x1024xf32>
    %c21_260 = arith.constant 21 : index
    %c0_261 = arith.constant 0 : index
    %296 = vector.load %arg14[%c21_260, %c0_261] : memref<27x1024xf32, #tpu.memory_space<vmem>>, vector<1x1024xf32>
    %297 = vector.broadcast %296 : vector<1x1024xf32> to vector<8x1024xf32>
    %298 = arith.mulf %295, %297 : vector<8x1024xf32>
    %c168_262 = arith.constant 168 : index
    %c0_263 = arith.constant 0 : index
    %299 = vector.load %arg17[%c168_262, %c0_263] : memref<256x1024xf32, #tpu.memory_space<vmem>>, vector<8x1024xf32>
    tpu.vector_store %arg17[%c168_262, %c0_263], %298 {strides = array<i32>} : memref<256x1024xf32, #tpu.memory_space<vmem>>, vector<8x1024xf32>,
    %c0_264 = arith.constant 0 : index
    %c192_265 = arith.constant 192 : index
    %300 = vector.load %arg16[%c0_264, %c192_265] : memref<8x1280xf32, #tpu.memory_space<vmem>>, vector<8x1024xf32>
    %c22_266 = arith.constant 22 : index
    %c0_267 = arith.constant 0 : index
    %301 = vector.load %arg14[%c22_266, %c0_267] : memref<27x1024xf32, #tpu.memory_space<vmem>>, vector<1x1024xf32>
    %302 = vector.broadcast %301 : vector<1x1024xf32> to vector<8x1024xf32>
    %303 = arith.mulf %300, %302 : vector<8x1024xf32>
    %c176_268 = arith.constant 176 : index
    %c0_269 = arith.constant 0 : index
    %304 = vector.load %arg17[%c176_268, %c0_269] : memref<256x1024xf32, #tpu.memory_space<vmem>>, vector<8x1024xf32>
    tpu.vector_store %arg17[%c176_268, %c0_269], %303 {strides = array<i32>} : memref<256x1024xf32, #tpu.memory_space<vmem>>, vector<8x1024xf32>,
    %c0_270 = arith.constant 0 : index
    %c193_271 = arith.constant 193 : index
    %305 = vector.load %arg16[%c0_270, %c193_271] : memref<8x1280xf32, #tpu.memory_space<vmem>>, vector<8x1024xf32>
    %c23_272 = arith.constant 23 : index
    %c0_273 = arith.constant 0 : index
    %306 = vector.load %arg14[%c23_272, %c0_273] : memref<27x1024xf32, #tpu.memory_space<vmem>>, vector<1x1024xf32>
    %307 = vector.broadcast %306 : vector<1x1024xf32> to vector<8x1024xf32>
    %308 = arith.mulf %305, %307 : vector<8x1024xf32>
    %c184_274 = arith.constant 184 : index
    %c0_275 = arith.constant 0 : index
    %309 = vector.load %arg17[%c184_274, %c0_275] : memref<256x1024xf32, #tpu.memory_space<vmem>>, vector<8x1024xf32>
    tpu.vector_store %arg17[%c184_274, %c0_275], %308 {strides = array<i32>} : memref<256x1024xf32, #tpu.memory_space<vmem>>, vector<8x1024xf32>,
    %c0_276 = arith.constant 0 : index
    %c199_277 = arith.constant 199 : index
    %310 = vector.load %arg16[%c0_276, %c199_277] : memref<8x1280xf32, #tpu.memory_space<vmem>>, vector<8x1024xf32>
    %c24_278 = arith.constant 24 : index
    %c0_279 = arith.constant 0 : index
    %311 = vector.load %arg14[%c24_278, %c0_279] : memref<27x1024xf32, #tpu.memory_space<vmem>>, vector<1x1024xf32>
    %312 = vector.broadcast %311 : vector<1x1024xf32> to vector<8x1024xf32>
    %313 = arith.mulf %310, %312 : vector<8x1024xf32>
    %c192_280 = arith.constant 192 : index
    %c0_281 = arith.constant 0 : index
    %314 = vector.load %arg17[%c192_280, %c0_281] : memref<256x1024xf32, #tpu.memory_space<vmem>>, vector<8x1024xf32>
    tpu.vector_store %arg17[%c192_280, %c0_281], %313 {strides = array<i32>} : memref<256x1024xf32, #tpu.memory_space<vmem>>, vector<8x1024xf32>,
    %c0_282 = arith.constant 0 : index
    %c200_283 = arith.constant 200 : index
    %315 = vector.load %arg16[%c0_282, %c200_283] : memref<8x1280xf32, #tpu.memory_space<vmem>>, vector<8x1024xf32>
    %c25_284 = arith.constant 25 : index
    %c0_285 = arith.constant 0 : index
    %316 = vector.load %arg14[%c25_284, %c0_285] : memref<27x1024xf32, #tpu.memory_space<vmem>>, vector<1x1024xf32>
    %317 = vector.broadcast %316 : vector<1x1024xf32> to vector<8x1024xf32>
    %318 = arith.mulf %315, %317 : vector<8x1024xf32>
    %c200_286 = arith.constant 200 : index
    %c0_287 = arith.constant 0 : index
    %319 = vector.load %arg17[%c200_286, %c0_287] : memref<256x1024xf32, #tpu.memory_space<vmem>>, vector<8x1024xf32>
    tpu.vector_store %arg17[%c200_286, %c0_287], %318 {strides = array<i32>} : memref<256x1024xf32, #tpu.memory_space<vmem>>, vector<8x1024xf32>,
    %c0_288 = arith.constant 0 : index
    %c201_289 = arith.constant 201 : index
    %320 = vector.load %arg16[%c0_288, %c201_289] : memref<8x1280xf32, #tpu.memory_space<vmem>>, vector<8x1024xf32>
    %c26_290 = arith.constant 26 : index
    %c0_291 = arith.constant 0 : index
    %321 = vector.load %arg14[%c26_290, %c0_291] : memref<27x1024xf32, #tpu.memory_space<vmem>>, vector<1x1024xf32>
    %322 = vector.broadcast %321 : vector<1x1024xf32> to vector<8x1024xf32>
    %323 = arith.mulf %320, %322 : vector<8x1024xf32>
    %c208_292 = arith.constant 208 : index
    %c0_293 = arith.constant 0 : index
    %324 = vector.load %arg17[%c208_292, %c0_293] : memref<256x1024xf32, #tpu.memory_space<vmem>>, vector<8x1024xf32>
    tpu.vector_store %arg17[%c208_292, %c0_293], %323 {strides = array<i32>} : memref<256x1024xf32, #tpu.memory_space<vmem>>, vector<8x1024xf32>,
    %c0_294 = arith.constant 0 : index
    %c0_295 = arith.constant 0 : index
    %325 = vector.load %arg8[%c0_294, %c0_295] : memref<8x256xf32, #tpu.memory_space<vmem>>, vector<8x256xf32>
    %c0_296 = arith.constant 0 : index
    %c0_297 = arith.constant 0 : index
    %326 = vector.load %arg17[%c0_296, %c0_297] : memref<256x1024xf32, #tpu.memory_space<vmem>>, vector<256x1024xf32>
    %cst_298 = arith.constant dense<0.000000e+00> : vector<8x1024xf32>
    %327 = tpu.matmul %325, %326, %cst_298 {dimension_numbers = #tpu.dot_dimension_numbers<[1], [0], [0], [1], [0, 0, 1, 1], [], []>} : vector<8x256xf32>, vector<256x1024xf32>, vector<8x1024xf32> -> vector<8x1024xf32>
    %c0_299 = arith.constant 0 : index
    %c0_300 = arith.constant 0 : index
    %328 = vector.load %arg9[%c0_299, %c0_300] : memref<8x1xf32, #tpu.memory_space<vmem>>, vector<8x1xf32>
    %329 = vector.broadcast %328 : vector<8x1xf32> to vector<8x1024xf32>
    %330 = arith.addf %327, %329 : vector<8x1024xf32>
    %cst_301 = arith.constant dense<0.000000e+00> : vector<8xf32>
    %331 = vector.multi_reduction <add>, %330, %cst_301 [1] : vector<8x1024xf32> to vector<8xf32>
    %332 = vector.shape_cast %331 : vector<8xf32> to vector<8x1xf32>
    %cst_302 = arith.constant 9.765625E-4 : f32
    %333 = vector.broadcast %cst_302 : f32 to vector<8x1xf32>
    %334 = arith.mulf %332, %333 : vector<8x1xf32>
    %335 = arith.mulf %330, %330 : vector<8x1024xf32>
    %cst_303 = arith.constant dense<0.000000e+00> : vector<8xf32>
    %336 = vector.multi_reduction <add>, %335, %cst_303 [1] : vector<8x1024xf32> to vector<8xf32>
    %337 = vector.shape_cast %336 : vector<8xf32> to vector<8x1xf32>
    %cst_304 = arith.constant 9.765625E-4 : f32
    %338 = vector.broadcast %cst_304 : f32 to vector<8x1xf32>
    %339 = arith.mulf %337, %338 : vector<8x1xf32>
    %340 = arith.mulf %334, %334 : vector<8x1xf32>
    %341 = arith.subf %339, %340 : vector<8x1xf32>
    %c0_305 = arith.constant 0 : index
    %c0_306 = arith.constant 0 : index
    %342 = vector.load %arg10[%c0_305, %c0_306] : memref<8x1xf32, #tpu.memory_space<vmem>>, vector<8x1xf32>
    %cst_307 = arith.constant 9.99999974E-6 : f32
    %343 = vector.broadcast %cst_307 : f32 to vector<8x1xf32>
    %344 = arith.addf %341, %343 : vector<8x1xf32>
    %345 = math.rsqrt %344 : vector<8x1xf32>
    %346 = arith.mulf %342, %345 : vector<8x1xf32>
    %c0_308 = arith.constant 0 : index
    %c0_309 = arith.constant 0 : index
    %347 = vector.load %arg11[%c0_308, %c0_309] : memref<8x1xf32, #tpu.memory_space<vmem>>, vector<8x1xf32>
    %348 = arith.mulf %334, %346 : vector<8x1xf32>
    %349 = arith.subf %347, %348 : vector<8x1xf32>
    %350 = vector.broadcast %346 : vector<8x1xf32> to vector<8x1024xf32>
    %351 = arith.mulf %330, %350 : vector<8x1024xf32>
    %352 = vector.broadcast %349 : vector<8x1xf32> to vector<8x1024xf32>
    %353 = arith.addf %351, %352 : vector<8x1024xf32>
    %cst_310 = arith.constant 0.000000e+00 : f32
    %354 = vector.broadcast %cst_310 : f32 to vector<8x1024xf32>
    %355 = arith.maximumf %353, %354 : vector<8x1024xf32>
    %356 = vector.extract_strided_slice %355 {offsets = [0, 0], sizes = [8, 512], strides = [1, 1]} : vector<8x1024xf32> to vector<8x512xf32>
    %c0_311 = arith.constant 0 : index
    %c0_312 = arith.constant 0 : index
    %357 = vector.load %arg12[%c0_311, %c0_312] : memref<8x2xf32, #tpu.memory_space<vmem>>, vector<8x1xf32>
    %358 = vector.broadcast %357 : vector<8x1xf32> to vector<8x512xf32>
    %359 = arith.mulf %356, %358 : vector<8x512xf32>
    %c0_313 = arith.constant 0 : index
    %c0_314 = arith.constant 0 : index
    %360 = vector.load %arg13[%c0_313, %c0_314] : memref<8x2xf32, #tpu.memory_space<vmem>>, vector<8x1xf32>
    %361 = vector.broadcast %360 : vector<8x1xf32> to vector<8x512xf32>
    %362 = arith.addf %359, %361 : vector<8x512xf32>
    %c0_315 = arith.constant 0 : index
    %c0_316 = arith.constant 0 : index
    %363 = vector.load %arg15[%c0_315, %c0_316] : memref<8x1024xf32, #tpu.memory_space<vmem>>, vector<8x512xf32>
    tpu.vector_store %arg15[%c0_315, %c0_316], %362 {strides = array<i32>} : memref<8x1024xf32, #tpu.memory_space<vmem>>, vector<8x512xf32>,
    %364 = vector.extract_strided_slice %355 {offsets = [0, 512], sizes = [8, 512], strides = [1, 1]} : vector<8x1024xf32> to vector<8x512xf32>
    %c0_317 = arith.constant 0 : index
    %c1_318 = arith.constant 1 : index
    %365 = vector.load %arg12[%c0_317, %c1_318] : memref<8x2xf32, #tpu.memory_space<vmem>>, vector<8x1xf32>
    %366 = vector.broadcast %365 : vector<8x1xf32> to vector<8x512xf32>
    %367 = arith.mulf %364, %366 : vector<8x512xf32>
    %c0_319 = arith.constant 0 : index
    %c1_320 = arith.constant 1 : index
    %368 = vector.load %arg13[%c0_319, %c1_320] : memref<8x2xf32, #tpu.memory_space<vmem>>, vector<8x1xf32>
    %369 = vector.broadcast %368 : vector<8x1xf32> to vector<8x512xf32>
    %370 = arith.addf %367, %369 : vector<8x512xf32>
    %c0_321 = arith.constant 0 : index
    %c512 = arith.constant 512 : index
    %371 = vector.load %arg15[%c0_321, %c512] : memref<8x1024xf32, #tpu.memory_space<vmem>>, vector<8x512xf32>
    tpu.vector_store %arg15[%c0_321, %c512], %370 {strides = array<i32>} : memref<8x1024xf32, #tpu.memory_space<vmem>>, vector<8x512xf32>,
    return
  }
  func.func @transform_0(%arg0: i32) -> (i32, i32) {
    %c0_i32 = arith.constant 0 : i32
    %c0_i32_0 = arith.constant 0 : i32
    %c0_i32_1 = arith.constant 0 : i32
    return %c0_i32, %c0_i32_0 : i32, i32
  }
  func.func @transform_1(%arg0: i32) -> (i32, i32) {
    %c0_i32 = arith.constant 0 : i32
    %c0_i32_0 = arith.constant 0 : i32
    %c0_i32_1 = arith.constant 0 : i32
    return %c0_i32, %c0_i32_0 : i32, i32
  }
  func.func @transform_2(%arg0: i32) -> (i32, i32) {
    %c0_i32 = arith.constant 0 : i32
    %c0_i32_0 = arith.constant 0 : i32
    %c0_i32_1 = arith.constant 0 : i32
    return %c0_i32, %c0_i32_0 : i32, i32
  }
  func.func @transform_3(%arg0: i32) -> (i32, i32) {
    %c0_i32 = arith.constant 0 : i32
    %c0_i32_0 = arith.constant 0 : i32
    %c0_i32_1 = arith.constant 0 : i32
    return %c0_i32, %c0_i32_0 : i32, i32
  }
  func.func @transform_4(%arg0: i32) -> (i32, i32) {
    %c0_i32 = arith.constant 0 : i32
    %c0_i32_0 = arith.constant 0 : i32
    %c0_i32_1 = arith.constant 0 : i32
    return %c0_i32, %c0_i32_0 : i32, i32
  }
  func.func @transform_5(%arg0: i32) -> (i32, i32) {
    %c0_i32 = arith.constant 0 : i32
    %c0_i32_0 = arith.constant 0 : i32
    %c0_i32_1 = arith.constant 0 : i32
    return %c0_i32, %c0_i32_0 : i32, i32
  }
  func.func @transform_6(%arg0: i32) -> (i32, i32) {
    %c0_i32 = arith.constant 0 : i32
    %c0_i32_0 = arith.constant 0 : i32
    %c0_i32_1 = arith.constant 0 : i32
    return %c0_i32, %c0_i32_0 : i32, i32
  }
  func.func @transform_7(%arg0: i32) -> (i32, i32) {
    %c0_i32 = arith.constant 0 : i32
    %c0_i32_0 = arith.constant 0 : i32
    %c0_i32_1 = arith.constant 0 : i32
    return %c0_i32, %c0_i32_0 : i32, i32
  }
  func.func @transform_8(%arg0: i32) -> (i32, i32) {
    %c0_i32 = arith.constant 0 : i32
    %c0_i32_0 = arith.constant 0 : i32
    %c0_i32_1 = arith.constant 0 : i32
    return %c0_i32, %c0_i32_0 : i32, i32
  }
  func.func @transform_9(%arg0: i32) -> (i32, i32) {
    %c0_i32 = arith.constant 0 : i32
    %c0_i32_0 = arith.constant 0 : i32
    %c0_i32_1 = arith.constant 0 : i32
    return %c0_i32, %c0_i32_0 : i32, i32
  }
  func.func @transform_10(%arg0: i32) -> (i32, i32) {
    %c0_i32 = arith.constant 0 : i32
    %c0_i32_0 = arith.constant 0 : i32
    %c0_i32_1 = arith.constant 0 : i32
    return %c0_i32, %c0_i32_0 : i32, i32
  }
  func.func @transform_11(%arg0: i32) -> (i32, i32) {
    %c0_i32 = arith.constant 0 : i32
    %c0_i32_0 = arith.constant 0 : i32
    %c0_i32_1 = arith.constant 0 : i32
    return %c0_i32, %c0_i32_0 : i32, i32
  }
  func.func @transform_12(%arg0: i32) -> (i32, i32) {
    %c0_i32 = arith.constant 0 : i32
    %c0_i32_0 = arith.constant 0 : i32
    %c0_i32_1 = arith.constant 0 : i32
    return %c0_i32, %c0_i32_0 : i32, i32
  }
  func.func @transform_13(%arg0: i32) -> (i32, i32) {
    %c0_i32 = arith.constant 0 : i32
    %c0_i32_0 = arith.constant 0 : i32
    %c0_i32_1 = arith.constant 0 : i32
    return %c0_i32, %c0_i32_0 : i32, i32
  }
  func.func @transform_14(%arg0: i32) -> (i32, i32) {
    %c0_i32 = arith.constant 0 : i32
    %c0_i32_0 = arith.constant 0 : i32
    %c0_i32_1 = arith.constant 0 : i32
    return %c0_i32, %c0_i32_0 : i32, i32
  }
}

</mosaic_0001>

<bundles_post_ra>
// kernel: encoding_blocks_pallas.1
= control target key start
LH: loop header
LB: loop body
LE: loop exit
PB: predicated region body
PF: predicated region fallthrough
CT: control target
= control target key end

     0   :  { %v342_v0 = vlaneseq  ;;  %s9127_s17 = smov 55   ;;  %s9128_s22 = smov 56   ;;  %vm390_vm0 = vcmask 449536   ;;  %vm530_vm1 = vcmask 457728   ;;  %vm670_vm2 = vcmask 465920   ;;  %s14444_s13 = inlined_call_operand.vmem [shape: f32[27,1024], index: 13, kind: input, shape index: {}]   ;;  %s14445_s0 = inlined_call_operand.vmem [shape: f32[8,1024], index: 0, kind: input, shape index: {}]   ;;  %s14446_s1 = inlined_call_operand.vmem [shape: f32[8,256], index: 1, kind: input, shape index: {}]   ;;  %s14447_s2 = inlined_call_operand.vmem [shape: f32[8,1], index: 2, kind: input, shape index: {}]   ;;  %s14448_s5 = inlined_call_operand.vmem [shape: f32[8,2], index: 5, kind: input, shape index: {}]   ;;  %s14449_s3 = inlined_call_operand.vmem [shape: f32[8,1], index: 3, kind: input, shape index: {}]   ;;  %s14450_s4 = inlined_call_operand.vmem [shape: f32[8,1], index: 4, kind: input, shape index: {}]   ;;  %s14451_s6 = inlined_call_operand.vmem [shape: f32[8,2], index: 6, kind: input, shape index: {}]   ;;  %s14452_s7 = inlined_call_operand.vmem [shape: f32[8,256], index: 7, kind: input, shape index: {}]   ;;  %s14453_s8 = inlined_call_operand.vmem [shape: f32[8,1], index: 8, kind: input, shape index: {}]   ;;  %s14454_s9 = inlined_call_operand.vmem [shape: f32[8,1], index: 9, kind: input, shape index: {}]   ;;  %s14455_s10 = inlined_call_operand.vmem [shape: f32[8,1], index: 10, kind: input, shape index: {}]   ;;  %s14456_s11 = inlined_call_operand.vmem [shape: f32[8,2], index: 11, kind: input, shape index: {}]   ;;  %s14457_s12 = inlined_call_operand.vmem [shape: f32[8,2], index: 12, kind: input, shape index: {}]   ;;  %s14458_s14 = inlined_call_operand.vmem [shape: f32[8,1024], index: 14, kind: output, shape index: {}]  }
   0x1   :  { %v338_v1 = vld [vmem:[%s14444_s13] ss:$8 sm:$0xf]  ;;  %v8970_v19 = vld [vmem:[%s14444_s13 + $0x1] ss:$8 sm:$0xf] }
   0x2   :  { %v339_v2 = vld [vmem:[%s14444_s13] ss:$8 sm:$0xf0]  ;;  %v343_v4 = vshrl.u32 %v342_v0, 7  ;;  %s14505_s27 = smov 57   ;;  %s14501_s16 = smov 63  }
   0x3   :  { %v340_v3 = vor.u32 %v339_v2, %v338_v1  ;;  %v8971_v20 = vld [vmem:[%s14444_s13 + $0x1] ss:$8 sm:$0xf0]  ;;  %v8972_v30 = vld [vmem:[%s14444_s13 + $0x2] ss:$8 sm:$0xf] }
   0x4   :  { %v9227_v5 = vsub.s32 2, %v343_v4  ;;  %v9229_v6 = vsub.s32 0, %v343_v4  ;;  %v9231_v7 = vsub.s32 3, %v343_v4  ;;  %v9233_v8 = vsub.s32 1, %v343_v4  ;;  %s9131_s18 = smov 73   ;;  %v9329_v61 = vld [vmem:[%s14445_s0 + $0x38] sm:$0xff] }
   0x5   :  { %v9241_v13 = vsub.s32 5, %v343_v4  ;;  %v9243_v14 = vsub.s32 4, %v343_v4  ;;  %v9249_v17 = vsub.s32 7, %v343_v4  ;;  %v9251_v18 = vsub.s32 6, %v343_v4  ;;  %s9132_s21 = smov 72   ;;  %s14503_s23 = smov 71  }
   0x6   :  { %14739 = vst [vmem:[#allocation4_spill] sm:$0xff] %v9227_v5  ;;  %14740 = vst [vmem:[#allocation5_spill] sm:$0xff] %v9229_v6  ;;  %v353_v9 = vrot.slane %v340_v3, %v9227_v5  ;;  %v345_v10 = vrot.slane %v340_v3, %v9229_v6  ;;  %v357_v11 = vrot.slane %v340_v3, %v9231_v7  ;;  %v8973_v31 = vld [vmem:[%s14444_s13 + $0x2] ss:$8 sm:$0xf0]  ;;  %s14498_s15 = smov 65  }
   0x7   :  { %14741 = vst [vmem:[#allocation6_spill] sm:$0xff] %v9231_v7  ;;  %14742 = vst [vmem:[#allocation7_spill] sm:$0xff] %v9233_v8  ;;  %v349_v12 = vrot.slane %v340_v3, %v9233_v8  ;;  %v365_v15 = vrot.slane %v340_v3, %v9241_v13  ;;  %v361_v16 = vrot.slane %v340_v3, %v9243_v14  ;;  %v8974_v41 = vld [vmem:[%s14444_s13 + $0x3] ss:$8 sm:$0xf]  ;;  %vm810_vm3 = vcmask 515072  }
   0x8   :  { %378 = vrot.lane.b32.xlu1 %v353_v9, %s9127_s17  ;;  %374 = vrot.lane.b32.xlu0 %v345_v10, %s9127_s17  ;;  %14743 = vst [vmem:[#allocation8_spill] sm:$0xff] %v9243_v14  ;;  %14744 = vst [vmem:[#allocation9_spill] sm:$0xff] %v9249_v17  ;;  %v373_v21 = vrot.slane %v340_v3, %v9249_v17  ;;  %v369_v22 = vrot.slane %v340_v3, %v9251_v18  ;;  %v8975_v42 = vld [vmem:[%s14444_s13 + $0x3] ss:$8 sm:$0xf0]  ;;  %s14493_s26 = smov 64  }
   0x9   :  { %14745 = vst [vmem:[#allocation10_spill] sm:$0xff] %v9251_v18  ;;  %v480_v23 = vor.u32 %v8971_v20, %v8970_v19  ;;  %v620_v34 = vor.u32 %v8973_v31, %v8972_v30  ;;  %v760_v45 = vor.u32 %v8975_v42, %v8974_v41  ;;  %vm950_vm4 = vcmask 523264   ;;  %s9136_s25 = smov 119   ;;  %s14586_s28 = smov 9  }
   0xa   :  { %vm863_vm5 = vcmask 531456   ;;  %vm14613_vm6 = vcmask 580608   ;;  %vm14614_vm7 = vcmask 588800   ;;  %vm443_vm8 = vcmask 596992   ;;  %s14584_s30 = smov 120   ;;  %s14542_s19 = smov 8  }
   0xb   :  { %v485_v24 = vrot.slane %v480_v23, %v9229_v6  ;;  %v489_v25 = vrot.slane %v480_v23, %v9233_v8  ;;  %v493_v26 = vrot.slane %v480_v23, %v9227_v5  ;;  %v497_v27 = vrot.slane %v480_v23, %v9231_v7  ;;  %s14905_s24 = smov 57   ;;  %s14913_s20 = smov 63  }
   0xc   :  { %380 = vrot.lane.b32.xlu1 %v357_v11, %s9127_s17  ;;  %376 = vrot.lane.b32.xlu0 %v349_v12, %s9127_s17  ;;  %v501_v28 = vrot.slane %v480_v23, %v9243_v14  ;;  %v505_v29 = vrot.slane %v480_v23, %v9241_v13  ;;  %v509_v32 = vrot.slane %v480_v23, %v9251_v18  ;;  %vm1641_vm9 = vcmask 973824  }
   0xd   :  { %v513_v33 = vrot.slane %v480_v23, %v9249_v17  ;;  %v629_v35 = vrot.slane %v620_v34, %v9233_v8  ;;  %v625_v36 = vrot.slane %v620_v34, %v9229_v6  ;;  %v637_v37 = vrot.slane %v620_v34, %v9231_v7 }
   0xe   :  { %v633_v38 = vrot.slane %v620_v34, %v9227_v5  ;;  %v645_v39 = vrot.slane %v620_v34, %v9241_v13  ;;  %v641_v40 = vrot.slane %v620_v34, %v9243_v14  ;;  %v653_v43 = vrot.slane %v620_v34, %v9249_v17 }
   0xf   :  { %v649_v44 = vrot.slane %v620_v34, %v9251_v18  ;;  %v765_v46 = vrot.slane %v760_v45, %v9229_v6  ;;  %v769_v47 = vrot.slane %v760_v45, %v9233_v8  ;;  %v773_v48 = vrot.slane %v760_v45, %v9227_v5  ;;  %v9381_v34 = vld [vmem:[%s14445_s0] sm:$0xff] }
  0x10   :  { %384 = vrot.lane.b32.xlu1 %v365_v15, %s9127_s17  ;;  %382 = vrot.lane.b32.xlu0 %v361_v16, %s9127_s17  ;;  %v777_v49 = vrot.slane %v760_v45, %v9231_v7  ;;  %v781_v50 = vrot.slane %v760_v45, %v9243_v14  ;;  %v785_v51 = vrot.slane %v760_v45, %v9241_v13  ;;  %vm1781_vm10 = vcmask 982016  }
  0x11   :  { %v789_v52 = vrot.slane %v760_v45, %v9251_v18  ;;  %v793_v53 = vrot.slane %v760_v45, %v9249_v17  ;;  %v9409_v45 = vld [vmem:[%s14445_s0 + $0x20] sm:$0xff]  ;;  %vm1921_vm11 = vcmask 990208   ;;  %vm14541_vm12 = vcmask 1039360  }
  0x12   :  { %vm2114_vm13 = vcmask 7168   ;;  %vm1974_vm14 = vcmask 56320   ;;  %vm14616_vm15 = vcmask 64512  }
  0x14   :  { %388 = vrot.lane.b32.xlu1 %v373_v21, %s9127_s17  ;;  %386 = vrot.lane.b32.xlu0 %v369_v22, %s9127_s17 }
  0x18   :  { %514 = vrot.lane.b32.xlu1 %v485_v24, %s9128_s22  ;;  %516 = vrot.lane.b32.xlu0 %v489_v25, %s9128_s22 }
  0x1c   :  { %518 = vrot.lane.b32.xlu1 %v493_v26, %s9128_s22  ;;  %520 = vrot.lane.b32.xlu0 %v497_v27, %s9128_s22  ;;  %v9364_v27 = vld [vmem:[%s14445_s0 + $0x8] sm:$0xff] }
  0x20   :  { %522 = vrot.lane.b32.xlu1 %v501_v28, %s9128_s22  ;;  %524 = vrot.lane.b32.xlu0 %v505_v29, %s9128_s22 }
  0x24   :  { %526 = vrot.lane.b32.xlu1 %v509_v32, %s9128_s22  ;;  %528 = vrot.lane.b32.xlu0 %v513_v33, %s9128_s22  ;;  %v9376_v33 = vld [vmem:[%s14445_s0 + $0x18] sm:$0xff] }
  0x28   :  { %656 = vrot.lane.b32.xlu1 %v629_v35, %s14505_s27  ;;  %654 = vrot.lane.b32.xlu0 %v625_v36, %s14505_s27 }
  0x2c   :  { %660 = vrot.lane.b32.xlu1 %v637_v37, %s14505_s27  ;;  %658 = vrot.lane.b32.xlu0 %v633_v38, %s14505_s27 }
  0x30   :  { %664 = vrot.lane.b32.xlu1 %v645_v39, %s14505_s27  ;;  %662 = vrot.lane.b32.xlu0 %v641_v40, %s14505_s27  ;;  %v9392_v39 = vld [vmem:[%s14445_s0 + $0x28] sm:$0xff]  ;;  %v9397_v40 = vld [vmem:[%s14445_s0 + $0x10] sm:$0xff] }
  0x34   :  { %668 = vrot.lane.b32.xlu1 %v653_v43, %s14505_s27  ;;  %666 = vrot.lane.b32.xlu0 %v649_v44, %s14505_s27 }
  0x38   :  { %794 = vrot.lane.b32.xlu1 %v765_v46, %s14501_s16  ;;  %796 = vrot.lane.b32.xlu0 %v769_v47, %s14501_s16 }
  0x3c   :  { %798 = vrot.lane.b32.xlu1 %v773_v48, %s14501_s16  ;;  %800 = vrot.lane.b32.xlu0 %v777_v49, %s14501_s16 }
  0x40   :  { %802 = vrot.lane.b32.xlu1 %v781_v50, %s14501_s16  ;;  %804 = vrot.lane.b32.xlu0 %v785_v51, %s14501_s16  ;;  %v9421_v51 = vld [vmem:[%s14445_s0 + $0x30] sm:$0xff] }
  0x44   :  { %806 = vrot.lane.b32.xlu1 %v789_v52, %s14501_s16  ;;  %808 = vrot.lane.b32.xlu0 %v793_v53, %s14501_s16 }
  0x7a   :  { %v379_v54 = vpop.permute.xlu1 %378  ;;  %v375_v55 = vpop.permute.xlu0 %374 }
  0x7b   :  { %v407_v56 = vmul.f32 0.0, %v375_v55 }
  0x7d   :  { %425 = vrot.lane.b32.xlu0 %v407_v56, %s9131_s18 }
  0x7e   :  { %v381_v57 = vpop.permute.xlu1 %380  ;;  %v377_v58 = vpop.permute.xlu0 %376 }
  0x7f   :  { %v392_v26 = vsel %vm390_vm0, %v377_v58, %v379_v54  ;;  %v391_v31 = vsel %vm390_vm0, %v375_v55, %v377_v58  ;;  %v393_v37 = vsel %vm390_vm0, %v379_v54, %v381_v57 }
  0x80   :  { %v409_v30 = vmul.f32 %v392_v26, %v9364_v27  ;;  %v408_v36 = vmul.f32 %v391_v31, %v9381_v34  ;;  %v410_v42 = vmul.f32 %v393_v37, %v9397_v40 }
  0x82   :  { %v385_v59 = vpop.permute.xlu1 %384  ;;  %v383_v60 = vpop.permute.xlu0 %382 }
  0x83   :  { %v394_v32 = vsel %vm390_vm0, %v381_v57, %v383_v60  ;;  %v395_v43 = vsel %vm390_vm0, %v383_v60, %v385_v59 }
  0x84   :  { %v411_v35 = vmul.f32 %v394_v32, %v9376_v33  ;;  %v412_v48 = vmul.f32 %v395_v43, %v9409_v45 }
  0x86   :  { %v389_v62 = vpop.permute.xlu1 %388  ;;  %v387_v63 = vpop.permute.xlu0 %386 }
  0x87   :  { %v415_v0 = vmul.f32 %v389_v62, %v9329_v61  ;;  %v396_v38 = vsel %vm390_vm0, %v385_v59, %v387_v63  ;;  %v397_v49 = vsel %vm390_vm0, %v387_v63, %v389_v62 }
  0x88   :  { %v413_v41 = vmul.f32 %v396_v38, %v9392_v39  ;;  %v414_v54 = vmul.f32 %v397_v49, %v9421_v51  ;;  %v8977_v49 = vld [vmem:[%s14444_s13 + $0x4] ss:$8 sm:$0xf0] }
  0x89   :  { %441 = vrot.lane.b32.xlu0 %v415_v0, %s9131_s18 }
  0x8a   :  { %v515_v1 = vpop.permute.xlu1 %514  ;;  %v9333_v2 = vpop.permute.xlu0 %516 }
  0x8b   :  { %v547_v3 = vmul.f32 0.0, %v515_v1  ;;  %v531_v44 = vsel %vm530_vm1, %v515_v1, %v9333_v2 }
  0x8c   :  { %v548_v47 = vmul.f32 %v531_v44, %v9381_v34 }
  0x8d   :  { %565 = vrot.lane.b32.xlu1 %v547_v3, %s9132_s21 }
  0x8e   :  { %v519_v4 = vpop.permute.xlu1 %518  ;;  %v9336_v9 = vpop.permute.xlu0 %520 }
  0x8f   :  { %v533_v50 = vsel %vm530_vm1, %v519_v4, %v9336_v9  ;;  %v532_v55 = vsel %vm530_vm1, %v9333_v2, %v519_v4 }
  0x90   :  { %v550_v53 = vmul.f32 %v533_v50, %v9397_v40  ;;  %v549_v58 = vmul.f32 %v532_v55, %v9364_v27 }
  0x92   :  { %v9338_v10 = vpop.permute.xlu1 %522  ;;  %v9340_v11 = vpop.permute.xlu0 %524 }
  0x93   :  { %v535_v56 = vsel %vm530_vm1, %v9338_v10, %v9340_v11  ;;  %v534_v59 = vsel %vm530_vm1, %v9336_v9, %v9338_v10 }
  0x94   :  { %v552_v57 = vmul.f32 %v535_v56, %v9409_v45  ;;  %v551_v0 = vmul.f32 %v534_v59, %v9376_v33 }
  0x96   :  { %v9342_v12 = vpop.permute.xlu1 %526  ;;  %v529_v15 = vpop.permute.xlu0 %528 }
  0x97   :  { %v555_v16 = vmul.f32 %v529_v15, %v9329_v61  ;;  %v537_v60 = vsel %vm530_vm1, %v9342_v12, %v529_v15  ;;  %v536_v1 = vsel %vm530_vm1, %v9340_v11, %v9342_v12 }
  0x98   :  { %v554_v63 = vmul.f32 %v537_v60, %v9421_v51  ;;  %v553_v9 = vmul.f32 %v536_v1, %v9392_v39 }
  0x99   :  { %581 = vrot.lane.b32.xlu1 %v555_v16, %s9132_s21 }
  0x9a   :  { %v9346_v19 = vpop.permute.xlu1 %656  ;;  %v9348_v20 = vpop.permute.xlu0 %654 }
  0x9b   :  { %v687_v21 = vmul.f32 0.0, %v9348_v20  ;;  %v671_v10 = vsel %vm670_vm2, %v9348_v20, %v9346_v19 }
  0x9c   :  { %v688_v12 = vmul.f32 %v671_v10, %v9381_v34 }
  0x9d   :  { %705 = vrot.lane.b32.xlu0 %v687_v21, %s14503_s23 }
  0x9e   :  { %v9352_v22 = vpop.permute.xlu1 %660  ;;  %v659_v46 = vpop.permute.xlu0 %658 }
  0x9f   :  { %v672_v2 = vsel %vm670_vm2, %v9346_v19, %v659_v46 }
  0xa0   :  { %v689_v4 = vmul.f32 %v672_v2, %v9364_v27 }
  0xa2   :  { %v9354_v23 = vpop.permute.xlu1 %664  ;;  %v663_v52 = vpop.permute.xlu0 %662 }
  0xa3   :  { %v674_v15 = vsel %vm670_vm2, %v9352_v22, %v663_v52 }
  0xa4   :  { %v691_v11 = vmul.f32 %v674_v15, %v9376_v33 }
  0xa6   :  { %v9356_v24 = vpop.permute.xlu1 %668  ;;  %v667_v62 = vpop.permute.xlu0 %666 }
  0xa7   :  { %v695_v25 = vmul.f32 %v9356_v24, %v9329_v61  ;;  %v676_v26 = vsel %vm670_vm2, %v9354_v23, %v667_v62  ;;  %v677_v37 = vsel %vm670_vm2, %v667_v62, %v9356_v24 }
  0xa8   :  { %v693_v19 = vmul.f32 %v676_v26, %v9392_v39 }
  0xa9   :  { %721 = vrot.lane.b32.xlu0 %v695_v25, %s14503_s23  ;;  %v673_v25 = vsel %vm670_vm2, %v659_v46, %v9352_v22 }
  0xaa   :  { %v9367_v28 = vpop.permute.xlu1 %794  ;;  %v797_v3 = vpop.permute.xlu0 %796  ;;  %v690_v20 = vmul.f32 %v673_v25, %v9397_v40 }
  0xab   :  { %v827_v29 = vmul.f32 0.0, %v9367_v28 }
  0xad   :  { %845 = vrot.lane.b32.xlu1 %v827_v29, %s14498_s15  ;;  %429 = vrot.lane.b32.xlu0 %v409_v30, %s9131_s18  ;;  %v675_v29 = vsel %vm670_vm2, %v663_v52, %v9354_v23  ;;  %v811_v30 = vsel %vm810_vm3, %v9367_v28, %v797_v3 }
  0xae   :  { %v799_v16 = vpop.permute.xlu1 %798  ;;  %v801_v21 = vpop.permute.xlu0 %800 }
  0xaf   :  { %v813_v32 = vsel %vm810_vm3, %v799_v16, %v801_v21  ;;  %v812_v28 = vsel %vm810_vm3, %v797_v3, %v799_v16 }
  0xb0   :  { %v830_v23 = vmul.f32 %v813_v32, %v9397_v40  ;;  %v829_v24 = vmul.f32 %v812_v28, %v9364_v27 }
  0xb1   :  { %433 = vrot.lane.b32.xlu0 %v411_v35, %s9131_s18  ;;  %427 = vrot.lane.b32.xlu1 %v408_v36, %s9131_s18  ;;  %v828_v35 = vmul.f32 %v811_v30, %v9381_v34  ;;  %v692_v36 = vmul.f32 %v675_v29, %v9409_v45 }
  0xb2   :  { %v803_v22 = vpop.permute.xlu1 %802  ;;  %v805_v31 = vpop.permute.xlu0 %804 }
  0xb3   :  { %v815_v38 = vsel %vm810_vm3, %v803_v22, %v805_v31  ;;  %v814_v46 = vsel %vm810_vm3, %v801_v21, %v803_v22 }
  0xb4   :  { %v832_v44 = vmul.f32 %v815_v38, %v9409_v45  ;;  %v831_v50 = vmul.f32 %v814_v46, %v9376_v33 }
  0xb5   :  { %437 = vrot.lane.b32.xlu0 %v413_v41, %s9131_s18  ;;  %431 = vrot.lane.b32.xlu1 %v410_v42, %s9131_s18  ;;  %v694_v41 = vmul.f32 %v677_v37, %v9421_v51 }
  0xb6   :  { %v807_v42 = vpop.permute.xlu1 %806  ;;  %v809_v43 = vpop.permute.xlu0 %808 }
  0xb9   :  { %567 = vrot.lane.b32.xlu0 %v548_v47, %s9132_s21  ;;  %435 = vrot.lane.b32.xlu1 %v412_v48, %s9131_s18  ;;  %v817_v47 = vsel %vm810_vm3, %v807_v42, %v809_v43  ;;  %v8976_v48 = vld [vmem:[%s14444_s13 + $0x4] ss:$8 sm:$0xf] }
  0xba   :  { %v834_v52 = vmul.f32 %v817_v47, %v9421_v51 }
  0xbd   :  { %571 = vrot.lane.b32.xlu0 %v550_v53, %s9132_s21  ;;  %439 = vrot.lane.b32.xlu1 %v414_v54, %s9131_s18  ;;  %v900_v53 = vor.u32 %v8977_v49, %v8976_v48  ;;  %v816_v54 = vsel %vm810_vm3, %v805_v31, %v807_v42 }
  0xbe   :  { %v833_v55 = vmul.f32 %v816_v54, %v9392_v39 }
  0xbf   :  { %v905_v56 = vrot.slane %v900_v53, %v9229_v6  ;;  %v909_v59 = vrot.slane %v900_v53, %v9233_v8  ;;  %v921_v60 = vrot.slane %v900_v53, %v9243_v14  ;;  %v917_v62 = vrot.slane %v900_v53, %v9231_v7 }
  0xc0   :  { %v933_v1 = vrot.slane %v900_v53, %v9249_v17 }
  0xc1   :  { %575 = vrot.lane.b32.xlu0 %v552_v57, %s9132_s21  ;;  %569 = vrot.lane.b32.xlu1 %v549_v58, %s9132_s21  ;;  %v835_v57 = vmul.f32 %v809_v43, %v9329_v61  ;;  %v913_v58 = vrot.slane %v900_v53, %v9227_v5 }
  0xc5   :  { %579 = vrot.lane.b32.xlu0 %v554_v63, %s9132_s21  ;;  %573 = vrot.lane.b32.xlu1 %v551_v0, %s9132_s21  ;;  %v929_v63 = vrot.slane %v900_v53, %v9251_v18  ;;  %v925_v0 = vrot.slane %v900_v53, %v9241_v13 }
  0xc9   :  { %709 = vrot.lane.b32.xlu0 %v689_v4, %s14503_s23  ;;  %577 = vrot.lane.b32.xlu1 %v553_v9, %s9132_s21 }
  0xcd   :  { %713 = vrot.lane.b32.xlu0 %v691_v11, %s14503_s23  ;;  %707 = vrot.lane.b32.xlu1 %v688_v12, %s14503_s23 }
  0xd1   :  { %717 = vrot.lane.b32.xlu0 %v693_v19, %s14503_s23  ;;  %711 = vrot.lane.b32.xlu1 %v690_v20, %s14503_s23 }
  0xd5   :  { %847 = vrot.lane.b32.xlu0 %v828_v35, %s14498_s15  ;;  %715 = vrot.lane.b32.xlu1 %v692_v36, %s14503_s23 }
  0xd9   :  { %719 = vrot.lane.b32.xlu1 %v694_v41, %s14503_s23  ;;  %851 = vrot.lane.b32.xlu0 %v830_v23, %s14498_s15 }
  0xdd   :  { %849 = vrot.lane.b32.xlu1 %v829_v24, %s14498_s15  ;;  %855 = vrot.lane.b32.xlu0 %v832_v44, %s14498_s15 }
  0xe1   :  { %853 = vrot.lane.b32.xlu1 %v831_v50, %s14498_s15  ;;  %859 = vrot.lane.b32.xlu0 %v834_v52, %s14498_s15 }
  0xe5   :  { %857 = vrot.lane.b32.xlu1 %v833_v55, %s14498_s15  ;;  %934 = vrot.lane.b32.xlu0 %v905_v56, %s14493_s26 }
  0xe9   :  { %861 = vrot.lane.b32.xlu1 %v835_v57, %s14498_s15  ;;  %938 = vrot.lane.b32.xlu0 %v913_v58, %s14493_s26 }
  0xed   :  { %936 = vrot.lane.b32.xlu1 %v909_v59, %s14493_s26  ;;  %942 = vrot.lane.b32.xlu0 %v921_v60, %s14493_s26 }
  0xef   :  { %v9527_v2 = vpop.permute.xlu0 %425 }
  0xf0   :  { %14746 = vst [vmem:[#allocation11_spill] sm:$0xff] %v9527_v2 }
  0xf1   :  { %940 = vrot.lane.b32.xlu1 %v917_v62, %s14493_s26  ;;  %946 = vrot.lane.b32.xlu0 %v929_v63, %s14493_s26 }
  0xf5   :  { %944 = vrot.lane.b32.xlu1 %v925_v0, %s14493_s26 }
  0xf9   :  { %948 = vrot.lane.b32.xlu1 %v933_v1, %s14493_s26 }
  0xfb   :  { %v9529_v3 = vpop.permute.xlu0 %441 }
  0xfc   :  { %14747 = vst [vmem:[#allocation12_spill] sm:$0xff] %v9529_v3 }
  0xff   :  { %v9531_v4 = vpop.permute.xlu1 %565 }
 0x100   :  { %14748 = vst [vmem:[#allocation13_spill] sm:$0xff] %v9531_v4 }
 0x10b   :  { %v9535_v10 = vpop.permute.xlu1 %581 }
 0x10c   :  { %14750 = vst [vmem:[#allocation15_spill] sm:$0xff] %v9535_v10 }
 0x10f   :  { %v9533_v9 = vpop.permute.xlu0 %705 }
 0x110   :  { %14749 = vst [vmem:[#allocation14_spill] sm:$0xff] %v9533_v9 }
 0x11b   :  { %v9537_v15 = vpop.permute.xlu0 %721 }
 0x11c   :  { %14751 = vst [vmem:[#allocation16_spill] sm:$0xff] %v9537_v15 }
 0x11f   :  { %v9539_v11 = vpop.permute.xlu1 %845  ;;  %v9541_v12 = vpop.permute.xlu0 %429 }
 0x120   :  { %14752 = vst [vmem:[#allocation17_spill] sm:$0xff] %v9539_v11  ;;  %14753 = vst [vmem:[#allocation18_spill] sm:$0xff] %v9541_v12  ;;  %v8991_v12 = vld [vmem:[%s14444_s13 + $0x43] ss:$8 sm:$0xf0] }
 0x123   :  { %v9543_v16 = vpop.permute.xlu0 %433  ;;  %v9545_v21 = vpop.permute.xlu1 %427 }
 0x124   :  { %14754 = vst [vmem:[#allocation19_spill] sm:$0xff] %v9543_v16  ;;  %14755 = vst [vmem:[#allocation20_spill] sm:$0xff] %v9545_v21 }
 0x127   :  { %v9547_v25 = vpop.permute.xlu0 %437  ;;  %v9549_v26 = vpop.permute.xlu1 %431 }
 0x128   :  { %14756 = vst [vmem:[#allocation21_spill] sm:$0xff] %v9547_v25  ;;  %14757 = vst [vmem:[#allocation22_spill] sm:$0xff] %v9549_v26 }
 0x12b   :  { %v9551_v19 = vpop.permute.xlu0 %567  ;;  %v9553_v20 = vpop.permute.xlu1 %435 }
 0x12c   :  { %14758 = vst [vmem:[#allocation23_spill] sm:$0xff] %v9551_v19  ;;  %14759 = vst [vmem:[#allocation24_spill] sm:$0xff] %v9553_v20 }
 0x12f   :  { %v9555_v29 = vpop.permute.xlu0 %571  ;;  %v9557_v30 = vpop.permute.xlu1 %439 }
 0x130   :  { %14760 = vst [vmem:[#allocation25_spill] sm:$0xff] %v9555_v29  ;;  %14761 = vst [vmem:[#allocation26_spill] sm:$0xff] %v9557_v30 }
 0x133   :  { %v9559_v22 = vpop.permute.xlu0 %575  ;;  %v9561_v31 = vpop.permute.xlu1 %569 }
 0x134   :  { %14762 = vst [vmem:[#allocation27_spill] sm:$0xff] %v9559_v22  ;;  %14763 = vst [vmem:[#allocation28_spill] sm:$0xff] %v9561_v31 }
 0x137   :  { %v9563_v32 = vpop.permute.xlu0 %579  ;;  %v9565_v35 = vpop.permute.xlu1 %573 }
 0x138   :  { %14764 = vst [vmem:[#allocation29_spill] sm:$0xff] %v9563_v32  ;;  %14765 = vst [vmem:[#allocation30_spill] sm:$0xff] %v9565_v35 }
 0x13b   :  { %v9567_v36 = vpop.permute.xlu0 %709  ;;  %v9569_v37 = vpop.permute.xlu1 %577 }
 0x13c   :  { %14766 = vst [vmem:[#allocation31_spill] sm:$0xff] %v9567_v36  ;;  %14767 = vst [vmem:[#allocation32_spill] sm:$0xff] %v9569_v37 }
 0x13f   :  { %v9571_v23 = vpop.permute.xlu0 %713  ;;  %v9573_v28 = vpop.permute.xlu1 %707 }
 0x140   :  { %14768 = vst [vmem:[#allocation33_spill] sm:$0xff] %v9571_v23  ;;  %14769 = vst [vmem:[#allocation34_spill] sm:$0xff] %v9573_v28 }
 0x143   :  { %v9575_v38 = vpop.permute.xlu0 %717  ;;  %v9577_v41 = vpop.permute.xlu1 %711 }
 0x144   :  { %14770 = vst [vmem:[#allocation35_spill] sm:$0xff] %v9575_v38  ;;  %14771 = vst [vmem:[#allocation36_spill] sm:$0xff] %v9577_v41 }
 0x147   :  { %v9579_v42 = vpop.permute.xlu0 %847  ;;  %v9581_v43 = vpop.permute.xlu1 %715 }
 0x148   :  { %14772 = vst [vmem:[#allocation37_spill] sm:$0xff] %v9579_v42  ;;  %14773 = vst [vmem:[#allocation38_spill] sm:$0xff] %v9581_v43 }
 0x14b   :  { %v9583_v24 = vpop.permute.xlu1 %719  ;;  %v9585_v44 = vpop.permute.xlu0 %851 }
 0x14c   :  { %14774 = vst [vmem:[#allocation39_spill] sm:$0xff] %v9583_v24  ;;  %14775 = vst [vmem:[#allocation40_spill] sm:$0xff] %v9585_v44 }
 0x14f   :  { %v9587_v46 = vpop.permute.xlu1 %849  ;;  %v9589_v47 = vpop.permute.xlu0 %855 }
 0x150   :  { %14776 = vst [vmem:[#allocation41_spill] sm:$0xff] %v9587_v46  ;;  %14777 = vst [vmem:[#allocation42_spill] sm:$0xff] %v9589_v47 }
 0x153   :  { %v9591_v48 = vpop.permute.xlu1 %853  ;;  %v9593_v49 = vpop.permute.xlu0 %859 }
 0x154   :  { %14778 = vst [vmem:[#allocation43_spill] sm:$0xff] %v9591_v48  ;;  %14779 = vst [vmem:[#allocation44_spill] sm:$0xff] %v9593_v49 }
 0x157   :  { %v9595_v50 = vpop.permute.xlu1 %857  ;;  %v935_v52 = vpop.permute.xlu0 %934 }
 0x158   :  { %14780 = vst [vmem:[#allocation45_spill] sm:$0xff] %v9595_v50  ;;  %v967_v53 = vmul.f32 0.0, %v935_v52 }
 0x15a   :  { %985 = vrot.lane.b32.xlu0 %v967_v53, %s14493_s26 }
 0x15b   :  { %v9598_v54 = vpop.permute.xlu1 %861  ;;  %v939_v55 = vpop.permute.xlu0 %938 }
 0x15c   :  { %14781 = vst [vmem:[#allocation46_spill] sm:$0xff] %v9598_v54 }
 0x15f   :  { %v937_v56 = vpop.permute.xlu1 %936  ;;  %v943_v57 = vpop.permute.xlu0 %942 }
 0x160   :  { %v951_v58 = vsel %vm950_vm4, %v935_v52, %v937_v56  ;;  %v952_v59 = vsel %vm950_vm4, %v937_v56, %v939_v55 }
 0x161   :  { %v969_v60 = vmul.f32 %v952_v59, %v9364_v27  ;;  %v968_v62 = vmul.f32 %v951_v58, %v9381_v34 }
 0x163   :  { %989 = vrot.lane.b32.xlu0 %v969_v60, %s14493_s26  ;;  %987 = vrot.lane.b32.xlu1 %v968_v62, %s14493_s26  ;;  %v941_v63 = vpop.permute.xlu1 %940  ;;  %v947_v53 = vpop.permute.xlu0 %946  ;;  %v8979_v60 = vld [vmem:[%s14444_s13 + $0x5] ss:$8 sm:$0xf0] }
 0x164   :  { %v953_v0 = vsel %vm950_vm4, %v939_v55, %v941_v63  ;;  %v954_v1 = vsel %vm950_vm4, %v941_v63, %v943_v57  ;;  %v8978_v55 = vld [vmem:[%s14444_s13 + $0x5] ss:$8 sm:$0xf] }
 0x165   :  { %v971_v30 = vmul.f32 %v954_v1, %v9376_v33  ;;  %v970_v52 = vmul.f32 %v953_v0, %v9397_v40 }
 0x167   :  { %993 = vrot.lane.b32.xlu0 %v971_v30, %s14493_s26  ;;  %991 = vrot.lane.b32.xlu1 %v970_v52, %s14493_s26  ;;  %v945_v56 = vpop.permute.xlu1 %944 }
 0x168   :  { %v955_v58 = vsel %vm950_vm4, %v943_v57, %v945_v56  ;;  %v956_v59 = vsel %vm950_vm4, %v945_v56, %v947_v53  ;;  %v1039_v57 = vor.u32 %v8979_v60, %v8978_v55 }
 0x169   :  { %v973_v62 = vmul.f32 %v956_v59, %v9392_v39  ;;  %v972_v63 = vmul.f32 %v955_v58, %v9409_v45 }
 0x16a   :  { %v1048_v56 = vrot.slane %v1039_v57, %v9233_v8  ;;  %v1044_v58 = vrot.slane %v1039_v57, %v9229_v6  ;;  %v1056_v59 = vrot.slane %v1039_v57, %v9231_v7  ;;  %v1064_v55 = vrot.slane %v1039_v57, %v9241_v13 }
 0x16b   :  { %997 = vrot.lane.b32.xlu0 %v973_v62, %s14493_s26  ;;  %995 = vrot.lane.b32.xlu1 %v972_v63, %s14493_s26  ;;  %v949_v30 = vpop.permute.xlu1 %948  ;;  %v1060_v60 = vrot.slane %v1039_v57, %v9243_v14  ;;  %v1072_v62 = vrot.slane %v1039_v57, %v9249_v17  ;;  %v1068_v63 = vrot.slane %v1039_v57, %v9251_v18 }
 0x16c   :  { %v957_v0 = vsel %vm950_vm4, %v947_v53, %v949_v30  ;;  %v975_v1 = vmul.f32 %v949_v30, %v9329_v61  ;;  %v1052_v53 = vrot.slane %v1039_v57, %v9227_v5 }
 0x16d   :  { %v974_v52 = vmul.f32 %v957_v0, %v9421_v51 }
 0x16f   :  { %1001 = vrot.lane.b32.xlu0 %v975_v1, %s14493_s26  ;;  %999 = vrot.lane.b32.xlu1 %v974_v52, %s14493_s26  ;;  %s14912_s26 = smov 71  }
 0x173   :  { %1075 = vrot.lane.b32.xlu0 %v1048_v56, %s14498_s15  ;;  %1073 = vrot.lane.b32.xlu1 %v1044_v58, %s14498_s15 }
 0x177   :  { %1079 = vrot.lane.b32.xlu0 %v1056_v59, %s14498_s15  ;;  %1077 = vrot.lane.b32.xlu1 %v1052_v53, %s14498_s15 }
 0x17b   :  { %1083 = vrot.lane.b32.xlu0 %v1064_v55, %s14498_s15  ;;  %1081 = vrot.lane.b32.xlu1 %v1060_v60, %s14498_s15 }
 0x17f   :  { %1087 = vrot.lane.b32.xlu0 %v1072_v62, %s14498_s15  ;;  %1085 = vrot.lane.b32.xlu1 %v1068_v63, %s14498_s15  ;;  %s14548_s15 = smov 1  }
 0x1cc   :  { %v9645_v30 = vpop.permute.xlu0 %985 }
 0x1cd   :  { %14782 = vst [vmem:[#allocation47_spill] sm:$0xff] %v9645_v30 }
 0x1d5   :  { %v9647_v0 = vpop.permute.xlu0 %989  ;;  %v9649_v1 = vpop.permute.xlu1 %987 }
 0x1d6   :  { %14783 = vst [vmem:[#allocation48_spill] sm:$0xff] %v9647_v0  ;;  %14784 = vst [vmem:[#allocation49_spill] sm:$0xff] %v9649_v1 }
 0x1d9   :  { %v9651_v52 = vpop.permute.xlu0 %993  ;;  %v9653_v56 = vpop.permute.xlu1 %991 }
 0x1da   :  { %14785 = vst [vmem:[#allocation50_spill] sm:$0xff] %v9651_v52  ;;  %14786 = vst [vmem:[#allocation51_spill] sm:$0xff] %v9653_v56 }
 0x1dd   :  { %v9655_v58 = vpop.permute.xlu0 %997  ;;  %v9657_v59 = vpop.permute.xlu1 %995 }
 0x1de   :  { %14787 = vst [vmem:[#allocation52_spill] sm:$0xff] %v9655_v58  ;;  %14788 = vst [vmem:[#allocation53_spill] sm:$0xff] %v9657_v59 }
 0x1e1   :  { %v9659_v53 = vpop.permute.xlu0 %1001  ;;  %v9661_v57 = vpop.permute.xlu1 %999 }
 0x1e2   :  { %14789 = vst [vmem:[#allocation54_spill] sm:$0xff] %v9659_v53  ;;  %14790 = vst [vmem:[#allocation55_spill] sm:$0xff] %v9661_v57 }
 0x1e5   :  { %v1076_v55 = vpop.permute.xlu0 %1075  ;;  %v1074_v60 = vpop.permute.xlu1 %1073 }
 0x1e6   :  { %v1089_v62 = vsel %vm863_vm5, %v1074_v60, %v1076_v55  ;;  %v1105_v63 = vmul.f32 0.0, %v1074_v60 }
 0x1e7   :  { %v1106_v3 = vmul.f32 %v1089_v62, %v9381_v34 }
 0x1e8   :  { %1123 = vrot.lane.b32.xlu1 %v1105_v63, %s14501_s16 }
 0x1e9   :  { %v1080_v32 = vpop.permute.xlu0 %1079  ;;  %1125 = vrot.lane.b32.xlu0 %v1106_v3, %s14501_s16  ;;  %v1078_v10 = vpop.permute.xlu1 %1077  ;;  %v8980_v3 = vld [vmem:[%s14444_s13 + $0x6] ss:$8 sm:$0xf] }
 0x1ea   :  { %v1090_v24 = vsel %vm863_vm5, %v1076_v55, %v1078_v10  ;;  %v1091_v15 = vsel %vm863_vm5, %v1078_v10, %v1080_v32  ;;  %v8981_v10 = vld [vmem:[%s14444_s13 + $0x6] ss:$8 sm:$0xf0] }
 0x1eb   :  { %v1108_v49 = vmul.f32 %v1091_v15, %v9397_v40  ;;  %v1107_v54 = vmul.f32 %v1090_v24, %v9364_v27 }
 0x1ed   :  { %v1084_v57 = vpop.permute.xlu0 %1083  ;;  %1129 = vrot.lane.b32.xlu0 %v1108_v49, %s14501_s16  ;;  %1127 = vrot.lane.b32.xlu1 %v1107_v54, %s14501_s16  ;;  %v1082_v60 = vpop.permute.xlu1 %1081  ;;  %v1177_v54 = vor.u32 %v8981_v10, %v8980_v3 }
 0x1ee   :  { %v1092_v62 = vsel %vm863_vm5, %v1080_v32, %v1082_v60  ;;  %v1093_v63 = vsel %vm863_vm5, %v1082_v60, %v1084_v57 }
 0x1ef   :  { %v1110_v15 = vmul.f32 %v1093_v63, %v9409_v45  ;;  %v1109_v24 = vmul.f32 %v1092_v62, %v9376_v33  ;;  %v1182_v62 = vrot.slane %v1177_v54, %v9229_v6  ;;  %v1186_v63 = vrot.slane %v1177_v54, %v9233_v8 }
 0x1f0   :  { %v1198_v3 = vrot.slane %v1177_v54, %v9243_v14  ;;  %v1210_v10 = vrot.slane %v1177_v54, %v9249_v17 }
 0x1f1   :  { %v1088_v49 = vpop.permute.xlu0 %1087  ;;  %1133 = vrot.lane.b32.xlu0 %v1110_v15, %s14501_s16  ;;  %1131 = vrot.lane.b32.xlu1 %v1109_v24, %s14501_s16  ;;  %v1086_v32 = vpop.permute.xlu1 %1085 }
 0x1f2   :  { %v1094_v55 = vsel %vm863_vm5, %v1084_v57, %v1086_v32  ;;  %v1095_v60 = vsel %vm863_vm5, %v1086_v32, %v1088_v49  ;;  %v1113_v25 = vmul.f32 %v1088_v49, %v9329_v61  ;;  %v1190_v57 = vrot.slane %v1177_v54, %v9227_v5 }
 0x1f3   :  { %v1111_v53 = vmul.f32 %v1094_v55, %v9392_v39  ;;  %v1112_v20 = vmul.f32 %v1095_v60, %v9421_v51 }
 0x1f5   :  { %1137 = vrot.lane.b32.xlu0 %v1112_v20, %s14501_s16  ;;  %1135 = vrot.lane.b32.xlu1 %v1111_v53, %s14501_s16  ;;  %v1194_v20 = vrot.slane %v1177_v54, %v9231_v7  ;;  %v1206_v53 = vrot.slane %v1177_v54, %v9251_v18 }
 0x1f9   :  { %1211 = vrot.lane.b32.xlu0 %v1182_v62, %s14503_s23  ;;  %1139 = vrot.lane.b32.xlu1 %v1113_v25, %s14501_s16  ;;  %v1202_v25 = vrot.slane %v1177_v54, %v9241_v13  ;;  %s14546_s16 = smov 127  }
 0x1fd   :  { %1215 = vrot.lane.b32.xlu0 %v1190_v57, %s14503_s23  ;;  %1213 = vrot.lane.b32.xlu1 %v1186_v63, %s14503_s23 }
 0x201   :  { %1219 = vrot.lane.b32.xlu0 %v1198_v3, %s14503_s23  ;;  %1217 = vrot.lane.b32.xlu1 %v1194_v20, %s14503_s23 }
 0x205   :  { %1223 = vrot.lane.b32.xlu0 %v1206_v53, %s14503_s23  ;;  %1221 = vrot.lane.b32.xlu1 %v1202_v25, %s14503_s23 }
 0x209   :  { %1225 = vrot.lane.b32.xlu1 %v1210_v10, %s14503_s23  ;;  %s14573_s23 = smov 7  }
 0x25a   :  { %v9709_v15 = vpop.permute.xlu1 %1123 }
 0x25b   :  { %14791 = vst [vmem:[#allocation56_spill] sm:$0xff] %v9709_v15  ;;  %v9711_v24 = vpop.permute.xlu0 %1125 }
 0x25c   :  { %14792 = vst [vmem:[#allocation57_spill] sm:$0xff] %v9711_v24 }
 0x25f   :  { %v9713_v49 = vpop.permute.xlu0 %1129  ;;  %v9715_v32 = vpop.permute.xlu1 %1127 }
 0x260   :  { %14793 = vst [vmem:[#allocation58_spill] sm:$0xff] %v9713_v49  ;;  %14794 = vst [vmem:[#allocation59_spill] sm:$0xff] %v9715_v32 }
 0x263   :  { %v9717_v55 = vpop.permute.xlu0 %1133  ;;  %v9719_v60 = vpop.permute.xlu1 %1131 }
 0x264   :  { %14795 = vst [vmem:[#allocation60_spill] sm:$0xff] %v9717_v55  ;;  %14796 = vst [vmem:[#allocation61_spill] sm:$0xff] %v9719_v60 }
 0x267   :  { %v9721_v62 = vpop.permute.xlu0 %1137  ;;  %v9723_v57 = vpop.permute.xlu1 %1135 }
 0x268   :  { %14797 = vst [vmem:[#allocation62_spill] sm:$0xff] %v9721_v62  ;;  %14798 = vst [vmem:[#allocation63_spill] sm:$0xff] %v9723_v57 }
 0x26b   :  { %v1212_v63 = vpop.permute.xlu0 %1211  ;;  %v9725_v54 = vpop.permute.xlu1 %1139 }
 0x26c   :  { %14799 = vst [vmem:[#allocation64_spill] sm:$0xff] %v9725_v54  ;;  %v1243_v3 = vmul.f32 0.0, %v1212_v63 }
 0x26e   :  { %1261 = vrot.lane.b32.xlu0 %v1243_v3, %s14505_s27 }
 0x26f   :  { %v1216_v20 = vpop.permute.xlu0 %1215  ;;  %v1214_v53 = vpop.permute.xlu1 %1213 }
 0x270   :  { %v1227_v25 = vsel %vm14613_vm6, %v1212_v63, %v1214_v53  ;;  %v1228_v10 = vsel %vm14613_vm6, %v1214_v53, %v1216_v20 }
 0x271   :  { %v1244_v22 = vmul.f32 %v1227_v25, %v9381_v34  ;;  %v1245_v37 = vmul.f32 %v1228_v10, %v9364_v27 }
 0x273   :  { %v1220_v62 = vpop.permute.xlu0 %1219  ;;  %1265 = vrot.lane.b32.xlu0 %v1245_v37, %s14505_s27  ;;  %1263 = vrot.lane.b32.xlu1 %v1244_v22, %s14505_s27  ;;  %v1218_v54 = vpop.permute.xlu1 %1217  ;;  %v8982_v22 = vld [vmem:[%s14444_s13 + $0x7] ss:$8 sm:$0xf] }
 0x274   :  { %v1229_v43 = vsel %vm14613_vm6, %v1216_v20, %v1218_v54  ;;  %v1230_v3 = vsel %vm14613_vm6, %v1218_v54, %v1220_v62 }
 0x275   :  { %v1246_v38 = vmul.f32 %v1229_v43, %v9397_v40  ;;  %v1247_v63 = vmul.f32 %v1230_v3, %v9376_v33  ;;  %v8983_v43 = vld [vmem:[%s14444_s13 + $0x7] ss:$8 sm:$0xf0] }
 0x277   :  { %v1224_v47 = vpop.permute.xlu0 %1223  ;;  %1269 = vrot.lane.b32.xlu0 %v1247_v63, %s14505_s27  ;;  %1267 = vrot.lane.b32.xlu1 %v1246_v38, %s14505_s27  ;;  %v1222_v53 = vpop.permute.xlu1 %1221 }
 0x278   :  { %v1231_v25 = vsel %vm14613_vm6, %v1220_v62, %v1222_v53  ;;  %v1232_v37 = vsel %vm14613_vm6, %v1222_v53, %v1224_v47  ;;  %v1315_v62 = vor.u32 %v8983_v43, %v8982_v22 }
 0x279   :  { %v1248_v54 = vmul.f32 %v1231_v25, %v9409_v45  ;;  %v1249_v20 = vmul.f32 %v1232_v37, %v9392_v39 }
 0x27a   :  { %v1324_v53 = vrot.slane %v1315_v62, %v9233_v8  ;;  %v1320_v25 = vrot.slane %v1315_v62, %v9229_v6  ;;  %v1332_v37 = vrot.slane %v1315_v62, %v9231_v7  ;;  %v1340_v22 = vrot.slane %v1315_v62, %v9241_v13 }
 0x27b   :  { %1273 = vrot.lane.b32.xlu0 %v1249_v20, %s14505_s27  ;;  %1271 = vrot.lane.b32.xlu1 %v1248_v54, %s14505_s27  ;;  %v1226_v38 = vpop.permute.xlu1 %1225  ;;  %v1336_v43 = vrot.slane %v1315_v62, %v9243_v14  ;;  %v1348_v54 = vrot.slane %v1315_v62, %v9249_v17  ;;  %v1344_v20 = vrot.slane %v1315_v62, %v9251_v18 }
 0x27c   :  { %v1233_v10 = vsel %vm14613_vm6, %v1224_v47, %v1226_v38  ;;  %v1251_v3 = vmul.f32 %v1226_v38, %v9329_v61  ;;  %v1328_v47 = vrot.slane %v1315_v62, %v9227_v5 }
 0x27d   :  { %v1250_v63 = vmul.f32 %v1233_v10, %v9421_v51 }
 0x27f   :  { %1277 = vrot.lane.b32.xlu0 %v1251_v3, %s14505_s27  ;;  %1275 = vrot.lane.b32.xlu1 %v1250_v63, %s14505_s27  ;;  %s14544_s27 = smov 121  }
 0x283   :  { %1351 = vrot.lane.b32.xlu0 %v1324_v53, %s9132_s21  ;;  %1349 = vrot.lane.b32.xlu1 %v1320_v25, %s9132_s21 }
 0x287   :  { %1355 = vrot.lane.b32.xlu0 %v1332_v37, %s9132_s21  ;;  %1353 = vrot.lane.b32.xlu1 %v1328_v47, %s9132_s21 }
 0x28b   :  { %1359 = vrot.lane.b32.xlu0 %v1340_v22, %s9132_s21  ;;  %1357 = vrot.lane.b32.xlu1 %v1336_v43, %s9132_s21 }
 0x28f   :  { %1363 = vrot.lane.b32.xlu0 %v1348_v54, %s9132_s21  ;;  %1361 = vrot.lane.b32.xlu1 %v1344_v20, %s9132_s21 }
 0x2e0   :  { %v9773_v38 = vpop.permute.xlu0 %1261 }
 0x2e1   :  { %14800 = vst [vmem:[#allocation65_spill] sm:$0xff] %v9773_v38 }
 0x2e5   :  { %v9775_v10 = vpop.permute.xlu0 %1265  ;;  %v9777_v3 = vpop.permute.xlu1 %1263 }
 0x2e9   :  { %v9779_v63 = vpop.permute.xlu0 %1269  ;;  %v9781_v53 = vpop.permute.xlu1 %1267 }
 0x2ea   :  { %14801 = vst [vmem:[#allocation66_spill] sm:$0xff] %v9779_v63  ;;  %14802 = vst [vmem:[#allocation67_spill] sm:$0xff] %v9781_v53 }
 0x2ed   :  { %v9783_v25 = vpop.permute.xlu0 %1273  ;;  %v9785_v37 = vpop.permute.xlu1 %1271 }
 0x2ee   :  { %14803 = vst [vmem:[#allocation68_spill] sm:$0xff] %v9783_v25  ;;  %14804 = vst [vmem:[#allocation69_spill] sm:$0xff] %v9785_v37 }
 0x2f1   :  { %v9787_v47 = vpop.permute.xlu0 %1277  ;;  %v9789_v62 = vpop.permute.xlu1 %1275 }
 0x2f2   :  { %14805 = vst [vmem:[#allocation70_spill] sm:$0xff] %v9787_v47  ;;  %14806 = vst [vmem:[#allocation71_spill] sm:$0xff] %v9789_v62 }
 0x2f5   :  { %v1352_v22 = vpop.permute.xlu0 %1351  ;;  %v1350_v43 = vpop.permute.xlu1 %1349 }
 0x2f6   :  { %v1365_v54 = vsel %vm14614_vm7, %v1350_v43, %v1352_v22  ;;  %v1381_v20 = vmul.f32 0.0, %v1350_v43 }
 0x2f7   :  { %v1382_v50 = vmul.f32 %v1365_v54, %v9381_v34 }
 0x2f8   :  { %1399 = vrot.lane.b32.xlu1 %v1381_v20, %s9128_s22 }
 0x2f9   :  { %v1356_v59 = vpop.permute.xlu0 %1355  ;;  %1401 = vrot.lane.b32.xlu0 %v1382_v50, %s9128_s22  ;;  %v1354_v58 = vpop.permute.xlu1 %1353  ;;  %v8984_v50 = vld [vmem:[%s14444_s13 + $0x40] ss:$8 sm:$0xf] }
 0x2fa   :  { %v1366_v55 = vsel %vm14614_vm7, %v1352_v22, %v1354_v58  ;;  %v1367_v47 = vsel %vm14614_vm7, %v1354_v58, %v1356_v59  ;;  %v8985_v58 = vld [vmem:[%s14444_s13 + $0x40] ss:$8 sm:$0xf0] }
 0x2fb   :  { %v1383_v62 = vmul.f32 %v1366_v55, %v9364_v27  ;;  %v1384_v57 = vmul.f32 %v1367_v47, %v9397_v40 }
 0x2fd   :  { %v1360_v37 = vpop.permute.xlu0 %1359  ;;  %1405 = vrot.lane.b32.xlu0 %v1384_v57, %s9128_s22  ;;  %1403 = vrot.lane.b32.xlu1 %v1383_v62, %s9128_s22  ;;  %v1358_v43 = vpop.permute.xlu1 %1357  ;;  %v1453_v62 = vor.u32 %v8985_v58, %v8984_v50 }
 0x2fe   :  { %v1368_v54 = vsel %vm14614_vm7, %v1356_v59, %v1358_v43  ;;  %v1369_v20 = vsel %vm14614_vm7, %v1358_v43, %v1360_v37 }
 0x2ff   :  { %v1385_v55 = vmul.f32 %v1368_v54, %v9376_v33  ;;  %v1386_v47 = vmul.f32 %v1369_v20, %v9409_v45  ;;  %v1458_v54 = vrot.slane %v1453_v62, %v9229_v6  ;;  %v1462_v20 = vrot.slane %v1453_v62, %v9233_v8 }
 0x300   :  { %v1474_v50 = vrot.slane %v1453_v62, %v9243_v14  ;;  %v1486_v58 = vrot.slane %v1453_v62, %v9249_v17 }
 0x301   :  { %v1364_v57 = vpop.permute.xlu0 %1363  ;;  %1409 = vrot.lane.b32.xlu0 %v1386_v47, %s9128_s22  ;;  %1407 = vrot.lane.b32.xlu1 %v1385_v55, %s9128_s22  ;;  %v1362_v59 = vpop.permute.xlu1 %1361 }
 0x302   :  { %v1370_v22 = vsel %vm14614_vm7, %v1360_v37, %v1362_v59  ;;  %v1371_v43 = vsel %vm14614_vm7, %v1362_v59, %v1364_v57  ;;  %v1389_v16 = vmul.f32 %v1364_v57, %v9329_v61  ;;  %v1466_v37 = vrot.slane %v1453_v62, %v9227_v5 }
 0x303   :  { %v1387_v25 = vmul.f32 %v1370_v22, %v9392_v39  ;;  %v1388_v26 = vmul.f32 %v1371_v43, %v9421_v51 }
 0x305   :  { %1413 = vrot.lane.b32.xlu0 %v1388_v26, %s9128_s22  ;;  %1411 = vrot.lane.b32.xlu1 %v1387_v25, %s9128_s22  ;;  %v1470_v26 = vrot.slane %v1453_v62, %v9231_v7  ;;  %v1482_v25 = vrot.slane %v1453_v62, %v9251_v18 }
 0x309   :  { %1487 = vrot.lane.b32.xlu0 %v1458_v54, %s9131_s18  ;;  %1415 = vrot.lane.b32.xlu1 %v1389_v16, %s9128_s22  ;;  %v1478_v16 = vrot.slane %v1453_v62, %v9241_v13 }
 0x30d   :  { %1491 = vrot.lane.b32.xlu0 %v1466_v37, %s9131_s18  ;;  %1489 = vrot.lane.b32.xlu1 %v1462_v20, %s9131_s18 }
 0x311   :  { %1495 = vrot.lane.b32.xlu0 %v1474_v50, %s9131_s18  ;;  %1493 = vrot.lane.b32.xlu1 %v1470_v26, %s9131_s18 }
 0x315   :  { %1499 = vrot.lane.b32.xlu0 %v1482_v25, %s9131_s18  ;;  %1497 = vrot.lane.b32.xlu1 %v1478_v16, %s9131_s18 }
 0x319   :  { %1501 = vrot.lane.b32.xlu1 %v1486_v58, %s9131_s18 }
 0x36a   :  { %v9837_v55 = vpop.permute.xlu1 %1399 }
 0x36b   :  { %v9839_v47 = vpop.permute.xlu0 %1401 }
 0x36f   :  { %v9841_v57 = vpop.permute.xlu0 %1405  ;;  %v9843_v59 = vpop.permute.xlu1 %1403 }
 0x370   :  { %14807 = vst [vmem:[#allocation72_spill] sm:$0xff] %v9841_v57 }
 0x373   :  { %v9845_v22 = vpop.permute.xlu0 %1409  ;;  %v9847_v43 = vpop.permute.xlu1 %1407 }
 0x374   :  { %14808 = vst [vmem:[#allocation73_spill] sm:$0xff] %v9845_v22  ;;  %14809 = vst [vmem:[#allocation74_spill] sm:$0xff] %v9847_v43 }
 0x377   :  { %v9849_v54 = vpop.permute.xlu0 %1413  ;;  %v9851_v37 = vpop.permute.xlu1 %1411 }
 0x378   :  { %14810 = vst [vmem:[#allocation75_spill] sm:$0xff] %v9849_v54  ;;  %14811 = vst [vmem:[#allocation76_spill] sm:$0xff] %v9851_v37 }
 0x37b   :  { %v1488_v20 = vpop.permute.xlu0 %1487  ;;  %v9853_v62 = vpop.permute.xlu1 %1415 }
 0x37c   :  { %14812 = vst [vmem:[#allocation77_spill] sm:$0xff] %v9853_v62  ;;  %v1519_v50 = vmul.f32 0.0, %v1488_v20 }
 0x37e   :  { %1537 = vrot.lane.b32.xlu0 %v1519_v50, %s9127_s17 }
 0x37f   :  { %v1492_v26 = vpop.permute.xlu0 %1491  ;;  %v1490_v25 = vpop.permute.xlu1 %1489 }
 0x380   :  { %v1503_v16 = vsel %vm443_vm8, %v1488_v20, %v1490_v25  ;;  %v1504_v58 = vsel %vm443_vm8, %v1490_v25, %v1492_v26 }
 0x381   :  { %v1520_v22 = vmul.f32 %v1503_v16, %v9381_v34  ;;  %v1521_v29 = vmul.f32 %v1504_v58, %v9364_v27 }
 0x383   :  { %v1496_v54 = vpop.permute.xlu0 %1495  ;;  %1541 = vrot.lane.b32.xlu0 %v1521_v29, %s9127_s17  ;;  %1539 = vrot.lane.b32.xlu1 %v1520_v22, %s9127_s17  ;;  %v1494_v62 = vpop.permute.xlu1 %1493  ;;  %v8986_v22 = vld [vmem:[%s14444_s13 + $0x41] ss:$8 sm:$0xf] }
 0x384   :  { %v1505_v37 = vsel %vm443_vm8, %v1492_v26, %v1494_v62  ;;  %v1506_v50 = vsel %vm443_vm8, %v1494_v62, %v1496_v54 }
 0x385   :  { %v1522_v35 = vmul.f32 %v1505_v37, %v9397_v40  ;;  %v1523_v20 = vmul.f32 %v1506_v50, %v9376_v33  ;;  %v8987_v37 = vld [vmem:[%s14444_s13 + $0x41] ss:$8 sm:$0xf0] }
 0x387   :  { %v1500_v2 = vpop.permute.xlu0 %1499  ;;  %1545 = vrot.lane.b32.xlu0 %v1523_v20, %s9127_s17  ;;  %1543 = vrot.lane.b32.xlu1 %v1522_v35, %s9127_s17  ;;  %v1498_v25 = vpop.permute.xlu1 %1497 }
 0x388   :  { %v1507_v16 = vsel %vm443_vm8, %v1496_v54, %v1498_v25  ;;  %v1508_v29 = vsel %vm443_vm8, %v1498_v25, %v1500_v2  ;;  %v1591_v54 = vor.u32 %v8987_v37, %v8986_v22 }
 0x389   :  { %v1524_v62 = vmul.f32 %v1507_v16, %v9409_v45  ;;  %v1525_v26 = vmul.f32 %v1508_v29, %v9392_v39 }
 0x38a   :  { %v1600_v25 = vrot.slane %v1591_v54, %v9233_v8  ;;  %v1596_v16 = vrot.slane %v1591_v54, %v9229_v6  ;;  %v1608_v29 = vrot.slane %v1591_v54, %v9231_v7  ;;  %v1612_v22 = vrot.slane %v1591_v54, %v9243_v14 }
 0x38b   :  { %1549 = vrot.lane.b32.xlu0 %v1525_v26, %s9127_s17  ;;  %1547 = vrot.lane.b32.xlu1 %v1524_v62, %s9127_s17  ;;  %v1502_v35 = vpop.permute.xlu1 %1501  ;;  %v1624_v37 = vrot.slane %v1591_v54, %v9249_v17  ;;  %v1620_v62 = vrot.slane %v1591_v54, %v9251_v18 }
 0x38c   :  { %v1509_v58 = vsel %vm443_vm8, %v1500_v2, %v1502_v35  ;;  %v1527_v50 = vmul.f32 %v1502_v35, %v9329_v61  ;;  %v1604_v2 = vrot.slane %v1591_v54, %v9227_v5  ;;  %v1616_v61 = vrot.slane %v1591_v54, %v9241_v13 }
 0x38d   :  { %v1526_v20 = vmul.f32 %v1509_v58, %v9421_v51 }
 0x38f   :  { %1553 = vrot.lane.b32.xlu0 %v1527_v50, %s9127_s17  ;;  %1551 = vrot.lane.b32.xlu1 %v1526_v20, %s9127_s17 }
 0x393   :  { %1627 = vrot.lane.b32.xlu0 %v1600_v25, %s9136_s25  ;;  %1625 = vrot.lane.b32.xlu1 %v1596_v16, %s9136_s25 }
 0x397   :  { %1631 = vrot.lane.b32.xlu0 %v1608_v29, %s9136_s25  ;;  %1629 = vrot.lane.b32.xlu1 %v1604_v2, %s9136_s25 }
 0x39b   :  { %1635 = vrot.lane.b32.xlu0 %v1616_v61, %s9136_s25  ;;  %1633 = vrot.lane.b32.xlu1 %v1612_v22, %s9136_s25 }
 0x39f   :  { %1639 = vrot.lane.b32.xlu0 %v1624_v37, %s9136_s25  ;;  %1637 = vrot.lane.b32.xlu1 %v1620_v62, %s9136_s25 }
 0x3f0   :  { %v9901_v26 = vpop.permute.xlu0 %1537 }
 0x3f5   :  { %v9903_v35 = vpop.permute.xlu0 %1541  ;;  %v9905_v58 = vpop.permute.xlu1 %1539 }
 0x3f9   :  { %v9907_v50 = vpop.permute.xlu0 %1545  ;;  %v9909_v20 = vpop.permute.xlu1 %1543 }
 0x3fa   :  { %14813 = vst [vmem:[#allocation78_spill] sm:$0xff] %v9907_v50 }
 0x3fd   :  { %v9911_v25 = vpop.permute.xlu0 %1549  ;;  %v9913_v16 = vpop.permute.xlu1 %1547 }
 0x3fe   :  { %14814 = vst [vmem:[#allocation79_spill] sm:$0xff] %v9911_v25  ;;  %14815 = vst [vmem:[#allocation80_spill] sm:$0xff] %v9913_v16 }
 0x401   :  { %v9915_v29 = vpop.permute.xlu0 %1553  ;;  %v9917_v54 = vpop.permute.xlu1 %1551 }
 0x402   :  { %14816 = vst [vmem:[#allocation81_spill] sm:$0xff] %v9915_v29  ;;  %14817 = vst [vmem:[#allocation82_spill] sm:$0xff] %v9917_v54 }
 0x405   :  { %v1628_v2 = vpop.permute.xlu0 %1627  ;;  %v1626_v61 = vpop.permute.xlu1 %1625 }
 0x406   :  { %v1642_v22 = vsel %vm1641_vm9, %v1626_v61, %v1628_v2  ;;  %v1658_v37 = vmul.f32 0.0, %v1626_v61 }
 0x407   :  { %v1659_v62 = vmul.f32 %v1642_v22, %v9381_v34 }
 0x408   :  { %1676 = vrot.lane.b32.xlu1 %v1658_v37, %s14586_s28 }
 0x409   :  { %v1632_v41 = vpop.permute.xlu0 %1631  ;;  %1678 = vrot.lane.b32.xlu0 %v1659_v62, %s14586_s28  ;;  %v1630_v25 = vpop.permute.xlu1 %1629 }
 0x40a   :  { %v1643_v16 = vsel %vm1641_vm9, %v1628_v2, %v1630_v25  ;;  %v1644_v29 = vsel %vm1641_vm9, %v1630_v25, %v1632_v41  ;;  %v8988_v2 = vld [vmem:[%s14444_s13 + $0x42] ss:$8 sm:$0xf] }
 0x40b   :  { %v1660_v54 = vmul.f32 %v1643_v16, %v9364_v27  ;;  %v1661_v23 = vmul.f32 %v1644_v29, %v9397_v40  ;;  %v8989_v27 = vld [vmem:[%s14444_s13 + $0x42] ss:$8 sm:$0xf0] }
 0x40c   :  { %v1731_v16 = vor.u32 %v8989_v27, %v8988_v2 }
 0x40d   :  { %v1636_v21 = vpop.permute.xlu0 %1635  ;;  %1682 = vrot.lane.b32.xlu0 %v1661_v23, %s14586_s28  ;;  %1680 = vrot.lane.b32.xlu1 %v1660_v54, %s14586_s28  ;;  %v1634_v34 = vpop.permute.xlu1 %1633 }
 0x40e   :  { %v1645_v61 = vsel %vm1641_vm9, %v1632_v41, %v1634_v34  ;;  %v1646_v22 = vsel %vm1641_vm9, %v1634_v34, %v1636_v21  ;;  %v1736_v34 = vrot.slane %v1731_v16, %v9229_v6  ;;  %v1756_v2 = vrot.slane %v1731_v16, %v9241_v13 }
 0x40f   :  { %v1662_v40 = vmul.f32 %v1645_v61, %v9376_v33  ;;  %v1663_v25 = vmul.f32 %v1646_v22, %v9409_v45  ;;  %v9948_v33 = vld [vmem:[%s14445_s0 + $0x38] sm:$0xff]  ;;  %v1748_v61 = vrot.slane %v1731_v16, %v9231_v7  ;;  %v1760_v22 = vrot.slane %v1731_v16, %v9251_v18 }
 0x410   :  { %v1764_v27 = vrot.slane %v1731_v16, %v9249_v17 }
 0x411   :  { %v1640_v23 = vpop.permute.xlu0 %1639  ;;  %1686 = vrot.lane.b32.xlu0 %v1663_v25, %s14586_s28  ;;  %1684 = vrot.lane.b32.xlu1 %v1662_v40, %s14586_s28  ;;  %v1638_v41 = vpop.permute.xlu1 %1637 }
 0x412   :  { %v1647_v29 = vsel %vm1641_vm9, %v1636_v21, %v1638_v41  ;;  %v1648_v54 = vsel %vm1641_vm9, %v1638_v41, %v1640_v23  ;;  %v1666_v45 = vmul.f32 %v9948_v33, %v1640_v23  ;;  %v1752_v21 = vrot.slane %v1731_v16, %v9243_v14 }
 0x413   :  { %v1664_v37 = vmul.f32 %v1647_v29, %v9392_v39  ;;  %v1665_v62 = vmul.f32 %v1648_v54, %v9421_v51  ;;  %v1744_v39 = vrot.slane %v1731_v16, %v9227_v5  ;;  %v1740_v51 = vrot.slane %v1731_v16, %v9233_v8 }
 0x415   :  { %1690 = vrot.lane.b32.xlu0 %v1665_v62, %s14586_s28  ;;  %1688 = vrot.lane.b32.xlu1 %v1664_v37, %s14586_s28 }
 0x419   :  { %1765 = vrot.lane.b32.xlu0 %v1736_v34, %s14584_s30  ;;  %1692 = vrot.lane.b32.xlu1 %v1666_v45, %s14586_s28 }
 0x41d   :  { %1769 = vrot.lane.b32.xlu0 %v1744_v39, %s14584_s30  ;;  %1767 = vrot.lane.b32.xlu1 %v1740_v51, %s14584_s30 }
 0x421   :  { %1773 = vrot.lane.b32.xlu0 %v1752_v21, %s14584_s30  ;;  %1771 = vrot.lane.b32.xlu1 %v1748_v61, %s14584_s30 }
 0x425   :  { %1777 = vrot.lane.b32.xlu0 %v1760_v22, %s14584_s30  ;;  %1775 = vrot.lane.b32.xlu1 %v1756_v2, %s14584_s30  ;;  %v9994_v22 = vld [vmem:[%s14445_s0] sm:$0xff] }
 0x429   :  { %1779 = vrot.lane.b32.xlu1 %v1764_v27, %s14584_s30  ;;  %v10000_v27 = vld [vmem:[%s14445_s0 + $0x8] sm:$0xff] }
 0x47a   :  { %v9970_v40 = vpop.permute.xlu1 %1676 }
 0x47b   :  { %v9972_v25 = vpop.permute.xlu0 %1678 }
 0x47f   :  { %v9974_v23 = vpop.permute.xlu0 %1682  ;;  %v9976_v41 = vpop.permute.xlu1 %1680 }
 0x483   :  { %v9978_v29 = vpop.permute.xlu0 %1686  ;;  %v9980_v54 = vpop.permute.xlu1 %1684 }
 0x484   :  { %14818 = vst [vmem:[#allocation83_spill] sm:$0xff] %v9978_v29  ;;  %14819 = vst [vmem:[#allocation84_spill] sm:$0xff] %v9980_v54 }
 0x487   :  { %v9982_v37 = vpop.permute.xlu0 %1690  ;;  %v9984_v62 = vpop.permute.xlu1 %1688 }
 0x488   :  { %14820 = vst [vmem:[#allocation85_spill] sm:$0xff] %v9982_v37  ;;  %14821 = vst [vmem:[#allocation86_spill] sm:$0xff] %v9984_v62 }
 0x48b   :  { %v1766_v45 = vpop.permute.xlu0 %1765  ;;  %v9986_v16 = vpop.permute.xlu1 %1692 }
 0x48c   :  { %14822 = vst [vmem:[#allocation87_spill] sm:$0xff] %v9986_v16  ;;  %v1798_v34 = vmul.f32 0.0, %v1766_v45 }
 0x48e   :  { %1816 = vrot.lane.b32.xlu0 %v1798_v34, %s14542_s19 }
 0x48f   :  { %v1770_v39 = vpop.permute.xlu0 %1769  ;;  %v1768_v51 = vpop.permute.xlu1 %1767 }
 0x490   :  { %v1782_v21 = vsel %vm1781_vm10, %v1766_v45, %v1768_v51  ;;  %v1783_v61 = vsel %vm1781_vm10, %v1768_v51, %v1770_v39 }
 0x491   :  { %v1799_v2 = vmul.f32 %v9994_v22, %v1782_v21  ;;  %v1800_v34 = vmul.f32 %v10000_v27, %v1783_v61  ;;  %v10010_v21 = vld [vmem:[%s14445_s0 + $0x10] sm:$0xff]  ;;  %v10016_v61 = vld [vmem:[%s14445_s0 + $0x18] sm:$0xff] }
 0x493   :  { %v1774_v37 = vpop.permute.xlu0 %1773  ;;  %1820 = vrot.lane.b32.xlu0 %v1800_v34, %s14542_s19  ;;  %1818 = vrot.lane.b32.xlu1 %v1799_v2, %s14542_s19  ;;  %v1772_v45 = vpop.permute.xlu1 %1771 }
 0x494   :  { %v1784_v51 = vsel %vm1781_vm10, %v1770_v39, %v1772_v45  ;;  %v1785_v16 = vsel %vm1781_vm10, %v1772_v45, %v1774_v37 }
 0x495   :  { %v1801_v29 = vmul.f32 %v10010_v21, %v1784_v51  ;;  %v1802_v34 = vmul.f32 %v10016_v61, %v1785_v16  ;;  %v8990_v51 = vld [vmem:[%s14444_s13 + $0x43] ss:$8 sm:$0xf] }
 0x496   :  { %v10032_v16 = vld [vmem:[%s14445_s0 + $0x20] sm:$0xff]  ;;  %v1871_v4 = vor.u32 %v8991_v12, %v8990_v51 }
 0x497   :  { %v1778_v2 = vpop.permute.xlu0 %1777  ;;  %1824 = vrot.lane.b32.xlu0 %v1802_v34, %s14542_s19  ;;  %1822 = vrot.lane.b32.xlu1 %v1801_v29, %s14542_s19  ;;  %v1776_v39 = vpop.permute.xlu1 %1775 }
 0x498   :  { %v1786_v45 = vsel %vm1781_vm10, %v1774_v37, %v1776_v39  ;;  %v1787_v62 = vsel %vm1781_vm10, %v1776_v39, %v1778_v2  ;;  %v10038_v37 = vld [vmem:[%s14445_s0 + $0x28] sm:$0xff]  ;;  %v1888_v12 = vrot.slane %v1871_v4, %v9231_v7  ;;  %v1900_v51 = vrot.slane %v1871_v4, %v9251_v18 }
 0x499   :  { %v1803_v29 = vmul.f32 %v10032_v16, %v1786_v45  ;;  %v1804_v34 = vmul.f32 %v10038_v37, %v1787_v62  ;;  %v10048_v45 = vld [vmem:[%s14445_s0 + $0x30] sm:$0xff]  ;;  %v1880_v62 = vrot.slane %v1871_v4, %v9233_v8 }
 0x49b   :  { %1828 = vrot.lane.b32.xlu0 %v1804_v34, %s14542_s19  ;;  %1826 = vrot.lane.b32.xlu1 %v1803_v29, %s14542_s19  ;;  %v1780_v39 = vpop.permute.xlu1 %1779  ;;  %v1876_v29 = vrot.slane %v1871_v4, %v9229_v6 }
 0x49c   :  { %v1788_v44 = vsel %vm1781_vm10, %v1778_v2, %v1780_v39  ;;  %v1806_v48 = vmul.f32 %v9948_v33, %v1780_v39  ;;  %v1884_v2 = vrot.slane %v1871_v4, %v9227_v5 }
 0x49d   :  { %v1805_v9 = vmul.f32 %v10048_v45, %v1788_v44  ;;  %v1896_v44 = vrot.slane %v1871_v4, %v9241_v13 }
 0x49f   :  { %1832 = vrot.lane.b32.xlu0 %v1806_v48, %s14542_s19  ;;  %1830 = vrot.lane.b32.xlu1 %v1805_v9, %s14542_s19  ;;  %v1892_v9 = vrot.slane %v1871_v4, %v9243_v14  ;;  %v1904_v48 = vrot.slane %v1871_v4, %v9249_v17 }
 0x4a3   :  { %1907 = vrot.lane.b32.xlu0 %v1880_v62, %s14544_s27  ;;  %1905 = vrot.lane.b32.xlu1 %v1876_v29, %s14544_s27 }
 0x4a7   :  { %1911 = vrot.lane.b32.xlu0 %v1888_v12, %s14544_s27  ;;  %1909 = vrot.lane.b32.xlu1 %v1884_v2, %s14544_s27 }
 0x4ab   :  { %1915 = vrot.lane.b32.xlu0 %v1896_v44, %s14544_s27  ;;  %1913 = vrot.lane.b32.xlu1 %v1892_v9, %s14544_s27 }
 0x4af   :  { %1919 = vrot.lane.b32.xlu0 %v1904_v48, %s14544_s27  ;;  %1917 = vrot.lane.b32.xlu1 %v1900_v51, %s14544_s27 }
 0x500   :  { %v10069_v34 = vpop.permute.xlu0 %1816 }
 0x505   :  { %v10071_v39 = vpop.permute.xlu0 %1820  ;;  %v10073_v62 = vpop.permute.xlu1 %1818 }
 0x509   :  { %v10075_v29 = vpop.permute.xlu0 %1824  ;;  %v10077_v12 = vpop.permute.xlu1 %1822 }
 0x50a   :  { %14823 = vst [vmem:[#allocation88_spill] sm:$0xff] %v10075_v29 }
 0x50d   :  { %v10079_v2 = vpop.permute.xlu0 %1828  ;;  %v10081_v44 = vpop.permute.xlu1 %1826 }
 0x50e   :  { %14824 = vst [vmem:[#allocation89_spill] sm:$0xff] %v10079_v2  ;;  %14825 = vst [vmem:[#allocation90_spill] sm:$0xff] %v10081_v44 }
 0x511   :  { %v10083_v9 = vpop.permute.xlu0 %1832  ;;  %v10085_v4 = vpop.permute.xlu1 %1830 }
 0x512   :  { %14826 = vst [vmem:[#allocation91_spill] sm:$0xff] %v10083_v9  ;;  %14827 = vst [vmem:[#allocation92_spill] sm:$0xff] %v10085_v4 }
 0x515   :  { %v1908_v48 = vpop.permute.xlu0 %1907  ;;  %v1906_v51 = vpop.permute.xlu1 %1905 }
 0x516   :  { %v1922_v19 = vsel %vm1921_vm11, %v1906_v51, %v1908_v48  ;;  %v1938_v31 = vmul.f32 0.0, %v1906_v51 }
 0x517   :  { %v1939_v56 = vmul.f32 %v9994_v22, %v1922_v19 }
 0x518   :  { %1956 = vrot.lane.b32.xlu1 %v1938_v31, %s14573_s23 }
 0x519   :  { %v1912_v52 = vpop.permute.xlu0 %1911  ;;  %1958 = vrot.lane.b32.xlu0 %v1939_v56, %s14573_s23  ;;  %v1910_v2 = vpop.permute.xlu1 %1909  ;;  %v8992_v56 = vld [vmem:[%s14444_s13 + $0x44] ss:$8 sm:$0xf] }
 0x51a   :  { %v1923_v44 = vsel %vm1921_vm11, %v1908_v48, %v1910_v2  ;;  %v1924_v9 = vsel %vm1921_vm11, %v1910_v2, %v1912_v52  ;;  %v8993_v2 = vld [vmem:[%s14444_s13 + $0x44] ss:$8 sm:$0xf0] }
 0x51b   :  { %v1940_v4 = vmul.f32 %v10000_v27, %v1923_v44  ;;  %v1941_v28 = vmul.f32 %v10010_v21, %v1924_v9 }
 0x51d   :  { %v1916_v36 = vpop.permute.xlu0 %1915  ;;  %1962 = vrot.lane.b32.xlu0 %v1941_v28, %s14573_s23  ;;  %1960 = vrot.lane.b32.xlu1 %v1940_v4, %s14573_s23  ;;  %v1914_v19 = vpop.permute.xlu1 %1913  ;;  %v2011_v4 = vor.u32 %v8993_v2, %v8992_v56 }
 0x51e   :  { %v1925_v31 = vsel %vm1921_vm11, %v1912_v52, %v1914_v19  ;;  %v1926_v51 = vsel %vm1921_vm11, %v1914_v19, %v1916_v36 }
 0x51f   :  { %v1942_v44 = vmul.f32 %v10016_v61, %v1925_v31  ;;  %v1943_v9 = vmul.f32 %v10032_v16, %v1926_v51  ;;  %v2016_v31 = vrot.slane %v2011_v4, %v9229_v6  ;;  %v2020_v51 = vrot.slane %v2011_v4, %v9233_v8 }
 0x520   :  { %v2032_v56 = vrot.slane %v2011_v4, %v9243_v14  ;;  %v2044_v2 = vrot.slane %v2011_v4, %v9249_v17 }
 0x521   :  { %v1920_v28 = vpop.permute.xlu0 %1919  ;;  %1966 = vrot.lane.b32.xlu0 %v1943_v9, %s14573_s23  ;;  %1964 = vrot.lane.b32.xlu1 %v1942_v44, %s14573_s23  ;;  %v1918_v52 = vpop.permute.xlu1 %1917 }
 0x522   :  { %v1927_v48 = vsel %vm1921_vm11, %v1916_v36, %v1918_v52  ;;  %v1928_v19 = vsel %vm1921_vm11, %v1918_v52, %v1920_v28  ;;  %v1946_v60 = vmul.f32 %v9948_v33, %v1920_v28  ;;  %v2024_v36 = vrot.slane %v2011_v4, %v9227_v5 }
 0x523   :  { %v1944_v11 = vmul.f32 %v10038_v37, %v1927_v48  ;;  %v1945_v49 = vmul.f32 %v10048_v45, %v1928_v19 }
 0x525   :  { %1970 = vrot.lane.b32.xlu0 %v1945_v49, %s14573_s23  ;;  %1968 = vrot.lane.b32.xlu1 %v1944_v11, %s14573_s23  ;;  %v2028_v49 = vrot.slane %v2011_v4, %v9231_v7  ;;  %v2040_v11 = vrot.slane %v2011_v4, %v9251_v18 }
 0x529   :  { %2045 = vrot.lane.b32.xlu0 %v2016_v31, %s14546_s16  ;;  %1972 = vrot.lane.b32.xlu1 %v1946_v60, %s14573_s23  ;;  %v2036_v60 = vrot.slane %v2011_v4, %v9241_v13 }
 0x52d   :  { %2049 = vrot.lane.b32.xlu0 %v2024_v36, %s14546_s16  ;;  %2047 = vrot.lane.b32.xlu1 %v2020_v51, %s14546_s16 }
 0x531   :  { %2053 = vrot.lane.b32.xlu0 %v2032_v56, %s14546_s16  ;;  %2051 = vrot.lane.b32.xlu1 %v2028_v49, %s14546_s16 }
 0x535   :  { %2057 = vrot.lane.b32.xlu0 %v2040_v11, %s14546_s16  ;;  %2055 = vrot.lane.b32.xlu1 %v2036_v60, %s14546_s16 }
 0x539   :  { %2059 = vrot.lane.b32.xlu1 %v2044_v2, %s14546_s16 }
 0x58a   :  { %v10133_v44 = vpop.permute.xlu1 %1956 }
 0x58b   :  { %v10135_v9 = vpop.permute.xlu0 %1958 }
 0x58f   :  { %v10137_v28 = vpop.permute.xlu0 %1962  ;;  %v10139_v52 = vpop.permute.xlu1 %1960 }
 0x593   :  { %v10141_v48 = vpop.permute.xlu0 %1966  ;;  %v10143_v19 = vpop.permute.xlu1 %1964 }
 0x594   :  { %14828 = vst [vmem:[#allocation93_spill] sm:$0xff] %v10141_v48  ;;  %14829 = vst [vmem:[#allocation94_spill] sm:$0xff] %v10143_v19 }
 0x597   :  { %v10145_v31 = vpop.permute.xlu0 %1970  ;;  %v10147_v36 = vpop.permute.xlu1 %1968 }
 0x598   :  { %14830 = vst [vmem:[#allocation95_spill] sm:$0xff] %v10145_v31  ;;  %14831 = vst [vmem:[#allocation96_spill] sm:$0xff] %v10147_v36 }
 0x59b   :  { %v2046_v51 = vpop.permute.xlu0 %2045  ;;  %v10149_v4 = vpop.permute.xlu1 %1972 }
 0x59c   :  { %14832 = vst [vmem:[#allocation97_spill] sm:$0xff] %v10149_v4  ;;  %v2078_v56 = vmul.f32 0.0, %v2046_v51 }
 0x59e   :  { %2096 = vrot.lane.b32.xlu0 %v2078_v56, %s14548_s15 }
 0x59f   :  { %v2050_v49 = vpop.permute.xlu0 %2049  ;;  %v2048_v11 = vpop.permute.xlu1 %2047 }
 0x5a0   :  { %v2062_v60 = vsel %vm14541_vm12, %v2046_v51, %v2048_v11  ;;  %v2063_v2 = vsel %vm14541_vm12, %v2048_v11, %v2050_v49 }
 0x5a1   :  { %v2079_v48 = vmul.f32 %v9994_v22, %v2062_v60  ;;  %v2080_v31 = vmul.f32 %v10000_v27, %v2063_v2 }
 0x5a3   :  { %v2054_v42 = vpop.permute.xlu0 %2053  ;;  %2100 = vrot.lane.b32.xlu0 %v2080_v31, %s14548_s15  ;;  %2098 = vrot.lane.b32.xlu1 %v2079_v48, %s14548_s15  ;;  %v2052_v4 = vpop.permute.xlu1 %2051  ;;  %v8996_v48 = vld [vmem:[%s14444_s13 + $0x46] ss:$8 sm:$0xf] }
 0x5a4   :  { %v2064_v36 = vsel %vm14541_vm12, %v2050_v49, %v2052_v4  ;;  %v2065_v56 = vsel %vm14541_vm12, %v2052_v4, %v2054_v42 }
 0x5a5   :  { %v2081_v46 = vmul.f32 %v10010_v21, %v2064_v36  ;;  %v2082_v51 = vmul.f32 %v10016_v61, %v2065_v56  ;;  %v8997_v36 = vld [vmem:[%s14444_s13 + $0x46] ss:$8 sm:$0xf0] }
 0x5a7   :  { %v2058_v30 = vpop.permute.xlu0 %2057  ;;  %2104 = vrot.lane.b32.xlu0 %v2082_v51, %s14548_s15  ;;  %2102 = vrot.lane.b32.xlu1 %v2081_v46, %s14548_s15  ;;  %v2056_v11 = vpop.permute.xlu1 %2055 }
 0x5a8   :  { %v2066_v60 = vsel %vm14541_vm12, %v2054_v42, %v2056_v11  ;;  %v2067_v31 = vsel %vm14541_vm12, %v2056_v11, %v2058_v30  ;;  %v2220_v42 = vor.u32 %v8997_v36, %v8996_v48 }
 0x5a9   :  { %v2083_v4 = vmul.f32 %v10032_v16, %v2066_v60  ;;  %v2084_v49 = vmul.f32 %v10038_v37, %v2067_v31 }
 0x5aa   :  { %v2229_v11 = vrot.slane %v2220_v42, %v9233_v8  ;;  %v2225_v60 = vrot.slane %v2220_v42, %v9229_v6  ;;  %v2237_v31 = vrot.slane %v2220_v42, %v9231_v7  ;;  %v2245_v48 = vrot.slane %v2220_v42, %v9241_v13 }
 0x5ab   :  { %2108 = vrot.lane.b32.xlu0 %v2084_v49, %s14548_s15  ;;  %2106 = vrot.lane.b32.xlu1 %v2083_v4, %s14548_s15  ;;  %v2060_v46 = vpop.permute.xlu1 %2059  ;;  %v2241_v36 = vrot.slane %v2220_v42, %v9243_v14  ;;  %v2253_v4 = vrot.slane %v2220_v42, %v9249_v17  ;;  %v2249_v49 = vrot.slane %v2220_v42, %v9251_v18 }
 0x5ac   :  { %v2068_v2 = vsel %vm14541_vm12, %v2058_v30, %v2060_v46  ;;  %v2086_v56 = vmul.f32 %v9948_v33, %v2060_v46  ;;  %v2233_v30 = vrot.slane %v2220_v42, %v9227_v5 }
 0x5ad   :  { %v2085_v51 = vmul.f32 %v10048_v45, %v2068_v2 }
 0x5af   :  { %2112 = vrot.lane.b32.xlu0 %v2086_v56, %s14548_s15  ;;  %2110 = vrot.lane.b32.xlu1 %v2085_v51, %s14548_s15 }
 0x5b3   :  { %2256 = vrot.lane.b32.xlu0 %v2229_v11, %s14548_s15  ;;  %2254 = vrot.lane.b32.xlu1 %v2225_v60, %s14548_s15 }
 0x5b7   :  { %2260 = vrot.lane.b32.xlu0 %v2237_v31, %s14548_s15  ;;  %2258 = vrot.lane.b32.xlu1 %v2233_v30, %s14548_s15 }
 0x5bb   :  { %2264 = vrot.lane.b32.xlu0 %v2245_v48, %s14548_s15  ;;  %2262 = vrot.lane.b32.xlu1 %v2241_v36, %s14548_s15 }
 0x5bf   :  { %2268 = vrot.lane.b32.xlu0 %v2253_v4, %s14548_s15  ;;  %2266 = vrot.lane.b32.xlu1 %v2249_v49, %s14548_s15  ;;  %s15169_s15 = smov 9  }
 0x610   :  { %v10197_v46 = vpop.permute.xlu0 %2096 }
 0x615   :  { %v10199_v2 = vpop.permute.xlu0 %2100  ;;  %v10201_v56 = vpop.permute.xlu1 %2098 }
 0x619   :  { %v10203_v51 = vpop.permute.xlu0 %2104  ;;  %v10205_v11 = vpop.permute.xlu1 %2102 }
 0x61a   :  { %14833 = vst [vmem:[#allocation98_spill] sm:$0xff] %v10203_v51 }
 0x61d   :  { %v10207_v60 = vpop.permute.xlu0 %2108  ;;  %v10209_v31 = vpop.permute.xlu1 %2106 }
 0x61e   :  { %14834 = vst [vmem:[#allocation99_spill] sm:$0xff] %v10207_v60  ;;  %14835 = vst [vmem:[#allocation100_spill] sm:$0xff] %v10209_v31 }
 0x621   :  { %v10211_v30 = vpop.permute.xlu0 %2112  ;;  %v10213_v42 = vpop.permute.xlu1 %2110 }
 0x622   :  { %14836 = vst [vmem:[#allocation101_spill] sm:$0xff] %v10211_v30  ;;  %14837 = vst [vmem:[#allocation102_spill] sm:$0xff] %v10213_v42 }
 0x625   :  { %v2257_v48 = vpop.permute.xlu0 %2256  ;;  %v2255_v36 = vpop.permute.xlu1 %2254 }
 0x626   :  { %v2270_v4 = vsel %vm2114_vm13, %v2255_v36, %v2257_v48  ;;  %v2286_v49 = vmul.f32 %v9994_v22, %v2255_v36 }
 0x627   :  { %v2287_v53 = vmul.f32 %v10000_v27, %v2270_v4 }
 0x628   :  { %2304 = vrot.lane.b32.xlu1 %v2286_v49, %s14546_s16 }
 0x629   :  { %v2261_v63 = vpop.permute.xlu0 %2260  ;;  %2306 = vrot.lane.b32.xlu0 %v2287_v53, %s14546_s16  ;;  %v2259_v60 = vpop.permute.xlu1 %2258  ;;  %v8998_v53 = vld [vmem:[%s14444_s13 + $0x47] ss:$8 sm:$0xf] }
 0x62a   :  { %v2271_v31 = vsel %vm2114_vm13, %v2257_v48, %v2259_v60  ;;  %v2272_v30 = vsel %vm2114_vm13, %v2259_v60, %v2261_v63  ;;  %v8999_v60 = vld [vmem:[%s14444_s13 + $0x47] ss:$8 sm:$0xf0] }
 0x62b   :  { %v2288_v42 = vmul.f32 %v10010_v21, %v2271_v31  ;;  %v2289_v1 = vmul.f32 %v10016_v61, %v2272_v30 }
 0x62d   :  { %v2265_v0 = vpop.permute.xlu0 %2264  ;;  %2310 = vrot.lane.b32.xlu0 %v2289_v1, %s14546_s16  ;;  %2308 = vrot.lane.b32.xlu1 %v2288_v42, %s14546_s16  ;;  %v2263_v36 = vpop.permute.xlu1 %2262  ;;  %v2358_v42 = vor.u32 %v8999_v60, %v8998_v53 }
 0x62e   :  { %v2273_v4 = vsel %vm2114_vm13, %v2261_v63, %v2263_v36  ;;  %v2274_v49 = vsel %vm2114_vm13, %v2263_v36, %v2265_v0 }
 0x62f   :  { %v2290_v31 = vmul.f32 %v10032_v16, %v2273_v4  ;;  %v2291_v30 = vmul.f32 %v10038_v37, %v2274_v49  ;;  %v2363_v4 = vrot.slane %v2358_v42, %v9229_v6  ;;  %v2371_v49 = vrot.slane %v2358_v42, %v9227_v5 }
 0x630   :  { %v2379_v53 = vrot.slane %v2358_v42, %v9243_v14  ;;  %v2391_v60 = vrot.slane %v2358_v42, %v9249_v17 }
 0x631   :  { %v2269_v1 = vpop.permute.xlu0 %2268  ;;  %2314 = vrot.lane.b32.xlu0 %v2291_v30, %s14546_s16  ;;  %2312 = vrot.lane.b32.xlu1 %v2290_v31, %s14546_s16  ;;  %v2267_v63 = vpop.permute.xlu1 %2266 }
 0x632   :  { %v2275_v48 = vsel %vm2114_vm13, %v2265_v0, %v2267_v63  ;;  %v2276_v36 = vsel %vm2114_vm13, %v2267_v63, %v2269_v1  ;;  %v2294_v43 = vmul.f32 0.0, %v2269_v1  ;;  %v2367_v0 = vrot.slane %v2358_v42, %v9233_v8 }
 0x633   :  { %v2292_v15 = vmul.f32 %v10048_v45, %v2275_v48  ;;  %v2293_v57 = vmul.f32 %v9948_v33, %v2276_v36 }
 0x635   :  { %2318 = vrot.lane.b32.xlu0 %v2293_v57, %s14546_s16  ;;  %2316 = vrot.lane.b32.xlu1 %v2292_v15, %s14546_s16  ;;  %v2375_v57 = vrot.slane %v2358_v42, %v9231_v7  ;;  %v2387_v15 = vrot.slane %v2358_v42, %v9251_v18 }
 0x639   :  { %2392 = vrot.lane.b32.xlu0 %v2363_v4, %s14573_s23  ;;  %2320 = vrot.lane.b32.xlu1 %v2294_v43, %s14546_s16  ;;  %v2383_v43 = vrot.slane %v2358_v42, %v9241_v13 }
 0x63d   :  { %2396 = vrot.lane.b32.xlu0 %v2371_v49, %s14573_s23  ;;  %2394 = vrot.lane.b32.xlu1 %v2367_v0, %s14573_s23 }
 0x641   :  { %2400 = vrot.lane.b32.xlu0 %v2379_v53, %s14573_s23  ;;  %2398 = vrot.lane.b32.xlu1 %v2375_v57, %s14573_s23 }
 0x645   :  { %2404 = vrot.lane.b32.xlu0 %v2387_v15, %s14573_s23  ;;  %2402 = vrot.lane.b32.xlu1 %v2383_v43, %s14573_s23 }
 0x649   :  { %2406 = vrot.lane.b32.xlu1 %v2391_v60, %s14573_s23 }
 0x69a   :  { %v10261_v31 = vpop.permute.xlu1 %2304 }
 0x69b   :  { %v10263_v30 = vpop.permute.xlu0 %2306 }
 0x69f   :  { %v10265_v1 = vpop.permute.xlu0 %2310  ;;  %v10267_v63 = vpop.permute.xlu1 %2308 }
 0x6a3   :  { %v10269_v48 = vpop.permute.xlu0 %2314  ;;  %v10271_v36 = vpop.permute.xlu1 %2312 }
 0x6a4   :  { %14838 = vst [vmem:[#allocation103_spill] sm:$0xff] %v10269_v48  ;;  %14839 = vst [vmem:[#allocation104_spill] sm:$0xff] %v10271_v36 }
 0x6a7   :  { %v10273_v4 = vpop.permute.xlu0 %2318  ;;  %v10275_v49 = vpop.permute.xlu1 %2316 }
 0x6a8   :  { %14840 = vst [vmem:[#allocation105_spill] sm:$0xff] %v10273_v4  ;;  %14841 = vst [vmem:[#allocation106_spill] sm:$0xff] %v10275_v49 }
 0x6ab   :  { %v2393_v0 = vpop.permute.xlu0 %2392  ;;  %v10277_v42 = vpop.permute.xlu1 %2320 }
 0x6ac   :  { %14842 = vst [vmem:[#allocation107_spill] sm:$0xff] %v10277_v42  ;;  %v2424_v53 = vmul.f32 %v9994_v22, %v2393_v0 }
 0x6ae   :  { %2442 = vrot.lane.b32.xlu0 %v2424_v53, %s14544_s27 }
 0x6af   :  { %v2397_v57 = vpop.permute.xlu0 %2396  ;;  %v2395_v15 = vpop.permute.xlu1 %2394 }
 0x6b0   :  { %v2408_v43 = vsel %vm1974_vm14, %v2393_v0, %v2395_v15  ;;  %v2409_v60 = vsel %vm1974_vm14, %v2395_v15, %v2397_v57 }
 0x6b1   :  { %v2425_v48 = vmul.f32 %v10000_v27, %v2408_v43  ;;  %v2426_v4 = vmul.f32 %v10010_v21, %v2409_v60 }
 0x6b3   :  { %v2401_v24 = vpop.permute.xlu0 %2400  ;;  %2446 = vrot.lane.b32.xlu0 %v2426_v4, %s14544_s27  ;;  %2444 = vrot.lane.b32.xlu1 %v2425_v48, %s14544_s27  ;;  %v2399_v42 = vpop.permute.xlu1 %2398  ;;  %v9000_v48 = vld [vmem:[%s14444_s13 + $0x80] ss:$8 sm:$0xf] }
 0x6b4   :  { %v2410_v49 = vsel %vm1974_vm14, %v2397_v57, %v2399_v42  ;;  %v2411_v53 = vsel %vm1974_vm14, %v2399_v42, %v2401_v24 }
 0x6b5   :  { %v2427_v32 = vmul.f32 %v10016_v61, %v2410_v49  ;;  %v2428_v0 = vmul.f32 %v10032_v16, %v2411_v53  ;;  %v9001_v49 = vld [vmem:[%s14444_s13 + $0x80] ss:$8 sm:$0xf0] }
 0x6b7   :  { %v2405_v38 = vpop.permute.xlu0 %2404  ;;  %2450 = vrot.lane.b32.xlu0 %v2428_v0, %s14544_s27  ;;  %2448 = vrot.lane.b32.xlu1 %v2427_v32, %s14544_s27  ;;  %v2403_v15 = vpop.permute.xlu1 %2402 }
 0x6b8   :  { %v2412_v43 = vsel %vm1974_vm14, %v2401_v24, %v2403_v15  ;;  %v2413_v4 = vsel %vm1974_vm14, %v2403_v15, %v2405_v38  ;;  %v2496_v24 = vor.u32 %v9001_v49, %v9000_v48 }
 0x6b9   :  { %v2429_v42 = vmul.f32 %v10038_v37, %v2412_v43  ;;  %v2430_v57 = vmul.f32 %v10048_v45, %v2413_v4 }
 0x6ba   :  { %v2505_v15 = vrot.slane %v2496_v24, %v9233_v8  ;;  %v2501_v43 = vrot.slane %v2496_v24, %v9229_v6  ;;  %v2513_v4 = vrot.slane %v2496_v24, %v9231_v7  ;;  %v2509_v48 = vrot.slane %v2496_v24, %v9227_v5 }
 0x6bb   :  { %2454 = vrot.lane.b32.xlu0 %v2430_v57, %s14544_s27  ;;  %2452 = vrot.lane.b32.xlu1 %v2429_v42, %s14544_s27  ;;  %v2407_v32 = vpop.permute.xlu1 %2406  ;;  %v2517_v49 = vrot.slane %v2496_v24, %v9243_v14  ;;  %v2529_v42 = vrot.slane %v2496_v24, %v9249_v17  ;;  %v2525_v57 = vrot.slane %v2496_v24, %v9251_v18 }
 0x6bc   :  { %v2414_v60 = vsel %vm1974_vm14, %v2405_v38, %v2407_v32  ;;  %v2432_v53 = vmul.f32 0.0, %v2407_v32  ;;  %v2521_v38 = vrot.slane %v2496_v24, %v9241_v13  ;;  %v8994_v32 = vld [vmem:[%s14444_s13 + $0x45] ss:$8 sm:$0xf] }
 0x6bd   :  { %v2431_v0 = vmul.f32 %v9948_v33, %v2414_v60  ;;  %v8995_v60 = vld [vmem:[%s14444_s13 + $0x45] ss:$8 sm:$0xf0] }
 0x6bf   :  { %2458 = vrot.lane.b32.xlu0 %v2432_v53, %s14544_s27  ;;  %2456 = vrot.lane.b32.xlu1 %v2431_v0, %s14544_s27  ;;  %v10331_v53 = vor.u32 %v8995_v60, %v8994_v32  ;;  %s14921_s27 = smov 64  }
 0x6c1   :  { %14843 = vst [vmem:[#allocation108_spill] sm:$0xff] %v10331_v53  ;;  %v2155_v24 = vrot.slane %v10331_v53, %v9229_v6  ;;  %v2163_v60 = vrot.slane %v10331_v53, %v9227_v5 }
 0x6c3   :  { %2532 = vrot.lane.b32.xlu0 %v2505_v15, %s14542_s19  ;;  %2530 = vrot.lane.b32.xlu1 %v2501_v43, %s14542_s19  ;;  %v2159_v15 = vrot.slane %v10331_v53, %v9233_v8  ;;  %v2192_v32 = vmul.f32 %v9994_v22, %v2155_v24 }
 0x6c7   :  { %2536 = vrot.lane.b32.xlu0 %v2513_v4, %s14542_s19  ;;  %2534 = vrot.lane.b32.xlu1 %v2509_v48, %s14542_s19 }
 0x6cb   :  { %2540 = vrot.lane.b32.xlu0 %v2521_v38, %s14542_s19  ;;  %2538 = vrot.lane.b32.xlu1 %v2517_v49, %s14542_s19  ;;  %v2193_v49 = vmul.f32 %v10000_v27, %v2159_v15  ;;  %v2322_v15 = vsel %vm14541_vm12, %v10261_v31, %v10263_v30  ;;  %v2325_v31 = vsel %vm14541_vm12, %v10265_v1, %v10271_v36 }
 0x6cf   :  { %2544 = vrot.lane.b32.xlu0 %v2529_v42, %s14542_s19  ;;  %2542 = vrot.lane.b32.xlu1 %v2525_v57, %s14542_s19  ;;  %v2167_v42 = vrot.slane %v10331_v53, %v9231_v7  ;;  %v2323_v57 = vsel %vm14541_vm12, %v10263_v30, %v10267_v63  ;;  %v2194_v30 = vmul.f32 %v10010_v21, %v2163_v60  ;;  %s14920_s19 = smov 65  }
 0x6d0   :  { %v1975_v60 = vsel %vm1974_vm14, %v10133_v44, %v10135_v9  ;;  %v1835_v44 = vsel %vm14616_vm15, %v10069_v34, %v10073_v62 }
 0x6d1   :  { %v2195_v24 = vmul.f32 %v10016_v61, %v2167_v42  ;;  %v2324_v42 = vsel %vm14541_vm12, %v10267_v63, %v10265_v1  ;;  %vm14615_vm12 = vcmask 72704  }
 0x6d2   :  { %v1695_v34 = vsel %vm14615_vm12, %v9970_v40, %v9972_v25  ;;  %v1555_v40 = vsel %vm390_vm0, %v9901_v26, %v9905_v58 }
 0x720   :  { %v2443_v0 = vpop.permute.xlu0 %2442 }
 0x725   :  { %v2447_v43 = vpop.permute.xlu0 %2446  ;;  %v2445_v4 = vpop.permute.xlu1 %2444 }
 0x726   :  { %v2461_v48 = vsel %vm1921_vm11, %v2445_v4, %v2447_v43  ;;  %v2460_v38 = vsel %vm1921_vm11, %v2443_v0, %v2445_v4 }
 0x727   :  { %4266 = vmatprep.subr.mxu0 %v2461_v48 }
 0x728   :  { %4267 = vmatpush1.msra.mxu0 %v2460_v38  ;;  %v2116_v38 = vsel %vm2114_vm13, %v10201_v56, %v10199_v2 }
 0x729   :  { %v10348_v17 = vpop.permute.xlu0 %2450  ;;  %4268 = vmatprep.subr.mxu0 %v2323_v57  ;;  %v2449_v0 = vpop.permute.xlu1 %2448 }
 0x72a   :  { %14844 = vst [vmem:[#allocation109_spill] sm:$0xff] %v10348_v17  ;;  %4269 = vmatpush1.msra.mxu0 %v2322_v15  ;;  %v2463_v4 = vsel %vm1921_vm11, %v2449_v0, %v10348_v17  ;;  %v2462_v48 = vsel %vm1921_vm11, %v2447_v43, %v2449_v0  ;;  %v1696_v0 = vsel %vm14615_vm12, %v9972_v25, %v9976_v41 }
 0x72b   :  { %4270 = vmatprep.subr.mxu0 %v2193_v49  ;;  %4337 = vmatprep.subr.mxu1 %v2463_v4  ;;  %v2115_v49 = vsel %vm2114_vm13, %v10197_v46, %v10201_v56  ;;  %v1836_v46 = vsel %vm14616_vm15, %v10073_v62, %v10071_v39  ;;  %v2118_v56 = vsel %vm2114_vm13, %v10205_v11, %v10203_v51 }
 0x72c   :  { %4271 = vmatpush1.msra.mxu0 %v2192_v32  ;;  %4338 = vmatpush1.msra.mxu1 %v2462_v48  ;;  %v1976_v32 = vsel %vm1974_vm14, %v10135_v9, %v10139_v52  ;;  %v2117_v9 = vsel %vm2114_vm13, %v10199_v2, %v10205_v11  ;;  %v1978_v15 = vsel %vm1974_vm14, %v10137_v28, %v10143_v19 }
 0x72d   :  { %v10364_v57 = vpop.permute.xlu0 %2454  ;;  %4272 = vmatprep.subr.mxu0 %v2116_v38  ;;  %4339 = vmatprep.subr.mxu1 %v2325_v31  ;;  %v10366_v43 = vpop.permute.xlu1 %2452  ;;  %v1977_v62 = vsel %vm1974_vm14, %v10139_v52, %v10137_v28  ;;  %v1556_v2 = vsel %vm390_vm0, %v9905_v58, %v9903_v35  ;;  %v1838_v11 = vsel %vm14616_vm15, %v10077_v12, %v10075_v29 }
 0x72e   :  { %14845 = vst [vmem:[#allocation110_spill] sm:$0xff] %v10364_v57  ;;  %14846 = vst [vmem:[#allocation111_spill] sm:$0xff] %v10366_v43  ;;  %4273 = vmatpush1.msra.mxu0 %v2115_v49  ;;  %4340 = vmatpush1.msra.mxu1 %v2324_v42  ;;  %v1837_v25 = vsel %vm14616_vm15, %v10071_v39, %v10077_v12  ;;  %v1418_v28 = vsel %vm530_vm1, %v9839_v47, %v9843_v59 }
 0x72f   :  { %4274 = vmatprep.subr.mxu0 %v1976_v32  ;;  %4341 = vmatprep.subr.mxu1 %v2195_v24  ;;  %v1698_v38 = vsel %vm14615_vm12, %v9974_v23, %v9980_v54  ;;  %v1417_v58 = vsel %vm530_vm1, %v9837_v55, %v9839_v47  ;;  %v1697_v39 = vsel %vm14615_vm12, %v9976_v41, %v9974_v23  ;;  %v14849_v55 = vld [vmem:[#allocation65_spill] sm:$0xff]  ;;  %v14850_v23 = vld [vmem:[#allocation59_spill] sm:$0xff] }
 0x730   :  { %4275 = vmatpush1.msra.mxu0 %v1975_v60  ;;  %4342 = vmatpush1.msra.mxu1 %v2194_v30  ;;  %v1280_v12 = vsel %vm670_vm2, %v9777_v3, %v9775_v10  ;;  %v1558_v30 = vsel %vm390_vm0, %v9909_v20, %v9907_v50  ;;  %v1279_v47 = vsel %vm670_vm2, %v14849_v55, %v9777_v3  ;;  %v14851_v41 = vld [vmem:[#allocation57_spill] sm:$0xff]  ;;  %v14852_v3 = vld [vmem:[#allocation74_spill] sm:$0xff] }
 0x731   :  { %v10386_v1 = vpop.permute.xlu0 %2458  ;;  %4276 = vmatprep.subr.mxu0 %v1836_v46  ;;  %4343 = vmatprep.subr.mxu1 %v2118_v56  ;;  %v10388_v63 = vpop.permute.xlu1 %2456  ;;  %v1142_v42 = vsel %vm810_vm3, %v14851_v41, %v14850_v23  ;;  %v1557_v46 = vsel %vm390_vm0, %v9903_v35, %v9909_v20 }
 0x732   :  { %14847 = vst [vmem:[#allocation112_spill] sm:$0xff] %v10386_v1  ;;  %14848 = vst [vmem:[#allocation113_spill] sm:$0xff] %v10388_v63  ;;  %4277 = vmatpush1.msra.mxu0 %v1835_v44  ;;  %4344 = vmatpush1.msra.mxu1 %v2117_v9  ;;  %v14853_v9 = vld [vmem:[#allocation72_spill] sm:$0xff] }
 0x733   :  { %4278 = vmatprep.subr.mxu0 %v1696_v0  ;;  %4345 = vmatprep.subr.mxu1 %v1978_v15  ;;  %v1420_v0 = vsel %vm530_vm1, %v14853_v9, %v14852_v3  ;;  %v14854_v15 = vld [vmem:[#allocation56_spill] sm:$0xff]  ;;  %v1419_v35 = vsel %vm530_vm1, %v9843_v59, %v14853_v9  ;;  %v14859_v59 = vld [vmem:[#allocation47_spill] sm:$0xff] }
 0x734   :  { %4279 = vmatpush1.msra.mxu0 %v1695_v34  ;;  %4346 = vmatpush1.msra.mxu1 %v1977_v62  ;;  %v1141_v34 = vsel %vm810_vm3, %v14854_v15, %v14851_v41  ;;  %v14855_v62 = vld [vmem:[#allocation48_spill] sm:$0xff]  ;;  %v14868_v9 = vld [vmem:[#allocation51_spill] sm:$0xff] }
 0x735   :  { %v2533_v4 = vpop.permute.xlu0 %2532  ;;  %4280 = vmatprep.subr.mxu0 %v1556_v2  ;;  %4347 = vmatprep.subr.mxu1 %v1838_v11  ;;  %v2531_v48 = vpop.permute.xlu1 %2530  ;;  %v14856_v2 = vld [vmem:[#allocation49_spill] sm:$0xff] }
 0x736   :  { %v2546_v52 = vsel %vm14616_vm15, %v2531_v48, %v2533_v4  ;;  %v2562_v24 = vmul.f32 %v9994_v22, %v2531_v48  ;;  %4281 = vmatpush1.msra.mxu0 %v1555_v40  ;;  %4348 = vmatpush1.msra.mxu1 %v1837_v25  ;;  %v1004_v11 = vsel %vm950_vm4, %v14856_v2, %v14855_v62  ;;  %v14858_v48 = vld [vmem:[#allocation67_spill] sm:$0xff] }
 0x737   :  { %v2563_v26 = vmul.f32 %v10000_v27, %v2546_v52  ;;  %4282 = vmatprep.subr.mxu0 %v1418_v28  ;;  %4349 = vmatprep.subr.mxu1 %v1698_v38  ;;  %v1281_v38 = vsel %vm670_vm2, %v9775_v10, %v14858_v48 }
 0x738   :  { %4283 = vmatpush1.msra.mxu0 %v1417_v58  ;;  %4350 = vmatpush1.msra.mxu1 %v1697_v39  ;;  %v14861_v58 = vld [vmem:[#allocation37_spill] sm:$0xff] }
 0x739   :  { %2580 = vrot.lane.b32.xlu1 %v2562_v24, %s14584_s30  ;;  %v2537_v31 = vpop.permute.xlu0 %2536  ;;  %4284 = vmatprep.subr.mxu0 %v1280_v12  ;;  %v2535_v49 = vpop.permute.xlu1 %2534  ;;  %v1003_v24 = vsel %vm950_vm4, %v14859_v59, %v14856_v2  ;;  %v14869_v2 = vld [vmem:[#allocation28_spill] sm:$0xff] }
 0x73a   :  { %4351 = vmatprep.subr.mxu1 %v1558_v30  ;;  %2582 = vrot.lane.b32.xlu0 %v2563_v26, %s14584_s30  ;;  %v2547_v32 = vsel %vm14616_vm15, %v2533_v4, %v2535_v49  ;;  %v2548_v60 = vsel %vm14616_vm15, %v2535_v49, %v2537_v31  ;;  %v14857_v4 = vld [vmem:[#allocation66_spill] sm:$0xff]  ;;  %v14860_v26 = vld [vmem:[#allocation41_spill] sm:$0xff] }
 0x73b   :  { %v2564_v56 = vmul.f32 %v10010_v21, %v2547_v32  ;;  %v2565_v44 = vmul.f32 %v10016_v61, %v2548_v60  ;;  %4285 = vmatpush1.msra.mxu0 %v1279_v47  ;;  %4352 = vmatpush1.msra.mxu1 %v1557_v46  ;;  %v1282_v40 = vsel %vm670_vm2, %v14858_v48, %v14857_v4  ;;  %v14862_v30 = vld [vmem:[#allocation61_spill] sm:$0xff]  ;;  %v14863_v49 = vld [vmem:[#allocation58_spill] sm:$0xff]  ;;  %v14865_v32 = vld [vmem:[#allocation31_spill] sm:$0xff] }
 0x73c   :  { %4286 = vmatprep.subr.mxu0 %v1142_v42  ;;  %4353 = vmatprep.subr.mxu1 %v1420_v0  ;;  %v865_v39 = vsel %vm863_vm5, %v14861_v58, %v14860_v26  ;;  %v1144_v55 = vsel %vm810_vm3, %v14863_v49, %v14862_v30  ;;  %v14864_v47 = vld [vmem:[#allocation17_spill] sm:$0xff]  ;;  %v1143_v41 = vsel %vm810_vm3, %v14850_v23, %v14863_v49  ;;  %v14866_v60 = vld [vmem:[#allocation34_spill] sm:$0xff]  ;;  %v14876_v49 = vld [vmem:[#allocation20_spill] sm:$0xff] }
 0x73d   :  { %4287 = vmatpush1.msra.mxu0 %v1141_v34  ;;  %4354 = vmatpush1.msra.mxu1 %v1419_v35  ;;  %v2541_v20 = vpop.permute.xlu0 %2540  ;;  %v2539_v25 = vpop.permute.xlu1 %2538  ;;  %v864_v10 = vsel %vm863_vm5, %v14864_v47, %v14861_v58  ;;  %v725_v46 = vsel %vm14613_vm6, %v14866_v60, %v14865_v32  ;;  %v9002_v23 = vld [vmem:[%s14444_s13 + $0x81] ss:$8 sm:$0xf] }
 0x73e   :  { %4288 = vmatprep.subr.mxu0 %v1004_v11  ;;  %4355 = vmatprep.subr.mxu1 %v1282_v40  ;;  %v2549_v28 = vsel %vm14616_vm15, %v2537_v31, %v2539_v25  ;;  %v2550_v52 = vsel %vm14616_vm15, %v2539_v25, %v2541_v20  ;;  %v9003_v35 = vld [vmem:[%s14444_s13 + $0x81] ss:$8 sm:$0xf0]  ;;  %v1005_v25 = vsel %vm950_vm4, %v14855_v62, %v14868_v9 }
 0x73f   :  { %2586 = vrot.lane.b32.xlu0 %v2565_v44, %s14584_s30  ;;  %2584 = vrot.lane.b32.xlu1 %v2564_v56, %s14584_s30  ;;  %v2566_v12 = vmul.f32 %v10032_v16, %v2549_v28  ;;  %v2567_v31 = vmul.f32 %v10038_v37, %v2550_v52  ;;  %v14867_v44 = vld [vmem:[#allocation50_spill] sm:$0xff]  ;;  %v14870_v11 = vld [vmem:[#allocation23_spill] sm:$0xff]  ;;  %v14873_v52 = vld [vmem:[#allocation40_spill] sm:$0xff]  ;;  %v2634_v58 = vor.u32 %v9003_v35, %v9002_v23 }
 0x740   :  { %4289 = vmatpush1.msra.mxu0 %v1003_v24  ;;  %4356 = vmatpush1.msra.mxu1 %v1281_v38  ;;  %v1006_v0 = vsel %vm950_vm4, %v14868_v9, %v14867_v44  ;;  %v585_v48 = vsel %vm14614_vm7, %v14870_v11, %v14869_v2  ;;  %v14872_v28 = vld [vmem:[#allocation43_spill] sm:$0xff]  ;;  %v866_v62 = vsel %vm863_vm5, %v14860_v26, %v14873_v52  ;;  %v14878_v47 = vld [vmem:[#allocation36_spill] sm:$0xff]  ;;  %v14880_v9 = vld [vmem:[#allocation30_spill] sm:$0xff] }
 0x741   :  { %4290 = vmatprep.subr.mxu0 %v865_v39  ;;  %4357 = vmatprep.subr.mxu1 %v1144_v55  ;;  %v2545_v42 = vpop.permute.xlu0 %2544  ;;  %v2543_v56 = vpop.permute.xlu1 %2542  ;;  %v867_v59 = vsel %vm863_vm5, %v14873_v52, %v14872_v28  ;;  %v14874_v39 = vld [vmem:[#allocation13_spill] sm:$0xff]  ;;  %v14882_v23 = vld [vmem:[#allocation19_spill] sm:$0xff]  ;;  %v14883_v35 = vld [vmem:[#allocation22_spill] sm:$0xff] }
 0x742   :  { %4291 = vmatpush1.msra.mxu0 %v864_v10  ;;  %4358 = vmatpush1.msra.mxu1 %v1143_v41  ;;  %v2551_v15 = vsel %vm14616_vm15, %v2541_v20, %v2543_v56  ;;  %v2552_v34 = vsel %vm14616_vm15, %v2543_v56, %v2545_v42  ;;  %v14871_v20 = vld [vmem:[#allocation14_spill] sm:$0xff]  ;;  %v14879_v41 = vld [vmem:[#allocation11_spill] sm:$0xff]  ;;  %v2570_v56 = vmul.f32 0.0, %v2545_v42  ;;  %v14884_v52 = vld [vmem:[#allocation9_spill] sm:$0xff] }
 0x743   :  { %4292 = vmatprep.subr.mxu0 %v725_v46  ;;  %4359 = vmatprep.subr.mxu1 %v1006_v0  ;;  %v724_v40 = vsel %vm14613_vm6, %v14871_v20, %v14866_v60  ;;  %v2568_v24 = vmul.f32 %v10048_v45, %v2551_v15  ;;  %v2569_v38 = vmul.f32 %v9948_v33, %v2552_v34  ;;  %v14877_v33 = vld [vmem:[#allocation33_spill] sm:$0xff] }
 0x744   :  { %2590 = vrot.lane.b32.xlu0 %v2567_v31, %s14584_s30  ;;  %2588 = vrot.lane.b32.xlu1 %v2566_v12, %s14584_s30  ;;  %v584_v12 = vsel %vm14614_vm7, %v14874_v39, %v14870_v11  ;;  %v14875_v31 = vld [vmem:[#allocation18_spill] sm:$0xff]  ;;  %v727_v10 = vsel %vm14613_vm6, %v14878_v47, %v14877_v33  ;;  %v444_v26 = vsel %vm443_vm8, %v14879_v41, %v14876_v49  ;;  %v14881_v0 = vld [vmem:[#allocation25_spill] sm:$0xff] }
 0x745   :  { %4293 = vmatpush1.msra.mxu0 %v724_v40  ;;  %4360 = vmatpush1.msra.mxu1 %v1005_v25  ;;  %v445_v55 = vsel %vm443_vm8, %v14876_v49, %v14875_v31  ;;  %v726_v60 = vsel %vm14613_vm6, %v14865_v32, %v14878_v47  ;;  %v2639_v46 = vrot.slane %v2634_v58, %v9229_v6 }
 0x746   :  { %4294 = vmatprep.subr.mxu0 %v585_v48  ;;  %4361 = vmatprep.subr.mxu1 %v867_v59  ;;  %v587_v15 = vsel %vm14614_vm7, %v14881_v0, %v14880_v9  ;;  %v586_v34 = vsel %vm14614_vm7, %v14869_v2, %v14881_v0  ;;  %v447_v11 = vsel %vm443_vm8, %v14883_v35, %v14882_v23 }
 0x747   :  { %4295 = vmatpush1.msra.mxu0 %v584_v12  ;;  %4362 = vmatpush1.msra.mxu1 %v866_v62  ;;  %v446_v42 = vsel %vm443_vm8, %v14875_v31, %v14883_v35  ;;  %v2647_v32 = vrot.slane %v2634_v58, %v9227_v5  ;;  %v2643_v48 = vrot.slane %v2634_v58, %v9233_v8 }
 0x748   :  { %4296 = vmatprep.subr.mxu0 %v445_v55  ;;  %4363 = vmatprep.subr.mxu1 %v727_v10  ;;  %v2655_v2 = vrot.slane %v2634_v58, %v9243_v14  ;;  %v2651_v20 = vrot.slane %v2634_v58, %v9231_v7  ;;  %v2663_v40 = vrot.slane %v2634_v58, %v9251_v18 }
 0x749   :  { %2594 = vrot.lane.b32.xlu0 %v2569_v38, %s14584_s30  ;;  %2592 = vrot.lane.b32.xlu1 %v2568_v24, %s14584_s30  ;;  %v2659_v25 = vrot.slane %v2634_v58, %v9241_v13  ;;  %v2667_v59 = vrot.slane %v2634_v58, %v14884_v52 }
 0x74a   :  { %4297 = vmatpush1.msra.mxu0 %v444_v26  ;;  %4364 = vmatpush1.msra.mxu1 %v726_v60 }
 0x74b   :  { %4365 = vmatprep.subr.mxu1 %v587_v15 }
 0x74c   :  { %4366 = vmatpush1.msra.mxu1 %v586_v34 }
 0x74d   :  { %4367 = vmatprep.subr.mxu1 %v447_v11  ;;  %2668 = vrot.lane.b32.xlu0 %v2639_v46, %s14586_s28 }
 0x74e   :  { %2596 = vrot.lane.b32.xlu1 %v2570_v56, %s14584_s30  ;;  %4368 = vmatpush1.msra.mxu1 %v446_v42 }
 0x751   :  { %2672 = vrot.lane.b32.xlu0 %v2647_v32, %s14586_s28 }
 0x752   :  { %2670 = vrot.lane.b32.xlu1 %v2643_v48, %s14586_s28 }
 0x755   :  { %2676 = vrot.lane.b32.xlu0 %v2655_v2, %s14586_s28  ;;  %v9004_v2 = vld [vmem:[%s14444_s13 + $0x82] ss:$8 sm:$0xf] }
 0x756   :  { %2674 = vrot.lane.b32.xlu1 %v2651_v20, %s14586_s28 }
 0x759   :  { %2680 = vrot.lane.b32.xlu0 %v2663_v40, %s14586_s28 }
 0x75a   :  { %2678 = vrot.lane.b32.xlu1 %v2659_v25, %s14586_s28 }
 0x75e   :  { %2682 = vrot.lane.b32.xlu1 %v2667_v59, %s14586_s28  ;;  %s15170_s28 = smov 120  }
 0x7ab   :  { %v10574_v24 = vpop.permute.xlu1 %2580 }
 0x7ac   :  { %14885 = vst [vmem:[#allocation65_spill] sm:$0xff] %v10574_v24  ;;  %v10576_v38 = vpop.permute.xlu0 %2582 }
 0x7ad   :  { %14886 = vst [vmem:[#allocation59_spill] sm:$0xff] %v10576_v38 }
 0x7b1   :  { %v10578_v39 = vpop.permute.xlu0 %2586  ;;  %v10580_v12 = vpop.permute.xlu1 %2584 }
 0x7b2   :  { %14887 = vst [vmem:[#allocation57_spill] sm:$0xff] %v10578_v39 }
 0x7b6   :  { %v10582_v62 = vpop.permute.xlu0 %2590  ;;  %v10584_v31 = vpop.permute.xlu1 %2588 }
 0x7b7   :  { %14888 = vst [vmem:[#allocation72_spill] sm:$0xff] %v10582_v62  ;;  %14889 = vst [vmem:[#allocation56_spill] sm:$0xff] %v10584_v31 }
 0x7bb   :  { %v10586_v49 = vpop.permute.xlu0 %2594  ;;  %v10588_v55 = vpop.permute.xlu1 %2592 }
 0x7bc   :  { %14890 = vst [vmem:[#allocation48_spill] sm:$0xff] %v10586_v49  ;;  %14891 = vst [vmem:[#allocation49_spill] sm:$0xff] %v10588_v55 }
 0x7bf   :  { %v2669_v47 = vpop.permute.xlu0 %2668 }
 0x7c0   :  { %v2700_v58 = vmul.f32 %v9994_v22, %v2669_v47  ;;  %v10591_v10 = vpop.permute.xlu1 %2596 }
 0x7c1   :  { %14892 = vst [vmem:[#allocation67_spill] sm:$0xff] %v10591_v10 }
 0x7c2   :  { %2718 = vrot.lane.b32.xlu0 %v2700_v58, %s9136_s25  ;;  %v10622_v58 = vld [vmem:[%s14445_s0 + $0x38] sm:$0xff] }
 0x7c3   :  { %v2673_v41 = vpop.permute.xlu0 %2672 }
 0x7c4   :  { %v2671_v26 = vpop.permute.xlu1 %2670 }
 0x7c5   :  { %v2684_v60 = vsel %vm14615_vm12, %v2669_v47, %v2671_v26  ;;  %v2685_v46 = vsel %vm14615_vm12, %v2671_v26, %v2673_v41 }
 0x7c6   :  { %v2701_v56 = vmul.f32 %v10000_v27, %v2684_v60  ;;  %v2702_v0 = vmul.f32 %v10010_v21, %v2685_v46 }
 0x7c7   :  { %v2677_v15 = vpop.permute.xlu0 %2676 }
 0x7c8   :  { %2722 = vrot.lane.b32.xlu0 %v2702_v0, %s9136_s25  ;;  %2720 = vrot.lane.b32.xlu1 %v2701_v56, %s9136_s25  ;;  %v2675_v22 = vpop.permute.xlu1 %2674 }
 0x7c9   :  { %v2686_v34 = vsel %vm14615_vm12, %v2673_v41, %v2675_v22  ;;  %v2687_v35 = vsel %vm14615_vm12, %v2675_v22, %v2677_v15 }
 0x7ca   :  { %v2703_v11 = vmul.f32 %v10016_v61, %v2686_v34  ;;  %v2704_v42 = vmul.f32 %v10032_v16, %v2687_v35  ;;  %v9005_v61 = vld [vmem:[%s14444_s13 + $0x82] ss:$8 sm:$0xf0] }
 0x7cb   :  { %v2681_v32 = vpop.permute.xlu0 %2680  ;;  %v2772_v25 = vor.u32 %v9005_v61, %v9004_v2 }
 0x7cc   :  { %2726 = vrot.lane.b32.xlu0 %v2704_v42, %s9136_s25  ;;  %2724 = vrot.lane.b32.xlu1 %v2703_v11, %s9136_s25  ;;  %v2679_v27 = vpop.permute.xlu1 %2678 }
 0x7cd   :  { %v2688_v21 = vsel %vm14615_vm12, %v2677_v15, %v2679_v27  ;;  %v2689_v48 = vsel %vm14615_vm12, %v2679_v27, %v2681_v32  ;;  %v2789_v26 = vrot.slane %v2772_v25, %v9231_v7  ;;  %v2785_v60 = vrot.slane %v2772_v25, %v9227_v5 }
 0x7ce   :  { %v2705_v16 = vmul.f32 %v10038_v37, %v2688_v21  ;;  %v2706_v20 = vmul.f32 %v10048_v45, %v2689_v48  ;;  %v2781_v37 = vrot.slane %v2772_v25, %v9233_v8  ;;  %v2777_v45 = vrot.slane %v2772_v25, %v9229_v6 }
 0x7cf   :  { %v2797_v46 = vrot.slane %v2772_v25, %v9241_v13  ;;  %v2793_v56 = vrot.slane %v2772_v25, %v9243_v14  ;;  %v2805_v0 = vrot.slane %v2772_v25, %v14884_v52  ;;  %v2801_v15 = vrot.slane %v2772_v25, %v9251_v18  ;;  %v10671_v25 = vld [vmem:[%s14445_s0 + $0x8] sm:$0xff] }
 0x7d0   :  { %2730 = vrot.lane.b32.xlu0 %v2706_v20, %s9136_s25  ;;  %2728 = vrot.lane.b32.xlu1 %v2705_v16, %s9136_s25  ;;  %v2683_v40 = vpop.permute.xlu1 %2682  ;;  %v10665_v20 = vld [vmem:[%s14445_s0] sm:$0xff] }
 0x7d1   :  { %v2690_v59 = vsel %vm14615_vm12, %v2681_v32, %v2683_v40  ;;  %v2708_v47 = vmul.f32 0.0, %v2683_v40 }
 0x7d2   :  { %v2707_v41 = vmul.f32 %v10622_v58, %v2690_v59 }
 0x7d4   :  { %2734 = vrot.lane.b32.xlu0 %v2708_v47, %s9136_s25  ;;  %2732 = vrot.lane.b32.xlu1 %v2707_v41, %s9136_s25 }
 0x7d8   :  { %2808 = vrot.lane.b32.xlu0 %v2781_v37, %s9127_s17  ;;  %2806 = vrot.lane.b32.xlu1 %v2777_v45, %s9127_s17 }
 0x7dc   :  { %2812 = vrot.lane.b32.xlu0 %v2789_v26, %s9127_s17  ;;  %2810 = vrot.lane.b32.xlu1 %v2785_v60, %s9127_s17  ;;  %v10681_v26 = vld [vmem:[%s14445_s0 + $0x10] sm:$0xff] }
 0x7e0   :  { %2816 = vrot.lane.b32.xlu0 %v2797_v46, %s9127_s17  ;;  %2814 = vrot.lane.b32.xlu1 %v2793_v56, %s9127_s17  ;;  %v10687_v46 = vld [vmem:[%s14445_s0 + $0x18] sm:$0xff] }
 0x7e4   :  { %2820 = vrot.lane.b32.xlu0 %v2805_v0, %s9127_s17  ;;  %2818 = vrot.lane.b32.xlu1 %v2801_v15, %s9127_s17 }
 0x834   :  { %v10643_v22 = vpop.permute.xlu0 %2718 }
 0x83a   :  { %v10645_v34 = vpop.permute.xlu0 %2722  ;;  %v10647_v35 = vpop.permute.xlu1 %2720 }
 0x83e   :  { %v10649_v11 = vpop.permute.xlu0 %2726  ;;  %v10651_v42 = vpop.permute.xlu1 %2724 }
 0x83f   :  { %14893 = vst [vmem:[#allocation47_spill] sm:$0xff] %v10649_v11  ;;  %14894 = vst [vmem:[#allocation41_spill] sm:$0xff] %v10651_v42 }
 0x842   :  { %v10653_v32 = vpop.permute.xlu0 %2730  ;;  %v10655_v27 = vpop.permute.xlu1 %2728 }
 0x843   :  { %14895 = vst [vmem:[#allocation37_spill] sm:$0xff] %v10653_v32  ;;  %14896 = vst [vmem:[#allocation58_spill] sm:$0xff] %v10655_v27 }
 0x846   :  { %v10657_v21 = vpop.permute.xlu0 %2734  ;;  %v10659_v48 = vpop.permute.xlu1 %2732 }
 0x847   :  { %14897 = vst [vmem:[#allocation17_spill] sm:$0xff] %v10657_v21  ;;  %14898 = vst [vmem:[#allocation31_spill] sm:$0xff] %v10659_v48 }
 0x84a   :  { %v2809_v2 = vpop.permute.xlu0 %2808  ;;  %v2807_v61 = vpop.permute.xlu1 %2806 }
 0x84b   :  { %v2822_v16 = vsel %vm390_vm0, %v2807_v61, %v2809_v2  ;;  %v2838_v40 = vmul.f32 %v10665_v20, %v2807_v61 }
 0x84c   :  { %v2839_v59 = vmul.f32 %v10671_v25, %v2822_v16  ;;  %v9006_v16 = vld [vmem:[%s14444_s13 + $0x83] ss:$8 sm:$0xf] }
 0x84d   :  { %2856 = vrot.lane.b32.xlu1 %v2838_v40, %s9131_s18  ;;  %v9007_v40 = vld [vmem:[%s14444_s13 + $0x83] ss:$8 sm:$0xf0] }
 0x84e   :  { %v2813_v47 = vpop.permute.xlu0 %2812  ;;  %2858 = vrot.lane.b32.xlu0 %v2839_v59, %s9131_s18  ;;  %v2811_v41 = vpop.permute.xlu1 %2810  ;;  %v10703_v59 = vld [vmem:[%s14445_s0 + $0x20] sm:$0xff] }
 0x84f   :  { %v2823_v37 = vsel %vm390_vm0, %v2809_v2, %v2811_v41  ;;  %v2824_v45 = vsel %vm390_vm0, %v2811_v41, %v2813_v47 }
 0x850   :  { %v2840_v60 = vmul.f32 %v10681_v26, %v2823_v37  ;;  %v2841_v56 = vmul.f32 %v10687_v46, %v2824_v45 }
 0x852   :  { %v2817_v0 = vpop.permute.xlu0 %2816  ;;  %2862 = vrot.lane.b32.xlu0 %v2841_v56, %s9131_s18  ;;  %2860 = vrot.lane.b32.xlu1 %v2840_v60, %s9131_s18  ;;  %v2815_v15 = vpop.permute.xlu1 %2814  ;;  %v2910_v56 = vor.u32 %v9007_v40, %v9006_v16 }
 0x853   :  { %v2825_v2 = vsel %vm390_vm0, %v2813_v47, %v2815_v15  ;;  %v2826_v61 = vsel %vm390_vm0, %v2815_v15, %v2817_v0  ;;  %v10709_v47 = vld [vmem:[%s14445_s0 + $0x28] sm:$0xff] }
 0x854   :  { %v2842_v41 = vmul.f32 %v10703_v59, %v2825_v2  ;;  %v2843_v37 = vmul.f32 %v10709_v47, %v2826_v61  ;;  %v10719_v2 = vld [vmem:[%s14445_s0 + $0x30] sm:$0xff]  ;;  %v2915_v16 = vrot.slane %v2910_v56, %v9229_v6  ;;  %v2919_v40 = vrot.slane %v2910_v56, %v9233_v8 }
 0x856   :  { %v2821_v45 = vpop.permute.xlu0 %2820  ;;  %2866 = vrot.lane.b32.xlu0 %v2843_v37, %s9131_s18  ;;  %2864 = vrot.lane.b32.xlu1 %v2842_v41, %s9131_s18  ;;  %v2819_v60 = vpop.permute.xlu1 %2818  ;;  %v2927_v41 = vrot.slane %v2910_v56, %v9231_v7  ;;  %v2943_v37 = vrot.slane %v2910_v56, %v14884_v52 }
 0x857   :  { %v2827_v15 = vsel %vm390_vm0, %v2817_v0, %v2819_v60  ;;  %v2828_v49 = vsel %vm390_vm0, %v2819_v60, %v2821_v45  ;;  %v2846_v48 = vmul.f32 0.0, %v2821_v45  ;;  %v2923_v0 = vrot.slane %v2910_v56, %v9227_v5 }
 0x858   :  { %v2844_v10 = vmul.f32 %v10719_v2, %v2827_v15  ;;  %v2845_v61 = vmul.f32 %v10622_v58, %v2828_v49  ;;  %v2931_v49 = vrot.slane %v2910_v56, %v9243_v14 }
 0x85a   :  { %2870 = vrot.lane.b32.xlu0 %v2845_v61, %s9131_s18  ;;  %2868 = vrot.lane.b32.xlu1 %v2844_v10, %s9131_s18  ;;  %v2939_v10 = vrot.slane %v2910_v56, %v9251_v18 }
 0x85e   :  { %2944 = vrot.lane.b32.xlu0 %v2915_v16, %s9128_s22  ;;  %2872 = vrot.lane.b32.xlu1 %v2846_v48, %s9131_s18  ;;  %v2935_v48 = vrot.slane %v2910_v56, %v9241_v13 }
 0x862   :  { %2948 = vrot.lane.b32.xlu0 %v2923_v0, %s9128_s22  ;;  %2946 = vrot.lane.b32.xlu1 %v2919_v40, %s9128_s22 }
 0x866   :  { %2952 = vrot.lane.b32.xlu0 %v2931_v49, %s9128_s22  ;;  %2950 = vrot.lane.b32.xlu1 %v2927_v41, %s9128_s22 }
 0x86a   :  { %2956 = vrot.lane.b32.xlu0 %v2939_v10, %s9128_s22  ;;  %2954 = vrot.lane.b32.xlu1 %v2935_v48, %s9128_s22 }
 0x86e   :  { %2958 = vrot.lane.b32.xlu1 %v2943_v37, %s9128_s22 }
 0x8bf   :  { %v10742_v45 = vpop.permute.xlu1 %2856 }
 0x8c0   :  { %v10744_v60 = vpop.permute.xlu0 %2858 }
 0x8c4   :  { %v10746_v15 = vpop.permute.xlu0 %2862  ;;  %v10748_v61 = vpop.permute.xlu1 %2860 }
 0x8c5   :  { %14899 = vst [vmem:[#allocation34_spill] sm:$0xff] %v10746_v15 }
 0x8c8   :  { %v10750_v16 = vpop.permute.xlu0 %2866  ;;  %v10752_v0 = vpop.permute.xlu1 %2864 }
 0x8c9   :  { %14900 = vst [vmem:[#allocation51_spill] sm:$0xff] %v10750_v16  ;;  %14901 = vst [vmem:[#allocation28_spill] sm:$0xff] %v10752_v0 }
 0x8cc   :  { %v10754_v40 = vpop.permute.xlu0 %2870  ;;  %v10756_v49 = vpop.permute.xlu1 %2868 }
 0x8cd   :  { %14902 = vst [vmem:[#allocation23_spill] sm:$0xff] %v10754_v40  ;;  %14903 = vst [vmem:[#allocation14_spill] sm:$0xff] %v10756_v49 }
 0x8d0   :  { %v2945_v41 = vpop.permute.xlu0 %2944  ;;  %v10758_v56 = vpop.permute.xlu1 %2872 }
 0x8d1   :  { %14904 = vst [vmem:[#allocation40_spill] sm:$0xff] %v10758_v56  ;;  %v2976_v10 = vmul.f32 %v10665_v20, %v2945_v41 }
 0x8d3   :  { %2994 = vrot.lane.b32.xlu0 %v2976_v10, %s9132_s21 }
 0x8d4   :  { %v2949_v48 = vpop.permute.xlu0 %2948  ;;  %v2947_v37 = vpop.permute.xlu1 %2946 }
 0x8d5   :  { %v2960_v21 = vsel %vm530_vm1, %v2945_v41, %v2947_v37  ;;  %v2961_v62 = vsel %vm530_vm1, %v2947_v37, %v2949_v48 }
 0x8d6   :  { %v2977_v55 = vmul.f32 %v10671_v25, %v2960_v21  ;;  %v2978_v27 = vmul.f32 %v10681_v26, %v2961_v62 }
 0x8d8   :  { %v2953_v40 = vpop.permute.xlu0 %2952  ;;  %2998 = vrot.lane.b32.xlu0 %v2978_v27, %s9132_s21  ;;  %2996 = vrot.lane.b32.xlu1 %v2977_v55, %s9132_s21  ;;  %v2951_v56 = vpop.permute.xlu1 %2950  ;;  %v9008_v55 = vld [vmem:[%s14444_s13 + $0x84] ss:$8 sm:$0xf] }
 0x8d9   :  { %v2962_v32 = vsel %vm530_vm1, %v2949_v48, %v2951_v56  ;;  %v2963_v10 = vsel %vm530_vm1, %v2951_v56, %v2953_v40 }
 0x8da   :  { %v2979_v16 = vmul.f32 %v10687_v46, %v2962_v32  ;;  %v2980_v41 = vmul.f32 %v10703_v59, %v2963_v10  ;;  %v9009_v32 = vld [vmem:[%s14444_s13 + $0x84] ss:$8 sm:$0xf0] }
 0x8dc   :  { %v2957_v49 = vpop.permute.xlu0 %2956  ;;  %3002 = vrot.lane.b32.xlu0 %v2980_v41, %s9132_s21  ;;  %3000 = vrot.lane.b32.xlu1 %v2979_v16, %s9132_s21  ;;  %v2955_v62 = vpop.permute.xlu1 %2954 }
 0x8dd   :  { %v2964_v21 = vsel %vm530_vm1, %v2953_v40, %v2955_v62  ;;  %v2965_v27 = vsel %vm530_vm1, %v2955_v62, %v2957_v49  ;;  %v3048_v40 = vor.u32 %v9009_v32, %v9008_v55 }
 0x8de   :  { %v2981_v56 = vmul.f32 %v10709_v47, %v2964_v21  ;;  %v2982_v48 = vmul.f32 %v10719_v2, %v2965_v27 }
 0x8df   :  { %v3057_v62 = vrot.slane %v3048_v40, %v9233_v8  ;;  %v3053_v21 = vrot.slane %v3048_v40, %v9229_v6  ;;  %v3065_v27 = vrot.slane %v3048_v40, %v9231_v7  ;;  %v3061_v55 = vrot.slane %v3048_v40, %v9227_v5 }
 0x8e0   :  { %3006 = vrot.lane.b32.xlu0 %v2982_v48, %s9132_s21  ;;  %3004 = vrot.lane.b32.xlu1 %v2981_v56, %s9132_s21  ;;  %v2959_v16 = vpop.permute.xlu1 %2958  ;;  %v3069_v32 = vrot.slane %v3048_v40, %v9243_v14  ;;  %v3081_v56 = vrot.slane %v3048_v40, %v14884_v52  ;;  %v3077_v48 = vrot.slane %v3048_v40, %v9251_v18 }
 0x8e1   :  { %v2966_v37 = vsel %vm530_vm1, %v2957_v49, %v2959_v16  ;;  %v2984_v10 = vmul.f32 0.0, %v2959_v16  ;;  %v3073_v49 = vrot.slane %v3048_v40, %v9241_v13 }
 0x8e2   :  { %v2983_v41 = vmul.f32 %v10622_v58, %v2966_v37 }
 0x8e4   :  { %3010 = vrot.lane.b32.xlu0 %v2984_v10, %s9132_s21  ;;  %3008 = vrot.lane.b32.xlu1 %v2983_v41, %s9132_s21 }
 0x8e8   :  { %3084 = vrot.lane.b32.xlu0 %v3057_v62, %s14905_s24  ;;  %3082 = vrot.lane.b32.xlu1 %v3053_v21, %s14905_s24 }
 0x8ec   :  { %3088 = vrot.lane.b32.xlu0 %v3065_v27, %s14905_s24  ;;  %3086 = vrot.lane.b32.xlu1 %v3061_v55, %s14905_s24 }
 0x8f0   :  { %3092 = vrot.lane.b32.xlu0 %v3073_v49, %s14905_s24  ;;  %3090 = vrot.lane.b32.xlu1 %v3069_v32, %s14905_s24 }
 0x8f4   :  { %3096 = vrot.lane.b32.xlu0 %v3081_v56, %s14905_s24  ;;  %3094 = vrot.lane.b32.xlu1 %v3077_v48, %s14905_s24 }
 0x945   :  { %v10806_v16 = vpop.permute.xlu0 %2994 }
 0x94a   :  { %v10808_v37 = vpop.permute.xlu0 %2998  ;;  %v10810_v10 = vpop.permute.xlu1 %2996 }
 0x94e   :  { %v10812_v41 = vpop.permute.xlu0 %3002  ;;  %v10814_v62 = vpop.permute.xlu1 %3000 }
 0x94f   :  { %14906 = vst [vmem:[#allocation13_spill] sm:$0xff] %v10812_v41  ;;  %14907 = vst [vmem:[#allocation18_spill] sm:$0xff] %v10814_v62 }
 0x952   :  { %v10816_v21 = vpop.permute.xlu0 %3006  ;;  %v10818_v27 = vpop.permute.xlu1 %3004 }
 0x953   :  { %14908 = vst [vmem:[#allocation20_spill] sm:$0xff] %v10816_v21  ;;  %14909 = vst [vmem:[#allocation36_spill] sm:$0xff] %v10818_v27 }
 0x956   :  { %v10820_v55 = vpop.permute.xlu0 %3010  ;;  %v10822_v40 = vpop.permute.xlu1 %3008 }
 0x957   :  { %14910 = vst [vmem:[#allocation11_spill] sm:$0xff] %v10820_v55  ;;  %14911 = vst [vmem:[#allocation25_spill] sm:$0xff] %v10822_v40 }
 0x95a   :  { %v3085_v49 = vpop.permute.xlu0 %3084  ;;  %v3083_v32 = vpop.permute.xlu1 %3082 }
 0x95b   :  { %v3098_v56 = vsel %vm670_vm2, %v3083_v32, %v3085_v49  ;;  %v3114_v48 = vmul.f32 %v10665_v20, %v3083_v32 }
 0x95c   :  { %v3115_v23 = vmul.f32 %v10671_v25, %v3098_v56 }
 0x95d   :  { %3132 = vrot.lane.b32.xlu1 %v3114_v48, %s14912_s26 }
 0x95e   :  { %v3089_v9 = vpop.permute.xlu0 %3088  ;;  %3134 = vrot.lane.b32.xlu0 %v3115_v23, %s14912_s26  ;;  %v3087_v21 = vpop.permute.xlu1 %3086  ;;  %v9010_v23 = vld [vmem:[%s14444_s13 + $0x85] ss:$8 sm:$0xf] }
 0x95f   :  { %v3099_v27 = vsel %vm670_vm2, %v3085_v49, %v3087_v21  ;;  %v3100_v55 = vsel %vm670_vm2, %v3087_v21, %v3089_v9  ;;  %v9011_v21 = vld [vmem:[%s14444_s13 + $0x85] ss:$8 sm:$0xf0] }
 0x960   :  { %v3116_v40 = vmul.f32 %v10681_v26, %v3099_v27  ;;  %v3117_v33 = vmul.f32 %v10687_v46, %v3100_v55 }
 0x962   :  { %v3093_v28 = vpop.permute.xlu0 %3092  ;;  %3138 = vrot.lane.b32.xlu0 %v3117_v33, %s14912_s26  ;;  %3136 = vrot.lane.b32.xlu1 %v3116_v40, %s14912_s26  ;;  %v3091_v32 = vpop.permute.xlu1 %3090  ;;  %v3186_v40 = vor.u32 %v9011_v21, %v9010_v23 }
 0x963   :  { %v3101_v56 = vsel %vm670_vm2, %v3089_v9, %v3091_v32  ;;  %v3102_v48 = vsel %vm670_vm2, %v3091_v32, %v3093_v28 }
 0x964   :  { %v3118_v27 = vmul.f32 %v10703_v59, %v3101_v56  ;;  %v3119_v55 = vmul.f32 %v10709_v47, %v3102_v48  ;;  %v3191_v56 = vrot.slane %v3186_v40, %v9229_v6  ;;  %v3199_v48 = vrot.slane %v3186_v40, %v9227_v5 }
 0x965   :  { %v3207_v23 = vrot.slane %v3186_v40, %v9243_v14  ;;  %v3219_v21 = vrot.slane %v3186_v40, %v14884_v52 }
 0x966   :  { %v3097_v33 = vpop.permute.xlu0 %3096  ;;  %3142 = vrot.lane.b32.xlu0 %v3119_v55, %s14912_s26  ;;  %3140 = vrot.lane.b32.xlu1 %v3118_v27, %s14912_s26  ;;  %v3095_v9 = vpop.permute.xlu1 %3094 }
 0x967   :  { %v3103_v49 = vsel %vm670_vm2, %v3093_v28, %v3095_v9  ;;  %v3104_v32 = vsel %vm670_vm2, %v3095_v9, %v3097_v33  ;;  %v3122_v4 = vmul.f32 0.0, %v3097_v33  ;;  %v3195_v28 = vrot.slane %v3186_v40, %v9233_v8 }
 0x968   :  { %v3120_v44 = vmul.f32 %v10719_v2, %v3103_v49  ;;  %v3121_v30 = vmul.f32 %v10622_v58, %v3104_v32 }
 0x96a   :  { %3146 = vrot.lane.b32.xlu0 %v3121_v30, %s14912_s26  ;;  %3144 = vrot.lane.b32.xlu1 %v3120_v44, %s14912_s26  ;;  %v3203_v30 = vrot.slane %v3186_v40, %v9231_v7  ;;  %v3215_v44 = vrot.slane %v3186_v40, %v9251_v18 }
 0x96e   :  { %3220 = vrot.lane.b32.xlu0 %v3191_v56, %s14913_s20  ;;  %3148 = vrot.lane.b32.xlu1 %v3122_v4, %s14912_s26  ;;  %v3211_v4 = vrot.slane %v3186_v40, %v9241_v13 }
 0x972   :  { %3224 = vrot.lane.b32.xlu0 %v3199_v48, %s14913_s20  ;;  %3222 = vrot.lane.b32.xlu1 %v3195_v28, %s14913_s20 }
 0x976   :  { %3228 = vrot.lane.b32.xlu0 %v3207_v23, %s14913_s20  ;;  %3226 = vrot.lane.b32.xlu1 %v3203_v30, %s14913_s20 }
 0x97a   :  { %3232 = vrot.lane.b32.xlu0 %v3215_v44, %s14913_s20  ;;  %3230 = vrot.lane.b32.xlu1 %v3211_v4, %s14913_s20 }
 0x97e   :  { %3234 = vrot.lane.b32.xlu1 %v3219_v21, %s14913_s20 }
 0x9cf   :  { %v10870_v27 = vpop.permute.xlu1 %3132 }
 0x9d0   :  { %v10872_v55 = vpop.permute.xlu0 %3134 }
 0x9d4   :  { %v10874_v33 = vpop.permute.xlu0 %3138  ;;  %v10876_v9 = vpop.permute.xlu1 %3136 }
 0x9d5   :  { %14914 = vst [vmem:[#allocation22_spill] sm:$0xff] %v10874_v33 }
 0x9d8   :  { %v10878_v49 = vpop.permute.xlu0 %3142  ;;  %v10880_v32 = vpop.permute.xlu1 %3140 }
 0x9d9   :  { %14915 = vst [vmem:[#allocation9_spill] sm:$0xff] %v10878_v49  ;;  %14916 = vst [vmem:[#allocation114_spill] sm:$0xff] %v10880_v32 }
 0x9dc   :  { %v10882_v56 = vpop.permute.xlu0 %3146  ;;  %v10884_v48 = vpop.permute.xlu1 %3144 }
 0x9dd   :  { %14917 = vst [vmem:[#allocation115_spill] sm:$0xff] %v10882_v56  ;;  %14918 = vst [vmem:[#allocation116_spill] sm:$0xff] %v10884_v48 }
 0x9e0   :  { %v3221_v28 = vpop.permute.xlu0 %3220  ;;  %v10886_v40 = vpop.permute.xlu1 %3148 }
 0x9e1   :  { %14919 = vst [vmem:[#allocation117_spill] sm:$0xff] %v10886_v40  ;;  %v3252_v23 = vmul.f32 %v10665_v20, %v3221_v28 }
 0x9e3   :  { %3270 = vrot.lane.b32.xlu0 %v3252_v23, %s14920_s19 }
 0x9e4   :  { %v3225_v30 = vpop.permute.xlu0 %3224  ;;  %v3223_v44 = vpop.permute.xlu1 %3222 }
 0x9e5   :  { %v3236_v4 = vsel %vm810_vm3, %v3221_v28, %v3223_v44  ;;  %v3237_v21 = vsel %vm810_vm3, %v3223_v44, %v3225_v30 }
 0x9e6   :  { %v3253_v49 = vmul.f32 %v10671_v25, %v3236_v4  ;;  %v3254_v3 = vmul.f32 %v10681_v26, %v3237_v21 }
 0x9e8   :  { %v3229_v56 = vpop.permute.xlu0 %3228  ;;  %3274 = vrot.lane.b32.xlu0 %v3254_v3, %s14920_s19  ;;  %3272 = vrot.lane.b32.xlu1 %v3253_v49, %s14920_s19  ;;  %v3227_v40 = vpop.permute.xlu1 %3226  ;;  %v9012_v49 = vld [vmem:[%s14444_s13 + $0x86] ss:$8 sm:$0xf] }
 0x9e9   :  { %v3238_v48 = vsel %vm810_vm3, %v3225_v30, %v3227_v40  ;;  %v3239_v23 = vsel %vm810_vm3, %v3227_v40, %v3229_v56 }
 0x9ea   :  { %v3255_v50 = vmul.f32 %v10687_v46, %v3238_v48  ;;  %v3256_v28 = vmul.f32 %v10703_v59, %v3239_v23  ;;  %v9013_v48 = vld [vmem:[%s14444_s13 + $0x86] ss:$8 sm:$0xf0] }
 0x9ec   :  { %v3233_v54 = vpop.permute.xlu0 %3232  ;;  %3278 = vrot.lane.b32.xlu0 %v3256_v28, %s14920_s19  ;;  %3276 = vrot.lane.b32.xlu1 %v3255_v50, %s14920_s19  ;;  %v3231_v44 = vpop.permute.xlu1 %3230 }
 0x9ed   :  { %v3240_v4 = vsel %vm810_vm3, %v3229_v56, %v3231_v44  ;;  %v3241_v3 = vsel %vm810_vm3, %v3231_v44, %v3233_v54  ;;  %v3324_v56 = vor.u32 %v9013_v48, %v9012_v49 }
 0x9ee   :  { %v3257_v40 = vmul.f32 %v10709_v47, %v3240_v4  ;;  %v3258_v30 = vmul.f32 %v10719_v2, %v3241_v3 }
 0x9ef   :  { %v3333_v44 = vrot.slane %v3324_v56, %v9233_v8  ;;  %v3329_v4 = vrot.slane %v3324_v56, %v9229_v6  ;;  %v3341_v3 = vrot.slane %v3324_v56, %v9231_v7  ;;  %v3337_v49 = vrot.slane %v3324_v56, %v9227_v5 }
 0x9f0   :  { %3282 = vrot.lane.b32.xlu0 %v3258_v30, %s14920_s19  ;;  %3280 = vrot.lane.b32.xlu1 %v3257_v40, %s14920_s19  ;;  %v3235_v50 = vpop.permute.xlu1 %3234  ;;  %v3345_v48 = vrot.slane %v3324_v56, %v9243_v14  ;;  %v3357_v40 = vrot.slane %v3324_v56, %v14884_v52  ;;  %v3353_v30 = vrot.slane %v3324_v56, %v9251_v18 }
 0x9f1   :  { %v3242_v21 = vsel %vm810_vm3, %v3233_v54, %v3235_v50  ;;  %v3260_v23 = vmul.f32 0.0, %v3235_v50  ;;  %v3349_v54 = vrot.slane %v3324_v56, %v9241_v13 }
 0x9f2   :  { %v3259_v28 = vmul.f32 %v10622_v58, %v3242_v21 }
 0x9f4   :  { %3286 = vrot.lane.b32.xlu0 %v3260_v23, %s14920_s19  ;;  %3284 = vrot.lane.b32.xlu1 %v3259_v28, %s14920_s19 }
 0x9f8   :  { %3360 = vrot.lane.b32.xlu0 %v3333_v44, %s14921_s27  ;;  %3358 = vrot.lane.b32.xlu1 %v3329_v4, %s14921_s27 }
 0x9fc   :  { %3364 = vrot.lane.b32.xlu0 %v3341_v3, %s14921_s27  ;;  %3362 = vrot.lane.b32.xlu1 %v3337_v49, %s14921_s27 }
 0xa00   :  { %3368 = vrot.lane.b32.xlu0 %v3349_v54, %s14921_s27  ;;  %3366 = vrot.lane.b32.xlu1 %v3345_v48, %s14921_s27 }
 0xa04   :  { %3372 = vrot.lane.b32.xlu0 %v3357_v40, %s14921_s27  ;;  %3370 = vrot.lane.b32.xlu1 %v3353_v30, %s14921_s27 }
 0xa55   :  { %v10934_v50 = vpop.permute.xlu0 %3270 }
 0xa5a   :  { %v10936_v21 = vpop.permute.xlu0 %3274  ;;  %v10938_v23 = vpop.permute.xlu1 %3272 }
 0xa5e   :  { %v10940_v28 = vpop.permute.xlu0 %3278  ;;  %v10942_v44 = vpop.permute.xlu1 %3276 }
 0xa62   :  { %v10944_v4 = vpop.permute.xlu0 %3282  ;;  %v10946_v3 = vpop.permute.xlu1 %3280 }
 0xa63   :  { %14922 = vst [vmem:[#allocation118_spill] sm:$0xff] %v10944_v4  ;;  %14923 = vst [vmem:[#allocation119_spill] sm:$0xff] %v10946_v3 }
 0xa66   :  { %v10948_v49 = vpop.permute.xlu0 %3286  ;;  %v10950_v56 = vpop.permute.xlu1 %3284 }
 0xa67   :  { %14924 = vst [vmem:[#allocation120_spill] sm:$0xff] %v10948_v49  ;;  %14925 = vst [vmem:[#allocation121_spill] sm:$0xff] %v10950_v56 }
 0xa6a   :  { %v3361_v54 = vpop.permute.xlu0 %3360  ;;  %v3359_v48 = vpop.permute.xlu1 %3358 }
 0xa6b   :  { %v3374_v40 = vsel %vm950_vm4, %v3359_v48, %v3361_v54  ;;  %v3390_v30 = vmul.f32 %v10665_v20, %v3359_v48 }
 0xa6c   :  { %v3391_v29 = vmul.f32 %v10671_v25, %v3374_v40 }
 0xa6d   :  { %3408 = vrot.lane.b32.xlu1 %v3390_v30, %s14921_s27 }
 0xa6e   :  { %v3365_v19 = vpop.permute.xlu0 %3364  ;;  %3410 = vrot.lane.b32.xlu0 %v3391_v29, %s14921_s27  ;;  %v3363_v4 = vpop.permute.xlu1 %3362  ;;  %v9014_v29 = vld [vmem:[%s14444_s13 + $0x87] ss:$8 sm:$0xf] }
 0xa6f   :  { %v3375_v3 = vsel %vm950_vm4, %v3361_v54, %v3363_v4  ;;  %v3376_v49 = vsel %vm950_vm4, %v3363_v4, %v3365_v19  ;;  %v9015_v4 = vld [vmem:[%s14444_s13 + $0x87] ss:$8 sm:$0xf0] }
 0xa70   :  { %v3392_v56 = vmul.f32 %v10681_v26, %v3375_v3  ;;  %v3393_v63 = vmul.f32 %v10687_v46, %v3376_v49 }
 0xa72   :  { %v3369_v1 = vpop.permute.xlu0 %3368  ;;  %3414 = vrot.lane.b32.xlu0 %v3393_v63, %s14921_s27  ;;  %3412 = vrot.lane.b32.xlu1 %v3392_v56, %s14921_s27  ;;  %v3367_v48 = vpop.permute.xlu1 %3366  ;;  %v3462_v56 = vor.u32 %v9015_v4, %v9014_v29 }
 0xa73   :  { %v3377_v40 = vsel %vm950_vm4, %v3365_v19, %v3367_v48  ;;  %v3378_v30 = vsel %vm950_vm4, %v3367_v48, %v3369_v1 }
 0xa74   :  { %v3394_v3 = vmul.f32 %v10703_v59, %v3377_v40  ;;  %v3395_v49 = vmul.f32 %v10709_v47, %v3378_v30  ;;  %v3467_v40 = vrot.slane %v3462_v56, %v9229_v6  ;;  %v3475_v30 = vrot.slane %v3462_v56, %v9227_v5 }
 0xa75   :  { %v3483_v29 = vrot.slane %v3462_v56, %v9243_v14  ;;  %v3495_v4 = vrot.slane %v3462_v56, %v14884_v52 }
 0xa76   :  { %v3373_v63 = vpop.permute.xlu0 %3372  ;;  %3418 = vrot.lane.b32.xlu0 %v3395_v49, %s14921_s27  ;;  %3416 = vrot.lane.b32.xlu1 %v3394_v3, %s14921_s27  ;;  %v3371_v19 = vpop.permute.xlu1 %3370 }
 0xa77   :  { %v3379_v54 = vsel %vm950_vm4, %v3369_v1, %v3371_v19  ;;  %v3380_v48 = vsel %vm950_vm4, %v3371_v19, %v3373_v63  ;;  %v3398_v31 = vmul.f32 0.0, %v3373_v63  ;;  %v3471_v1 = vrot.slane %v3462_v56, %v9233_v8 }
 0xa78   :  { %v3396_v51 = vmul.f32 %v10719_v2, %v3379_v54  ;;  %v3397_v39 = vmul.f32 %v10622_v58, %v3380_v48 }
 0xa7a   :  { %3422 = vrot.lane.b32.xlu0 %v3397_v39, %s14921_s27  ;;  %3420 = vrot.lane.b32.xlu1 %v3396_v51, %s14921_s27  ;;  %v3479_v39 = vrot.slane %v3462_v56, %v9231_v7  ;;  %v3491_v51 = vrot.slane %v3462_v56, %v9251_v18 }
 0xa7e   :  { %3496 = vrot.lane.b32.xlu0 %v3467_v40, %s14920_s19  ;;  %3424 = vrot.lane.b32.xlu1 %v3398_v31, %s14921_s27  ;;  %v3487_v31 = vrot.slane %v3462_v56, %v9241_v13 }
 0xa82   :  { %3500 = vrot.lane.b32.xlu0 %v3475_v30, %s14920_s19  ;;  %3498 = vrot.lane.b32.xlu1 %v3471_v1, %s14920_s19 }
 0xa86   :  { %3504 = vrot.lane.b32.xlu0 %v3483_v29, %s14920_s19  ;;  %3502 = vrot.lane.b32.xlu1 %v3479_v39, %s14920_s19 }
 0xa8a   :  { %3508 = vrot.lane.b32.xlu0 %v3491_v51, %s14920_s19  ;;  %3506 = vrot.lane.b32.xlu1 %v3487_v31, %s14920_s19 }
 0xa8e   :  { %3510 = vrot.lane.b32.xlu1 %v3495_v4, %s14920_s19 }
 0xadf   :  { %v10998_v3 = vpop.permute.xlu1 %3408 }
 0xae0   :  { %v11000_v49 = vpop.permute.xlu0 %3410 }
 0xae4   :  { %v11002_v63 = vpop.permute.xlu0 %3414  ;;  %v11004_v19 = vpop.permute.xlu1 %3412 }
 0xae8   :  { %v11006_v54 = vpop.permute.xlu0 %3418  ;;  %v11008_v48 = vpop.permute.xlu1 %3416 }
 0xae9   :  { %14926 = vst [vmem:[#allocation122_spill] sm:$0xff] %v11006_v54 }
 0xaec   :  { %v11010_v40 = vpop.permute.xlu0 %3422  ;;  %v11012_v30 = vpop.permute.xlu1 %3420 }
 0xaed   :  { %14927 = vst [vmem:[#allocation123_spill] sm:$0xff] %v11010_v40  ;;  %14928 = vst [vmem:[#allocation124_spill] sm:$0xff] %v11012_v30 }
 0xaf0   :  { %v3497_v1 = vpop.permute.xlu0 %3496  ;;  %v11014_v56 = vpop.permute.xlu1 %3424 }
 0xaf1   :  { %14929 = vst [vmem:[#allocation125_spill] sm:$0xff] %v11014_v56  ;;  %v3528_v29 = vmul.f32 %v10665_v20, %v3497_v1 }
 0xaf3   :  { %3546 = vrot.lane.b32.xlu0 %v3528_v29, %s14913_s20 }
 0xaf4   :  { %v3501_v39 = vpop.permute.xlu0 %3500  ;;  %v3499_v51 = vpop.permute.xlu1 %3498 }
 0xaf5   :  { %v3512_v31 = vsel %vm863_vm5, %v3497_v1, %v3499_v51  ;;  %v3513_v4 = vsel %vm863_vm5, %v3499_v51, %v3501_v39 }
 0xaf6   :  { %v3529_v54 = vmul.f32 %v10671_v25, %v3512_v31  ;;  %v3530_v42 = vmul.f32 %v10681_v26, %v3513_v4  ;;  %v9020_v4 = vld [vmem:[%s14444_s13 + $0xc2] ss:$8 sm:$0xf] }
 0xaf8   :  { %v3505_v40 = vpop.permute.xlu0 %3504  ;;  %3550 = vrot.lane.b32.xlu0 %v3530_v42, %s14913_s20  ;;  %3548 = vrot.lane.b32.xlu1 %v3529_v54, %s14913_s20  ;;  %v3503_v56 = vpop.permute.xlu1 %3502  ;;  %v9016_v54 = vld [vmem:[%s14444_s13 + $0xc0] ss:$8 sm:$0xf] }
 0xaf9   :  { %v3514_v30 = vsel %vm863_vm5, %v3501_v39, %v3503_v56  ;;  %v3515_v29 = vsel %vm863_vm5, %v3503_v56, %v3505_v40 }
 0xafa   :  { %v3531_v11 = vmul.f32 %v10687_v46, %v3514_v30  ;;  %v3532_v1 = vmul.f32 %v10703_v59, %v3515_v29  ;;  %v9017_v30 = vld [vmem:[%s14444_s13 + $0xc0] ss:$8 sm:$0xf0] }
 0xafc   :  { %v3509_v36 = vpop.permute.xlu0 %3508  ;;  %3554 = vrot.lane.b32.xlu0 %v3532_v1, %s14913_s20  ;;  %3552 = vrot.lane.b32.xlu1 %v3531_v11, %s14913_s20  ;;  %v3507_v51 = vpop.permute.xlu1 %3506 }
 0xafd   :  { %v3516_v31 = vsel %vm863_vm5, %v3505_v40, %v3507_v51  ;;  %v3517_v42 = vsel %vm863_vm5, %v3507_v51, %v3509_v36  ;;  %v3600_v40 = vor.u32 %v9017_v30, %v9016_v54  ;;  %v9021_v51 = vld [vmem:[%s14444_s13 + $0xc2] ss:$8 sm:$0xf0] }
 0xafe   :  { %v3533_v56 = vmul.f32 %v10709_v47, %v3516_v31  ;;  %v3534_v39 = vmul.f32 %v10719_v2, %v3517_v42  ;;  %v11054_v30 = vor.u32 %v9021_v51, %v9020_v4 }
 0xaff   :  { %v3609_v42 = vrot.slane %v3600_v40, %v9233_v8  ;;  %v3605_v54 = vrot.slane %v3600_v40, %v9229_v6 }
 0xb00   :  { %3558 = vrot.lane.b32.xlu0 %v3534_v39, %s14913_s20  ;;  %3556 = vrot.lane.b32.xlu1 %v3533_v56, %s14913_s20  ;;  %v3511_v11 = vpop.permute.xlu1 %3510  ;;  %v3613_v56 = vrot.slane %v3600_v40, %v9227_v5  ;;  %v9018_v39 = vld [vmem:[%s14444_s13 + $0xc1] ss:$8 sm:$0xf]  ;;  %v3889_v4 = vrot.slane %v11054_v30, %v9227_v5 }
 0xb01   :  { %v3518_v29 = vsel %vm863_vm5, %v3509_v36, %v3511_v11  ;;  %v3536_v1 = vmul.f32 0.0, %v3511_v11  ;;  %v3881_v36 = vrot.slane %v11054_v30, %v9229_v6  ;;  %v9019_v11 = vld [vmem:[%s14444_s13 + $0xc1] ss:$8 sm:$0xf0] }
 0xb02   :  { %v3535_v31 = vmul.f32 %v10622_v58, %v3518_v29  ;;  %v3885_v29 = vrot.slane %v11054_v30, %v9233_v8 }
 0xb04   :  { %3562 = vrot.lane.b32.xlu0 %v3536_v1, %s14913_s20  ;;  %3560 = vrot.lane.b32.xlu1 %v3535_v31, %s14913_s20  ;;  %v11073_v1 = vor.u32 %v9019_v11, %v9018_v39  ;;  %v3617_v39 = vrot.slane %v3600_v40, %v9231_v7 }
 0xb06   :  { %v3747_v51 = vrot.slane %v11073_v1, %v9233_v8  ;;  %v3743_v31 = vrot.slane %v11073_v1, %v9229_v6  ;;  %v3759_v11 = vrot.slane %v11073_v1, %v9243_v14 }
 0xb08   :  { %3636 = vrot.lane.b32.xlu0 %v3609_v42, %s14912_s26  ;;  %3634 = vrot.lane.b32.xlu1 %v3605_v54, %s14912_s26  ;;  %v3893_v42 = vrot.slane %v11054_v30, %v9231_v7  ;;  %v3751_v54 = vrot.slane %v11073_v1, %v9227_v5 }
 0xb0c   :  { %3910 = vrot.lane.b32.xlu0 %v3881_v36, %s9131_s18  ;;  %3638 = vrot.lane.b32.xlu1 %v3613_v56, %s14912_s26  ;;  %v3755_v36 = vrot.slane %v11073_v1, %v9231_v7  ;;  %v3897_v56 = vrot.slane %v11054_v30, %v9243_v14 }
 0xb10   :  { %3914 = vrot.lane.b32.xlu0 %v3889_v4, %s9131_s18  ;;  %3912 = vrot.lane.b32.xlu1 %v3885_v29, %s9131_s18  ;;  %v3625_v4 = vrot.slane %v3600_v40, %v9241_v13  ;;  %v3621_v29 = vrot.slane %v3600_v40, %v9243_v14 }
 0xb14   :  { %3774 = vrot.lane.b32.xlu0 %v3747_v51, %s9132_s21  ;;  %3772 = vrot.lane.b32.xlu1 %v3743_v31, %s9132_s21  ;;  %v3633_v51 = vrot.slane %v3600_v40, %v14884_v52  ;;  %v3629_v31 = vrot.slane %v3600_v40, %v9251_v18 }
 0xb18   :  { %3916 = vrot.lane.b32.xlu0 %v3893_v42, %s9131_s18  ;;  %3776 = vrot.lane.b32.xlu1 %v3751_v54, %s9132_s21 }
 0xb1c   :  { %3778 = vrot.lane.b32.xlu0 %v3755_v36, %s9132_s21  ;;  %3918 = vrot.lane.b32.xlu1 %v3897_v56, %s9131_s18 }
 0xb20   :  { %3640 = vrot.lane.b32.xlu0 %v3617_v39, %s14912_s26  ;;  %3780 = vrot.lane.b32.xlu1 %v3759_v11, %s9132_s21 }
 0xb24   :  { %3644 = vrot.lane.b32.xlu0 %v3625_v4, %s14912_s26  ;;  %3642 = vrot.lane.b32.xlu1 %v3621_v29, %s14912_s26 }
 0xb28   :  { %3648 = vrot.lane.b32.xlu0 %v3633_v51, %s14912_s26  ;;  %3646 = vrot.lane.b32.xlu1 %v3629_v31, %s14912_s26 }
 0xb65   :  { %v11108_v42 = vpop.permute.xlu0 %3546 }
 0xb6a   :  { %v11110_v54 = vpop.permute.xlu0 %3550  ;;  %v11112_v36 = vpop.permute.xlu1 %3548 }
 0xb6e   :  { %v11114_v56 = vpop.permute.xlu0 %3554  ;;  %v11116_v39 = vpop.permute.xlu1 %3552 }
 0xb72   :  { %v11118_v11 = vpop.permute.xlu0 %3558  ;;  %v11120_v4 = vpop.permute.xlu1 %3556 }
 0xb73   :  { %14930 = vst [vmem:[#allocation126_spill] sm:$0xff] %v11118_v11  ;;  %14931 = vst [vmem:[#allocation127_spill] sm:$0xff] %v11120_v4 }
 0xb76   :  { %v11122_v29 = vpop.permute.xlu0 %3562  ;;  %v11124_v40 = vpop.permute.xlu1 %3560 }
 0xb77   :  { %14932 = vst [vmem:[#allocation128_spill] sm:$0xff] %v11122_v29  ;;  %14933 = vst [vmem:[#allocation129_spill] sm:$0xff] %v11124_v40 }
 0xb7a   :  { %v3637_v51 = vpop.permute.xlu0 %3636  ;;  %v3635_v31 = vpop.permute.xlu1 %3634 }
 0xb7b   :  { %v3650_v5 = vsel %vm14613_vm6, %v3635_v31, %v3637_v51  ;;  %v3666_v6 = vmul.f32 %v10665_v20, %v3635_v31 }
 0xb7c   :  { %v3667_v7 = vmul.f32 %v10671_v25, %v3650_v5 }
 0xb7d   :  { %3684 = vrot.lane.b32.xlu1 %v3666_v6, %s14905_s24 }
 0xb7e   :  { %v3911_v8 = vpop.permute.xlu0 %3910  ;;  %3686 = vrot.lane.b32.xlu0 %v3667_v7, %s14905_s24  ;;  %v3639_v11 = vpop.permute.xlu1 %3638 }
 0xb7f   :  { %v3651_v4 = vsel %vm14613_vm6, %v3637_v51, %v3639_v11 }
 0xb80   :  { %v3668_v29 = vmul.f32 %v10681_v26, %v3651_v4 }
 0xb82   :  { %v3915_v15 = vpop.permute.xlu0 %3914  ;;  %3688 = vrot.lane.b32.xlu1 %v3668_v29, %s14905_s24  ;;  %v3913_v40 = vpop.permute.xlu1 %3912 }
 0xb86   :  { %v3775_v0 = vpop.permute.xlu0 %3774  ;;  %v3773_v17 = vpop.permute.xlu1 %3772 }
 0xb8a   :  { %v3917_v62 = vpop.permute.xlu0 %3916  ;;  %v3777_v31 = vpop.permute.xlu1 %3776 }
 0xb8e   :  { %v3779_v41 = vpop.permute.xlu0 %3778  ;;  %v11134_v5 = vpop.permute.xlu1 %3918 }
 0xb92   :  { %v3641_v6 = vpop.permute.xlu0 %3640  ;;  %v11136_v43 = vpop.permute.xlu1 %3780 }
 0xb93   :  { %v3652_v7 = vsel %vm14613_vm6, %v3639_v11, %v3641_v6 }
 0xb94   :  { %v3669_v51 = vmul.f32 %v10687_v46, %v3652_v7 }
 0xb96   :  { %v3645_v57 = vpop.permute.xlu0 %3644  ;;  %3690 = vrot.lane.b32.xlu0 %v3669_v51, %s14905_s24  ;;  %v3643_v4 = vpop.permute.xlu1 %3642 }
 0xb97   :  { %v3653_v29 = vsel %vm14613_vm6, %v3641_v6, %v3643_v4  ;;  %v3654_v14 = vsel %vm14613_vm6, %v3643_v4, %v3645_v57  ;;  %v3942_v4 = vmul.f32 %v10665_v20, %v3911_v8 }
 0xb98   :  { %v3670_v33 = vmul.f32 %v10703_v59, %v3653_v29  ;;  %v3671_v32 = vmul.f32 %v10709_v47, %v3654_v14  ;;  %v3763_v14 = vrot.slane %v11073_v1, %v9241_v13 }
 0xb9a   :  { %v3649_v24 = vpop.permute.xlu0 %3648  ;;  %3694 = vrot.lane.b32.xlu0 %v3671_v32, %s14905_s24  ;;  %3692 = vrot.lane.b32.xlu1 %v3670_v33, %s14905_s24  ;;  %v3647_v11 = vpop.permute.xlu1 %3646  ;;  %v3767_v33 = vrot.slane %v11073_v1, %v9251_v18 }
 0xb9b   :  { %v3655_v7 = vsel %vm14613_vm6, %v3645_v57, %v3647_v11  ;;  %v3656_v53 = vsel %vm14613_vm6, %v3647_v11, %v3649_v24  ;;  %v3674_v38 = vmul.f32 0.0, %v3649_v24  ;;  %v3771_v57 = vrot.slane %v11073_v1, %v14884_v52 }
 0xb9c   :  { %v3672_v51 = vmul.f32 %v10719_v2, %v3655_v7  ;;  %v3673_v6 = vmul.f32 %v10622_v58, %v3656_v53  ;;  %v3905_v53 = vrot.slane %v11054_v30, %v9251_v18  ;;  %v3901_v24 = vrot.slane %v11054_v30, %v9241_v13 }
 0xb9d   :  { %v3926_v58 = vsel %vm443_vm8, %v3911_v8, %v3913_v40  ;;  %v3927_v1 = vsel %vm443_vm8, %v3913_v40, %v3915_v15  ;;  %v3788_v11 = vsel %vm14614_vm7, %v3773_v17, %v3775_v0  ;;  %v3789_v7 = vsel %vm14614_vm7, %v3775_v0, %v3777_v31 }
 0xb9e   :  { %3698 = vrot.lane.b32.xlu0 %v3673_v6, %s14905_s24  ;;  %3696 = vrot.lane.b32.xlu1 %v3672_v51, %s14905_s24  ;;  %v3943_v32 = vmul.f32 %v10671_v25, %v3926_v58  ;;  %v3944_v29 = vmul.f32 %v10681_v26, %v3927_v1  ;;  %v3806_v40 = vmul.f32 %v10681_v26, %v3789_v7 }
 0xb9f   :  { %v3928_v51 = vsel %vm443_vm8, %v3915_v15, %v3917_v62  ;;  %v3804_v8 = vmul.f32 %v10665_v20, %v3773_v17  ;;  %v3790_v0 = vsel %vm14614_vm7, %v3777_v31, %v3779_v41  ;;  %v3791_v15 = vsel %vm14614_vm7, %v3779_v41, %v11136_v43  ;;  %v11204_v20 = vld [vmem:[%s14446_s1 + $0x8] sm:$0xff] }
 0xba0   :  { %v3945_v6 = vmul.f32 %v10687_v46, %v3928_v51  ;;  %v3808_v17 = vmul.f32 %v10703_v59, %v3791_v15  ;;  %4330 = vmatprep.mubr.f32.mxu0 %v11204_v20  ;;  %4401 = vmatprep.mubr.f32.mxu1 %v11204_v20 }
 0xba2   :  { %3782 = vrot.lane.b32.xlu0 %v3763_v14, %s9132_s21  ;;  %3700 = vrot.lane.b32.xlu1 %v3674_v38, %s14905_s24  ;;  %v3909_v38 = vrot.slane %v11054_v30, %v14884_v52  ;;  %v3805_v30 = vmul.f32 %v10671_v25, %v3788_v11  ;;  %v3929_v14 = vsel %vm443_vm8, %v3917_v62, %v11134_v5 }
 0xba3   :  { %v3807_v25 = vmul.f32 %v10687_v46, %v3790_v0  ;;  %v3946_v26 = vmul.f32 %v10703_v59, %v3929_v14 }
 0xba6   :  { %3786 = vrot.lane.b32.xlu0 %v3771_v57, %s9132_s21  ;;  %3784 = vrot.lane.b32.xlu1 %v3767_v33, %s9132_s21 }
 0xbaa   :  { %3922 = vrot.lane.b32.xlu0 %v3905_v53, %s9131_s18  ;;  %3920 = vrot.lane.b32.xlu1 %v3901_v24, %s9131_s18 }
 0xbae   :  { %3962 = vrot.lane.b32.xlu0 %v3943_v32, %s9127_s17  ;;  %3924 = vrot.lane.b32.xlu1 %v3909_v38, %s9131_s18 }
 0xbb2   :  { %3960 = vrot.lane.b32.xlu0 %v3942_v4, %s9127_s17  ;;  %3964 = vrot.lane.b32.xlu1 %v3944_v29, %s9127_s17 }
 0xbb6   :  { %3826 = vrot.lane.b32.xlu0 %v3806_v40, %s9128_s22  ;;  %3824 = vrot.lane.b32.xlu1 %v3805_v30, %s9128_s22  ;;  %v11233_v30 = vld [vmem:[%s14445_s0 + $0x38] sm:$0xff] }
 0xbba   :  { %3966 = vrot.lane.b32.xlu0 %v3945_v6, %s9127_s17  ;;  %3822 = vrot.lane.b32.xlu1 %v3804_v8, %s9128_s22 }
 0xbbe   :  { %3828 = vrot.lane.b32.xlu0 %v3807_v25, %s9128_s22  ;;  %3968 = vrot.lane.b32.xlu1 %v3946_v26, %s9127_s17 }
 0xbc2   :  { %3830 = vrot.lane.b32.xlu1 %v3808_v17, %s9128_s22 }
 0xbef   :  { %v3685_v46 = vpop.permute.xlu1 %3684 }
 0xbf0   :  { %v3687_v62 = vpop.permute.xlu0 %3686 }
 0xbf4   :  { %v11209_v41 = vpop.permute.xlu1 %3688 }
 0xc08   :  { %v11211_v31 = vpop.permute.xlu0 %3690 }
 0xc0c   :  { %v11213_v57 = vpop.permute.xlu0 %3694  ;;  %v11215_v59 = vpop.permute.xlu1 %3692 }
 0xc10   :  { %v11217_v33 = vpop.permute.xlu0 %3698  ;;  %v11219_v53 = vpop.permute.xlu1 %3696 }
 0xc14   :  { %v3783_v24 = vpop.permute.xlu0 %3782  ;;  %v11221_v58 = vpop.permute.xlu1 %3700 }
 0xc15   :  { %v3792_v38 = vsel %vm14614_vm7, %v11136_v43, %v3783_v24 }
 0xc16   :  { %v3809_v32 = vmul.f32 %v10709_v47, %v3792_v38 }
 0xc18   :  { %3832 = vrot.lane.b32.xlu0 %v3809_v32, %s9128_s22  ;;  %v3787_v1 = vpop.permute.xlu0 %3786  ;;  %v3785_v4 = vpop.permute.xlu1 %3784 }
 0xc19   :  { %v3793_v29 = vsel %vm14614_vm7, %v3783_v24, %v3785_v4  ;;  %v3794_v11 = vsel %vm14614_vm7, %v3785_v4, %v3787_v1  ;;  %v3812_v43 = vmul.f32 0.0, %v3787_v1 }
 0xc1a   :  { %v3810_v7 = vmul.f32 %v10719_v2, %v3793_v29  ;;  %v3811_v40 = vmul.f32 %v11233_v30, %v3794_v11 }
 0xc1c   :  { %v3923_v51 = vpop.permute.xlu0 %3922  ;;  %3836 = vrot.lane.b32.xlu0 %v3811_v40, %s9128_s22  ;;  %3834 = vrot.lane.b32.xlu1 %v3810_v7, %s9128_s22  ;;  %v3921_v8 = vpop.permute.xlu1 %3920 }
 0xc1d   :  { %v3930_v6 = vsel %vm443_vm8, %v11134_v5, %v3921_v8  ;;  %v3931_v0 = vsel %vm443_vm8, %v3921_v8, %v3923_v51 }
 0xc1e   :  { %v3947_v14 = vmul.f32 %v10709_v47, %v3930_v6  ;;  %v3948_v25 = vmul.f32 %v10719_v2, %v3931_v0  ;;  %v3565_v6 = vsel %vm810_vm3, %v11112_v36, %v11110_v54  ;;  %v3564_v0 = vsel %vm810_vm3, %v11108_v42, %v11112_v36  ;;  %v4260_v42 = vld [vmem:[%s14447_s2] sm:$0xff] }
 0xc20   :  { %v3963_v26 = vpop.permute.xlu0 %3962  ;;  %3838 = vrot.lane.b32.xlu1 %v3812_v43, %s9128_s22  ;;  %3970 = vrot.lane.b32.xlu0 %v3947_v14, %s9127_s17  ;;  %v3925_v15 = vpop.permute.xlu1 %3924  ;;  %v3703_v43 = vsel %vm670_vm2, %v3687_v62, %v11209_v41 }
 0xc21   :  { %v3932_v17 = vsel %vm443_vm8, %v3923_v51, %v3925_v15  ;;  %v3950_v38 = vmul.f32 0.0, %v3925_v15  ;;  %v3702_v51 = vsel %vm670_vm2, %v3685_v46, %v3687_v62  ;;  %v3427_v46 = vsel %vm950_vm4, %v11000_v49, %v11004_v19 }
 0xc22   :  { %v3949_v24 = vmul.f32 %v11233_v30, %v3932_v17  ;;  %v3289_v15 = vsel %vm863_vm5, %v10938_v23, %v10936_v21  ;;  %v14617_v17 = vmov 0  }
 0xc23   :  { %9093 = vset.pattern.permute.xlu0 %v14617_v17  ;;  %9094 = vset.pattern.permute.xlu1 %v14617_v17 }
 0xc24   :  { %v3961_v32 = vpop.permute.xlu0 %3960  ;;  %3972 = vrot.lane.b32.xlu1 %v3948_v25, %s9127_s17  ;;  %3974 = vrot.lane.b32.xlu0 %v3949_v24, %s9127_s17  ;;  %v3965_v5 = vpop.permute.xlu1 %3964  ;;  %v3288_v24 = vsel %vm863_vm5, %v10934_v50, %v10938_v23  ;;  %v3705_v50 = vsel %vm670_vm2, %v11211_v31, %v11215_v59  ;;  %v3013_v23 = vsel %vm14614_vm7, %v10810_v10, %v10808_v37 }
 0xc25   :  { %v3979_v47 = vsel %vm390_vm0, %v3963_v26, %v3965_v5  ;;  %v3978_v2 = vsel %vm390_vm0, %v3961_v32, %v3963_v26  ;;  %v3426_v26 = vsel %vm950_vm4, %v10998_v3, %v11000_v49  ;;  %v3151_v49 = vsel %vm14613_vm6, %v10872_v55, %v10876_v9 }
 0xc26   :  { %4308 = vmatprep.subr.mxu0 %v3979_v47  ;;  %v3150_v32 = vsel %vm14613_vm6, %v10870_v27, %v10872_v55  ;;  %v3012_v27 = vsel %vm14614_vm7, %v10806_v16, %v10810_v10  ;;  %v3567_v55 = vsel %vm810_vm3, %v11116_v39, %v11114_v56  ;;  %v2875_v47 = vsel %vm443_vm8, %v10744_v60, %v10748_v61 }
 0xc27   :  { %4309 = vmatpush2.msra.mxu0 %v3978_v2  ;;  %v2874_v16 = vsel %vm443_vm8, %v10742_v45, %v10744_v60  ;;  %v3429_v10 = vsel %vm950_vm4, %v11002_v63, %v11008_v48  ;;  %v2736_v45 = vsel %vm1641_vm9, %v10643_v22, %v10647_v35  ;;  %v3291_v60 = vsel %vm863_vm5, %v10942_v44, %v10940_v28  ;;  %v14936_v22 = vld [vmem:[#allocation65_spill] sm:$0xff] }
 0xc28   :  { %v3827_v1 = vpop.permute.xlu0 %3826  ;;  %3976 = vrot.lane.b32.xlu1 %v3950_v38, %s9127_s17  ;;  %v3825_v4 = vpop.permute.xlu1 %3824  ;;  %4263 = vperm.xlu0 %9093, %v4260_v42  }
 0xc29   :  { %v3841_v29 = vsel %vm530_vm1, %v3825_v4, %v3827_v1 }
 0xc2a   :  { %4310 = vmatprep.subr.mxu0 %v3841_v29  ;;  %v14938_v29 = vld [vmem:[#allocation22_spill] sm:$0xff] }
 0xc2c   :  { %v3823_v11 = vpop.permute.xlu1 %3822  ;;  %v3967_v7 = vpop.permute.xlu0 %3966 }
 0xc2d   :  { %v3840_v40 = vsel %vm530_vm1, %v3823_v11, %v3825_v4  ;;  %v3980_v62 = vsel %vm390_vm0, %v3965_v5, %v3967_v7  ;;  %v3704_v5 = vsel %vm670_vm2, %v11209_v41, %v11211_v31  ;;  %v3566_v41 = vsel %vm810_vm3, %v11110_v54, %v11116_v39  ;;  %v14934_v39 = vld [vmem:[#allocation59_spill] sm:$0xff]  ;;  %v14937_v4 = vld [vmem:[#allocation114_spill] sm:$0xff] }
 0xc2e   :  { %4311 = vmatpush2.msra.mxu0 %v3840_v40  ;;  %v2737_v31 = vsel %vm1641_vm9, %v10647_v35, %v10645_v34  ;;  %v3428_v54 = vsel %vm950_vm4, %v11004_v19, %v11002_v63  ;;  %v2599_v2 = vsel %vm1781_vm10, %v14934_v39, %v10580_v12  ;;  %v3290_v63 = vsel %vm863_vm5, %v10936_v21, %v10942_v44  ;;  %v14935_v19 = vld [vmem:[#allocation108_spill] sm:$0xff] }
 0xc2f   :  { %4312 = vmatprep.subr.mxu0 %v3703_v43  ;;  %v2598_v35 = vsel %vm1781_vm10, %v14936_v22, %v14934_v39  ;;  %v3153_v11 = vsel %vm14613_vm6, %v14938_v29, %v14937_v4  ;;  %v14939_v40 = vld [vmem:[#allocation8_spill] sm:$0xff]  ;;  %v3152_v44 = vsel %vm14613_vm6, %v10876_v9, %v14938_v29  ;;  %v14940_v43 = vld [vmem:[#allocation110_spill] sm:$0xff]  ;;  %vm14947_vm6 = vcmask 1039360  }
 0xc30   :  { %4313 = vmatpush2.msra.mxu0 %v3702_v51  ;;  %v11257_v8 = vpop.permute.xlu1 %3968  ;;  %v3829_v25 = vpop.permute.xlu0 %3828  ;;  %v2171_v21 = vrot.slane %v14935_v19, %v14939_v40  ;;  %v14941_v51 = vld [vmem:[#allocation111_spill] sm:$0xff]  ;;  %v2183_v39 = vrot.slane %v14935_v19, %v14884_v52  ;;  %v14959_v22 = vld [vmem:[#allocation96_spill] sm:$0xff] }
 0xc31   :  { %4314 = vmatprep.subr.mxu0 %v3565_v6  ;;  %v3981_v14 = vsel %vm390_vm0, %v3967_v7, %v11257_v8  ;;  %v3842_v38 = vsel %vm530_vm1, %v3827_v1, %v3829_v25  ;;  %v2175_v1 = vrot.slane %v14935_v19, %v9241_v13  ;;  %v11351_v7 = vld [vmem:[%s14446_s1] sm:$0xff]  ;;  %v2465_v6 = vsel %vm1921_vm11, %v14941_v51, %v14940_v43  ;;  %s15188_s1 = smov 8  }
 0xc32   :  { %4315 = vmatpush2.msra.mxu0 %v3564_v0  ;;  %4379 = vmatprep.subr.mxu1 %v3981_v14  ;;  %v14942_v0 = vld [vmem:[#allocation13_spill] sm:$0xff]  ;;  %v14943_v14 = vld [vmem:[#allocation18_spill] sm:$0xff] }
 0xc33   :  { %4316 = vmatprep.subr.mxu0 %v3427_v46  ;;  %4380 = vmatpush2.msra.mxu1 %v3980_v62  ;;  %v3015_v46 = vsel %vm14614_vm7, %v14943_v14, %v14942_v0  ;;  %v14944_v62 = vld [vmem:[#allocation109_spill] sm:$0xff]  ;;  %v3014_v9 = vsel %vm14614_vm7, %v10808_v37, %v14943_v14  ;;  %vm14951_vm7 = vmmov %vm14947_vm6 }
 0xc34   :  { %4317 = vmatpush2.msra.mxu0 %v3426_v26  ;;  %v11277_v36 = vpop.permute.xlu1 %3830  ;;  %v9124_v26 = vld [vmem:[%s14445_s0 + $0x28] sm:$0xff] }
 0xc35   :  { %4318 = vmatprep.subr.mxu0 %v3289_v15  ;;  %v3843_v3 = vsel %vm530_vm1, %v3829_v25, %v11277_v36  ;;  %v2464_v25 = vsel %vm1921_vm11, %v14944_v62, %v14941_v51  ;;  %v2197_v42 = vmul.f32 %v9124_v26, %v2175_v1  ;;  %v14945_v15 = vld [vmem:[#allocation106_spill] sm:$0xff]  ;;  %v2179_v1 = vrot.slane %v14935_v19, %v9251_v18  ;;  %v14967_v26 = vld [vmem:[#allocation107_spill] sm:$0xff] }
 0xc36   :  { %4319 = vmatpush2.msra.mxu0 %v3288_v24  ;;  %4381 = vmatprep.subr.mxu1 %v3843_v3  ;;  %v14946_v24 = vld [vmem:[#allocation103_spill] sm:$0xff]  ;;  %v14963_v51 = vld [vmem:[#allocation94_spill] sm:$0xff]  ;;  %v2199_v62 = vmul.f32 %v11233_v30, %v2183_v39 }
 0xc37   :  { %4320 = vmatprep.subr.mxu0 %v3151_v49  ;;  %4382 = vmatpush2.msra.mxu1 %v3842_v38  ;;  %v2327_v3 = vsel %vm14947_vm6, %v14946_v24, %v14945_v15  ;;  %v14948_v49 = vld [vmem:[#allocation28_spill] sm:$0xff]  ;;  %v14949_v38 = vld [vmem:[#allocation34_spill] sm:$0xff] }
 0xc38   :  { %4321 = vmatpush2.msra.mxu0 %v3150_v32  ;;  %4383 = vmatprep.subr.mxu1 %v3705_v50  ;;  %v2877_v32 = vsel %vm443_vm8, %v14949_v38, %v14948_v49  ;;  %v9125_v50 = vld [vmem:[%s14445_s0 + $0x20] sm:$0xff]  ;;  %v14965_v19 = vld [vmem:[#allocation90_spill] sm:$0xff] }
 0xc39   :  { %4322 = vmatprep.subr.mxu0 %v3013_v23  ;;  %4384 = vmatpush2.msra.mxu1 %v3704_v5  ;;  %v2196_v37 = vmul.f32 %v9125_v50, %v2171_v21  ;;  %v14950_v23 = vld [vmem:[#allocation104_spill] sm:$0xff]  ;;  %v14962_v21 = vld [vmem:[#allocation113_spill] sm:$0xff] }
 0xc3a   :  { %4323 = vmatpush2.msra.mxu0 %v3012_v27  ;;  %4385 = vmatprep.subr.mxu1 %v3567_v55  ;;  %v2326_v5 = vsel %vm14951_vm7, %v14950_v23, %v14946_v24  ;;  %v2876_v27 = vsel %vm443_vm8, %v10748_v61, %v14949_v38  ;;  %v14952_v55 = vld [vmem:[#allocation47_spill] sm:$0xff]  ;;  %v14957_v61 = vld [vmem:[#allocation57_spill] sm:$0xff]  ;;  %vm14971_vm7 = vmmov %vm14947_vm6 }
 0xc3b   :  { %4324 = vmatprep.subr.mxu0 %v2875_v47  ;;  %4386 = vmatpush2.msra.mxu1 %v3566_v41  ;;  %v14953_v47 = vld [vmem:[#allocation41_spill] sm:$0xff] }
 0xc3c   :  { %4325 = vmatpush2.msra.mxu0 %v2874_v16  ;;  %4387 = vmatprep.subr.mxu1 %v3429_v10  ;;  %v2739_v41 = vsel %vm1641_vm9, %v14953_v47, %v14952_v55  ;;  %v2738_v16 = vsel %vm1641_vm9, %v10645_v34, %v14953_v47  ;;  %v14954_v10 = vld [vmem:[#allocation99_spill] sm:$0xff]  ;;  %v2600_v34 = vsel %vm1781_vm10, %v10580_v12, %v14957_v61  ;;  %v14964_v12 = vld [vmem:[#allocation89_spill] sm:$0xff] }
 0xc3d   :  { %4326 = vmatprep.subr.mxu0 %v2737_v31  ;;  %4388 = vmatpush2.msra.mxu1 %v3428_v54  ;;  %v14955_v31 = vld [vmem:[#allocation100_spill] sm:$0xff]  ;;  %v1840_v14 = vsel %vm14616_vm15, %v14965_v19, %v14964_v12 }
 0xc3e   :  { %4327 = vmatpush2.msra.mxu0 %v2736_v45  ;;  %4389 = vmatprep.subr.mxu1 %v3291_v60  ;;  %v2120_v54 = vsel %vm2114_vm13, %v14955_v31, %v14954_v10  ;;  %v14956_v45 = vld [vmem:[#allocation56_spill] sm:$0xff] }
 0xc3f   :  { %4328 = vmatprep.subr.mxu0 %v2599_v2  ;;  %4390 = vmatpush2.msra.mxu1 %v3290_v63  ;;  %v2601_v60 = vsel %vm1781_vm10, %v14957_v61, %v14956_v45  ;;  %v14958_v2 = vld [vmem:[#allocation98_spill] sm:$0xff]  ;;  %v14978_v61 = vld [vmem:[#allocation76_spill] sm:$0xff] }
 0xc40   :  { %4329 = vmatpush2.msra.mxu0 %v2598_v35  ;;  %4391 = vmatprep.subr.mxu1 %v3153_v11  ;;  %v2119_v63 = vsel %vm2114_vm13, %v14958_v2, %v14955_v31  ;;  %v14960_v35 = vld [vmem:[#allocation93_spill] sm:$0xff]  ;;  %v14961_v11 = vld [vmem:[#allocation112_spill] sm:$0xff] }
 0xc41   :  { %4392 = vmatpush2.msra.mxu1 %v3152_v44  ;;  %4408 = vmatprep.subr.mxu0 %v2465_v6  ;;  %v1980_v29 = vsel %vm1974_vm14, %v14960_v35, %v14959_v22  ;;  %v2467_v44 = vsel %vm1921_vm11, %v14962_v21, %v14961_v11  ;;  %v1979_v6 = vsel %vm1974_vm14, %v14963_v51, %v14960_v35  ;;  %v14976_v31 = vld [vmem:[#allocation101_spill] sm:$0xff]  ;;  %v14982_v35 = vld [vmem:[#allocation95_spill] sm:$0xff]  ;;  %v14983_v11 = vld [vmem:[#allocation68_spill] sm:$0xff] }
 0xc42   :  { %4331 = vmatmul.mubr.f32.vlgmr.msra.gmra.mxu0 %v11351_v7  ;;  %4393 = vmatprep.subr.mxu1 %v3015_v46  ;;  %v2466_v46 = vsel %vm1921_vm11, %v14940_v43, %v14962_v21  ;;  %v14969_v43 = vld [vmem:[#allocation86_spill] sm:$0xff]  ;;  %v14984_v21 = vld [vmem:[#allocation69_spill] sm:$0xff] }
 0xc43   :  { %4409 = vmatpush1.msra.mxu0 %v2464_v25  ;;  %4394 = vmatpush2.msra.mxu1 %v3014_v9  ;;  %v14966_v25 = vld [vmem:[#allocation88_spill] sm:$0xff]  ;;  %v14985_v51 = vld [vmem:[#allocation66_spill] sm:$0xff] }
 0xc44   :  { %4410 = vmatprep.subr.mxu0 %v2327_v3  ;;  %4395 = vmatprep.subr.mxu1 %v2877_v32  ;;  %v1839_v9 = vsel %vm14616_vm15, %v14966_v25, %v14965_v19  ;;  %v9126_v3 = vld [vmem:[%s14445_s0 + $0x30] sm:$0xff]  ;;  %v14970_v32 = vld [vmem:[#allocation83_spill] sm:$0xff]  ;;  %v14989_v25 = vld [vmem:[#allocation60_spill] sm:$0xff]  ;;  %s15171_s0 = smov 7  }
 0xc45   :  { %4411 = vmatpush1.msra.mxu0 %v2326_v5  ;;  %4396 = vmatpush2.msra.mxu1 %v2876_v27  ;;  %v2198_v38 = vmul.f32 %v9126_v3, %v2179_v1  ;;  %v1700_v30 = vsel %vm14615_vm12, %v14970_v32, %v14969_v43  ;;  %v14973_v5 = vld [vmem:[#allocation79_spill] sm:$0xff]  ;;  %v14974_v27 = vld [vmem:[#allocation80_spill] sm:$0xff]  ;;  %v14981_v1 = vld [vmem:[#allocation97_spill] sm:$0xff] }
 0xc46   :  { %4412 = vmatprep.subr.mxu0 %v2197_v42  ;;  %4397 = vmatprep.subr.mxu1 %v2739_v41  ;;  %v14968_v42 = vld [vmem:[#allocation105_spill] sm:$0xff]  ;;  %v1560_v47 = vsel %vm390_vm0, %v14974_v27, %v14973_v5  ;;  %v14975_v41 = vld [vmem:[#allocation78_spill] sm:$0xff]  ;;  %v14986_v19 = vld [vmem:[#allocation91_spill] sm:$0xff] }
 0xc47   :  { %4413 = vmatpush1.msra.mxu0 %v2196_v37  ;;  %4398 = vmatpush2.msra.mxu1 %v2738_v16  ;;  %v2329_v24 = vsel %vm14947_vm6, %v14968_v42, %v14967_v26  ;;  %v2328_v50 = vsel %vm14971_vm7, %v14945_v15, %v14968_v42  ;;  %v14972_v37 = vld [vmem:[#allocation84_spill] sm:$0xff]  ;;  %v1559_v16 = vsel %vm390_vm0, %v14975_v41, %v14974_v27  ;;  %v14977_v15 = vld [vmem:[#allocation102_spill] sm:$0xff]  ;;  %v14990_v26 = vld [vmem:[#allocation61_spill] sm:$0xff]  ;;  %vm15005_vm6 = vcmask 580608  }
 0xc48   :  { %4414 = vmatprep.subr.mxu0 %v2120_v54  ;;  %4399 = vmatprep.subr.mxu1 %v2601_v60  ;;  %v1699_v23 = vsel %vm14615_vm12, %v14972_v37, %v14970_v32  ;;  %v2122_v54 = vsel %vm2114_vm13, %v14977_v15, %v14976_v31  ;;  %v14979_v60 = vld [vmem:[#allocation73_spill] sm:$0xff]  ;;  %v2121_v2 = vsel %vm2114_vm13, %v14954_v10, %v14977_v15  ;;  %v14993_v32 = vld [vmem:[#allocation52_spill] sm:$0xff]  ;;  %v14995_v37 = vld [vmem:[#allocation50_spill] sm:$0xff] }
 0xc49   :  { %4415 = vmatpush1.msra.mxu0 %v2119_v63  ;;  %4400 = vmatpush2.msra.mxu1 %v2600_v34  ;;  %v1422_v39 = vsel %vm530_vm1, %v14979_v60, %v14978_v61  ;;  %v14980_v63 = vld [vmem:[#allocation74_spill] sm:$0xff]  ;;  %v1981_v10 = vsel %vm1974_vm14, %v14959_v22, %v14982_v35  ;;  %v1145_v42 = vsel %vm810_vm3, %v14990_v26, %v14989_v25  ;;  %v14992_v3 = vld [vmem:[#allocation85_spill] sm:$0xff]  ;;  %vm15007_vm7 = vmmov %vm15005_vm6 }
 0xc4a   :  { %4416 = vmatprep.subr.mxu0 %v1980_v29  ;;  %4479 = vmatprep.subr.mxu1 %v2467_v44  ;;  %v1421_v34 = vsel %vm530_vm1, %v14980_v63, %v14979_v60  ;;  %v1982_v29 = vsel %vm1974_vm14, %v14982_v35, %v14981_v1  ;;  %v1284_v44 = vsel %vm670_vm2, %v14984_v21, %v14983_v11  ;;  %v14996_v27 = vld [vmem:[#allocation81_spill] sm:$0xff]  ;;  %v14999_v31 = vld [vmem:[#allocation42_spill] sm:$0xff] }
 0xc4b   :  { %4417 = vmatpush1.msra.mxu0 %v1979_v6  ;;  %4402 = vmatmul.mubr.f32.vlgmr.msra.gmra.mxu1 %v11351_v7  ;;  %v1283_v6 = vsel %vm670_vm2, %v14985_v51, %v14984_v21  ;;  %v15004_v1 = vld [vmem:[#allocation38_spill] sm:$0xff] }
 0xc4c   :  { %4418 = vmatprep.subr.mxu0 %v1840_v14  ;;  %4480 = vmatpush1.msra.mxu1 %v2466_v46  ;;  %v14987_v14 = vld [vmem:[#allocation92_spill] sm:$0xff] }
 0xc4d   :  { %4419 = vmatpush1.msra.mxu0 %v1839_v9  ;;  %4481 = vmatprep.subr.mxu1 %v2329_v24  ;;  %v1842_v46 = vsel %vm14616_vm15, %v14987_v14, %v14986_v19  ;;  %v1841_v22 = vsel %vm14616_vm15, %v14964_v12, %v14987_v14  ;;  %v14991_v24 = vld [vmem:[#allocation87_spill] sm:$0xff]  ;;  %v1701_v12 = vsel %vm14615_vm12, %v14969_v43, %v14992_v3 }
 0xc4e   :  { %4420 = vmatprep.subr.mxu0 %v1700_v30  ;;  %4482 = vmatpush1.msra.mxu1 %v2328_v50  ;;  %v14994_v30 = vld [vmem:[#allocation53_spill] sm:$0xff]  ;;  %v15011_v19 = vld [vmem:[#allocation27_spill] sm:$0xff] }
 0xc4f   :  { %4421 = vmatpush1.msra.mxu0 %v1699_v23  ;;  %4483 = vmatprep.subr.mxu1 %v2199_v62  ;;  %v14988_v62 = vld [vmem:[#allocation63_spill] sm:$0xff]  ;;  %v1008_v50 = vsel %vm950_vm4, %v14994_v30, %v14993_v32  ;;  %v1007_v23 = vsel %vm950_vm4, %v14995_v37, %v14994_v30 }
 0xc50   :  { %4422 = vmatprep.subr.mxu0 %v1560_v47  ;;  %4484 = vmatpush1.msra.mxu1 %v2198_v38  ;;  %v1146_v9 = vsel %vm810_vm3, %v14989_v25, %v14988_v62  ;;  %v1702_v38 = vsel %vm14615_vm12, %v14992_v3, %v14991_v24  ;;  %v14997_v47 = vld [vmem:[#allocation82_spill] sm:$0xff]  ;;  %vm15012_vm12 = vcmask 588800   ;;  %v15018_v24 = vld [vmem:[#allocation24_spill] sm:$0xff] }
 0xc51   :  { %4423 = vmatpush1.msra.mxu0 %v1559_v16  ;;  %4485 = vmatprep.subr.mxu1 %v2122_v54  ;;  %v1562_v41 = vsel %vm390_vm0, %v14997_v47, %v14996_v27  ;;  %v14998_v16 = vld [vmem:[#allocation45_spill] sm:$0xff]  ;;  %v1561_v43 = vsel %vm390_vm0, %v14973_v5, %v14997_v47  ;;  %v15000_v54 = vld [vmem:[#allocation43_spill] sm:$0xff]  ;;  %v15022_v27 = vld [vmem:[#allocation46_spill] sm:$0xff] }
 0xc52   :  { %4424 = vmatprep.subr.mxu0 %v1422_v39  ;;  %4486 = vmatpush1.msra.mxu1 %v2121_v2  ;;  %v869_v15 = vsel %vm863_vm5, %v14999_v31, %v14998_v16  ;;  %v868_v60 = vsel %vm863_vm5, %v15000_v54, %v14999_v31  ;;  %v15001_v39 = vld [vmem:[#allocation77_spill] sm:$0xff]  ;;  %v15002_v2 = vld [vmem:[#allocation75_spill] sm:$0xff]  ;;  %v15023_v47 = vld [vmem:[#allocation44_spill] sm:$0xff] }
 0xc53   :  { %4425 = vmatpush1.msra.mxu0 %v1421_v34  ;;  %4487 = vmatprep.subr.mxu1 %v1982_v29  ;;  %v1424_v63 = vsel %vm530_vm1, %v15002_v2, %v15001_v39  ;;  %v15003_v34 = vld [vmem:[#allocation35_spill] sm:$0xff]  ;;  %v1423_v5 = vsel %vm530_vm1, %v14978_v61, %v15002_v2  ;;  %v15006_v29 = vld [vmem:[#allocation33_spill] sm:$0xff]  ;;  %v15024_v31 = vld [vmem:[#allocation16_spill] sm:$0xff] }
 0xc54   :  { %4426 = vmatprep.subr.mxu0 %v1284_v44  ;;  %4488 = vmatpush1.msra.mxu1 %v1981_v10  ;;  %v729_v35 = vsel %vm15005_vm6, %v15004_v1, %v15003_v34  ;;  %v728_v21 = vsel %vm15007_vm7, %v15006_v29, %v15004_v1  ;;  %v15008_v44 = vld [vmem:[#allocation70_spill] sm:$0xff]  ;;  %v15009_v10 = vld [vmem:[#allocation71_spill] sm:$0xff]  ;;  %vm15014_vm6 = vmmov %vm15012_vm12 }
 0xc55   :  { %4427 = vmatpush1.msra.mxu0 %v1283_v6  ;;  %4489 = vmatprep.subr.mxu1 %v1842_v46  ;;  %v1286_v51 = vsel %vm670_vm2, %v15009_v10, %v15008_v44  ;;  %v15010_v6 = vld [vmem:[#allocation32_spill] sm:$0xff]  ;;  %v1285_v61 = vsel %vm670_vm2, %v14983_v11, %v15009_v10  ;;  %v15013_v46 = vld [vmem:[#allocation30_spill] sm:$0xff]  ;;  %v15027_v54 = vld [vmem:[#allocation15_spill] sm:$0xff] }
 0xc56   :  { %4428 = vmatprep.subr.mxu0 %v1146_v9  ;;  %4490 = vmatpush1.msra.mxu1 %v1841_v22  ;;  %v589_v14 = vsel %vm15012_vm12, %v15011_v19, %v15010_v6  ;;  %v588_v25 = vsel %vm15014_vm6, %v15013_v46, %v15011_v19  ;;  %v15015_v9 = vld [vmem:[#allocation64_spill] sm:$0xff]  ;;  %v15016_v22 = vld [vmem:[#allocation62_spill] sm:$0xff]  ;;  %vm15026_vm12 = vmmov %vm15007_vm7  ;;  %v3707_v46 = vsel %vm670_vm2, %v11213_v57, %v11219_v53 }
 0xc57   :  { %4429 = vmatpush1.msra.mxu0 %v1145_v42  ;;  %4491 = vmatprep.subr.mxu1 %v1702_v38  ;;  %v1148_v26 = vsel %vm810_vm3, %v15016_v22, %v15015_v9  ;;  %v15017_v42 = vld [vmem:[#allocation21_spill] sm:$0xff]  ;;  %v1147_v11 = vsel %vm810_vm3, %v14988_v62, %v15016_v22  ;;  %v15019_v38 = vld [vmem:[#allocation19_spill] sm:$0xff]  ;;  %v871_v62 = vsel %vm863_vm5, %v15023_v47, %v15022_v27  ;;  %vm15029_vm15 = vmmov %vm15014_vm6 }
 0xc58   :  { %4430 = vmatprep.subr.mxu0 %v1008_v50  ;;  %4492 = vmatpush1.msra.mxu1 %v1701_v12  ;;  %v449_v3 = vsel %vm443_vm8, %v15018_v24, %v15017_v42  ;;  %v448_v30 = vsel %vm443_vm8, %v15019_v38, %v15018_v24  ;;  %v15020_v50 = vld [vmem:[#allocation54_spill] sm:$0xff]  ;;  %v15021_v12 = vld [vmem:[#allocation55_spill] sm:$0xff]  ;;  %v3709_v38 = vsel %vm670_vm2, %v11217_v33, %v11221_v58  ;;  %v15039_v27 = vld [vmem:[#allocation129_spill] sm:$0xff] }
 0xc59   :  { %4431 = vmatpush1.msra.mxu0 %v1007_v23  ;;  %4493 = vmatprep.subr.mxu1 %v1562_v41  ;;  %v1010_v37 = vsel %vm950_vm4, %v15021_v12, %v15020_v50  ;;  %v1009_v23 = vsel %vm950_vm4, %v14993_v32, %v15021_v12  ;;  %v870_v41 = vsel %vm863_vm5, %v14998_v16, %v15023_v47  ;;  %v15030_v16 = vld [vmem:[#allocation12_spill] sm:$0xff]  ;;  %v15031_v2 = vld [vmem:[#allocation26_spill] sm:$0xff]  ;;  %v15037_v12 = vld [vmem:[#allocation119_spill] sm:$0xff] }
 0xc5a   :  { %4432 = vmatprep.subr.mxu0 %v869_v15  ;;  %4494 = vmatpush1.msra.mxu1 %v1561_v43  ;;  %v15025_v15 = vld [vmem:[#allocation39_spill] sm:$0xff]  ;;  %v15032_v22 = vld [vmem:[#allocation126_spill] sm:$0xff]  ;;  %v15041_v47 = vld [vmem:[#allocation9_spill] sm:$0xff] }
 0xc5b   :  { %4433 = vmatpush1.msra.mxu0 %v868_v60  ;;  %4495 = vmatprep.subr.mxu1 %v1424_v63  ;;  %v731_v43 = vsel %vm15026_vm12, %v15025_v15, %v15024_v31  ;;  %v730_v32 = vsel %vm15007_vm7, %v15003_v34, %v15025_v15  ;;  %v15028_v60 = vld [vmem:[#allocation29_spill] sm:$0xff]  ;;  %v451_v63 = vsel %vm443_vm8, %v15031_v2, %v15030_v16  ;;  %v15036_v50 = vld [vmem:[#allocation118_spill] sm:$0xff]  ;;  %v15044_v31 = vld [vmem:[#allocation123_spill] sm:$0xff] }
 0xc5c   :  { %4434 = vmatprep.subr.mxu0 %v729_v35  ;;  %4496 = vmatpush1.msra.mxu1 %v1423_v5  ;;  %v591_v39 = vsel %vm15014_vm6, %v15028_v60, %v15027_v54  ;;  %v450_v34 = vsel %vm443_vm8, %v15017_v42, %v15031_v2  ;;  %vm15045_vm12 = vmmov %vm15007_vm7  ;;  %v15047_v54 = vld [vmem:[#allocation36_spill] sm:$0xff] }
 0xc5d   :  { %4435 = vmatpush1.msra.mxu0 %v728_v21  ;;  %4497 = vmatprep.subr.mxu1 %v1286_v51 }
 0xc5e   :  { %4436 = vmatprep.subr.mxu0 %v589_v14  ;;  %4498 = vmatpush1.msra.mxu1 %v1285_v61 }
 0xc5f   :  { %4437 = vmatpush1.msra.mxu0 %v588_v25  ;;  %4499 = vmatprep.subr.mxu1 %v1148_v26  ;;  %v15033_v26 = vld [vmem:[#allocation127_spill] sm:$0xff] }
 0xc60   :  { %4438 = vmatprep.subr.mxu0 %v449_v3  ;;  %4500 = vmatpush1.msra.mxu1 %v1147_v11  ;;  %v3568_v24 = vsel %vm810_vm3, %v11114_v56, %v15033_v26  ;;  %v3708_v56 = vsel %vm670_vm2, %v11219_v53, %v11217_v33  ;;  %v3570_v33 = vsel %vm810_vm3, %v15032_v22, %v15039_v27  ;;  %v15040_v53 = vld [vmem:[#allocation116_spill] sm:$0xff] }
 0xc61   :  { %4439 = vmatpush1.msra.mxu0 %v448_v30  ;;  %4501 = vmatprep.subr.mxu1 %v1010_v37  ;;  %v3293_v37 = vsel %vm863_vm5, %v15037_v12, %v15036_v50 }
 0xc62   :  { %4502 = vmatpush1.msra.mxu1 %v1009_v23  ;;  %4472 = vmatprep.mubr.f32.mxu0 %v11204_v20  ;;  %v15038_v23 = vld [vmem:[#allocation128_spill] sm:$0xff] }
 0xc63   :  { %4503 = vmatprep.subr.mxu1 %v871_v62  ;;  %4543 = vmatprep.mubr.f32.mxu1 %v11204_v20  ;;  %v590_v20 = vsel %vm15029_vm15, %v15010_v6, %v15028_v60  ;;  %v3571_v58 = vsel %vm810_vm3, %v15039_v27, %v15038_v23  ;;  %vm15042_vm15 = vmmov %vm15007_vm7 }
 0xc64   :  { %4504 = vmatpush1.msra.mxu1 %v870_v41  ;;  %v3155_v62 = vsel %vm15042_vm15, %v15041_v47, %v15040_v53  ;;  %v15043_v41 = vld [vmem:[#allocation125_spill] sm:$0xff]  ;;  %vm15048_vm7 = vmmov %vm15014_vm6 }
 0xc65   :  { %4505 = vmatprep.subr.mxu1 %v731_v43  ;;  %v3433_v15 = vsel %vm950_vm4, %v15044_v31, %v15043_v41  ;;  %vm15055_vm15 = vmmov %vm15045_vm12 }
 0xc66   :  { %4506 = vmatpush1.msra.mxu1 %v730_v32  ;;  %v15046_v32 = vld [vmem:[#allocation20_spill] sm:$0xff] }
 0xc67   :  { %4507 = vmatprep.subr.mxu1 %v591_v39  ;;  %v3017_v60 = vsel %vm15048_vm7, %v15047_v54, %v15046_v32  ;;  %v15049_v39 = vld [vmem:[#allocation120_spill] sm:$0xff]  ;;  %vm15060_vm7 = vmmov %vm15014_vm6 }
 0xc68   :  { %4508 = vmatpush1.msra.mxu1 %v590_v20  ;;  %v15050_v20 = vld [vmem:[#allocation121_spill] sm:$0xff] }
 0xc69   :  { %4509 = vmatprep.subr.mxu1 %v451_v63  ;;  %v3295_v16 = vsel %vm863_vm5, %v15050_v20, %v15049_v39  ;;  %v3294_v2 = vsel %vm863_vm5, %v15036_v50, %v15050_v20  ;;  %v15051_v63 = vld [vmem:[#allocation14_spill] sm:$0xff] }
 0xc6a   :  { %4510 = vmatpush1.msra.mxu1 %v450_v34  ;;  %v15052_v34 = vld [vmem:[#allocation51_spill] sm:$0xff] }
 0xc8a   :  { %v3833_v1 = vpop.permute.xlu0 %3832 }
 0xc8b   :  { %v3844_v61 = vsel %vm530_vm1, %v11277_v36, %v3833_v1  ;;  %v3569_v36 = vsel %vm810_vm3, %v15033_v26, %v15032_v22  ;;  %v15064_v22 = vld [vmem:[#allocation23_spill] sm:$0xff] }
 0xc8e   :  { %v3837_v35 = vpop.permute.xlu0 %3836  ;;  %v3835_v5 = vpop.permute.xlu1 %3834 }
 0xc8f   :  { %v3845_v19 = vsel %vm530_vm1, %v3833_v1, %v3835_v5  ;;  %v3846_v3 = vsel %vm530_vm1, %v3835_v5, %v3837_v35  ;;  %v2879_v1 = vsel %vm443_vm8, %v15052_v34, %v15051_v63  ;;  %v15054_v5 = vld [vmem:[#allocation115_spill] sm:$0xff] }
 0xc92   :  { %v3839_v29 = vpop.permute.xlu1 %3838  ;;  %v3971_v21 = vpop.permute.xlu0 %3970 }
 0xc93   :  { %v3982_v51 = vsel %vm390_vm0, %v11257_v8, %v3971_v21  ;;  %v3706_v8 = vsel %vm670_vm2, %v11215_v59, %v11213_v57  ;;  %v3847_v42 = vsel %vm530_vm1, %v3837_v35, %v3839_v29  ;;  %v15034_v57 = vld [vmem:[#allocation124_spill] sm:$0xff]  ;;  %v15035_v59 = vld [vmem:[#allocation122_spill] sm:$0xff]  ;;  %v15053_v35 = vld [vmem:[#allocation117_spill] sm:$0xff] }
 0xc94   :  { %v3431_v11 = vsel %vm950_vm4, %v15035_v59, %v15034_v57  ;;  %v3430_v30 = vsel %vm950_vm4, %v11008_v48, %v15035_v59  ;;  %v3292_v48 = vsel %vm863_vm5, %v10940_v28, %v15037_v12  ;;  %v3154_v28 = vsel %vm15045_vm12, %v14937_v4, %v15041_v47  ;;  %v15067_v59 = vld [vmem:[#allocation67_spill] sm:$0xff] }
 0xc95   :  { %v3432_v43 = vsel %vm950_vm4, %v15034_v57, %v15044_v31  ;;  %v3016_v4 = vsel %vm15014_vm6, %v14942_v0, %v15047_v54  ;;  %v3157_v29 = vsel %vm15055_vm15, %v15054_v5, %v15053_v35  ;;  %v2878_v0 = vsel %vm443_vm8, %v14948_v49, %v15052_v34  ;;  %vm15130_vm15 = vmmov %vm15045_vm12 }
 0xc96   :  { %v3973_v44 = vpop.permute.xlu1 %3972  ;;  %v3975_v6 = vpop.permute.xlu0 %3974 }
 0xc97   :  { %v3983_v10 = vsel %vm390_vm0, %v3971_v21, %v3973_v44  ;;  %v3984_v9 = vsel %vm390_vm0, %v3973_v44, %v3975_v6  ;;  %v3156_v21 = vsel %vm15045_vm12, %v15040_v53, %v15054_v5  ;;  %v15056_v44 = vld [vmem:[#allocation37_spill] sm:$0xff] }
 0xc98   :  { %4450 = vmatprep.subr.mxu0 %v3983_v10  ;;  %v15057_v10 = vld [vmem:[#allocation58_spill] sm:$0xff] }
 0xc99   :  { %4451 = vmatpush2.msra.mxu0 %v3982_v51  ;;  %v2741_v51 = vsel %vm1641_vm9, %v15057_v10, %v15056_v44  ;;  %v2740_v49 = vsel %vm1641_vm9, %v14952_v55, %v15057_v10 }
 0xc9a   :  { %4452 = vmatprep.subr.mxu0 %v3845_v19  ;;  %v3977_v14 = vpop.permute.xlu1 %3976  ;;  %v15059_v19 = vld [vmem:[#allocation25_spill] sm:$0xff] }
 0xc9b   :  { %4453 = vmatpush2.msra.mxu0 %v3844_v61  ;;  %v3985_v25 = vsel %vm390_vm0, %v3975_v6, %v3977_v14  ;;  %v15058_v6 = vld [vmem:[#allocation11_spill] sm:$0xff]  ;;  %v3018_v61 = vsel %vm15014_vm6, %v15046_v32, %v15059_v19 }
 0xc9c   :  { %4454 = vmatprep.subr.mxu0 %v3707_v46  ;;  %4521 = vmatprep.subr.mxu1 %v3985_v25  ;;  %v3019_v14 = vsel %vm15060_vm7, %v15059_v19, %v15058_v6  ;;  %v15061_v46 = vld [vmem:[#allocation49_spill] sm:$0xff]  ;;  %v15062_v25 = vld [vmem:[#allocation72_spill] sm:$0xff]  ;;  %v14618_v19 = vmov 1   ;;  %vm15131_vm7 = vmmov %vm15045_vm12 }
 0xc9d   :  { %4455 = vmatpush2.msra.mxu0 %v3706_v8  ;;  %4522 = vmatpush2.msra.mxu1 %v3984_v9  ;;  %v2603_v8 = vsel %vm1781_vm10, %v15062_v25, %v15061_v46  ;;  %v15063_v9 = vld [vmem:[#allocation40_spill] sm:$0xff]  ;;  %v2602_v55 = vsel %vm1781_vm10, %v14956_v45, %v15062_v25  ;;  %vm15132_vm6 = vmmov %vm15131_vm7 }
 0xc9e   :  { %4456 = vmatprep.subr.mxu0 %v3569_v36  ;;  %4523 = vmatprep.subr.mxu1 %v3847_v42  ;;  %v2881_v26 = vsel %vm443_vm8, %v15064_v22, %v15063_v9  ;;  %v2880_v36 = vsel %vm443_vm8, %v15051_v63, %v15064_v22  ;;  %v15065_v42 = vld [vmem:[#allocation17_spill] sm:$0xff]  ;;  %v15068_v45 = vld [vmem:[#allocation48_spill] sm:$0xff] }
 0xc9f   :  { %4457 = vmatpush2.msra.mxu0 %v3568_v24  ;;  %4524 = vmatpush2.msra.mxu1 %v3846_v3  ;;  %v15066_v24 = vld [vmem:[#allocation31_spill] sm:$0xff] }
 0xca0   :  { %4458 = vmatprep.subr.mxu0 %v3431_v11  ;;  %4525 = vmatprep.subr.mxu1 %v3709_v38  ;;  %v2743_v3 = vsel %vm1641_vm9, %v15066_v24, %v15065_v42  ;;  %v2742_v57 = vsel %vm1641_vm9, %v15056_v44, %v15066_v24  ;;  %v2605_v11 = vsel %vm1781_vm10, %v15068_v45, %v15067_v59  ;;  %v4679_v42 = vld [vmem:[%s14444_s13] ss:$8 sm:$0xf0] }
 0xca1   :  { %4459 = vmatpush2.msra.mxu0 %v3430_v30  ;;  %4526 = vmatpush2.msra.mxu1 %v3708_v56  ;;  %v2604_v38 = vsel %vm1781_vm10, %v15061_v46, %v15068_v45 }
 0xca2   :  { %4460 = vmatprep.subr.mxu0 %v3293_v37  ;;  %4527 = vmatprep.subr.mxu1 %v3571_v58 }
 0xca3   :  { %4461 = vmatpush2.msra.mxu0 %v3292_v48  ;;  %4528 = vmatpush2.msra.mxu1 %v3570_v33  ;;  %v4264_v56 = vpop.permute.xlu0 %4263 }
 0xca4   :  { %4462 = vmatprep.subr.mxu0 %v3155_v62  ;;  %4529 = vmatprep.subr.mxu1 %v3433_v15 }
 0xca5   :  { %4463 = vmatpush2.msra.mxu0 %v3154_v28  ;;  %4530 = vmatpush2.msra.mxu1 %v3432_v43 }
 0xca6   :  { %4464 = vmatprep.subr.mxu0 %v3017_v60  ;;  %4531 = vmatprep.subr.mxu1 %v3295_v16 }
 0xca7   :  { %4465 = vmatpush2.msra.mxu0 %v3016_v4  ;;  %4532 = vmatpush2.msra.mxu1 %v3294_v2 }
 0xca8   :  { %4466 = vmatprep.subr.mxu0 %v2879_v1  ;;  %4533 = vmatprep.subr.mxu1 %v3157_v29 }
 0xca9   :  { %4467 = vmatpush2.msra.mxu0 %v2878_v0  ;;  %4534 = vmatpush2.msra.mxu1 %v3156_v21 }
 0xcaa   :  { %4468 = vmatprep.subr.mxu0 %v2741_v51  ;;  %4535 = vmatprep.subr.mxu1 %v3019_v14  ;;  %v4641_v14 = vld [vmem:[%s14448_s5] sm:$0xff] }
 0xcab   :  { %4469 = vmatpush2.msra.mxu0 %v2740_v49  ;;  %4536 = vmatpush2.msra.mxu1 %v3018_v61 }
 0xcac   :  { %4470 = vmatprep.subr.mxu0 %v2603_v8  ;;  %4537 = vmatprep.subr.mxu1 %v2881_v26  ;;  %v4580_v26 = vld [vmem:[%s14449_s3] sm:$0xff]  ;;  %s15173_s3 = smov 127  }
 0xcad   :  { %4471 = vmatpush2.msra.mxu0 %v2602_v55  ;;  %4538 = vmatpush2.msra.mxu1 %v2880_v36  ;;  %v4678_v36 = vld [vmem:[%s14444_s13] ss:$8 sm:$0xf] }
 0xcae   :  { %4473 = vmatmul.mubr.f32.vlgmr.msra.gmra.mxu0 %v11351_v7  ;;  %4539 = vmatprep.subr.mxu1 %v2743_v3  ;;  %v4584_v3 = vld [vmem:[%s14450_s4] sm:$0xff]  ;;  %v4680_v59 = vor.u32 %v4679_v42, %v4678_v36  ;;  %s15172_s4 = smov 1  }
 0xcaf   :  { %4540 = vmatpush2.msra.mxu1 %v2742_v57  ;;  %9095 = vset.pattern.permute.xlu0 %v14618_v19 }
 0xcb0   :  { %4541 = vmatprep.subr.mxu1 %v2605_v11  ;;  %v15069_v11 = vld [vmem:[#allocation7_spill] sm:$0xff] }
 0xcb1   :  { %4542 = vmatpush2.msra.mxu1 %v2604_v38  ;;  %v4689_v38 = vrot.slane %v4680_v59, %v15069_v11 }
 0xcb2   :  { %4544 = vmatmul.mubr.f32.vlgmr.msra.gmra.mxu1 %v11351_v7 }
 0xd02   :  { %v4332_v30 = vpop.f32.mrf.mxu0 }
 0xd03   :  { %v11701_v12 = vadd.f32 %v4332_v30, %v4264_v56  ;;  %v4623_v30 = vld [vmem:[%s14451_s6] sm:$0xff]  ;;  %s15174_s6 = smov 121  }
 0xd04   :  { %v4334_v50 = vpop.f32.mrf.mxu0 }
 0xd05   :  { %v11703_v37 = vadd.f32 %v4334_v50, %v4264_v56  ;;  %v4560_v27 = vmul.f32 %v11701_v12, %v11701_v12 }
 0xd07   :  { %v4561_v58 = vmul.f32 %v11703_v37, %v11703_v37  ;;  %v4550_v7 = vadd.f32 %v11703_v37, %v11701_v12 }
 0xd09   :  { %v4568_v53 = vadd.f32 %v4561_v58, %v4560_v27  ;;  %v15071_v27 = vld [vmem:[#allocation5_spill] sm:$0xff] }
 0xd0a   :  { %v4685_v58 = vrot.slane %v4680_v59, %v15071_v27 }
 0xd0b   :  { %v4403_v23 = vpop.f32.mrf.mxu1 }
 0xd0c   :  { %v11709_v48 = vadd.f32 %v4403_v23, %v4264_v56  ;;  %v4705_v23 = vrot.slane %v4680_v59, %v9241_v13 }
 0xd0d   :  { %v4405_v33 = vpop.f32.mrf.mxu1 }
 0xd0e   :  { %v4562_v47 = vmul.f32 %v11709_v48, %v11709_v48  ;;  %v11715_v62 = vadd.f32 %v4405_v33, %v4264_v56  ;;  %v4551_v41 = vadd.f32 %v4550_v7, %v11709_v48  ;;  %v4713_v33 = vrot.slane %v4680_v59, %v14884_v52  ;;  %v15072_v7 = vld [vmem:[#allocation4_spill] sm:$0xff] }
 0xd10   :  { %v4569_v31 = vadd.f32 %v4568_v53, %v4562_v47  ;;  %v4563_v15 = vmul.f32 %v11715_v62, %v11715_v62  ;;  %v4552_v43 = vadd.f32 %v4551_v41, %v11715_v62  ;;  %v4693_v53 = vrot.slane %v4680_v59, %v15072_v7 }
 0xd11   :  { %v4701_v47 = vrot.slane %v4680_v59, %v14939_v40  ;;  %v4709_v41 = vrot.slane %v4680_v59, %v9251_v18 }
 0xd12   :  { %v4570_v60 = vadd.f32 %v4569_v31, %v4563_v15 }
 0xd6e   :  { %v4474_v28 = vpop.f32.mrf.mxu0 }
 0xd6f   :  { %v11721_v32 = vadd.f32 %v4474_v28, %v4264_v56 }
 0xd70   :  { %v4476_v54 = vpop.f32.mrf.mxu0 }
 0xd71   :  { %v4553_v39 = vadd.f32 %v4552_v43, %v11721_v32  ;;  %v4564_v20 = vmul.f32 %v11721_v32, %v11721_v32  ;;  %v11726_v16 = vadd.f32 %v4476_v54, %v4264_v56 }
 0xd72   :  { %v4545_v4 = vpop.f32.mrf.mxu1 }
 0xd73   :  { %v4571_v2 = vadd.f32 %v4570_v60, %v4564_v20  ;;  %v4554_v63 = vadd.f32 %v4553_v39, %v11726_v16  ;;  %v4565_v34 = vmul.f32 %v11726_v16, %v11726_v16  ;;  %v11731_v1 = vadd.f32 %v4545_v4, %v4264_v56 }
 0xd74   :  { %v4547_v35 = vpop.f32.mrf.mxu1 }
 0xd75   :  { %v4572_v5 = vadd.f32 %v4571_v2, %v4565_v34  ;;  %v4555_v29 = vadd.f32 %v4554_v63, %v11731_v1  ;;  %v4566_v0 = vmul.f32 %v11731_v1, %v11731_v1  ;;  %v11736_v21 = vadd.f32 %v4547_v35, %v4264_v56  ;;  %v15070_v56 = vld [vmem:[#allocation6_spill] sm:$0xff] }
 0xd76   :  { %v4697_v50 = vrot.slane %v4680_v59, %v15070_v56 }
 0xd77   :  { %v4567_v44 = vmul.f32 %v11736_v21, %v11736_v21  ;;  %v4556_v10 = vadd.f32 %v4555_v29, %v11736_v21  ;;  %v4573_v51 = vadd.f32 %v4572_v5, %v4566_v0 }
 0xd79   :  { %4557 = vadd.xlane.f32.xlu1 %v4556_v10  ;;  %v4574_v6 = vadd.f32 %v4573_v51, %v4567_v44 }
 0xd7b   :  { %4575 = vadd.xlane.f32.xlu0 %v4574_v6 }
 0xd91   :  { %4644 = vperm.xlu0 %9095, %v4641_v14  }
 0xd95   :  { %9096 = vset.pattern.permute.xlu0 %v14617_v17 }
 0xe02   :  { %v4558_v49 = vpop.xlane.xlu1 %4557 }
 0xe03   :  { %v4559_v61 = vmul.f32 0.0009765625, %v4558_v49 }
 0xe04   :  { %v4576_v46 = vpop.xlane.xlu0 %4575 }
 0xe05   :  { %v4578_v25 = vmul.f32 %v4559_v61, %v4559_v61  ;;  %v4577_v8 = vmul.f32 0.0009765625, %v4576_v46 }
 0xe07   :  { %v4579_v9 = vsub.f32 %v4577_v8, %v4578_v25 }
 0xe09   :  { %v4581_v22 = vadd.f32 1e-05, %v4579_v9 }
 0xe0b   :  { %9103 = vrsqrt.f32 %v4581_v22 }
 0xe0c   :  { %v4645_v31 = vpop.permute.xlu0 %4644 }
 0xe18   :  { %v9104_v55 = vpop.eup %9103 }
 0xe19   :  { %v4583_v24 = vmul.f32 %v9104_v55, %v4580_v26 }
 0xe1b   :  { %4589 = vperm.xlu1 %9094, %v4583_v24   ;;  %v4585_v57 = vmul.f32 %v4583_v24, %v4559_v61 }
 0xe1d   :  { %v4586_v45 = vsub.f32 %v4584_v3, %v4585_v57 }
 0xe1f   :  { %4616 = vperm.xlu1 %9094, %v4641_v14   ;;  %4602 = vperm.xlu0 %9096, %v4586_v45  }
 0xe23   :  { %4626 = vperm.xlu1 %9094, %v4623_v30   ;;  %4716 = vrot.lane.b32.xlu0 %v4689_v38, %s9127_s17 }
 0xe27   :  { %9097 = vset.pattern.permute.xlu1 %v14618_v19  ;;  %4720 = vrot.lane.b32.xlu0 %v4697_v50, %s9127_s17 }
 0xe28   :  { %4654 = vperm.xlu1 %9097, %v4623_v30  }
 0xe2b   :  { %4724 = vrot.lane.b32.xlu0 %v4705_v23, %s9127_s17 }
 0xe2c   :  { %4714 = vrot.lane.b32.xlu1 %v4685_v58, %s9127_s17 }
 0xe2d   :  { %9098 = vset.pattern.permute.xlu1 %v14617_v17 }
 0xe2f   :  { %4728 = vrot.lane.b32.xlu0 %v4713_v33, %s9127_s17 }
 0xe30   :  { %4718 = vrot.lane.b32.xlu1 %v4693_v53, %s9127_s17 }
 0xe34   :  { %4722 = vrot.lane.b32.xlu1 %v4701_v47, %s9127_s17 }
 0xe38   :  { %4726 = vrot.lane.b32.xlu1 %v4709_v41, %s9127_s17 }
 0xe96   :  { %v4590_v15 = vpop.permute.xlu1 %4589 }
 0xe97   :  { %v4592_v28 = vmul.f32 %v4590_v15, %v11701_v12  ;;  %v4593_v39 = vmul.f32 %v4590_v15, %v11703_v37  ;;  %v4594_v20 = vmul.f32 %v4590_v15, %v11709_v48  ;;  %v4595_v35 = vmul.f32 %v4590_v15, %v11715_v62 }
 0xe98   :  { %v4596_v29 = vmul.f32 %v4590_v15, %v11721_v32  ;;  %v4597_v14 = vmul.f32 %v4590_v15, %v11726_v16  ;;  %v4598_v37 = vmul.f32 %v4590_v15, %v11731_v1  ;;  %v4599_v36 = vmul.f32 %v4590_v15, %v11736_v21 }
 0xe9a   :  { %v4617_v43 = vpop.permute.xlu1 %4616  ;;  %v4603_v54 = vpop.permute.xlu0 %4602 }
 0xe9b   :  { %v4605_v60 = vadd.f32 %v4603_v54, %v4592_v28  ;;  %v4606_v2 = vadd.f32 %v4603_v54, %v4593_v39  ;;  %v4607_v63 = vadd.f32 %v4603_v54, %v4594_v20  ;;  %v4608_v0 = vadd.f32 %v4603_v54, %v4595_v35 }
 0xe9c   :  { %v4609_v6 = vadd.f32 %v4603_v54, %v4596_v29  ;;  %v4610_v9 = vadd.f32 %v4603_v54, %v4597_v14  ;;  %v4611_v22 = vadd.f32 %v4603_v54, %v4598_v37  ;;  %v4612_v57 = vadd.f32 %v4603_v54, %v4599_v36  ;;  %v9023_v54 = vld [vmem:[%s14444_s13 + $0x1] ss:$8 sm:$0xf0] }
 0xe9d   :  { %v4619_v34 = vmul.f32 %v4617_v43, %v4605_v60  ;;  %v4620_v44 = vmul.f32 %v4617_v43, %v4606_v2  ;;  %v4621_v10 = vmul.f32 %v4617_v43, %v4607_v63  ;;  %v4622_v48 = vmul.f32 %v4617_v43, %v4608_v0  ;;  %v9022_v43 = vld [vmem:[%s14444_s13 + $0x1] ss:$8 sm:$0xf] }
 0xe9e   :  { %v4627_v4 = vpop.permute.xlu1 %4626  ;;  %v4717_v5 = vpop.permute.xlu0 %4716  ;;  %v4647_v26 = vmul.f32 %v4645_v31, %v4609_v6  ;;  %v4648_v38 = vmul.f32 %v4645_v31, %v4610_v9  ;;  %v4649_v30 = vmul.f32 %v4645_v31, %v4611_v22  ;;  %v4650_v60 = vmul.f32 %v4645_v31, %v4612_v57 }
 0xe9f   :  { %v4629_v12 = vadd.f32 %v4627_v4, %v4619_v34  ;;  %v4630_v49 = vadd.f32 %v4627_v4, %v4620_v44  ;;  %v4631_v61 = vadd.f32 %v4627_v4, %v4621_v10  ;;  %v4632_v16 = vadd.f32 %v4627_v4, %v4622_v48 }
 0xea1   :  { %v11786_v46 = vmax.f32 %v4629_v12, 0.0  ;;  %v11792_v1 = vmax.f32 %v4630_v49, 0.0  ;;  %v11794_v42 = vmax.f32 %v4631_v61, 0.0  ;;  %v11801_v58 = vmax.f32 %v4632_v16, 0.0 }
 0xea2   :  { %v4721_v25 = vpop.permute.xlu0 %4720 }
 0xea3   :  { %v4655_v51 = vpop.permute.xlu1 %4654 }
 0xea4   :  { %v4657_v24 = vadd.f32 %v4655_v51, %v4647_v26  ;;  %v4658_v33 = vadd.f32 %v4655_v51, %v4648_v38  ;;  %v4659_v53 = vadd.f32 %v4655_v51, %v4649_v30  ;;  %v4660_v4 = vadd.f32 %v4655_v51, %v4650_v60 }
 0xea6   :  { %v4725_v50 = vpop.permute.xlu0 %4724  ;;  %v11803_v47 = vmax.f32 %v4657_v24, 0.0  ;;  %v11817_v2 = vmax.f32 %v4658_v33, 0.0  ;;  %v11819_v63 = vmax.f32 %v4659_v53, 0.0  ;;  %v11827_v10 = vmax.f32 %v4660_v4, 0.0 }
 0xea7   :  { %v4715_v62 = vpop.permute.xlu1 %4714 }
 0xea8   :  { %v4730_v8 = vsel %vm390_vm0, %v4715_v62, %v4717_v5  ;;  %v4746_v32 = vmul.f32 0.0, %v4715_v62  ;;  %15073 = vst [vmem:[#allocation59_spill] sm:$0xff] %v11817_v2  ;;  %15074 = vst [vmem:[#allocation108_spill] sm:$0xff] %v11819_v63 }
 0xea9   :  { %v4747_v55 = vmul.f32 %v4730_v8, %v11786_v46  ;;  %15075 = vst [vmem:[#allocation65_spill] sm:$0xff] %v11827_v10 }
 0xeaa   :  { %4764 = vrot.lane.b32.xlu1 %v4746_v32, %s9131_s18  ;;  %v4729_v34 = vpop.permute.xlu0 %4728 }
 0xeab   :  { %v4719_v3 = vpop.permute.xlu1 %4718  ;;  %4766 = vrot.lane.b32.xlu0 %v4747_v55, %s9131_s18  ;;  %v4754_v51 = vmul.f32 %v4729_v34, %v11827_v10 }
 0xeac   :  { %v4731_v59 = vsel %vm390_vm0, %v4717_v5, %v4719_v3  ;;  %v4732_v45 = vsel %vm390_vm0, %v4719_v3, %v4721_v25  ;;  %v4817_v5 = vor.u32 %v9023_v54, %v9022_v43 }
 0xead   :  { %v4748_v21 = vmul.f32 %v4731_v59, %v11792_v1  ;;  %v4749_v23 = vmul.f32 %v4732_v45, %v11794_v42 }
 0xeae   :  { %v4822_v12 = vrot.slane %v4817_v5, %v15071_v27  ;;  %v4826_v6 = vrot.slane %v4817_v5, %v15069_v11  ;;  %v4830_v14 = vrot.slane %v4817_v5, %v15072_v7  ;;  %v4834_v37 = vrot.slane %v4817_v5, %v15070_v56 }
 0xeaf   :  { %v4723_v41 = vpop.permute.xlu1 %4722  ;;  %4768 = vrot.lane.b32.xlu1 %v4748_v21, %s9131_s18  ;;  %4770 = vrot.lane.b32.xlu0 %v4749_v23, %s9131_s18  ;;  %v4838_v48 = vrot.slane %v4817_v5, %v14939_v40  ;;  %v4842_v49 = vrot.slane %v4817_v5, %v9241_v13  ;;  %v4846_v61 = vrot.slane %v4817_v5, %v9251_v18 }
 0xeb0   :  { %v4733_v15 = vsel %vm390_vm0, %v4721_v25, %v4723_v41  ;;  %v4734_v28 = vsel %vm390_vm0, %v4723_v41, %v4725_v50  ;;  %v4850_v25 = vrot.slane %v4817_v5, %v14884_v52 }
 0xeb1   :  { %v4750_v39 = vmul.f32 %v4733_v15, %v11801_v58  ;;  %v4751_v20 = vmul.f32 %v4734_v28, %v11803_v47 }
 0xeb3   :  { %v4727_v35 = vpop.permute.xlu1 %4726  ;;  %4772 = vrot.lane.b32.xlu1 %v4750_v39, %s9131_s18  ;;  %4774 = vrot.lane.b32.xlu0 %v4751_v20, %s9131_s18  ;;  %v9024_v39 = vld [vmem:[%s14444_s13 + $0x2] ss:$8 sm:$0xf] }
 0xeb4   :  { %v4735_v29 = vsel %vm390_vm0, %v4725_v50, %v4727_v35  ;;  %v4736_v31 = vsel %vm390_vm0, %v4727_v35, %v4729_v34  ;;  %v9025_v20 = vld [vmem:[%s14444_s13 + $0x2] ss:$8 sm:$0xf0] }
 0xeb5   :  { %v4752_v0 = vmul.f32 %v4735_v29, %v11817_v2  ;;  %v4753_v44 = vmul.f32 %v4736_v31, %v11819_v63  ;;  %v4954_v5 = vor.u32 %v9025_v20, %v9024_v39 }
 0xeb7   :  { %4776 = vrot.lane.b32.xlu1 %v4752_v0, %s9131_s18  ;;  %4778 = vrot.lane.b32.xlu0 %v4753_v44, %s9131_s18  ;;  %v4959_v44 = vrot.slane %v4954_v5, %v15071_v27 }
 0xebb   :  { %4780 = vrot.lane.b32.xlu1 %v4754_v51, %s9131_s18  ;;  %4851 = vrot.lane.b32.xlu0 %v4822_v12, %s9128_s22  ;;  %v4963_v12 = vrot.slane %v4954_v5, %v15069_v11  ;;  %v4967_v51 = vrot.slane %v4954_v5, %v15072_v7 }
 0xebf   :  { %4853 = vrot.lane.b32.xlu1 %v4826_v6, %s9128_s22  ;;  %4855 = vrot.lane.b32.xlu0 %v4830_v14, %s9128_s22  ;;  %v4971_v6 = vrot.slane %v4954_v5, %v15070_v56  ;;  %v4975_v14 = vrot.slane %v4954_v5, %v14939_v40 }
 0xec3   :  { %4857 = vrot.lane.b32.xlu1 %v4834_v37, %s9128_s22  ;;  %4859 = vrot.lane.b32.xlu0 %v4838_v48, %s9128_s22  ;;  %v4979_v37 = vrot.slane %v4954_v5, %v9241_v13  ;;  %v4983_v48 = vrot.slane %v4954_v5, %v9251_v18 }
 0xec7   :  { %4861 = vrot.lane.b32.xlu1 %v4842_v49, %s9128_s22  ;;  %4863 = vrot.lane.b32.xlu0 %v4846_v61, %s9128_s22  ;;  %v4987_v49 = vrot.slane %v4954_v5, %v14884_v52  ;;  %v9027_v5 = vld [vmem:[%s14444_s13 + $0x3] ss:$8 sm:$0xf0] }
 0xecb   :  { %4865 = vrot.lane.b32.xlu1 %v4850_v25, %s9128_s22 }
 0xf1c   :  { %v11849_v62 = vpop.permute.xlu1 %4764 }
 0xf1d   :  { %15076 = vst [vmem:[#allocation114_spill] sm:$0xff] %v11849_v62  ;;  %v11851_v8 = vpop.permute.xlu0 %4766  ;;  %v9065_v62 = vld [vmem:[%s14444_s13 + $0x86] ss:$8 sm:$0xf0] }
 0xf1e   :  { %15077 = vst [vmem:[#allocation22_spill] sm:$0xff] %v11851_v8 }
 0xf21   :  { %v11853_v32 = vpop.permute.xlu1 %4768  ;;  %v11855_v9 = vpop.permute.xlu0 %4770 }
 0xf22   :  { %15078 = vst [vmem:[#allocation110_spill] sm:$0xff] %v11853_v32  ;;  %15079 = vst [vmem:[#allocation111_spill] sm:$0xff] %v11855_v9  ;;  %v9061_v32 = vld [vmem:[%s14444_s13 + $0x84] ss:$8 sm:$0xf0] }
 0xf25   :  { %v11857_v22 = vpop.permute.xlu1 %4772  ;;  %v11859_v26 = vpop.permute.xlu0 %4774 }
 0xf26   :  { %15080 = vst [vmem:[#allocation13_spill] sm:$0xff] %v11857_v22  ;;  %15081 = vst [vmem:[#allocation18_spill] sm:$0xff] %v11859_v26 }
 0xf29   :  { %v11861_v55 = vpop.permute.xlu1 %4776  ;;  %v11863_v36 = vpop.permute.xlu0 %4778 }
 0xf2a   :  { %15082 = vst [vmem:[#allocation109_spill] sm:$0xff] %v11861_v55  ;;  %15083 = vst [vmem:[#allocation106_spill] sm:$0xff] %v11863_v36 }
 0xf2d   :  { %v11865_v16 = vpop.permute.xlu1 %4780  ;;  %v4852_v24 = vpop.permute.xlu0 %4851 }
 0xf2e   :  { %15084 = vst [vmem:[#allocation103_spill] sm:$0xff] %v11865_v16  ;;  %v4883_v3 = vmul.f32 0.0, %v4852_v24 }
 0xf30   :  { %4901 = vrot.lane.b32.xlu0 %v4883_v3, %s9132_s21 }
 0xf31   :  { %v4854_v57 = vpop.permute.xlu1 %4853  ;;  %v4856_v59 = vpop.permute.xlu0 %4855 }
 0xf32   :  { %v4867_v45 = vsel %vm530_vm1, %v4852_v24, %v4854_v57  ;;  %v4868_v38 = vsel %vm530_vm1, %v4854_v57, %v4856_v59 }
 0xf33   :  { %v4884_v30 = vmul.f32 %v4867_v45, %v11786_v46  ;;  %v4885_v50 = vmul.f32 %v4868_v38, %v11792_v1 }
 0xf35   :  { %v4858_v21 = vpop.permute.xlu1 %4857  ;;  %4903 = vrot.lane.b32.xlu1 %v4884_v30, %s9132_s21  ;;  %4905 = vrot.lane.b32.xlu0 %v4885_v50, %s9132_s21  ;;  %v4860_v23 = vpop.permute.xlu0 %4859 }
 0xf36   :  { %v4869_v33 = vsel %vm530_vm1, %v4856_v59, %v4858_v21  ;;  %v4870_v53 = vsel %vm530_vm1, %v4858_v21, %v4860_v23 }
 0xf37   :  { %v4886_v41 = vmul.f32 %v4869_v33, %v11794_v42  ;;  %v4887_v15 = vmul.f32 %v4870_v53, %v11801_v58 }
 0xf39   :  { %v4862_v28 = vpop.permute.xlu1 %4861  ;;  %4907 = vrot.lane.b32.xlu1 %v4886_v41, %s9132_s21  ;;  %4909 = vrot.lane.b32.xlu0 %v4887_v15, %s9132_s21  ;;  %v4864_v43 = vpop.permute.xlu0 %4863 }
 0xf3a   :  { %v4871_v54 = vsel %vm530_vm1, %v4860_v23, %v4862_v28  ;;  %v4872_v60 = vsel %vm530_vm1, %v4862_v28, %v4864_v43 }
 0xf3b   :  { %v4888_v4 = vmul.f32 %v4871_v54, %v11803_v47  ;;  %v4889_v34 = vmul.f32 %v4872_v60, %v11817_v2 }
 0xf3d   :  { %v4866_v35 = vpop.permute.xlu1 %4865  ;;  %4911 = vrot.lane.b32.xlu1 %v4888_v4, %s9132_s21  ;;  %4913 = vrot.lane.b32.xlu0 %v4889_v34, %s9132_s21 }
 0xf3e   :  { %v4873_v29 = vsel %vm530_vm1, %v4864_v43, %v4866_v35  ;;  %v4891_v31 = vmul.f32 %v4866_v35, %v11827_v10  ;;  %v9026_v35 = vld [vmem:[%s14444_s13 + $0x3] ss:$8 sm:$0xf] }
 0xf3f   :  { %v4890_v0 = vmul.f32 %v4873_v29, %v11819_v63 }
 0xf41   :  { %4915 = vrot.lane.b32.xlu1 %v4890_v0, %s9132_s21  ;;  %4917 = vrot.lane.b32.xlu0 %v4891_v31, %s9132_s21 }
 0xf45   :  { %4988 = vrot.lane.b32.xlu1 %v4959_v44, %s14905_s24  ;;  %4990 = vrot.lane.b32.xlu0 %v4963_v12, %s14905_s24  ;;  %v5091_v12 = vor.u32 %v9027_v5, %v9026_v35 }
 0xf49   :  { %4992 = vrot.lane.b32.xlu1 %v4967_v51, %s14905_s24  ;;  %4994 = vrot.lane.b32.xlu0 %v4971_v6, %s14905_s24 }
 0xf4d   :  { %4996 = vrot.lane.b32.xlu1 %v4975_v14, %s14905_s24  ;;  %4998 = vrot.lane.b32.xlu0 %v4979_v37, %s14905_s24 }
 0xf51   :  { %5000 = vrot.lane.b32.xlu1 %v4983_v48, %s14905_s24  ;;  %5002 = vrot.lane.b32.xlu0 %v4987_v49, %s14905_s24  ;;  %v5096_v48 = vrot.slane %v5091_v12, %v15071_v27 }
 0xfa2   :  { %v11913_v61 = vpop.permute.xlu0 %4901 }
 0xfa3   :  { %15085 = vst [vmem:[#allocation28_spill] sm:$0xff] %v11913_v61 }
 0xfa7   :  { %v11915_v25 = vpop.permute.xlu1 %4903  ;;  %v11917_v24 = vpop.permute.xlu0 %4905 }
 0xfa8   :  { %15086 = vst [vmem:[#allocation34_spill] sm:$0xff] %v11915_v25  ;;  %15087 = vst [vmem:[#allocation104_spill] sm:$0xff] %v11917_v24 }
 0xfab   :  { %v11919_v3 = vpop.permute.xlu1 %4907  ;;  %v11921_v57 = vpop.permute.xlu0 %4909 }
 0xfac   :  { %15088 = vst [vmem:[#allocation47_spill] sm:$0xff] %v11919_v3  ;;  %15089 = vst [vmem:[#allocation41_spill] sm:$0xff] %v11921_v57 }
 0xfaf   :  { %v11923_v59 = vpop.permute.xlu1 %4911  ;;  %v11925_v45 = vpop.permute.xlu0 %4913 }
 0xfb0   :  { %15090 = vst [vmem:[#allocation99_spill] sm:$0xff] %v11923_v59  ;;  %15091 = vst [vmem:[#allocation100_spill] sm:$0xff] %v11925_v45 }
 0xfb3   :  { %v11927_v38 = vpop.permute.xlu1 %4915  ;;  %v11929_v30 = vpop.permute.xlu0 %4917 }
 0xfb4   :  { %15092 = vst [vmem:[#allocation56_spill] sm:$0xff] %v11927_v38  ;;  %15093 = vst [vmem:[#allocation57_spill] sm:$0xff] %v11929_v30 }
 0xfb7   :  { %v4989_v50 = vpop.permute.xlu1 %4988  ;;  %v4991_v21 = vpop.permute.xlu0 %4990 }
 0xfb8   :  { %v5020_v23 = vmul.f32 0.0, %v4989_v50  ;;  %v5004_v33 = vsel %vm670_vm2, %v4989_v50, %v4991_v21  ;;  %v5100_v50 = vrot.slane %v5091_v12, %v15069_v11 }
 0xfb9   :  { %v5021_v53 = vmul.f32 %v5004_v33, %v11786_v46  ;;  %v5112_v33 = vrot.slane %v5091_v12, %v14939_v40 }
 0xfba   :  { %5038 = vrot.lane.b32.xlu1 %v5020_v23, %s14912_s26  ;;  %v5108_v23 = vrot.slane %v5091_v12, %v15070_v56 }
 0xfbb   :  { %v4993_v41 = vpop.permute.xlu1 %4992  ;;  %5040 = vrot.lane.b32.xlu0 %v5021_v53, %s14912_s26  ;;  %v4995_v15 = vpop.permute.xlu0 %4994  ;;  %v5116_v53 = vrot.slane %v5091_v12, %v9241_v13 }
 0xfbc   :  { %v5005_v28 = vsel %vm670_vm2, %v4991_v21, %v4993_v41  ;;  %v5006_v43 = vsel %vm670_vm2, %v4993_v41, %v4995_v15  ;;  %v5104_v21 = vrot.slane %v5091_v12, %v15072_v7  ;;  %v5120_v41 = vrot.slane %v5091_v12, %v9251_v18 }
 0xfbd   :  { %v5022_v54 = vmul.f32 %v5005_v28, %v11792_v1  ;;  %v5023_v60 = vmul.f32 %v5006_v43, %v11794_v42 }
 0xfbf   :  { %v4997_v39 = vpop.permute.xlu1 %4996  ;;  %5042 = vrot.lane.b32.xlu1 %v5022_v54, %s14912_s26  ;;  %5044 = vrot.lane.b32.xlu0 %v5023_v60, %s14912_s26  ;;  %v4999_v20 = vpop.permute.xlu0 %4998 }
 0xfc0   :  { %v5007_v4 = vsel %vm670_vm2, %v4995_v15, %v4997_v39  ;;  %v5008_v34 = vsel %vm670_vm2, %v4997_v39, %v4999_v20  ;;  %v5124_v15 = vrot.slane %v5091_v12, %v14884_v52 }
 0xfc1   :  { %v5024_v29 = vmul.f32 %v5007_v4, %v11801_v58  ;;  %v5025_v31 = vmul.f32 %v5008_v34, %v11803_v47 }
 0xfc3   :  { %v5001_v0 = vpop.permute.xlu1 %5000  ;;  %5046 = vrot.lane.b32.xlu1 %v5024_v29, %s14912_s26  ;;  %5048 = vrot.lane.b32.xlu0 %v5025_v31, %s14912_s26  ;;  %v5003_v44 = vpop.permute.xlu0 %5002 }
 0xfc4   :  { %v5009_v51 = vsel %vm670_vm2, %v4999_v20, %v5001_v0  ;;  %v5010_v6 = vsel %vm670_vm2, %v5001_v0, %v5003_v44  ;;  %v5028_v49 = vmul.f32 %v5003_v44, %v11827_v10 }
 0xfc5   :  { %v5026_v14 = vmul.f32 %v5009_v51, %v11817_v2  ;;  %v5027_v37 = vmul.f32 %v5010_v6, %v11819_v63 }
 0xfc7   :  { %5050 = vrot.lane.b32.xlu1 %v5026_v14, %s14912_s26  ;;  %5052 = vrot.lane.b32.xlu0 %v5027_v37, %s14912_s26 }
 0xfcb   :  { %5054 = vrot.lane.b32.xlu1 %v5028_v49, %s14912_s26  ;;  %5125 = vrot.lane.b32.xlu0 %v5096_v48, %s14913_s20 }
 0xfcf   :  { %5127 = vrot.lane.b32.xlu1 %v5100_v50, %s14913_s20  ;;  %5129 = vrot.lane.b32.xlu0 %v5104_v21, %s14913_s20 }
 0xfd3   :  { %5131 = vrot.lane.b32.xlu1 %v5108_v23, %s14913_s20  ;;  %5133 = vrot.lane.b32.xlu0 %v5112_v33, %s14913_s20 }
 0xfd7   :  { %5135 = vrot.lane.b32.xlu1 %v5116_v53, %s14913_s20  ;;  %5137 = vrot.lane.b32.xlu0 %v5120_v41, %s14913_s20 }
 0xfdb   :  { %5139 = vrot.lane.b32.xlu1 %v5124_v15, %s14913_s20  ;;  %v9028_v15 = vld [vmem:[%s14444_s13 + $0x4] ss:$8 sm:$0xf] }
0x102c   :  { %v11977_v28 = vpop.permute.xlu1 %5038 }
0x102d   :  { %15094 = vst [vmem:[#allocation98_spill] sm:$0xff] %v11977_v28  ;;  %v11979_v43 = vpop.permute.xlu0 %5040  ;;  %v9056_v28 = vld [vmem:[%s14444_s13 + $0x82] ss:$8 sm:$0xf] }
0x102e   :  { %15095 = vst [vmem:[#allocation96_spill] sm:$0xff] %v11979_v43 }
0x1031   :  { %v11981_v54 = vpop.permute.xlu1 %5042  ;;  %v11983_v60 = vpop.permute.xlu0 %5044 }
0x1032   :  { %15096 = vst [vmem:[#allocation93_spill] sm:$0xff] %v11981_v54  ;;  %15097 = vst [vmem:[#allocation112_spill] sm:$0xff] %v11983_v60 }
0x1035   :  { %v11985_v39 = vpop.permute.xlu1 %5046  ;;  %v11987_v20 = vpop.permute.xlu0 %5048 }
0x1036   :  { %15098 = vst [vmem:[#allocation113_spill] sm:$0xff] %v11985_v39  ;;  %15099 = vst [vmem:[#allocation94_spill] sm:$0xff] %v11987_v20 }
0x1039   :  { %v11989_v4 = vpop.permute.xlu1 %5050  ;;  %v11991_v34 = vpop.permute.xlu0 %5052 }
0x103a   :  { %15100 = vst [vmem:[#allocation89_spill] sm:$0xff] %v11989_v4  ;;  %15101 = vst [vmem:[#allocation90_spill] sm:$0xff] %v11991_v34 }
0x103d   :  { %v11993_v35 = vpop.permute.xlu1 %5054  ;;  %v5126_v5 = vpop.permute.xlu0 %5125 }
0x103e   :  { %15102 = vst [vmem:[#allocation88_spill] sm:$0xff] %v11993_v35  ;;  %v5157_v29 = vmul.f32 0.0, %v5126_v5 }
0x1040   :  { %5175 = vrot.lane.b32.xlu0 %v5157_v29, %s14920_s19 }
0x1041   :  { %v5128_v31 = vpop.permute.xlu1 %5127  ;;  %v5130_v0 = vpop.permute.xlu0 %5129 }
0x1042   :  { %v5141_v44 = vsel %vm810_vm3, %v5126_v5, %v5128_v31  ;;  %v5142_v12 = vsel %vm810_vm3, %v5128_v31, %v5130_v0  ;;  %v9029_v5 = vld [vmem:[%s14444_s13 + $0x4] ss:$8 sm:$0xf0] }
0x1043   :  { %v5158_v51 = vmul.f32 %v5141_v44, %v11786_v46  ;;  %v5159_v6 = vmul.f32 %v5142_v12, %v11792_v1  ;;  %v5228_v44 = vor.u32 %v9029_v5, %v9028_v15 }
0x1045   :  { %v5132_v14 = vpop.permute.xlu1 %5131  ;;  %5177 = vrot.lane.b32.xlu1 %v5158_v51, %s14920_s19  ;;  %5179 = vrot.lane.b32.xlu0 %v5159_v6, %s14920_s19  ;;  %v5134_v37 = vpop.permute.xlu0 %5133 }
0x1046   :  { %v5143_v48 = vsel %vm810_vm3, %v5130_v0, %v5132_v14  ;;  %v5144_v49 = vsel %vm810_vm3, %v5132_v14, %v5134_v37  ;;  %v5233_v14 = vrot.slane %v5228_v44, %v15071_v27 }
0x1047   :  { %v5160_v50 = vmul.f32 %v5143_v48, %v11794_v42  ;;  %v5161_v21 = vmul.f32 %v5144_v49, %v11801_v58  ;;  %v5241_v48 = vrot.slane %v5228_v44, %v15072_v7  ;;  %v5245_v49 = vrot.slane %v5228_v44, %v15070_v56 }
0x1049   :  { %v5136_v23 = vpop.permute.xlu1 %5135  ;;  %5181 = vrot.lane.b32.xlu1 %v5160_v50, %s14920_s19  ;;  %5183 = vrot.lane.b32.xlu0 %v5161_v21, %s14920_s19  ;;  %v5138_v33 = vpop.permute.xlu0 %5137  ;;  %v5249_v50 = vrot.slane %v5228_v44, %v14939_v40  ;;  %v5253_v21 = vrot.slane %v5228_v44, %v9241_v13 }
0x104a   :  { %v5145_v53 = vsel %vm810_vm3, %v5134_v37, %v5136_v23  ;;  %v5146_v41 = vsel %vm810_vm3, %v5136_v23, %v5138_v33  ;;  %v5237_v37 = vrot.slane %v5228_v44, %v15069_v11  ;;  %v5257_v23 = vrot.slane %v5228_v44, %v9251_v18 }
0x104b   :  { %v5162_v29 = vmul.f32 %v5145_v53, %v11803_v47  ;;  %v5163_v31 = vmul.f32 %v5146_v41, %v11817_v2 }
0x104d   :  { %v5140_v0 = vpop.permute.xlu1 %5139  ;;  %5185 = vrot.lane.b32.xlu1 %v5162_v29, %s14920_s19  ;;  %5187 = vrot.lane.b32.xlu0 %v5163_v31, %s14920_s19 }
0x104e   :  { %v5147_v12 = vsel %vm810_vm3, %v5138_v33, %v5140_v0  ;;  %v5165_v51 = vmul.f32 %v5140_v0, %v11827_v10  ;;  %v5261_v33 = vrot.slane %v5228_v44, %v14884_v52 }
0x104f   :  { %v5164_v6 = vmul.f32 %v5147_v12, %v11819_v63 }
0x1051   :  { %5189 = vrot.lane.b32.xlu1 %v5164_v6, %s14920_s19  ;;  %5191 = vrot.lane.b32.xlu0 %v5165_v51, %s14920_s19 }
0x1055   :  { %5262 = vrot.lane.b32.xlu1 %v5233_v14, %s14921_s27  ;;  %5264 = vrot.lane.b32.xlu0 %v5237_v37, %s14921_s27 }
0x1059   :  { %5266 = vrot.lane.b32.xlu1 %v5241_v48, %s14921_s27  ;;  %5268 = vrot.lane.b32.xlu0 %v5245_v49, %s14921_s27 }
0x105d   :  { %5270 = vrot.lane.b32.xlu1 %v5249_v50, %s14921_s27  ;;  %5272 = vrot.lane.b32.xlu0 %v5253_v21, %s14921_s27 }
0x1061   :  { %5274 = vrot.lane.b32.xlu1 %v5257_v23, %s14921_s27  ;;  %5276 = vrot.lane.b32.xlu0 %v5261_v33, %s14921_s27 }
0x10b2   :  { %v12041_v53 = vpop.permute.xlu0 %5175 }
0x10b3   :  { %15103 = vst [vmem:[#allocation107_spill] sm:$0xff] %v12041_v53 }
0x10b7   :  { %v12043_v41 = vpop.permute.xlu1 %5177  ;;  %v12045_v15 = vpop.permute.xlu0 %5179 }
0x10b8   :  { %15104 = vst [vmem:[#allocation105_spill] sm:$0xff] %v12043_v41  ;;  %15105 = vst [vmem:[#allocation86_spill] sm:$0xff] %v12045_v15 }
0x10bb   :  { %v12047_v5 = vpop.permute.xlu1 %5181  ;;  %v12049_v29 = vpop.permute.xlu0 %5183 }
0x10bc   :  { %15106 = vst [vmem:[#allocation83_spill] sm:$0xff] %v12047_v5  ;;  %15107 = vst [vmem:[#allocation84_spill] sm:$0xff] %v12049_v29 }
0x10bf   :  { %v12051_v31 = vpop.permute.xlu1 %5185  ;;  %v12053_v0 = vpop.permute.xlu0 %5187 }
0x10c0   :  { %15108 = vst [vmem:[#allocation79_spill] sm:$0xff] %v12051_v31  ;;  %15109 = vst [vmem:[#allocation80_spill] sm:$0xff] %v12053_v0 }
0x10c3   :  { %v12055_v12 = vpop.permute.xlu1 %5189  ;;  %v12057_v44 = vpop.permute.xlu0 %5191 }
0x10c4   :  { %15110 = vst [vmem:[#allocation78_spill] sm:$0xff] %v12055_v12  ;;  %15111 = vst [vmem:[#allocation101_spill] sm:$0xff] %v12057_v44 }
0x10c7   :  { %v5263_v51 = vpop.permute.xlu1 %5262  ;;  %v5265_v6 = vpop.permute.xlu0 %5264 }
0x10c8   :  { %v5294_v14 = vmul.f32 0.0, %v5263_v51  ;;  %v5278_v37 = vsel %vm950_vm4, %v5263_v51, %v5265_v6 }
0x10c9   :  { %v5295_v48 = vmul.f32 %v5278_v37, %v11786_v46 }
0x10ca   :  { %5312 = vrot.lane.b32.xlu1 %v5294_v14, %s14921_s27 }
0x10cb   :  { %v5267_v49 = vpop.permute.xlu1 %5266  ;;  %5314 = vrot.lane.b32.xlu0 %v5295_v48, %s14921_s27  ;;  %v5269_v50 = vpop.permute.xlu0 %5268  ;;  %v9031_v48 = vld [vmem:[%s14444_s13 + $0x5] ss:$8 sm:$0xf0] }
0x10cc   :  { %v5279_v21 = vsel %vm950_vm4, %v5265_v6, %v5267_v49  ;;  %v5280_v23 = vsel %vm950_vm4, %v5267_v49, %v5269_v50  ;;  %v9030_v6 = vld [vmem:[%s14444_s13 + $0x5] ss:$8 sm:$0xf] }
0x10cd   :  { %v5296_v33 = vmul.f32 %v5279_v21, %v11792_v1  ;;  %v5297_v17 = vmul.f32 %v5280_v23, %v11794_v42 }
0x10cf   :  { %v5271_v19 = vpop.permute.xlu1 %5270  ;;  %5316 = vrot.lane.b32.xlu1 %v5296_v33, %s14921_s27  ;;  %5318 = vrot.lane.b32.xlu0 %v5297_v17, %s14921_s27  ;;  %v5273_v51 = vpop.permute.xlu0 %5272 }
0x10d0   :  { %v5281_v14 = vsel %vm950_vm4, %v5269_v50, %v5271_v19  ;;  %v5282_v37 = vsel %vm950_vm4, %v5271_v19, %v5273_v51  ;;  %v5365_v50 = vor.u32 %v9031_v48, %v9030_v6 }
0x10d1   :  { %v5298_v49 = vmul.f32 %v5281_v14, %v11801_v58  ;;  %v5299_v21 = vmul.f32 %v5282_v37, %v11803_v47 }
0x10d2   :  { %v5370_v14 = vrot.slane %v5365_v50, %v15071_v27  ;;  %v5378_v6 = vrot.slane %v5365_v50, %v15072_v7  ;;  %v5390_v48 = vrot.slane %v5365_v50, %v9241_v13 }
0x10d3   :  { %v5275_v23 = vpop.permute.xlu1 %5274  ;;  %5320 = vrot.lane.b32.xlu1 %v5298_v49, %s14921_s27  ;;  %5322 = vrot.lane.b32.xlu0 %v5299_v21, %s14921_s27  ;;  %v5277_v17 = vpop.permute.xlu0 %5276  ;;  %v5394_v49 = vrot.slane %v5365_v50, %v9251_v18  ;;  %v5398_v21 = vrot.slane %v5365_v50, %v14884_v52 }
0x10d4   :  { %v5283_v19 = vsel %vm950_vm4, %v5273_v51, %v5275_v23  ;;  %v5284_v33 = vsel %vm950_vm4, %v5275_v23, %v5277_v17  ;;  %v5302_v37 = vmul.f32 %v5277_v17, %v11827_v10  ;;  %v5374_v51 = vrot.slane %v5365_v50, %v15069_v11 }
0x10d5   :  { %v5300_v36 = vmul.f32 %v5283_v19, %v11817_v2  ;;  %v5301_v16 = vmul.f32 %v5284_v33, %v11819_v63 }
0x10d7   :  { %5324 = vrot.lane.b32.xlu1 %v5300_v36, %s14921_s27  ;;  %5326 = vrot.lane.b32.xlu0 %v5301_v16, %s14921_s27  ;;  %v5382_v36 = vrot.slane %v5365_v50, %v15070_v56  ;;  %v5386_v16 = vrot.slane %v5365_v50, %v14939_v40 }
0x10db   :  { %5328 = vrot.lane.b32.xlu1 %v5302_v37, %s14921_s27  ;;  %5399 = vrot.lane.b32.xlu0 %v5370_v14, %s14920_s19 }
0x10df   :  { %5401 = vrot.lane.b32.xlu1 %v5374_v51, %s14920_s19  ;;  %5403 = vrot.lane.b32.xlu0 %v5378_v6, %s14920_s19 }
0x10e3   :  { %5405 = vrot.lane.b32.xlu1 %v5382_v36, %s14920_s19  ;;  %5407 = vrot.lane.b32.xlu0 %v5386_v16, %s14920_s19 }
0x10e7   :  { %5409 = vrot.lane.b32.xlu1 %v5390_v48, %s14920_s19  ;;  %5411 = vrot.lane.b32.xlu0 %v5394_v49, %s14920_s19 }
0x10eb   :  { %5413 = vrot.lane.b32.xlu1 %v5398_v21, %s14920_s19 }
0x113c   :  { %v12105_v23 = vpop.permute.xlu1 %5312 }
0x113d   :  { %15112 = vst [vmem:[#allocation102_spill] sm:$0xff] %v12105_v23  ;;  %v12107_v17 = vpop.permute.xlu0 %5314 }
0x113e   :  { %15113 = vst [vmem:[#allocation76_spill] sm:$0xff] %v12107_v17 }
0x1141   :  { %v12109_v19 = vpop.permute.xlu1 %5316  ;;  %v12111_v33 = vpop.permute.xlu0 %5318 }
0x1142   :  { %15114 = vst [vmem:[#allocation73_spill] sm:$0xff] %v12109_v19  ;;  %15115 = vst [vmem:[#allocation74_spill] sm:$0xff] %v12111_v33 }
0x1145   :  { %v12113_v14 = vpop.permute.xlu1 %5320  ;;  %v12115_v37 = vpop.permute.xlu0 %5322 }
0x1146   :  { %15116 = vst [vmem:[#allocation97_spill] sm:$0xff] %v12113_v14  ;;  %15117 = vst [vmem:[#allocation95_spill] sm:$0xff] %v12115_v37 }
0x1149   :  { %v12117_v51 = vpop.permute.xlu1 %5324  ;;  %v12119_v6 = vpop.permute.xlu0 %5326 }
0x114a   :  { %15118 = vst [vmem:[#allocation68_spill] sm:$0xff] %v12117_v51  ;;  %15119 = vst [vmem:[#allocation69_spill] sm:$0xff] %v12119_v6 }
0x114d   :  { %v12121_v36 = vpop.permute.xlu1 %5328  ;;  %v5400_v50 = vpop.permute.xlu0 %5399 }
0x114e   :  { %15120 = vst [vmem:[#allocation66_spill] sm:$0xff] %v12121_v36  ;;  %v5431_v16 = vmul.f32 0.0, %v5400_v50 }
0x1150   :  { %5449 = vrot.lane.b32.xlu0 %v5431_v16, %s14913_s20 }
0x1151   :  { %v5402_v48 = vpop.permute.xlu1 %5401  ;;  %v5404_v49 = vpop.permute.xlu0 %5403 }
0x1152   :  { %v5415_v21 = vsel %vm863_vm5, %v5400_v50, %v5402_v48  ;;  %v5416_v38 = vsel %vm863_vm5, %v5402_v48, %v5404_v49 }
0x1153   :  { %v5432_v30 = vmul.f32 %v5415_v21, %v11786_v46  ;;  %v5433_v34 = vmul.f32 %v5416_v38, %v11792_v1 }
0x1155   :  { %v5406_v35 = vpop.permute.xlu1 %5405  ;;  %5451 = vrot.lane.b32.xlu1 %v5432_v30, %s14913_s20  ;;  %5453 = vrot.lane.b32.xlu0 %v5433_v34, %s14913_s20  ;;  %v5408_v12 = vpop.permute.xlu0 %5407  ;;  %v9032_v34 = vld [vmem:[%s14444_s13 + $0x6] ss:$8 sm:$0xf] }
0x1156   :  { %v5417_v44 = vsel %vm863_vm5, %v5404_v49, %v5406_v35  ;;  %v5418_v16 = vsel %vm863_vm5, %v5406_v35, %v5408_v12  ;;  %v9033_v35 = vld [vmem:[%s14444_s13 + $0x6] ss:$8 sm:$0xf0] }
0x1157   :  { %v5434_v6 = vmul.f32 %v5417_v44, %v11794_v42  ;;  %v5435_v50 = vmul.f32 %v5418_v16, %v11801_v58 }
0x1159   :  { %v5410_v36 = vpop.permute.xlu1 %5409  ;;  %5455 = vrot.lane.b32.xlu1 %v5434_v6, %s14913_s20  ;;  %5457 = vrot.lane.b32.xlu0 %v5435_v50, %s14913_s20  ;;  %v5412_v38 = vpop.permute.xlu0 %5411 }
0x115a   :  { %v5419_v48 = vsel %vm863_vm5, %v5408_v12, %v5410_v36  ;;  %v5420_v30 = vsel %vm863_vm5, %v5410_v36, %v5412_v38  ;;  %v5502_v12 = vor.u32 %v9033_v35, %v9032_v34 }
0x115b   :  { %v5436_v44 = vmul.f32 %v5419_v48, %v11803_v47  ;;  %v5437_v49 = vmul.f32 %v5420_v30, %v11817_v2 }
0x115c   :  { %v5507_v50 = vrot.slane %v5502_v12, %v15071_v27  ;;  %v5511_v48 = vrot.slane %v5502_v12, %v15069_v11  ;;  %v5515_v30 = vrot.slane %v5502_v12, %v15072_v7  ;;  %v5523_v34 = vrot.slane %v5502_v12, %v14939_v40 }
0x115d   :  { %v5414_v6 = vpop.permute.xlu1 %5413  ;;  %5459 = vrot.lane.b32.xlu1 %v5436_v44, %s14913_s20  ;;  %5461 = vrot.lane.b32.xlu0 %v5437_v49, %s14913_s20  ;;  %v5527_v35 = vrot.slane %v5502_v12, %v9241_v13  ;;  %v5531_v44 = vrot.slane %v5502_v12, %v9251_v18  ;;  %v5535_v49 = vrot.slane %v5502_v12, %v14884_v52 }
0x115e   :  { %v5421_v36 = vsel %vm863_vm5, %v5412_v38, %v5414_v6  ;;  %v5439_v21 = vmul.f32 %v5414_v6, %v11827_v10  ;;  %v5519_v38 = vrot.slane %v5502_v12, %v15070_v56 }
0x115f   :  { %v5438_v16 = vmul.f32 %v5421_v36, %v11819_v63 }
0x1161   :  { %5463 = vrot.lane.b32.xlu1 %v5438_v16, %s14913_s20  ;;  %5465 = vrot.lane.b32.xlu0 %v5439_v21, %s14913_s20 }
0x1165   :  { %5536 = vrot.lane.b32.xlu1 %v5507_v50, %s14912_s26  ;;  %5538 = vrot.lane.b32.xlu0 %v5511_v48, %s14912_s26 }
0x1169   :  { %5540 = vrot.lane.b32.xlu1 %v5515_v30, %s14912_s26  ;;  %5542 = vrot.lane.b32.xlu0 %v5519_v38, %s14912_s26 }
0x116d   :  { %5544 = vrot.lane.b32.xlu1 %v5523_v34, %s14912_s26  ;;  %5546 = vrot.lane.b32.xlu0 %v5527_v35, %s14912_s26 }
0x1171   :  { %5548 = vrot.lane.b32.xlu1 %v5531_v44, %s14912_s26  ;;  %5550 = vrot.lane.b32.xlu0 %v5535_v49, %s14912_s26 }
0x11c2   :  { %v12169_v6 = vpop.permute.xlu0 %5449 }
0x11c3   :  { %15121 = vst [vmem:[#allocation91_spill] sm:$0xff] %v12169_v6 }
0x11c7   :  { %v12171_v36 = vpop.permute.xlu1 %5451  ;;  %v12173_v21 = vpop.permute.xlu0 %5453 }
0x11c8   :  { %15122 = vst [vmem:[#allocation92_spill] sm:$0xff] %v12171_v36  ;;  %15123 = vst [vmem:[#allocation63_spill] sm:$0xff] %v12173_v21 }
0x11cb   :  { %v12175_v16 = vpop.permute.xlu1 %5455  ;;  %v12177_v50 = vpop.permute.xlu0 %5457 }
0x11cc   :  { %15124 = vst [vmem:[#allocation60_spill] sm:$0xff] %v12175_v16  ;;  %15125 = vst [vmem:[#allocation61_spill] sm:$0xff] %v12177_v50 }
0x11cf   :  { %v12179_v48 = vpop.permute.xlu1 %5459  ;;  %v12181_v30 = vpop.permute.xlu0 %5461 }
0x11d0   :  { %15126 = vst [vmem:[#allocation87_spill] sm:$0xff] %v12179_v48  ;;  %15127 = vst [vmem:[#allocation85_spill] sm:$0xff] %v12181_v30 }
0x11d3   :  { %v12183_v38 = vpop.permute.xlu1 %5463  ;;  %v12185_v12 = vpop.permute.xlu0 %5465 }
0x11d4   :  { %15128 = vst [vmem:[#allocation52_spill] sm:$0xff] %v12183_v38  ;;  %15129 = vst [vmem:[#allocation53_spill] sm:$0xff] %v12185_v12 }
0x11d7   :  { %v5537_v34 = vpop.permute.xlu1 %5536  ;;  %v5539_v35 = vpop.permute.xlu0 %5538 }
0x11d8   :  { %v5568_v44 = vmul.f32 0.0, %v5537_v34  ;;  %v5552_v49 = vsel %vm15130_vm15, %v5537_v34, %v5539_v35  ;;  %vm15133_vm15 = vmmov %vm15132_vm6 }
0x11d9   :  { %v5569_v26 = vmul.f32 %v5552_v49, %v11786_v46 }
0x11da   :  { %5586 = vrot.lane.b32.xlu1 %v5568_v44, %s14905_s24 }
0x11db   :  { %v5541_v55 = vpop.permute.xlu1 %5540  ;;  %5588 = vrot.lane.b32.xlu0 %v5569_v26, %s14905_s24  ;;  %v5543_v59 = vpop.permute.xlu0 %5542  ;;  %v9034_v26 = vld [vmem:[%s14444_s13 + $0x7] ss:$8 sm:$0xf] }
0x11dc   :  { %v5553_v45 = vsel %vm15045_vm12, %v5539_v35, %v5541_v55  ;;  %v5554_v20 = vsel %vm15131_vm7, %v5541_v55, %v5543_v59  ;;  %v9035_v55 = vld [vmem:[%s14444_s13 + $0x7] ss:$8 sm:$0xf0]  ;;  %vm15134_vm12 = vmmov %vm15132_vm6 }
0x11dd   :  { %v5570_v38 = vmul.f32 %v5553_v45, %v11792_v1  ;;  %v5571_v12 = vmul.f32 %v5554_v20, %v11794_v42  ;;  %vm15135_vm7 = vmmov %vm15132_vm6 }
0x11df   :  { %v5545_v4 = vpop.permute.xlu1 %5544  ;;  %5590 = vrot.lane.b32.xlu1 %v5570_v38, %s14905_s24  ;;  %5592 = vrot.lane.b32.xlu0 %v5571_v12, %s14905_s24  ;;  %v5547_v34 = vpop.permute.xlu0 %5546  ;;  %v5639_v12 = vor.u32 %v9035_v55, %v9034_v26 }
0x11e0   :  { %v5555_v44 = vsel %vm15132_vm6, %v5543_v59, %v5545_v4  ;;  %v5556_v49 = vsel %vm15133_vm15, %v5545_v4, %v5547_v34  ;;  %vm15145_vm6 = vcmask 588800  }
0x11e1   :  { %v5572_v45 = vmul.f32 %v5555_v44, %v11801_v58  ;;  %v5573_v20 = vmul.f32 %v5556_v49, %v11803_v47  ;;  %v5644_v44 = vrot.slane %v5639_v12, %v15071_v27  ;;  %v5652_v26 = vrot.slane %v5639_v12, %v15072_v7  ;;  %vm15146_vm15 = vmmov %vm15145_vm6 }
0x11e2   :  { %v5664_v55 = vrot.slane %v5639_v12, %v9241_v13 }
0x11e3   :  { %v5549_v38 = vpop.permute.xlu1 %5548  ;;  %5594 = vrot.lane.b32.xlu1 %v5572_v45, %s14905_s24  ;;  %5596 = vrot.lane.b32.xlu0 %v5573_v20, %s14905_s24  ;;  %v5551_v59 = vpop.permute.xlu0 %5550  ;;  %v5668_v45 = vrot.slane %v5639_v12, %v9251_v18  ;;  %v5672_v20 = vrot.slane %v5639_v12, %v14884_v52 }
0x11e4   :  { %v5557_v4 = vsel %vm15134_vm12, %v5547_v34, %v5549_v38  ;;  %v5558_v35 = vsel %vm15135_vm7, %v5549_v38, %v5551_v59  ;;  %v5576_v49 = vmul.f32 %v5551_v59, %v11827_v10  ;;  %v5648_v34 = vrot.slane %v5639_v12, %v15069_v11  ;;  %vm15147_vm12 = vmmov %vm15145_vm6 }
0x11e5   :  { %v5574_v31 = vmul.f32 %v5557_v4, %v11817_v2  ;;  %v5575_v0 = vmul.f32 %v5558_v35, %v11819_v63  ;;  %vm15148_vm7 = vmmov %vm15145_vm6 }
0x11e7   :  { %5598 = vrot.lane.b32.xlu1 %v5574_v31, %s14905_s24  ;;  %5600 = vrot.lane.b32.xlu0 %v5575_v0, %s14905_s24  ;;  %v5656_v31 = vrot.slane %v5639_v12, %v15070_v56  ;;  %v5660_v0 = vrot.slane %v5639_v12, %v14939_v40 }
0x11eb   :  { %5602 = vrot.lane.b32.xlu1 %v5576_v49, %s14905_s24  ;;  %5673 = vrot.lane.b32.xlu0 %v5644_v44, %s9132_s21 }
0x11ef   :  { %5675 = vrot.lane.b32.xlu1 %v5648_v34, %s9132_s21  ;;  %5677 = vrot.lane.b32.xlu0 %v5652_v26, %s9132_s21 }
0x11f3   :  { %5679 = vrot.lane.b32.xlu1 %v5656_v31, %s9132_s21  ;;  %5681 = vrot.lane.b32.xlu0 %v5660_v0, %s9132_s21 }
0x11f7   :  { %5683 = vrot.lane.b32.xlu1 %v5664_v55, %s9132_s21  ;;  %5685 = vrot.lane.b32.xlu0 %v5668_v45, %s9132_s21 }
0x11fb   :  { %5687 = vrot.lane.b32.xlu1 %v5672_v20, %s9132_s21 }
0x124c   :  { %v12233_v38 = vpop.permute.xlu1 %5586 }
0x124d   :  { %15136 = vst [vmem:[#allocation50_spill] sm:$0xff] %v12233_v38  ;;  %v12235_v59 = vpop.permute.xlu0 %5588 }
0x124e   :  { %15137 = vst [vmem:[#allocation81_spill] sm:$0xff] %v12235_v59 }
0x1251   :  { %v12237_v4 = vpop.permute.xlu1 %5590  ;;  %v12239_v35 = vpop.permute.xlu0 %5592 }
0x1252   :  { %15138 = vst [vmem:[#allocation82_spill] sm:$0xff] %v12237_v4  ;;  %15139 = vst [vmem:[#allocation45_spill] sm:$0xff] %v12239_v35 }
0x1255   :  { %v12241_v44 = vpop.permute.xlu1 %5594  ;;  %v12243_v49 = vpop.permute.xlu0 %5596 }
0x1256   :  { %15140 = vst [vmem:[#allocation42_spill] sm:$0xff] %v12241_v44  ;;  %15141 = vst [vmem:[#allocation43_spill] sm:$0xff] %v12243_v49 }
0x1259   :  { %v12245_v34 = vpop.permute.xlu1 %5598  ;;  %v12247_v26 = vpop.permute.xlu0 %5600 }
0x125a   :  { %15142 = vst [vmem:[#allocation77_spill] sm:$0xff] %v12245_v34  ;;  %15143 = vst [vmem:[#allocation75_spill] sm:$0xff] %v12247_v26 }
0x125d   :  { %v12249_v31 = vpop.permute.xlu1 %5602  ;;  %v5674_v12 = vpop.permute.xlu0 %5673 }
0x125e   :  { %15144 = vst [vmem:[#allocation35_spill] sm:$0xff] %v12249_v31  ;;  %v5705_v0 = vmul.f32 0.0, %v5674_v12 }
0x1260   :  { %5723 = vrot.lane.b32.xlu0 %v5705_v0, %s9128_s22 }
0x1261   :  { %v5676_v55 = vpop.permute.xlu1 %5675  ;;  %v5678_v45 = vpop.permute.xlu0 %5677 }
0x1262   :  { %v5689_v20 = vsel %vm15145_vm6, %v5674_v12, %v5676_v55  ;;  %v5690_v37 = vsel %vm15146_vm15, %v5676_v55, %v5678_v45  ;;  %vm15149_vm15 = vmmov %vm15145_vm6 }
0x1263   :  { %v5706_v51 = vmul.f32 %v5689_v20, %v11786_v46  ;;  %v5707_v48 = vmul.f32 %v5690_v37, %v11792_v1 }
0x1265   :  { %v5680_v30 = vpop.permute.xlu1 %5679  ;;  %5725 = vrot.lane.b32.xlu1 %v5706_v51, %s9128_s22  ;;  %5727 = vrot.lane.b32.xlu0 %v5707_v48, %s9128_s22  ;;  %v5682_v26 = vpop.permute.xlu0 %5681  ;;  %v9036_v48 = vld [vmem:[%s14444_s13 + $0x40] ss:$8 sm:$0xf] }
0x1266   :  { %v5691_v31 = vsel %vm15147_vm12, %v5678_v45, %v5680_v30  ;;  %v5692_v0 = vsel %vm15148_vm7, %v5680_v30, %v5682_v26  ;;  %v9037_v30 = vld [vmem:[%s14444_s13 + $0x40] ss:$8 sm:$0xf0]  ;;  %vm15150_vm12 = vmmov %vm15145_vm6  ;;  %vm15195_vm7 = vcmask 1039360  }
0x1267   :  { %v5708_v49 = vmul.f32 %v5691_v31, %v11794_v42  ;;  %v5709_v12 = vmul.f32 %v5692_v0, %v11801_v58 }
0x1269   :  { %v5684_v34 = vpop.permute.xlu1 %5683  ;;  %5729 = vrot.lane.b32.xlu1 %v5708_v49, %s9128_s22  ;;  %5731 = vrot.lane.b32.xlu0 %v5709_v12, %s9128_s22  ;;  %v5686_v37 = vpop.permute.xlu0 %5685 }
0x126a   :  { %v5693_v55 = vsel %vm15145_vm6, %v5682_v26, %v5684_v34  ;;  %v5694_v51 = vsel %vm15149_vm15, %v5684_v34, %v5686_v37  ;;  %v5776_v26 = vor.u32 %v9037_v30, %v9036_v48  ;;  %vm15196_vm6 = vmmov %vm15195_vm7 }
0x126b   :  { %v5710_v31 = vmul.f32 %v5693_v55, %v11803_v47  ;;  %v5711_v45 = vmul.f32 %v5694_v51, %v11817_v2  ;;  %vm15198_vm15 = vmmov %vm15196_vm6 }
0x126c   :  { %v5781_v12 = vrot.slane %v5776_v26, %v15071_v27  ;;  %v5785_v55 = vrot.slane %v5776_v26, %v15069_v11  ;;  %v5789_v51 = vrot.slane %v5776_v26, %v15072_v7  ;;  %v5797_v48 = vrot.slane %v5776_v26, %v14939_v40 }
0x126d   :  { %v5688_v49 = vpop.permute.xlu1 %5687  ;;  %5733 = vrot.lane.b32.xlu1 %v5710_v31, %s9128_s22  ;;  %5735 = vrot.lane.b32.xlu0 %v5711_v45, %s9128_s22  ;;  %v5801_v30 = vrot.slane %v5776_v26, %v9241_v13  ;;  %v5805_v31 = vrot.slane %v5776_v26, %v9251_v18  ;;  %v5809_v45 = vrot.slane %v5776_v26, %v14884_v52 }
0x126e   :  { %v5695_v34 = vsel %vm15150_vm12, %v5686_v37, %v5688_v49  ;;  %v5713_v20 = vmul.f32 %v5688_v49, %v11827_v10  ;;  %v5793_v37 = vrot.slane %v5776_v26, %v15070_v56  ;;  %vm15199_vm12 = vmmov %vm15196_vm6 }
0x126f   :  { %v5712_v0 = vmul.f32 %v5695_v34, %v11819_v63 }
0x1271   :  { %5737 = vrot.lane.b32.xlu1 %v5712_v0, %s9128_s22  ;;  %5739 = vrot.lane.b32.xlu0 %v5713_v20, %s9128_s22 }
0x1275   :  { %5810 = vrot.lane.b32.xlu1 %v5781_v12, %s9131_s18  ;;  %5812 = vrot.lane.b32.xlu0 %v5785_v55, %s9131_s18 }
0x1279   :  { %5814 = vrot.lane.b32.xlu1 %v5789_v51, %s9131_s18  ;;  %5816 = vrot.lane.b32.xlu0 %v5793_v37, %s9131_s18 }
0x127d   :  { %5818 = vrot.lane.b32.xlu1 %v5797_v48, %s9131_s18  ;;  %5820 = vrot.lane.b32.xlu0 %v5801_v30, %s9131_s18 }
0x1281   :  { %5822 = vrot.lane.b32.xlu1 %v5805_v31, %s9131_s18  ;;  %5824 = vrot.lane.b32.xlu0 %v5809_v45, %s9131_s18 }
0x12d2   :  { %v12297_v49 = vpop.permute.xlu0 %5723 }
0x12d3   :  { %15151 = vst [vmem:[#allocation38_spill] sm:$0xff] %v12297_v49 }
0x12d7   :  { %v12299_v34 = vpop.permute.xlu1 %5725  ;;  %v12301_v20 = vpop.permute.xlu0 %5727 }
0x12d8   :  { %15152 = vst [vmem:[#allocation33_spill] sm:$0xff] %v12299_v34  ;;  %15153 = vst [vmem:[#allocation70_spill] sm:$0xff] %v12301_v20 }
0x12db   :  { %v12303_v0 = vpop.permute.xlu1 %5729  ;;  %v12305_v12 = vpop.permute.xlu0 %5731 }
0x12dc   :  { %15154 = vst [vmem:[#allocation71_spill] sm:$0xff] %v12303_v0  ;;  %15155 = vst [vmem:[#allocation32_spill] sm:$0xff] %v12305_v12 }
0x12df   :  { %v12307_v55 = vpop.permute.xlu1 %5733  ;;  %v12309_v51 = vpop.permute.xlu0 %5735 }
0x12e0   :  { %15156 = vst [vmem:[#allocation27_spill] sm:$0xff] %v12307_v55  ;;  %15157 = vst [vmem:[#allocation30_spill] sm:$0xff] %v12309_v51 }
0x12e3   :  { %v12311_v37 = vpop.permute.xlu1 %5737  ;;  %v12313_v26 = vpop.permute.xlu0 %5739 }
0x12e4   :  { %15158 = vst [vmem:[#allocation64_spill] sm:$0xff] %v12311_v37  ;;  %15159 = vst [vmem:[#allocation62_spill] sm:$0xff] %v12313_v26 }
0x12e7   :  { %v5811_v48 = vpop.permute.xlu1 %5810  ;;  %v5813_v30 = vpop.permute.xlu0 %5812 }
0x12e8   :  { %v5842_v31 = vmul.f32 0.0, %v5811_v48  ;;  %v5826_v45 = vsel %vm443_vm8, %v5811_v48, %v5813_v30 }
0x12e9   :  { %v5843_v9 = vmul.f32 %v5826_v45, %v11786_v46 }
0x12ea   :  { %5860 = vrot.lane.b32.xlu1 %v5842_v31, %s9127_s17 }
0x12eb   :  { %v5815_v22 = vpop.permute.xlu1 %5814  ;;  %5862 = vrot.lane.b32.xlu0 %v5843_v9, %s9127_s17  ;;  %v5817_v3 = vpop.permute.xlu0 %5816  ;;  %v9038_v9 = vld [vmem:[%s14444_s13 + $0x41] ss:$8 sm:$0xf] }
0x12ec   :  { %v5827_v55 = vsel %vm443_vm8, %v5813_v30, %v5815_v22  ;;  %v5828_v51 = vsel %vm443_vm8, %v5815_v22, %v5817_v3  ;;  %v9039_v22 = vld [vmem:[%s14444_s13 + $0x41] ss:$8 sm:$0xf0] }
0x12ed   :  { %v5844_v37 = vmul.f32 %v5827_v55, %v11792_v1  ;;  %v5845_v26 = vmul.f32 %v5828_v51, %v11794_v42 }
0x12ef   :  { %v5819_v57 = vpop.permute.xlu1 %5818  ;;  %5864 = vrot.lane.b32.xlu1 %v5844_v37, %s9127_s17  ;;  %5866 = vrot.lane.b32.xlu0 %v5845_v26, %s9127_s17  ;;  %v5821_v48 = vpop.permute.xlu0 %5820  ;;  %v5913_v26 = vor.u32 %v9039_v22, %v9038_v9 }
0x12f0   :  { %v5829_v31 = vsel %vm443_vm8, %v5817_v3, %v5819_v57  ;;  %v5830_v45 = vsel %vm443_vm8, %v5819_v57, %v5821_v48 }
0x12f1   :  { %v5846_v55 = vmul.f32 %v5829_v31, %v11801_v58  ;;  %v5847_v51 = vmul.f32 %v5830_v45, %v11803_v47  ;;  %v5918_v31 = vrot.slane %v5913_v26, %v15071_v27  ;;  %v5926_v9 = vrot.slane %v5913_v26, %v15072_v7 }
0x12f2   :  { %v5938_v22 = vrot.slane %v5913_v26, %v9241_v13 }
0x12f3   :  { %v5823_v37 = vpop.permute.xlu1 %5822  ;;  %5868 = vrot.lane.b32.xlu1 %v5846_v55, %s9127_s17  ;;  %5870 = vrot.lane.b32.xlu0 %v5847_v51, %s9127_s17  ;;  %v5825_v3 = vpop.permute.xlu0 %5824  ;;  %v5942_v55 = vrot.slane %v5913_v26, %v9251_v18  ;;  %v5946_v51 = vrot.slane %v5913_v26, %v14884_v52 }
0x12f4   :  { %v5831_v57 = vsel %vm443_vm8, %v5821_v48, %v5823_v37  ;;  %v5832_v30 = vsel %vm443_vm8, %v5823_v37, %v5825_v3  ;;  %v5850_v45 = vmul.f32 %v5825_v3, %v11827_v10  ;;  %v5922_v48 = vrot.slane %v5913_v26, %v15069_v11 }
0x12f5   :  { %v5848_v60 = vmul.f32 %v5831_v57, %v11817_v2  ;;  %v5849_v39 = vmul.f32 %v5832_v30, %v11819_v63 }
0x12f7   :  { %5872 = vrot.lane.b32.xlu1 %v5848_v60, %s9127_s17  ;;  %5874 = vrot.lane.b32.xlu0 %v5849_v39, %s9127_s17  ;;  %v5930_v60 = vrot.slane %v5913_v26, %v15070_v56  ;;  %v5934_v39 = vrot.slane %v5913_v26, %v14939_v40 }
0x12fb   :  { %5876 = vrot.lane.b32.xlu1 %v5850_v45, %s9127_s17  ;;  %5947 = vrot.lane.b32.xlu0 %v5918_v31, %s9136_s25 }
0x12ff   :  { %5949 = vrot.lane.b32.xlu1 %v5922_v48, %s9136_s25  ;;  %5951 = vrot.lane.b32.xlu0 %v5926_v9, %s9136_s25 }
0x1303   :  { %5953 = vrot.lane.b32.xlu1 %v5930_v60, %s9136_s25  ;;  %5955 = vrot.lane.b32.xlu0 %v5934_v39, %s9136_s25 }
0x1307   :  { %5957 = vrot.lane.b32.xlu1 %v5938_v22, %s9136_s25  ;;  %5959 = vrot.lane.b32.xlu0 %v5942_v55, %s9136_s25 }
0x130b   :  { %5961 = vrot.lane.b32.xlu1 %v5946_v51, %s9136_s25 }
0x135c   :  { %v12361_v37 = vpop.permute.xlu1 %5860 }
0x135d   :  { %15160 = vst [vmem:[#allocation21_spill] sm:$0xff] %v12361_v37  ;;  %v12363_v3 = vpop.permute.xlu0 %5862 }
0x135e   :  { %15161 = vst [vmem:[#allocation24_spill] sm:$0xff] %v12363_v3 }
0x1361   :  { %v12365_v57 = vpop.permute.xlu1 %5864  ;;  %v12367_v30 = vpop.permute.xlu0 %5866 }
0x1362   :  { %15162 = vst [vmem:[#allocation19_spill] sm:$0xff] %v12365_v57  ;;  %15163 = vst [vmem:[#allocation54_spill] sm:$0xff] %v12367_v30  ;;  %v9052_v30 = vld [vmem:[%s14444_s13 + $0x80] ss:$8 sm:$0xf] }
0x1365   :  { %v12369_v31 = vpop.permute.xlu1 %5868  ;;  %v12371_v45 = vpop.permute.xlu0 %5870 }
0x1366   :  { %15164 = vst [vmem:[#allocation55_spill] sm:$0xff] %v12369_v31  ;;  %15165 = vst [vmem:[#allocation46_spill] sm:$0xff] %v12371_v45 }
0x1369   :  { %v12373_v48 = vpop.permute.xlu1 %5872  ;;  %v12375_v9 = vpop.permute.xlu0 %5874 }
0x136a   :  { %15166 = vst [vmem:[#allocation44_spill] sm:$0xff] %v12373_v48  ;;  %15167 = vst [vmem:[#allocation16_spill] sm:$0xff] %v12375_v9 }
0x136d   :  { %v12377_v60 = vpop.permute.xlu1 %5876  ;;  %v5948_v26 = vpop.permute.xlu0 %5947 }
0x136e   :  { %15168 = vst [vmem:[#allocation39_spill] sm:$0xff] %v12377_v60  ;;  %v5979_v39 = vmul.f32 0.0, %v5948_v26 }
0x1370   :  { %5997 = vrot.lane.b32.xlu0 %v5979_v39, %s15169_s15 }
0x1371   :  { %v5950_v22 = vpop.permute.xlu1 %5949  ;;  %v5952_v55 = vpop.permute.xlu0 %5951 }
0x1372   :  { %v5963_v51 = vsel %vm1641_vm9, %v5948_v26, %v5950_v22  ;;  %v5964_v5 = vsel %vm1641_vm9, %v5950_v22, %v5952_v55 }
0x1373   :  { %v5980_v29 = vmul.f32 %v5963_v51, %v11786_v46  ;;  %v5981_v45 = vmul.f32 %v5964_v5, %v11792_v1 }
0x1375   :  { %v5954_v33 = vpop.permute.xlu1 %5953  ;;  %5999 = vrot.lane.b32.xlu1 %v5980_v29, %s15169_s15  ;;  %6001 = vrot.lane.b32.xlu0 %v5981_v45, %s15169_s15  ;;  %v5956_v9 = vpop.permute.xlu0 %5955  ;;  %v9040_v45 = vld [vmem:[%s14444_s13 + $0x42] ss:$8 sm:$0xf] }
0x1376   :  { %v5965_v60 = vsel %vm1641_vm9, %v5952_v55, %v5954_v33  ;;  %v5966_v39 = vsel %vm1641_vm9, %v5954_v33, %v5956_v9  ;;  %v9041_v33 = vld [vmem:[%s14444_s13 + $0x42] ss:$8 sm:$0xf0] }
0x1377   :  { %v5982_v48 = vmul.f32 %v5965_v60, %v11794_v42  ;;  %v5983_v26 = vmul.f32 %v5966_v39, %v11801_v58 }
0x1379   :  { %v5958_v14 = vpop.permute.xlu1 %5957  ;;  %6003 = vrot.lane.b32.xlu1 %v5982_v48, %s15169_s15  ;;  %6005 = vrot.lane.b32.xlu0 %v5983_v26, %s15169_s15  ;;  %v5960_v5 = vpop.permute.xlu0 %5959 }
0x137a   :  { %v5967_v22 = vsel %vm1641_vm9, %v5956_v9, %v5958_v14  ;;  %v5968_v29 = vsel %vm1641_vm9, %v5958_v14, %v5960_v5  ;;  %v12404_v9 = vor.u32 %v9041_v33, %v9040_v45 }
0x137b   :  { %v5984_v60 = vmul.f32 %v5967_v22, %v11803_v47  ;;  %v5985_v55 = vmul.f32 %v5968_v29, %v11817_v2  ;;  %v9050_v29 = vld [vmem:[%s14444_s13 + $0x47] ss:$8 sm:$0xf] }
0x137c   :  { %v6055_v26 = vrot.slane %v12404_v9, %v15071_v27  ;;  %v6059_v22 = vrot.slane %v12404_v9, %v15069_v11  ;;  %v6063_v45 = vrot.slane %v12404_v9, %v15072_v7  ;;  %v6067_v33 = vrot.slane %v12404_v9, %v15070_v56 }
0x137d   :  { %v5962_v48 = vpop.permute.xlu1 %5961  ;;  %6007 = vrot.lane.b32.xlu1 %v5984_v60, %s15169_s15  ;;  %6009 = vrot.lane.b32.xlu0 %v5985_v55, %s15169_s15  ;;  %v9048_v55 = vld [vmem:[%s14444_s13 + $0x46] ss:$8 sm:$0xf] }
0x137e   :  { %v5969_v14 = vsel %vm1641_vm9, %v5960_v5, %v5962_v48  ;;  %v5987_v51 = vmul.f32 %v5962_v48, %v11827_v10  ;;  %v9051_v5 = vld [vmem:[%s14444_s13 + $0x47] ss:$8 sm:$0xf0]  ;;  %v9049_v48 = vld [vmem:[%s14444_s13 + $0x46] ss:$8 sm:$0xf0] }
0x137f   :  { %v5986_v39 = vmul.f32 %v5969_v14, %v11819_v63  ;;  %v12427_v60 = vor.u32 %v9051_v5, %v9050_v29  ;;  %v9071_v10 = vld [vmem:[%s14444_s13 + $0xc1] ss:$8 sm:$0xf0]  ;;  %v9069_v63 = vld [vmem:[%s14444_s13 + $0xc0] ss:$8 sm:$0xf0] }
0x1381   :  { %6011 = vrot.lane.b32.xlu1 %v5986_v39, %s15169_s15  ;;  %6013 = vrot.lane.b32.xlu0 %v5987_v51, %s15169_s15  ;;  %v6671_v14 = vrot.slane %v12427_v60, %v15071_v27  ;;  %v6675_v51 = vrot.slane %v12427_v60, %v15069_v11  ;;  %v12441_v39 = vor.u32 %v9049_v48, %v9048_v55 }
0x1382   :  { %v6683_v55 = vrot.slane %v12427_v60, %v15070_v56  ;;  %v6687_v48 = vrot.slane %v12427_v60, %v14939_v40  ;;  %v6691_v21 = vrot.slane %v12427_v60, %v9241_v13  ;;  %v6699_v3 = vrot.slane %v12427_v60, %v14884_v52 }
0x1383   :  { %v6538_v29 = vrot.slane %v12441_v39, %v15069_v11  ;;  %v6542_v5 = vrot.slane %v12441_v39, %v15072_v7  ;;  %v6554_v49 = vrot.slane %v12441_v39, %v9241_v13 }
0x1385   :  { %6084 = vrot.lane.b32.xlu1 %v6055_v26, %s15170_s28  ;;  %6086 = vrot.lane.b32.xlu0 %v6059_v22, %s15170_s28  ;;  %v6679_v26 = vrot.slane %v12427_v60, %v15072_v7  ;;  %v6534_v22 = vrot.slane %v12441_v39, %v15071_v27 }
0x1389   :  { %6088 = vrot.lane.b32.xlu1 %v6063_v45, %s15170_s28  ;;  %6090 = vrot.lane.b32.xlu0 %v6067_v33, %s15170_s28  ;;  %v9044_v45 = vld [vmem:[%s14444_s13 + $0x44] ss:$8 sm:$0xf] }
0x138a   :  { %v9045_v33 = vld [vmem:[%s14444_s13 + $0x44] ss:$8 sm:$0xf0] }
0x138d   :  { %6700 = vrot.lane.b32.xlu1 %v6671_v14, %s15171_s0  ;;  %6702 = vrot.lane.b32.xlu0 %v6675_v51, %s15171_s0  ;;  %v12467_v14 = vor.u32 %v9045_v33, %v9044_v45  ;;  %v6546_v45 = vrot.slane %v12441_v39, %v15070_v56 }
0x138f   :  { %v6329_v51 = vrot.slane %v12467_v14, %v15071_v27 }
0x1391   :  { %6704 = vrot.lane.b32.xlu1 %v6679_v26, %s15171_s0  ;;  %6563 = vrot.lane.b32.xlu0 %v6534_v22, %s15172_s4  ;;  %v6333_v26 = vrot.slane %v12467_v14, %v15069_v11  ;;  %v9042_v22 = vld [vmem:[%s14444_s13 + $0x43] ss:$8 sm:$0xf] }
0x1395   :  { %6565 = vrot.lane.b32.xlu1 %v6538_v29, %s15172_s4  ;;  %6567 = vrot.lane.b32.xlu0 %v6542_v5, %s15172_s4  ;;  %v9043_v29 = vld [vmem:[%s14444_s13 + $0x43] ss:$8 sm:$0xf0]  ;;  %v6337_v5 = vrot.slane %v12467_v14, %v15072_v7 }
0x1396   :  { %v12487_v33 = vor.u32 %v9043_v29, %v9042_v22  ;;  %v6341_v22 = vrot.slane %v12467_v14, %v15070_v56  ;;  %v6345_v29 = vrot.slane %v12467_v14, %v14939_v40 }
0x1399   :  { %6706 = vrot.lane.b32.xlu1 %v6683_v55, %s15171_s0  ;;  %6708 = vrot.lane.b32.xlu0 %v6687_v48, %s15171_s0  ;;  %v6550_v55 = vrot.slane %v12441_v39, %v14939_v40  ;;  %v6192_v48 = vrot.slane %v12487_v33, %v15071_v27 }
0x139d   :  { %6358 = vrot.lane.b32.xlu1 %v6329_v51, %s15173_s3  ;;  %6360 = vrot.lane.b32.xlu0 %v6333_v26, %s15173_s3  ;;  %v6196_v51 = vrot.slane %v12487_v33, %v15069_v11  ;;  %v6200_v26 = vrot.slane %v12487_v33, %v15072_v7 }
0x13a1   :  { %6362 = vrot.lane.b32.xlu1 %v6337_v5, %s15173_s3  ;;  %6569 = vrot.lane.b32.xlu0 %v6546_v45, %s15172_s4  ;;  %v9072_v5 = vld [vmem:[%s14444_s13 + $0xc2] ss:$8 sm:$0xf] }
0x13a2   :  { %v9073_v45 = vld [vmem:[%s14444_s13 + $0xc2] ss:$8 sm:$0xf0] }
0x13a5   :  { %6571 = vrot.lane.b32.xlu1 %v6550_v55, %s15172_s4  ;;  %6221 = vrot.lane.b32.xlu0 %v6192_v48, %s15174_s6  ;;  %v6204_v55 = vrot.slane %v12487_v33, %v15070_v56  ;;  %v6208_v48 = vrot.slane %v12487_v33, %v14939_v40 }
0x13a9   :  { %6223 = vrot.lane.b32.xlu1 %v6196_v51, %s15174_s6  ;;  %6225 = vrot.lane.b32.xlu0 %v6200_v26, %s15174_s6  ;;  %v12519_v51 = vor.u32 %v9073_v45, %v9072_v5  ;;  %v6071_v26 = vrot.slane %v12404_v9, %v14939_v40 }
0x13ab   :  { %v8182_v5 = vrot.slane %v12519_v51, %v15069_v11  ;;  %v8186_v45 = vrot.slane %v12519_v51, %v15072_v7 }
0x13ad   :  { %6364 = vrot.lane.b32.xlu1 %v6341_v22, %s15173_s3  ;;  %6366 = vrot.lane.b32.xlu0 %v6345_v29, %s15173_s3  ;;  %v8178_v22 = vrot.slane %v12519_v51, %v15071_v27  ;;  %v9070_v29 = vld [vmem:[%s14444_s13 + $0xc1] ss:$8 sm:$0xf] }
0x13b1   :  { %6227 = vrot.lane.b32.xlu1 %v6204_v55, %s15174_s6  ;;  %6229 = vrot.lane.b32.xlu0 %v6208_v48, %s15174_s6  ;;  %v12539_v55 = vor.u32 %v9071_v10, %v9070_v29  ;;  %v9068_v48 = vld [vmem:[%s14444_s13 + $0xc0] ss:$8 sm:$0xf] }
0x13b2   :  { %v12553_v10 = vor.u32 %v9069_v63, %v9068_v48  ;;  %v9066_v48 = vld [vmem:[%s14444_s13 + $0x87] ss:$8 sm:$0xf] }
0x13b3   :  { %v8049_v29 = vrot.slane %v12539_v55, %v15072_v7 }
0x13b4   :  { %v7912_v63 = vrot.slane %v12553_v10, %v15072_v7 }
0x13b5   :  { %6092 = vrot.lane.b32.xlu1 %v6071_v26, %s15170_s28  ;;  %8207 = vrot.lane.b32.xlu0 %v8178_v22, %s9131_s18  ;;  %v8041_v26 = vrot.slane %v12539_v55, %v15071_v27  ;;  %v8045_v22 = vrot.slane %v12539_v55, %v15069_v11 }
0x13b9   :  { %8209 = vrot.lane.b32.xlu1 %v8182_v5, %s9131_s18  ;;  %8211 = vrot.lane.b32.xlu0 %v8186_v45, %s9131_s18  ;;  %v7904_v5 = vrot.slane %v12553_v10, %v15071_v27  ;;  %v7908_v45 = vrot.slane %v12553_v10, %v15069_v11 }
0x13bd   :  { %8070 = vrot.lane.b32.xlu1 %v8041_v26, %s9132_s21  ;;  %8072 = vrot.lane.b32.xlu0 %v8045_v22, %s9132_s21  ;;  %v9067_v26 = vld [vmem:[%s14444_s13 + $0x87] ss:$8 sm:$0xf0]  ;;  %v8190_v22 = vrot.slane %v12519_v51, %v15070_v56 }
0x13c1   :  { %8074 = vrot.lane.b32.xlu1 %v8049_v29, %s9132_s21  ;;  %7933 = vrot.lane.b32.xlu0 %v7904_v5, %s14912_s26  ;;  %v8194_v29 = vrot.slane %v12519_v51, %v14939_v40  ;;  %v12579_v5 = vor.u32 %v9067_v26, %v9066_v48  ;;  %v8053_v26 = vrot.slane %v12539_v55, %v15070_v56 }
0x13c3   :  { %v7767_v2 = vrot.slane %v12579_v5, %v15071_v27  ;;  %v7775_v48 = vrot.slane %v12579_v5, %v15072_v7  ;;  %v7783_v16 = vrot.slane %v12579_v5, %v14939_v40 }
0x13c5   :  { %7935 = vrot.lane.b32.xlu1 %v7908_v45, %s14912_s26  ;;  %7937 = vrot.lane.b32.xlu0 %v7912_v63, %s14912_s26  ;;  %v7771_v45 = vrot.slane %v12579_v5, %v15069_v11  ;;  %v9064_v63 = vld [vmem:[%s14444_s13 + $0x86] ss:$8 sm:$0xf] }
0x13c9   :  { %8213 = vrot.lane.b32.xlu1 %v8190_v22, %s9131_s18  ;;  %8215 = vrot.lane.b32.xlu0 %v8194_v29, %s9131_s18  ;;  %v12599_v22 = vor.u32 %v9065_v62, %v9064_v63  ;;  %v8057_v29 = vrot.slane %v12539_v55, %v14939_v40  ;;  %v9062_v63 = vld [vmem:[%s14444_s13 + $0x85] ss:$8 sm:$0xf] }
0x13cb   :  { %v7638_v62 = vrot.slane %v12599_v22, %v15072_v7 }
0x13cd   :  { %7796 = vrot.lane.b32.xlu1 %v7767_v2, %s14920_s19  ;;  %7798 = vrot.lane.b32.xlu0 %v7771_v45, %s14920_s19  ;;  %v7630_v2 = vrot.slane %v12599_v22, %v15071_v27  ;;  %v7634_v45 = vrot.slane %v12599_v22, %v15069_v11 }
0x13d1   :  { %7800 = vrot.lane.b32.xlu1 %v7775_v48, %s14920_s19  ;;  %8076 = vrot.lane.b32.xlu0 %v8053_v26, %s9132_s21  ;;  %v9063_v48 = vld [vmem:[%s14444_s13 + $0x85] ss:$8 sm:$0xf0]  ;;  %v7916_v26 = vrot.slane %v12553_v10, %v15070_v56 }
0x13d5   :  { %8078 = vrot.lane.b32.xlu1 %v8057_v29, %s9132_s21  ;;  %7659 = vrot.lane.b32.xlu0 %v7630_v2, %s14921_s27  ;;  %v7920_v29 = vrot.slane %v12553_v10, %v14939_v40  ;;  %v12625_v2 = vor.u32 %v9063_v48, %v9062_v63  ;;  %v7779_v48 = vrot.slane %v12579_v5, %v15070_v56 }
0x13d7   :  { %v7493_v8 = vrot.slane %v12625_v2, %v15071_v27  ;;  %v7501_v63 = vrot.slane %v12625_v2, %v15072_v7 }
0x13d9   :  { %7661 = vrot.lane.b32.xlu1 %v7634_v45, %s14921_s27  ;;  %7663 = vrot.lane.b32.xlu0 %v7638_v62, %s14921_s27  ;;  %v7497_v45 = vrot.slane %v12625_v2, %v15069_v11  ;;  %v9060_v62 = vld [vmem:[%s14444_s13 + $0x84] ss:$8 sm:$0xf] }
0x13dd   :  { %7939 = vrot.lane.b32.xlu1 %v7916_v26, %s14912_s26  ;;  %7941 = vrot.lane.b32.xlu0 %v7920_v29, %s14912_s26  ;;  %v12645_v26 = vor.u32 %v9061_v32, %v9060_v62 }
0x13df   :  { %v7360_v32 = vrot.slane %v12645_v26, %v15069_v11  ;;  %v7364_v62 = vrot.slane %v12645_v26, %v15072_v7 }
0x13e1   :  { %7522 = vrot.lane.b32.xlu1 %v7493_v8, %s14913_s20  ;;  %7524 = vrot.lane.b32.xlu0 %v7497_v45, %s14913_s20  ;;  %v7356_v8 = vrot.slane %v12645_v26, %v15071_v27 }
0x13e2   :  { %v12647_v29 = vpop.permute.xlu0 %5997 }
0x13e3   :  { %15175 = vst [vmem:[#allocation15_spill] sm:$0xff] %v12647_v29 }
0x13e5   :  { %7526 = vrot.lane.b32.xlu1 %v7501_v63, %s14913_s20  ;;  %7802 = vrot.lane.b32.xlu0 %v7779_v48, %s14920_s19  ;;  %v9058_v63 = vld [vmem:[%s14444_s13 + $0x83] ss:$8 sm:$0xf] }
0x13e6   :  { %v9059_v48 = vld [vmem:[%s14444_s13 + $0x83] ss:$8 sm:$0xf0] }
0x13e7   :  { %v12655_v45 = vpop.permute.xlu1 %5999  ;;  %v12657_v50 = vpop.permute.xlu0 %6001  ;;  %v12681_v24 = vor.u32 %v9059_v48, %v9058_v63  ;;  %v9057_v63 = vld [vmem:[%s14444_s13 + $0x82] ss:$8 sm:$0xf0] }
0x13e8   :  { %15176 = vst [vmem:[#allocation29_spill] sm:$0xff] %v12655_v45  ;;  %15177 = vst [vmem:[#allocation12_spill] sm:$0xff] %v12657_v50  ;;  %v6216_v50 = vrot.slane %v12487_v33, %v9251_v18 }
0x13e9   :  { %7804 = vrot.lane.b32.xlu1 %v7783_v16, %s14920_s19  ;;  %7385 = vrot.lane.b32.xlu0 %v7356_v8, %s14905_s24  ;;  %v7642_v16 = vrot.slane %v12599_v22, %v15070_v56  ;;  %v7646_v8 = vrot.slane %v12599_v22, %v14939_v40 }
0x13eb   :  { %v12671_v61 = vpop.permute.xlu1 %6003  ;;  %v12673_v25 = vpop.permute.xlu0 %6005 }
0x13ec   :  { %15178 = vst [vmem:[#allocation26_spill] sm:$0xff] %v12671_v61  ;;  %15179 = vst [vmem:[#allocation126_spill] sm:$0xff] %v12673_v25 }
0x13ed   :  { %7387 = vrot.lane.b32.xlu1 %v7360_v32, %s14905_s24  ;;  %7389 = vrot.lane.b32.xlu0 %v7364_v62, %s14905_s24  ;;  %v7219_v32 = vrot.slane %v12681_v24, %v15071_v27  ;;  %v7223_v62 = vrot.slane %v12681_v24, %v15069_v11 }
0x13ef   :  { %v12683_v35 = vpop.permute.xlu1 %6007  ;;  %v12685_v44 = vpop.permute.xlu0 %6009 }
0x13f0   :  { %15180 = vst [vmem:[#allocation127_spill] sm:$0xff] %v12683_v35  ;;  %15181 = vst [vmem:[#allocation124_spill] sm:$0xff] %v12685_v44  ;;  %v12709_v44 = vor.u32 %v9057_v63, %v9056_v28 }
0x13f1   :  { %7665 = vrot.lane.b32.xlu1 %v7642_v16, %s14921_s27  ;;  %7667 = vrot.lane.b32.xlu0 %v7646_v8, %s14921_s27  ;;  %v7227_v16 = vrot.slane %v12681_v24, %v15072_v7  ;;  %v7505_v8 = vrot.slane %v12625_v2, %v15070_v56 }
0x13f2   :  { %15184 = vst [vmem:[#allocation119_spill] sm:$0xff] %v12709_v44  ;;  %v7086_v28 = vrot.slane %v12709_v44, %v15069_v11  ;;  %v7090_v63 = vrot.slane %v12709_v44, %v15072_v7  ;;  %v7094_v6 = vrot.slane %v12709_v44, %v15070_v56 }
0x13f3   :  { %v12699_v48 = vpop.permute.xlu1 %6011  ;;  %v12701_v35 = vpop.permute.xlu0 %6013 }
0x13f4   :  { %15182 = vst [vmem:[#allocation122_spill] sm:$0xff] %v12699_v48  ;;  %15183 = vst [vmem:[#allocation118_spill] sm:$0xff] %v12701_v35 }
0x13f5   :  { %7248 = vrot.lane.b32.xlu1 %v7219_v32, %s9128_s22  ;;  %7250 = vrot.lane.b32.xlu0 %v7223_v62, %s9128_s22  ;;  %v7509_v32 = vrot.slane %v12625_v2, %v14939_v40  ;;  %v7082_v62 = vrot.slane %v12709_v44, %v15071_v27 }
0x13f7   :  { %v12711_v43 = vpop.permute.xlu1 %6084  ;;  %v12713_v54 = vpop.permute.xlu0 %6086 }
0x13f9   :  { %7252 = vrot.lane.b32.xlu1 %v7227_v16, %s9128_s22  ;;  %7528 = vrot.lane.b32.xlu0 %v7505_v8, %s14913_s20  ;;  %v9054_v16 = vld [vmem:[%s14444_s13 + $0x81] ss:$8 sm:$0xf] }
0x13fa   :  { %v9055_v8 = vld [vmem:[%s14444_s13 + $0x81] ss:$8 sm:$0xf0] }
0x13fb   :  { %v12721_v48 = vpop.permute.xlu1 %6088  ;;  %v12723_v35 = vpop.permute.xlu0 %6090  ;;  %v12747_v53 = vor.u32 %v9055_v8, %v9054_v16  ;;  %v9053_v16 = vld [vmem:[%s14444_s13 + $0x80] ss:$8 sm:$0xf0] }
0x13fc   :  { %v12775_v23 = vor.u32 %v9053_v16, %v9052_v30 }
0x13fd   :  { %7530 = vrot.lane.b32.xlu1 %v7509_v32, %s14913_s20  ;;  %7111 = vrot.lane.b32.xlu0 %v7082_v62, %s9127_s17  ;;  %v7368_v32 = vrot.slane %v12645_v26, %v15070_v56  ;;  %v7372_v62 = vrot.slane %v12645_v26, %v14939_v40  ;;  %15185 = vst [vmem:[#allocation128_spill] sm:$0xff] %v12747_v53 }
0x13fe   :  { %15186 = vst [vmem:[#allocation129_spill] sm:$0xff] %v12775_v23  ;;  %v6812_v30 = vrot.slane %v12775_v23, %v15069_v11  ;;  %v6816_v16 = vrot.slane %v12775_v23, %v15072_v7  ;;  %v6957_v59 = vrot.slane %v12747_v53, %v15070_v56  ;;  %v6820_v20 = vrot.slane %v12775_v23, %v15070_v56 }
0x13ff   :  { %v12737_v0 = vpop.permute.xlu1 %6700  ;;  %v12739_v12 = vpop.permute.xlu0 %6702 }
0x1401   :  { %7113 = vrot.lane.b32.xlu1 %v7086_v28, %s9127_s17  ;;  %7115 = vrot.lane.b32.xlu0 %v7090_v63, %s9127_s17  ;;  %v6945_v28 = vrot.slane %v12747_v53, %v15071_v27  ;;  %v6949_v63 = vrot.slane %v12747_v53, %v15069_v11 }
0x1403   :  { %v12749_v41 = vpop.permute.xlu1 %6704  ;;  %v12751_v15 = vpop.permute.xlu0 %6563 }
0x1405   :  { %7391 = vrot.lane.b32.xlu1 %v7368_v32, %s14905_s24  ;;  %7393 = vrot.lane.b32.xlu0 %v7372_v62, %s14905_s24  ;;  %v6953_v32 = vrot.slane %v12747_v53, %v15072_v7  ;;  %v7231_v62 = vrot.slane %v12681_v24, %v15070_v56 }
0x1407   :  { %v12765_v8 = vpop.permute.xlu1 %6565  ;;  %v12767_v31 = vpop.permute.xlu0 %6567 }
0x1408   :  { %v6580_v7 = vsel %vm2114_vm13, %v12765_v8, %v12767_v31 }
0x1409   :  { %6974 = vrot.lane.b32.xlu1 %v6945_v28, %s15169_s15  ;;  %6976 = vrot.lane.b32.xlu0 %v6949_v63, %s15169_s15  ;;  %v7235_v28 = vrot.slane %v12681_v24, %v14939_v40  ;;  %v6808_v63 = vrot.slane %v12775_v23, %v15071_v27 }
0x140b   :  { %v12777_v17 = vpop.permute.xlu1 %6706  ;;  %v12779_v19 = vpop.permute.xlu0 %6708 }
0x140c   :  { %15187 = vst [vmem:[#allocation116_spill] sm:$0xff] %v12779_v19  ;;  %v6719_v27 = vsel %vm1974_vm14, %v12777_v17, %v12779_v19 }
0x140d   :  { %6978 = vrot.lane.b32.xlu1 %v6953_v32, %s15169_s15  ;;  %7254 = vrot.lane.b32.xlu0 %v7231_v62, %s9128_s22 }
0x140f   :  { %v12787_v61 = vpop.permute.xlu1 %6358  ;;  %v12789_v25 = vpop.permute.xlu0 %6360 }
0x1411   :  { %7256 = vrot.lane.b32.xlu1 %v7235_v28, %s9128_s22  ;;  %6837 = vrot.lane.b32.xlu0 %v6808_v63, %s15188_s1  ;;  %v7098_v28 = vrot.slane %v12709_v44, %v14939_v40 }
0x1413   :  { %v12797_v32 = vpop.permute.xlu1 %6362  ;;  %v12799_v62 = vpop.permute.xlu0 %6569 }
0x1414   :  { %v6581_v19 = vsel %vm2114_vm13, %v12767_v31, %v12799_v62  ;;  %v6083_v31 = vrot.slane %v12404_v9, %v14884_v52 }
0x1415   :  { %6839 = vrot.lane.b32.xlu1 %v6812_v30, %s15188_s1  ;;  %6841 = vrot.lane.b32.xlu0 %v6816_v16, %s15188_s1  ;;  %v6695_v30 = vrot.slane %v12427_v60, %v9251_v18 }
0x1417   :  { %v12807_v63 = vpop.permute.xlu1 %6571  ;;  %v12809_v36 = vpop.permute.xlu0 %6221 }
0x1418   :  { %15189 = vst [vmem:[#allocation9_spill] sm:$0xff] %v12807_v63 }
0x1419   :  { %7117 = vrot.lane.b32.xlu1 %v7094_v6, %s9127_s17  ;;  %7119 = vrot.lane.b32.xlu0 %v7098_v28, %s9127_s17  ;;  %v6961_v6 = vrot.slane %v12747_v53, %v14939_v40 }
0x141b   :  { %v12817_v16 = vpop.permute.xlu1 %6223  ;;  %v12819_v38 = vpop.permute.xlu0 %6225 }
0x141d   :  { %6710 = vrot.lane.b32.xlu1 %v6691_v21, %s15171_s0  ;;  %6712 = vrot.lane.b32.xlu0 %v6695_v30, %s15171_s0  ;;  %v6558_v21 = vrot.slane %v12441_v39, %v9251_v18 }
0x141f   :  { %v12827_v28 = vpop.permute.xlu1 %6364  ;;  %v12829_v4 = vpop.permute.xlu0 %6366 }
0x1420   :  { %15190 = vst [vmem:[#allocation125_spill] sm:$0xff] %v12829_v4 }
0x1421   :  { %6980 = vrot.lane.b32.xlu1 %v6957_v59, %s15169_s15  ;;  %6982 = vrot.lane.b32.xlu0 %v6961_v6, %s15169_s15  ;;  %v6824_v59 = vrot.slane %v12775_v23, %v14939_v40  ;;  %v6353_v40 = vrot.slane %v12467_v14, %v9251_v18  ;;  %v6716_v23 = vsel %vm1974_vm14, %v12737_v0, %v12739_v12 }
0x1423   :  { %v12837_v30 = vpop.permute.xlu1 %6227  ;;  %v12839_v34 = vpop.permute.xlu0 %6229 }
0x1424   :  { %15191 = vst [vmem:[#allocation123_spill] sm:$0xff] %v12839_v34 }
0x1425   :  { %6573 = vrot.lane.b32.xlu1 %v6554_v49, %s15172_s4  ;;  %6575 = vrot.lane.b32.xlu0 %v6558_v21, %s15172_s4  ;;  %v6349_v49 = vrot.slane %v12467_v14, %v9241_v13 }
0x1427   :  { %v12847_v6 = vpop.permute.xlu1 %6092  ;;  %v12849_v37 = vpop.permute.xlu0 %8207 }
0x1428   :  { %15192 = vst [vmem:[#allocation20_spill] sm:$0xff] %v12847_v6 }
0x1429   :  { %6843 = vrot.lane.b32.xlu1 %v6820_v20, %s15188_s1  ;;  %6845 = vrot.lane.b32.xlu0 %v6824_v59, %s15188_s1  ;;  %v6562_v20 = vrot.slane %v12441_v39, %v14884_v52 }
0x142b   :  { %v12857_v21 = vpop.permute.xlu1 %8209  ;;  %v12859_v57 = vpop.permute.xlu0 %8211 }
0x142d   :  { %6714 = vrot.lane.b32.xlu1 %v6699_v3, %s15171_s0  ;;  %6368 = vrot.lane.b32.xlu0 %v6349_v49, %s15173_s3  ;;  %v6717_v3 = vsel %vm1974_vm14, %v12739_v12, %v12749_v41  ;;  %v6733_v49 = vmul.f32 %v6716_v23, %v11792_v1  ;;  %v6579_v23 = vsel %vm2114_vm13, %v12751_v15, %v12765_v8 }
0x142e   :  { %v6734_v39 = vmul.f32 %v6717_v3, %v11794_v42  ;;  %v6732_v3 = vmul.f32 %v12737_v0, %v11786_v46  ;;  %v6357_v8 = vrot.slane %v12467_v14, %v14884_v52 }
0x142f   :  { %v12867_v59 = vpop.permute.xlu1 %8070  ;;  %v12869_v60 = vpop.permute.xlu0 %8072 }
0x1431   :  { %6370 = vrot.lane.b32.xlu1 %v6353_v40, %s15173_s3  ;;  %6577 = vrot.lane.b32.xlu0 %v6562_v20, %s15172_s4  ;;  %v6212_v40 = vrot.slane %v12487_v33, %v9241_v13 }
0x1433   :  { %v12881_v29 = vpop.permute.xlu1 %8074  ;;  %v12883_v45 = vpop.permute.xlu0 %7933 }
0x1435   :  { %6754 = vrot.lane.b32.xlu0 %v6734_v39, %s15174_s6  ;;  %6752 = vrot.lane.b32.xlu1 %v6733_v49, %s15174_s6  ;;  %v6596_v49 = vmul.f32 %v6579_v23, %v11792_v1 }
0x1437   :  { %v12891_v12 = vpop.permute.xlu1 %7935  ;;  %v12893_v20 = vpop.permute.xlu0 %7937 }
0x1439   :  { %6233 = vrot.lane.b32.xlu0 %v6216_v50, %s15174_s6  ;;  %6231 = vrot.lane.b32.xlu1 %v6212_v40, %s15174_s6  ;;  %v6075_v50 = vrot.slane %v12404_v9, %v9241_v13  ;;  %v6597_v40 = vmul.f32 %v6580_v7, %v11794_v42  ;;  %v6718_v7 = vsel %vm1974_vm14, %v12749_v41, %v12777_v17 }
0x143a   :  { %v6735_v14 = vmul.f32 %v6718_v7, %v11801_v58  ;;  %v6220_v41 = vrot.slane %v12487_v33, %v14884_v52  ;;  %v6374_v7 = vsel %vm15195_vm7, %v12787_v61, %v12789_v25  ;;  %v6375_v17 = vsel %vm15196_vm6, %v12789_v25, %v12797_v32 }
0x143b   :  { %v12903_v39 = vpop.permute.xlu1 %8213  ;;  %v12905_v53 = vpop.permute.xlu0 %8215  ;;  %v6391_v33 = vmul.f32 %v6374_v7, %v11786_v46  ;;  %v6582_v25 = vsel %vm2114_vm13, %v12799_v62, %v12807_v63  ;;  %v6390_v62 = vmul.f32 0.0, %v12787_v61  ;;  %v6100_v63 = vsel %vm1781_vm10, %v12711_v43, %v12713_v54 }
0x143c   :  { %15193 = vst [vmem:[#allocation36_spill] sm:$0xff] %v12905_v53  ;;  %vm15209_vm7 = vcmask 588800  }
0x143d   :  { %6750 = vrot.lane.b32.xlu1 %v6732_v3, %s15174_s6  ;;  %6615 = vrot.lane.b32.xlu0 %v6596_v49, %s15173_s3  ;;  %v6079_v3 = vrot.slane %v12404_v9, %v9251_v18  ;;  %vm15210_vm6 = vmmov %vm15209_vm7 }
0x143f   :  { %v12915_v0 = vpop.permute.xlu1 %7796  ;;  %v12917_v23 = vpop.permute.xlu0 %7798 }
0x1441   :  { %6094 = vrot.lane.b32.xlu0 %v6075_v50, %s15170_s28  ;;  %6617 = vrot.lane.b32.xlu1 %v6597_v40, %s15173_s3  ;;  %v6595_v50 = vmul.f32 %v12751_v15, %v11786_v46 }
0x1443   :  { %v12925_v49 = vpop.permute.xlu1 %7800  ;;  %v12927_v56 = vpop.permute.xlu0 %8076 }
0x1445   :  { %6372 = vrot.lane.b32.xlu0 %v6357_v8, %s15173_s3  ;;  %6096 = vrot.lane.b32.xlu1 %v6079_v3, %s15170_s28  ;;  %v6736_v8 = vmul.f32 %v6719_v27, %v11803_v47  ;;  %v6392_v27 = vmul.f32 %v6375_v17, %v11792_v1 }
0x1447   :  { %v12937_v40 = vpop.permute.xlu1 %8078  ;;  %v12939_v44 = vpop.permute.xlu0 %7659 }
0x1448   :  { %15194 = vst [vmem:[#allocation120_spill] sm:$0xff] %v12937_v40 }
0x1449   :  { %6756 = vrot.lane.b32.xlu0 %v6735_v14, %s15174_s6  ;;  %6613 = vrot.lane.b32.xlu1 %v6595_v50, %s15173_s3 }
0x144b   :  { %v12949_v15 = vpop.permute.xlu1 %7661  ;;  %v12951_v3 = vpop.permute.xlu0 %7663 }
0x144d   :  { %6235 = vrot.lane.b32.xlu0 %v6220_v41, %s15174_s6  ;;  %6758 = vrot.lane.b32.xlu1 %v6736_v8, %s15174_s6  ;;  %v6598_v41 = vmul.f32 %v6581_v19, %v11801_v58  ;;  %v6599_v8 = vmul.f32 %v6582_v25, %v11803_v47  ;;  %v6237_v19 = vsel %vm1921_vm11, %v12809_v36, %v12817_v16 }
0x144e   :  { %v6238_v25 = vsel %vm1921_vm11, %v12817_v16, %v12819_v38  ;;  %v6254_v9 = vmul.f32 %v6237_v19, %v11786_v46  ;;  %v6117_v16 = vmul.f32 %v6100_v63, %v11786_v46 }
0x144f   :  { %v12963_v50 = vpop.permute.xlu1 %7939  ;;  %v12965_v14 = vpop.permute.xlu0 %7941  ;;  %v6255_v61 = vmul.f32 %v6238_v25, %v11792_v1  ;;  %v6101_v25 = vsel %vm1781_vm10, %v12713_v54, %v12721_v48  ;;  %v6377_v54 = vsel %vm15199_vm12, %v12827_v28, %v12829_v4  ;;  %v8206_v4 = vrot.slane %v12519_v51, %v14884_v52 }
0x1450   :  { %v6118_v63 = vmul.f32 %v6101_v25, %v11792_v1 }
0x1451   :  { %6412 = vrot.lane.b32.xlu0 %v6392_v27, %s15172_s4  ;;  %6410 = vrot.lane.b32.xlu1 %v6391_v33, %s15172_s4 }
0x1453   :  { %v12977_v7 = vpop.permute.xlu1 %7522  ;;  %v12979_v17 = vpop.permute.xlu0 %7524 }
0x1455   :  { %6621 = vrot.lane.b32.xlu0 %v6599_v8, %s15173_s3  ;;  %6619 = vrot.lane.b32.xlu1 %v6598_v41, %s15173_s3 }
0x1457   :  { %v12986_v27 = vpop.permute.xlu1 %7526  ;;  %v12988_v33 = vpop.permute.xlu0 %7802 }
0x1459   :  { %6408 = vrot.lane.b32.xlu0 %v6390_v62, %s15172_s4  ;;  %6098 = vrot.lane.b32.xlu1 %v6083_v31, %s15170_s28  ;;  %v6253_v31 = vmul.f32 0.0, %v12809_v36 }
0x145b   :  { %v13000_v41 = vpop.permute.xlu1 %7804  ;;  %v13002_v8 = vpop.permute.xlu0 %7385 }
0x145c   :  { %15197 = vst [vmem:[#allocation121_spill] sm:$0xff] %v13002_v8  ;;  %v6376_v8 = vsel %vm15198_vm15, %v12797_v32, %v12827_v28  ;;  %v6116_v32 = vmul.f32 0.0, %v12711_v43  ;;  %v6240_v28 = vsel %vm1921_vm11, %v12837_v30, %v12839_v34  ;;  %vm15214_vm15 = vcmask 580608  }
0x145d   :  { %6273 = vrot.lane.b32.xlu1 %v6254_v9, %s15171_s0  ;;  %6275 = vrot.lane.b32.xlu0 %v6255_v61, %s15171_s0  ;;  %v6393_v36 = vmul.f32 %v6376_v8, %v11794_v42  ;;  %v6239_v8 = vsel %vm1921_vm11, %v12819_v38, %v12837_v30  ;;  %v6102_v38 = vsel %vm1781_vm10, %v12721_v48, %v12723_v35  ;;  %vm15215_vm12 = vmmov %vm15214_vm15 }
0x145e   :  { %v6256_v43 = vmul.f32 %v6239_v8, %v11794_v42  ;;  %v6103_v30 = vsel %vm1781_vm10, %v12723_v35, %v12847_v6  ;;  %v8198_v48 = vrot.slane %v12519_v51, %v9241_v13  ;;  %v8202_v35 = vrot.slane %v12519_v51, %v9251_v18 }
0x145f   :  { %v13011_v62 = vpop.permute.xlu1 %7387  ;;  %v13013_v19 = vpop.permute.xlu0 %7389  ;;  %v7924_v6 = vrot.slane %v12553_v10, %v9241_v13 }
0x1461   :  { %6271 = vrot.lane.b32.xlu1 %v6253_v31, %s15171_s0  ;;  %6136 = vrot.lane.b32.xlu0 %v6117_v16, %s15188_s1  ;;  %v6394_v16 = vmul.f32 %v6377_v54, %v11801_v58 }
0x1463   :  { %v13025_v9 = vpop.permute.xlu1 %7665  ;;  %v13027_v61 = vpop.permute.xlu0 %7667 }
0x1465   :  { %6138 = vrot.lane.b32.xlu1 %v6118_v63, %s15188_s1  ;;  %6414 = vrot.lane.b32.xlu0 %v6393_v36, %s15172_s4  ;;  %v6257_v63 = vmul.f32 %v6240_v28, %v11801_v58 }
0x1467   :  { %v13036_v31 = vpop.permute.xlu1 %7248  ;;  %v13038_v25 = vpop.permute.xlu0 %7250 }
0x1469   :  { %6134 = vrot.lane.b32.xlu0 %v6116_v32, %s15188_s1  ;;  %6416 = vrot.lane.b32.xlu1 %v6394_v16, %s15172_s4  ;;  %v6119_v32 = vmul.f32 %v6102_v38, %v11794_v42  ;;  %v6120_v16 = vmul.f32 %v6103_v30, %v11801_v58  ;;  %v8061_v38 = vrot.slane %v12539_v55, %v9241_v13 }
0x146a   :  { %v8065_v30 = vrot.slane %v12539_v55, %v9251_v18 }
0x146b   :  { %v13050_v36 = vpop.permute.xlu1 %7252  ;;  %v13052_v54 = vpop.permute.xlu0 %7528 }
0x146d   :  { %6277 = vrot.lane.b32.xlu1 %v6256_v43, %s15171_s0  ;;  %6279 = vrot.lane.b32.xlu0 %v6257_v63, %s15171_s0 }
0x146f   :  { %v13064_v8 = vpop.permute.xlu1 %7530  ;;  %v13066_v28 = vpop.permute.xlu0 %7111 }
0x1471   :  { %6140 = vrot.lane.b32.xlu1 %v6119_v32, %s15188_s1  ;;  %6142 = vrot.lane.b32.xlu0 %v6120_v16, %s15188_s1 }
0x1473   :  { %v13074_v43 = vpop.permute.xlu1 %7113  ;;  %v13076_v63 = vpop.permute.xlu0 %7115 }
0x1475   :  { %8217 = vrot.lane.b32.xlu1 %v8198_v48, %s9131_s18  ;;  %8219 = vrot.lane.b32.xlu0 %v8202_v35, %s9131_s18  ;;  %v7928_v48 = vrot.slane %v12553_v10, %v9251_v18 }
0x1477   :  { %v13084_v32 = vpop.permute.xlu1 %7391  ;;  %v13086_v16 = vpop.permute.xlu0 %7393 }
0x1478   :  { %15200 = vst [vmem:[#allocation14_spill] sm:$0xff] %v13086_v16 }
0x1479   :  { %8080 = vrot.lane.b32.xlu1 %v8061_v38, %s9132_s21  ;;  %8082 = vrot.lane.b32.xlu0 %v8065_v30, %s9132_s21  ;;  %v7787_v38 = vrot.slane %v12579_v5, %v9241_v13 }
0x147b   :  { %v13094_v35 = vpop.permute.xlu1 %6974  ;;  %v13096_v34 = vpop.permute.xlu0 %6976 }
0x147c   :  { %15201 = vst [vmem:[#allocation51_spill] sm:$0xff] %v13094_v35  ;;  %v7791_v35 = vrot.slane %v12579_v5, %v9251_v18 }
0x147d   :  { %7943 = vrot.lane.b32.xlu1 %v7924_v6, %s14912_s26  ;;  %7945 = vrot.lane.b32.xlu0 %v7928_v48, %s14912_s26  ;;  %v8069_v6 = vrot.slane %v12539_v55, %v14884_v52 }
0x147f   :  { %v13104_v30 = vpop.permute.xlu1 %6978  ;;  %v13106_v16 = vpop.permute.xlu0 %7254 }
0x1480   :  { %15202 = vst [vmem:[#allocation117_spill] sm:$0xff] %v13104_v30  ;;  %15203 = vst [vmem:[#allocation115_spill] sm:$0xff] %v13106_v16  ;;  %v8223_v30 = vsel %vm443_vm8, %v12849_v37, %v12857_v21 }
0x1481   :  { %8221 = vrot.lane.b32.xlu1 %v8206_v4, %s9131_s18  ;;  %7806 = vrot.lane.b32.xlu0 %v7787_v38, %s14920_s19  ;;  %v8224_v4 = vsel %vm443_vm8, %v12857_v21, %v12859_v57  ;;  %v8240_v38 = vmul.f32 %v8223_v30, %v11792_v1  ;;  %v7654_v21 = vrot.slane %v12599_v22, %v9251_v18 }
0x1482   :  { %v8241_v55 = vmul.f32 %v8224_v4, %v11794_v42  ;;  %v7932_v30 = vrot.slane %v12553_v10, %v14884_v52  ;;  %v8239_v4 = vmul.f32 %v12849_v37, %v11786_v46 }
0x1483   :  { %v13114_v48 = vpop.permute.xlu1 %7256  ;;  %v13116_v51 = vpop.permute.xlu0 %6837 }
0x1484   :  { %15204 = vst [vmem:[#allocation37_spill] sm:$0xff] %v13114_v48  ;;  %15205 = vst [vmem:[#allocation58_spill] sm:$0xff] %v13116_v51  ;;  %v7650_v51 = vrot.slane %v12599_v22, %v9241_v13 }
0x1485   :  { %7808 = vrot.lane.b32.xlu1 %v7791_v35, %s14920_s19  ;;  %8084 = vrot.lane.b32.xlu0 %v8069_v6, %s9132_s21 }
0x1487   :  { %v13128_v16 = vpop.permute.xlu1 %6839  ;;  %v13130_v48 = vpop.permute.xlu0 %6841 }
0x1489   :  { %8259 = vrot.lane.b32.xlu1 %v8240_v38, %s9127_s17  ;;  %8261 = vrot.lane.b32.xlu0 %v8241_v55, %s9127_s17 }
0x148b   :  { %v13138_v35 = vpop.permute.xlu1 %7117  ;;  %v13140_v6 = vpop.permute.xlu0 %7119 }
0x148c   :  { %15206 = vst [vmem:[#allocation11_spill] sm:$0xff] %v13138_v35  ;;  %v8086_v35 = vsel %vm15209_vm7, %v12867_v59, %v12869_v60  ;;  %vm15219_vm7 = vmmov %vm15210_vm6 }
0x148d   :  { %7669 = vrot.lane.b32.xlu1 %v7650_v51, %s14921_s27  ;;  %7671 = vrot.lane.b32.xlu0 %v7654_v21, %s14921_s27  ;;  %v8087_v51 = vsel %vm15210_vm6, %v12869_v60, %v12881_v29  ;;  %v8103_v10 = vmul.f32 %v8086_v35, %v11792_v1  ;;  %v7517_v60 = vrot.slane %v12625_v2, %v9251_v18 }
0x148e   :  { %v8104_v37 = vmul.f32 %v8087_v51, %v11794_v42  ;;  %v7795_v35 = vrot.slane %v12579_v5, %v14884_v52  ;;  %v8102_v51 = vmul.f32 %v12867_v59, %v11786_v46 }
0x148f   :  { %v13148_v38 = vpop.permute.xlu1 %6710  ;;  %v13150_v55 = vpop.permute.xlu0 %6712 }
0x1490   :  { %15207 = vst [vmem:[#allocation25_spill] sm:$0xff] %v13148_v38  ;;  %15208 = vst [vmem:[#allocation49_spill] sm:$0xff] %v13150_v55  ;;  %v7513_v55 = vrot.slane %v12625_v2, %v9241_v13 }
0x1491   :  { %7947 = vrot.lane.b32.xlu1 %v7932_v30, %s14912_s26  ;;  %8257 = vrot.lane.b32.xlu0 %v8239_v4, %s9127_s17 }
0x1493   :  { %v13162_v21 = vpop.permute.xlu1 %6980  ;;  %v13164_v38 = vpop.permute.xlu0 %6982 }
0x1495   :  { %8122 = vrot.lane.b32.xlu1 %v8103_v10, %s9128_s22  ;;  %8124 = vrot.lane.b32.xlu0 %v8104_v37, %s9128_s22 }
0x1497   :  { %v13172_v30 = vpop.permute.xlu1 %6573  ;;  %v13174_v4 = vpop.permute.xlu0 %6575 }
0x1498   :  { %15211 = vst [vmem:[#allocation72_spill] sm:$0xff] %v13172_v30  ;;  %v7949_v30 = vsel %vm15214_vm15, %v12883_v45, %v12891_v12  ;;  %vm15221_vm15 = vcmask 1039360  }
0x1499   :  { %7532 = vrot.lane.b32.xlu1 %v7513_v55, %s14913_s20  ;;  %7534 = vrot.lane.b32.xlu0 %v7517_v60, %s14913_s20  ;;  %v7950_v55 = vsel %vm15215_vm12, %v12891_v12, %v12893_v20  ;;  %v7966_v5 = vmul.f32 %v7949_v30, %v11792_v1  ;;  %v8226_v12 = vsel %vm443_vm8, %v12903_v39, %v12905_v53  ;;  %vm15225_vm12 = vmmov %vm15221_vm15 }
0x149a   :  { %v7967_v59 = vmul.f32 %v7950_v55, %v11794_v42 }
0x149b   :  { %v13182_v10 = vpop.permute.xlu1 %6843  ;;  %v13184_v37 = vpop.permute.xlu0 %6845 }
0x149c   :  { %15212 = vst [vmem:[#allocation40_spill] sm:$0xff] %v13182_v10  ;;  %15213 = vst [vmem:[#allocation23_spill] sm:$0xff] %v13184_v37  ;;  %v8225_v37 = vsel %vm443_vm8, %v12859_v57, %v12903_v39  ;;  %v7376_v57 = vrot.slane %v12645_v26, %v9241_v13  ;;  %v7380_v39 = vrot.slane %v12645_v26, %v9251_v18 }
0x149d   :  { %7810 = vrot.lane.b32.xlu1 %v7795_v35, %s14920_s19  ;;  %8120 = vrot.lane.b32.xlu0 %v8102_v51, %s9128_s22  ;;  %v8242_v30 = vmul.f32 %v8225_v37, %v11801_v58  ;;  %v8243_v35 = vmul.f32 %v8226_v12, %v11803_v47  ;;  %v7658_v12 = vrot.slane %v12599_v22, %v14884_v52 }
0x149f   :  { %v13196_v60 = vpop.permute.xlu1 %6714  ;;  %v13198_v10 = vpop.permute.xlu0 %6368 }
0x14a1   :  { %7985 = vrot.lane.b32.xlu1 %v7966_v5, %s14905_s24  ;;  %7987 = vrot.lane.b32.xlu0 %v7967_v59, %s14905_s24 }
0x14a3   :  { %v13210_v51 = vpop.permute.xlu1 %6370  ;;  %v13212_v55 = vpop.permute.xlu0 %6577 }
0x14a4   :  { %15216 = vst [vmem:[#allocation17_spill] sm:$0xff] %v13212_v55  ;;  %v7812_v55 = vsel %vm863_vm5, %v12915_v0, %v12917_v23 }
0x14a5   :  { %8263 = vrot.lane.b32.xlu1 %v8242_v30, %s9127_s17  ;;  %8265 = vrot.lane.b32.xlu0 %v8243_v35, %s9127_s17  ;;  %v7965_v30 = vmul.f32 %v12883_v45, %v11786_v46  ;;  %v7829_v22 = vmul.f32 %v7812_v55, %v11792_v1  ;;  %v9046_v55 = vld [vmem:[%s14444_s13 + $0x45] ss:$8 sm:$0xf] }
0x14a7   :  { %v6753_v5 = vpop.permute.xlu1 %6752  ;;  %v13220_v59 = vpop.permute.xlu0 %6754 }
0x14a8   :  { %v6769_v37 = vsel %vm1921_vm11, %v6753_v5, %v13220_v59 }
0x14a9   :  { %7395 = vrot.lane.b32.xlu1 %v7376_v57, %s14905_s24  ;;  %7397 = vrot.lane.b32.xlu0 %v7380_v39, %s14905_s24  ;;  %v7813_v57 = vsel %vm863_vm5, %v12917_v23, %v12925_v49 }
0x14aa   :  { %8563 = vmatprep.subr.mxu0 %v6769_v37  ;;  %v7830_v45 = vmul.f32 %v7813_v57, %v11794_v42 }
0x14ab   :  { %v13230_v35 = vpop.permute.xlu1 %6231  ;;  %v13232_v53 = vpop.permute.xlu0 %6233 }
0x14ac   :  { %15217 = vst [vmem:[#allocation31_spill] sm:$0xff] %v13230_v35  ;;  %15218 = vst [vmem:[#allocation67_spill] sm:$0xff] %v13232_v53  ;;  %v8088_v53 = vsel %vm15219_vm7, %v12881_v29, %v12927_v56  ;;  %v8089_v35 = vsel %vm15210_vm6, %v12927_v56, %v12937_v40  ;;  %vm15226_vm7 = vcmask 580608  }
0x14ad   :  { %7673 = vrot.lane.b32.xlu1 %v7658_v12, %s14921_s27  ;;  %7983 = vrot.lane.b32.xlu0 %v7965_v30, %s14905_s24  ;;  %v9047_v12 = vld [vmem:[%s14444_s13 + $0x45] ss:$8 sm:$0xf0]  ;;  %v8105_v29 = vmul.f32 %v8088_v53, %v11801_v58  ;;  %v8106_v30 = vmul.f32 %v8089_v35, %v11803_v47  ;;  %vm15227_vm6 = vmmov %vm15226_vm7 }
0x14af   :  { %v6751_v39 = vpop.permute.xlu1 %6750  ;;  %v6616_v37 = vpop.permute.xlu0 %6615 }
0x14b0   :  { %v6768_v23 = vsel %vm1921_vm11, %v6751_v39, %v6753_v5  ;;  %v13270_v39 = vor.u32 %v9047_v12, %v9046_v55  ;;  %v7828_v55 = vmul.f32 %v12915_v0, %v11786_v46 }
0x14b1   :  { %7848 = vrot.lane.b32.xlu1 %v7829_v22, %s14913_s20  ;;  %7850 = vrot.lane.b32.xlu0 %v7830_v45, %s14913_s20  ;;  %v7239_v22 = vrot.slane %v12681_v24, %v9241_v13  ;;  %v7243_v45 = vrot.slane %v12681_v24, %v9251_v18 }
0x14b2   :  { %8564 = vmatpush1.msra.mxu0 %v6768_v23  ;;  %v7521_v23 = vrot.slane %v12625_v2, %v14884_v52 }
0x14b3   :  { %v6618_v56 = vpop.permute.xlu1 %6617  ;;  %v13261_v57 = vpop.permute.xlu0 %6094 }
0x14b4   :  { %15220 = vst [vmem:[#allocation48_spill] sm:$0xff] %v13261_v57  ;;  %v6632_v5 = vsel %vm15221_vm15, %v6616_v37, %v6618_v56  ;;  %vm15231_vm15 = vmmov %vm15225_vm12 }
0x14b5   :  { %8126 = vrot.lane.b32.xlu1 %v8105_v29, %s9128_s22  ;;  %8128 = vrot.lane.b32.xlu0 %v8106_v30, %s9128_s22  ;;  %v6469_v29 = vrot.slane %v13270_v39, %v15069_v11  ;;  %v15224_v30 = vld [vmem:[#allocation5_spill] sm:$0xff] }
0x14b6   :  { %8565 = vmatprep.subr.mxu0 %v6632_v5  ;;  %v6465_v40 = vrot.slane %v13270_v39, %v15224_v30 }
0x14b7   :  { %v13272_v53 = vpop.permute.xlu1 %6096  ;;  %v13274_v35 = vpop.permute.xlu0 %6372  ;;  %v6503_v11 = vmul.f32 %v6469_v29, %v11792_v1 }
0x14b8   :  { %15222 = vst [vmem:[#allocation7_spill] sm:$0xff] %v13272_v53  ;;  %15223 = vst [vmem:[#allocation130_spill] sm:$0xff] %v13274_v35  ;;  %v6502_v0 = vmul.f32 %v6465_v40, %v11786_v46 }
0x14b9   :  { %7258 = vrot.lane.b32.xlu1 %v7239_v22, %s9128_s22  ;;  %7260 = vrot.lane.b32.xlu0 %v7243_v45, %s9128_s22  ;;  %v7675_v22 = vsel %vm950_vm4, %v12939_v44, %v12949_v15  ;;  %v7676_v45 = vsel %vm950_vm4, %v12949_v15, %v12951_v3  ;;  %v7951_v15 = vsel %vm15226_vm7, %v12893_v20, %v12963_v50  ;;  %vm15233_vm7 = vcmask 64512  }
0x14ba   :  { %v7692_v30 = vmul.f32 %v7675_v22, %v11792_v1  ;;  %v7693_v35 = vmul.f32 %v7676_v45, %v11794_v42  ;;  %v7968_v29 = vmul.f32 %v7951_v15, %v11801_v58 }
0x14bb   :  { %v6614_v12 = vpop.permute.xlu1 %6613  ;;  %v6757_v5 = vpop.permute.xlu0 %6756 }
0x14bc   :  { %v6631_v2 = vsel %vm15225_vm12, %v6614_v12, %v6616_v37  ;;  %v7952_v37 = vsel %vm15227_vm6, %v12963_v50, %v12965_v14  ;;  %vm15236_vm6 = vmmov %vm15233_vm7 }
0x14bd   :  { %7536 = vrot.lane.b32.xlu1 %v7521_v23, %s14913_s20  ;;  %7846 = vrot.lane.b32.xlu0 %v7828_v55, %s14913_s20  ;;  %v6770_v23 = vsel %vm1921_vm11, %v13220_v59, %v6757_v5  ;;  %v7969_v20 = vmul.f32 %v7952_v37, %v11803_v47 }
0x14be   :  { %8566 = vmatpush1.msra.mxu0 %v6631_v2 }
0x14bf   :  { %8567 = vmatprep.subr.mxu0 %v6503_v11  ;;  %v13299_v53 = vpop.permute.xlu1 %6758  ;;  %v13301_v57 = vpop.permute.xlu0 %6235 }
0x14c0   :  { %8568 = vmatpush1.msra.mxu0 %v6502_v0  ;;  %v6771_v40 = vsel %vm1921_vm11, %v6757_v5, %v13299_v53  ;;  %v15229_v5 = vld [vmem:[#allocation6_spill] sm:$0xff]  ;;  %v15230_v0 = vld [vmem:[#allocation4_spill] sm:$0xff] }
0x14c1   :  { %7711 = vrot.lane.b32.xlu1 %v7692_v30, %s14921_s27  ;;  %7713 = vrot.lane.b32.xlu0 %v7693_v35, %s14921_s27  ;;  %v15228_v35 = vld [vmem:[#allocation119_spill] sm:$0xff]  ;;  %v6477_v45 = vrot.slane %v13270_v39, %v15229_v5  ;;  %v6473_v30 = vrot.slane %v13270_v39, %v15230_v0  ;;  %v7691_v5 = vmul.f32 %v12939_v44, %v11786_v46 }
0x14c2   :  { %8634 = vmatprep.subr.mxu1 %v6771_v40  ;;  %v7102_v22 = vrot.slane %v15228_v35, %v9241_v13  ;;  %v7106_v59 = vrot.slane %v15228_v35, %v9251_v18  ;;  %v7384_v40 = vrot.slane %v12645_v26, %v14884_v52  ;;  %v7539_v26 = vsel %vm810_vm3, %v12979_v17, %v12986_v27 }
0x14c3   :  { %8635 = vmatpush1.msra.mxu1 %v6770_v23  ;;  %v6411_v55 = vpop.permute.xlu1 %6410  ;;  %v13317_v12 = vpop.permute.xlu0 %6412  ;;  %v6505_v23 = vmul.f32 %v6477_v45, %v11801_v58 }
0x14c4   :  { %v6427_v50 = vsel %vm2114_vm13, %v6411_v55, %v13317_v12 }
0x14c5   :  { %7989 = vrot.lane.b32.xlu1 %v7968_v29, %s14905_s24  ;;  %7991 = vrot.lane.b32.xlu0 %v7969_v20, %s14905_s24 }
0x14c6   :  { %8569 = vmatprep.subr.mxu0 %v6427_v50  ;;  %v6504_v50 = vmul.f32 %v6473_v30, %v11794_v42 }
0x14c7   :  { %v6620_v2 = vpop.permute.xlu1 %6619  ;;  %v13329_v11 = vpop.permute.xlu0 %6621 }
0x14c8   :  { %v6634_v15 = vsel %vm15231_vm15, %v6620_v2, %v13329_v11  ;;  %v6633_v37 = vsel %vm15225_vm12, %v6618_v56, %v6620_v2  ;;  %v7538_v56 = vsel %vm810_vm3, %v12977_v7, %v12979_v17  ;;  %v7556_v2 = vmul.f32 %v7539_v26, %v11794_v42 }
0x14c9   :  { %7121 = vrot.lane.b32.xlu1 %v7102_v22, %s9127_s17  ;;  %7123 = vrot.lane.b32.xlu0 %v7106_v59, %s9127_s17  ;;  %v7555_v59 = vmul.f32 %v7538_v56, %v11792_v1  ;;  %v7815_v17 = vsel %vm863_vm5, %v12988_v33, %v13000_v41  ;;  %vm15239_vm15 = vcmask 72704  }
0x14ca   :  { %8636 = vmatprep.subr.mxu1 %v6634_v15  ;;  %vm15241_vm12 = vmmov %vm15239_vm15 }
0x14cb   :  { %8637 = vmatpush1.msra.mxu1 %v6633_v37  ;;  %v13341_v29 = vpop.permute.xlu1 %6098  ;;  %v6409_v20 = vpop.permute.xlu0 %6408 }
0x14cc   :  { %8638 = vmatprep.subr.mxu1 %v6505_v23  ;;  %v6426_v22 = vsel %vm2114_vm13, %v6409_v20, %v6411_v55  ;;  %v7814_v55 = vsel %vm863_vm5, %v12925_v49, %v12988_v33  ;;  %v15232_v49 = vld [vmem:[#allocation128_spill] sm:$0xff] }
0x14cd   :  { %8639 = vmatpush1.msra.mxu1 %v6504_v50  ;;  %7399 = vrot.lane.b32.xlu1 %v7384_v40, %s14905_s24  ;;  %v7831_v30 = vmul.f32 %v7814_v55, %v11801_v58  ;;  %v7832_v40 = vmul.f32 %v7815_v17, %v11803_v47  ;;  %v6965_v20 = vrot.slane %v15232_v49, %v9241_v13 }
0x14ce   :  { %7709 = vrot.lane.b32.xlu0 %v7691_v5, %s14921_s27  ;;  %8570 = vmatpush1.msra.mxu0 %v6426_v22  ;;  %v6969_v33 = vrot.slane %v15232_v49, %v9251_v18  ;;  %v7247_v22 = vrot.slane %v12681_v24, %v14884_v52  ;;  %v7402_v24 = vsel %vm670_vm2, %v13011_v62, %v13013_v19 }
0x14cf   :  { %v6274_v44 = vpop.permute.xlu1 %6273  ;;  %v6276_v45 = vpop.permute.xlu0 %6275 }
0x14d0   :  { %v6290_v0 = vsel %vm1974_vm14, %v6274_v44, %v6276_v45 }
0x14d1   :  { %7574 = vrot.lane.b32.xlu1 %v7555_v59, %s14920_s19  ;;  %8571 = vmatprep.subr.mxu0 %v6290_v0 }
0x14d2   :  { %7576 = vrot.lane.b32.xlu0 %v7556_v2, %s14920_s19  ;;  %v15235_v2 = vld [vmem:[#allocation121_spill] sm:$0xff] }
0x14d3   :  { %v6272_v15 = vpop.permute.xlu1 %6271  ;;  %v6137_v37 = vpop.permute.xlu0 %6136  ;;  %v7401_v55 = vsel %vm670_vm2, %v15235_v2, %v13011_v62  ;;  %v15240_v62 = vld [vmem:[#allocation15_spill] sm:$0xff] }
0x14d4   :  { %v6289_v23 = vsel %vm1974_vm14, %v6272_v15, %v6274_v44  ;;  %v7554_v44 = vmul.f32 %v12977_v7, %v11786_v46  ;;  %v15237_v7 = vld [vmem:[#allocation12_spill] sm:$0xff] }
0x14d5   :  { %7852 = vrot.lane.b32.xlu1 %v7831_v30, %s14913_s20  ;;  %8572 = vmatpush1.msra.mxu0 %v6289_v23  ;;  %v15238_v30 = vld [vmem:[#allocation29_spill] sm:$0xff] }
0x14d6   :  { %7854 = vrot.lane.b32.xlu0 %v7832_v40, %s14913_s20  ;;  %v6016_v15 = vsel %vm15239_vm15, %v15238_v30, %v15237_v7  ;;  %v7418_v40 = vmul.f32 %v7401_v55, %v11792_v1  ;;  %v7678_v55 = vsel %vm950_vm4, %v13025_v9, %v13027_v61  ;;  %vm15260_vm15 = vmmov %vm15241_vm12 }
0x14d7   :  { %v6139_v50 = vpop.permute.xlu1 %6138  ;;  %v6415_v5 = vpop.permute.xlu0 %6414 }
0x14d8   :  { %v6153_v56 = vsel %vm15233_vm7, %v6137_v37, %v6139_v50  ;;  %vm15252_vm7 = vmmov %vm15236_vm6 }
0x14d9   :  { %6984 = vrot.lane.b32.xlu1 %v6965_v20, %s15169_s15  ;;  %8573 = vmatprep.subr.mxu0 %v6153_v56  ;;  %v6015_v20 = vsel %vm15241_vm12, %v15240_v62, %v15238_v30  ;;  %v7419_v56 = vmul.f32 %v7402_v24, %v11794_v42  ;;  %v15246_v24 = vld [vmem:[#allocation70_spill] sm:$0xff]  ;;  %v15247_v30 = vld [vmem:[#allocation33_spill] sm:$0xff] }
0x14da   :  { %6986 = vrot.lane.b32.xlu0 %v6969_v33, %s15169_s15 }
0x14db   :  { %v13380_v26 = vpop.permute.xlu1 %6416  ;;  %v6135_v59 = vpop.permute.xlu0 %6134 }
0x14dc   :  { %15234 = vst [vmem:[#allocation5_spill] sm:$0xff] %v13380_v26  ;;  %v6152_v0 = vsel %vm15236_vm6, %v6135_v59, %v6137_v37  ;;  %v6429_v17 = vsel %vm2114_vm13, %v6415_v5, %v13380_v26  ;;  %v6428_v37 = vsel %vm2114_vm13, %v13317_v12, %v6415_v5  ;;  %v15243_v59 = vld [vmem:[#allocation19_spill] sm:$0xff]  ;;  %v15244_v12 = vld [vmem:[#allocation24_spill] sm:$0xff]  ;;  %v15286_v26 = vld [vmem:[#allocation22_spill] sm:$0xff] }
0x14dd   :  { %7262 = vrot.lane.b32.xlu1 %v7247_v22, %s9128_s22  ;;  %8574 = vmatpush1.msra.mxu0 %v6152_v0  ;;  %v7677_v22 = vsel %vm950_vm4, %v12951_v3, %v13025_v9  ;;  %v5879_v5 = vsel %vm390_vm0, %v15244_v12, %v15243_v59  ;;  %v15245_v0 = vld [vmem:[#allocation21_spill] sm:$0xff] }
0x14de   :  { %7572 = vrot.lane.b32.xlu0 %v7554_v44, %s14920_s19  ;;  %8640 = vmatprep.subr.mxu1 %v6429_v17  ;;  %v5878_v17 = vsel %vm390_vm0, %v15245_v0, %v15244_v12 }
0x14df   :  { %8575 = vmatprep.subr.mxu0 %v6016_v15  ;;  %8641 = vmatpush1.msra.mxu1 %v6428_v37  ;;  %v6278_v23 = vpop.permute.xlu1 %6277  ;;  %v13404_v33 = vpop.permute.xlu0 %6279  ;;  %v5742_v15 = vsel %vm530_vm1, %v15247_v30, %v15246_v24  ;;  %v7694_v37 = vmul.f32 %v7677_v22, %v11801_v58 }
0x14e0   :  { %15242 = vst [vmem:[#allocation119_spill] sm:$0xff] %v13404_v33  ;;  %8576 = vmatpush1.msra.mxu0 %v6015_v20  ;;  %v6292_v44 = vsel %vm1974_vm14, %v6278_v23, %v13404_v33  ;;  %v6291_v3 = vsel %vm1974_vm14, %v6276_v45, %v6278_v23  ;;  %v7695_v45 = vmul.f32 %v7678_v55, %v11803_v47  ;;  %v15250_v23 = vld [vmem:[#allocation82_spill] sm:$0xff]  ;;  %v15254_v55 = vld [vmem:[#allocation63_spill] sm:$0xff] }
0x14e1   :  { %8577 = vmatprep.subr.mxu0 %v5879_v5  ;;  %7437 = vrot.lane.b32.xlu1 %v7418_v40, %s14912_s26  ;;  %v15248_v40 = vld [vmem:[#allocation38_spill] sm:$0xff] }
0x14e2   :  { %7439 = vrot.lane.b32.xlu0 %v7419_v56, %s14912_s26  ;;  %8578 = vmatpush1.msra.mxu0 %v5878_v17  ;;  %v5741_v62 = vsel %vm530_vm1, %v15248_v40, %v15247_v30  ;;  %v15251_v56 = vld [vmem:[#allocation81_spill] sm:$0xff]  ;;  %v15253_v5 = vld [vmem:[#allocation50_spill] sm:$0xff]  ;;  %v15255_v17 = vld [vmem:[#allocation92_spill] sm:$0xff] }
0x14e3   :  { %8642 = vmatprep.subr.mxu1 %v6292_v44  ;;  %8579 = vmatprep.subr.mxu0 %v5742_v15  ;;  %v6141_v9 = vpop.permute.xlu1 %6140  ;;  %v13431_v20 = vpop.permute.xlu0 %6142  ;;  %v5605_v12 = vsel %vm670_vm2, %v15251_v56, %v15250_v23  ;;  %v5604_v44 = vsel %vm670_vm2, %v15253_v5, %v15251_v56  ;;  %v15256_v30 = vld [vmem:[#allocation129_spill] sm:$0xff] }
0x14e4   :  { %15249 = vst [vmem:[#allocation6_spill] sm:$0xff] %v13431_v20  ;;  %8643 = vmatpush1.msra.mxu1 %v6291_v3  ;;  %8580 = vmatpush1.msra.mxu0 %v5741_v62  ;;  %v6155_v22 = vsel %vm15252_vm7, %v6141_v9, %v13431_v20  ;;  %v6154_v0 = vsel %vm15236_vm6, %v6139_v50, %v6141_v9  ;;  %v15258_v9 = vld [vmem:[#allocation126_spill] sm:$0xff]  ;;  %v15261_v5 = vld [vmem:[#allocation73_spill] sm:$0xff]  ;;  %vm15273_vm7 = vcmask 580608  }
0x14e5   :  { %8581 = vmatprep.subr.mxu0 %v5605_v12  ;;  %7715 = vrot.lane.b32.xlu1 %v7694_v37, %s14921_s27  ;;  %v5468_v3 = vsel %vm810_vm3, %v15255_v17, %v15254_v55  ;;  %v6828_v15 = vrot.slane %v15256_v30, %v9241_v13  ;;  %v15257_v37 = vld [vmem:[#allocation91_spill] sm:$0xff]  ;;  %v6832_v50 = vrot.slane %v15256_v30, %v9251_v18  ;;  %v15272_v18 = vld [vmem:[#allocation96_spill] sm:$0xff]  ;;  %vm15275_vm6 = vmmov %vm15273_vm7 }
0x14e6   :  { %7717 = vrot.lane.b32.xlu0 %v7695_v45, %s14921_s27  ;;  %8582 = vmatpush1.msra.mxu0 %v5604_v44  ;;  %v5467_v62 = vsel %vm810_vm3, %v15257_v37, %v15255_v17  ;;  %v15259_v45 = vld [vmem:[#allocation26_spill] sm:$0xff]  ;;  %v15264_v37 = vld [vmem:[#allocation55_spill] sm:$0xff] }
0x14e7   :  { %8644 = vmatprep.subr.mxu1 %v6155_v22  ;;  %8583 = vmatprep.subr.mxu0 %v5468_v3  ;;  %v13450_v40 = vpop.permute.xlu1 %8217  ;;  %v13455_v56 = vpop.permute.xlu0 %8219  ;;  %v6018_v12 = vsel %vm15260_vm15, %v15259_v45, %v15258_v9  ;;  %v15262_v22 = vld [vmem:[#allocation76_spill] sm:$0xff]  ;;  %v6017_v17 = vsel %vm15241_vm12, %v15237_v7, %v15259_v45  ;;  %v15268_v45 = vld [vmem:[#allocation107_spill] sm:$0xff]  ;;  %vm15280_vm15 = vcmask 588800  }
0x14e8   :  { %8645 = vmatpush1.msra.mxu1 %v6154_v0  ;;  %8584 = vmatpush1.msra.mxu0 %v5467_v62  ;;  %v5331_v44 = vsel %vm950_vm4, %v15262_v22, %v15261_v5  ;;  %v15263_v0 = vld [vmem:[#allocation102_spill] sm:$0xff]  ;;  %vm15282_vm12 = vmmov %vm15280_vm15 }
0x14e9   :  { %8646 = vmatprep.subr.mxu1 %v6018_v12  ;;  %8585 = vmatprep.subr.mxu0 %v5331_v44  ;;  %v5330_v3 = vsel %vm950_vm4, %v15263_v0, %v15262_v22  ;;  %v15265_v62 = vld [vmem:[#allocation54_spill] sm:$0xff]  ;;  %v15267_v44 = vld [vmem:[#allocation105_spill] sm:$0xff]  ;;  %v15270_v0 = vld [vmem:[#allocation71_spill] sm:$0xff] }
0x14ea   :  { %8647 = vmatpush1.msra.mxu1 %v6017_v17  ;;  %6847 = vrot.lane.b32.xlu1 %v6828_v15, %s15188_s1  ;;  %v5881_v9 = vsel %vm390_vm0, %v15265_v62, %v15264_v37  ;;  %v15266_v12 = vld [vmem:[#allocation86_spill] sm:$0xff]  ;;  %v7110_v15 = vrot.slane %v15228_v35, %v14884_v52  ;;  %v5193_v22 = vsel %vm863_vm5, %v15268_v45, %v15267_v44  ;;  %v15269_v17 = vld [vmem:[#allocation32_spill] sm:$0xff]  ;;  %v15271_v37 = vld [vmem:[#allocation93_spill] sm:$0xff] }
0x14eb   :  { %6849 = vrot.lane.b32.xlu0 %v6832_v50, %s15188_s1  ;;  %8586 = vmatpush1.msra.mxu0 %v5330_v3  ;;  %v5194_v20 = vsel %vm863_vm5, %v15267_v44, %v15266_v12  ;;  %v13479_v33 = vpop.permute.xlu1 %8080  ;;  %v13481_v7 = vpop.permute.xlu0 %8082  ;;  %v5880_v50 = vsel %vm390_vm0, %v15243_v59, %v15265_v62  ;;  %v5744_v3 = vsel %vm530_vm1, %v15270_v0, %v15269_v17  ;;  %v15274_v62 = vld [vmem:[#allocation98_spill] sm:$0xff] }
0x14ec   :  { %8648 = vmatprep.subr.mxu1 %v5881_v9  ;;  %8587 = vmatprep.subr.mxu0 %v5194_v20  ;;  %v5057_v35 = vsel %vm15273_vm7, %v15272_v18, %v15271_v37  ;;  %v7417_v20 = vmul.f32 %v15235_v2, %v11786_v46  ;;  %v5743_v59 = vsel %vm530_vm1, %v15246_v24, %v15270_v0  ;;  %v15276_v24 = vld [vmem:[#allocation42_spill] sm:$0xff]  ;;  %vm15294_vm7 = vmmov %vm15275_vm6 }
0x14ed   :  { %8649 = vmatpush1.msra.mxu1 %v5880_v50  ;;  %8588 = vmatpush1.msra.mxu0 %v5193_v22  ;;  %v7264_v9 = vsel %vm530_vm1, %v13036_v31, %v13038_v25  ;;  %v5056_v44 = vsel %vm15275_vm6, %v15274_v62, %v15272_v18  ;;  %v7265_v45 = vsel %vm530_vm1, %v13038_v25, %v13050_v36  ;;  %v15277_v22 = vld [vmem:[#allocation45_spill] sm:$0xff]  ;;  %v15285_v17 = vld [vmem:[#allocation110_spill] sm:$0xff] }
0x14ee   :  { %8650 = vmatprep.subr.mxu1 %v5744_v3  ;;  %8589 = vmatprep.subr.mxu0 %v5057_v35  ;;  %v5607_v0 = vsel %vm670_vm2, %v15277_v22, %v15276_v24  ;;  %v15279_v3 = vld [vmem:[#allocation34_spill] sm:$0xff]  ;;  %v5606_v18 = vsel %vm670_vm2, %v15250_v23, %v15277_v22  ;;  %v15283_v62 = vld [vmem:[#allocation61_spill] sm:$0xff]  ;;  %v7540_v23 = vsel %vm810_vm3, %v12986_v27, %v13052_v54 }
0x14ef   :  { %8651 = vmatpush1.msra.mxu1 %v5743_v59  ;;  %7125 = vrot.lane.b32.xlu1 %v7110_v15, %s9127_s17  ;;  %v13509_v50 = vpop.permute.xlu1 %7943  ;;  %v13511_v2 = vpop.permute.xlu0 %7945  ;;  %v15278_v15 = vld [vmem:[#allocation104_spill] sm:$0xff] }
0x14f0   :  { %7435 = vrot.lane.b32.xlu0 %v7417_v20, %s14912_s26  ;;  %8590 = vmatpush1.msra.mxu0 %v5056_v44  ;;  %v4920_v35 = vsel %vm15280_vm15, %v15279_v3, %v15278_v15  ;;  %v15281_v59 = vld [vmem:[#allocation28_spill] sm:$0xff]  ;;  %v7281_v20 = vmul.f32 %v7264_v9, %v11792_v1  ;;  %vm15297_vm15 = vmmov %vm15282_vm12 }
0x14f1   :  { %8652 = vmatprep.subr.mxu1 %v5607_v0  ;;  %8591 = vmatprep.subr.mxu0 %v4920_v35  ;;  %v4919_v25 = vsel %vm15282_vm12, %v15281_v59, %v15279_v3  ;;  %v15284_v44 = vld [vmem:[#allocation60_spill] sm:$0xff]  ;;  %v4783_v0 = vsel %vm443_vm8, %v15286_v26, %v15285_v17  ;;  %v7282_v35 = vmul.f32 %v7265_v45, %v11794_v42  ;;  %v15287_v45 = vld [vmem:[#allocation114_spill] sm:$0xff] }
0x14f2   :  { %8653 = vmatpush1.msra.mxu1 %v5606_v18  ;;  %8592 = vmatpush1.msra.mxu0 %v4919_v25  ;;  %v5470_v24 = vsel %vm810_vm3, %v15284_v44, %v15283_v62  ;;  %v5469_v9 = vsel %vm810_vm3, %v15254_v55, %v15284_v44  ;;  %v7541_v18 = vsel %vm810_vm3, %v13052_v54, %v13064_v8  ;;  %v15289_v55 = vld [vmem:[#allocation74_spill] sm:$0xff]  ;;  %v15290_v44 = vld [vmem:[#allocation84_spill] sm:$0xff] }
0x14f3   :  { %8654 = vmatprep.subr.mxu1 %v5470_v24  ;;  %8593 = vmatprep.subr.mxu0 %v4783_v0  ;;  %v13543_v22 = vpop.permute.xlu1 %8221  ;;  %v13545_v3 = vpop.permute.xlu0 %7806  ;;  %v4782_v27 = vsel %vm443_vm8, %v15287_v45, %v15286_v26  ;;  %v15288_v24 = vld [vmem:[#allocation97_spill] sm:$0xff]  ;;  %v7557_v25 = vmul.f32 %v7540_v23, %v11801_v58  ;;  %v5332_v54 = vsel %vm950_vm4, %v15261_v5, %v15289_v55  ;;  %v15291_v0 = vld [vmem:[#allocation83_spill] sm:$0xff]  ;;  %v15293_v45 = vld [vmem:[#allocation112_spill] sm:$0xff] }
0x14f4   :  { %8655 = vmatpush1.msra.mxu1 %v5469_v9  ;;  %7300 = vrot.lane.b32.xlu1 %v7281_v20, %s9132_s21  ;;  %v5333_v59 = vsel %vm950_vm4, %v15289_v55, %v15288_v24  ;;  %v7558_v20 = vmul.f32 %v7541_v18, %v11803_v47  ;;  %v5196_v26 = vsel %vm863_vm5, %v15291_v0, %v15290_v44  ;;  %v15292_v18 = vld [vmem:[#allocation113_spill] sm:$0xff] }
0x14f5   :  { %7302 = vrot.lane.b32.xlu0 %v7282_v35, %s9132_s21  ;;  %8594 = vmatpush1.msra.mxu0 %v4782_v27  ;;  %v5195_v23 = vsel %vm863_vm5, %v15266_v12, %v15291_v0  ;;  %v6973_v5 = vrot.slane %v15232_v49, %v14884_v52  ;;  %v5059_v27 = vsel %vm15294_vm7, %v15293_v45, %v15292_v18  ;;  %v15295_v49 = vld [vmem:[#allocation41_spill] sm:$0xff]  ;;  %vm15302_vm7 = vcmask 72704   ;;  %v15310_v18 = vld [vmem:[#allocation11_spill] sm:$0xff] }
0x14f6   :  { %8656 = vmatprep.subr.mxu1 %v5333_v59  ;;  %v5058_v55 = vsel %vm15275_vm6, %v15271_v37, %v15293_v45  ;;  %v7280_v12 = vmul.f32 %v13036_v31, %v11786_v46  ;;  %v7127_v59 = vsel %vm390_vm0, %v13066_v28, %v13074_v43  ;;  %v15299_v45 = vld [vmem:[#allocation111_spill] sm:$0xff]  ;;  %vm15304_vm6 = vmmov %vm15302_vm7 }
0x14f7   :  { %8657 = vmatpush1.msra.mxu1 %v5332_v54  ;;  %v13566_v35 = vpop.permute.xlu1 %7808  ;;  %v13568_v9 = vpop.permute.xlu0 %8084 }
0x14f8   :  { %8658 = vmatprep.subr.mxu1 %v5196_v26  ;;  %7578 = vrot.lane.b32.xlu1 %v7557_v25, %s14920_s19  ;;  %v15296_v25 = vld [vmem:[#allocation47_spill] sm:$0xff]  ;;  %v7128_v26 = vsel %vm390_vm0, %v13074_v43, %v13076_v63  ;;  %v4784_v43 = vsel %vm443_vm8, %v15285_v17, %v15299_v45 }
0x14f9   :  { %8659 = vmatpush1.msra.mxu1 %v5195_v23  ;;  %7580 = vrot.lane.b32.xlu0 %v7558_v20, %s14920_s19  ;;  %v4922_v54 = vsel %vm15297_vm15, %v15296_v25, %v15295_v49  ;;  %v4921_v31 = vsel %vm15282_vm12, %v15278_v15, %v15296_v25  ;;  %v15298_v23 = vld [vmem:[#allocation13_spill] sm:$0xff]  ;;  %v7145_v15 = vmul.f32 %v7128_v26, %v11794_v42  ;;  %vm15308_vm15 = vcmask 64512  }
0x14fa   :  { %8660 = vmatprep.subr.mxu1 %v5059_v27  ;;  %v4785_v27 = vsel %vm443_vm8, %v15299_v45, %v15298_v23  ;;  %v6836_v45 = vrot.slane %v15256_v30, %v14884_v52  ;;  %vm15309_vm12 = vmmov %vm15308_vm15 }
0x14fb   :  { %8661 = vmatpush1.msra.mxu1 %v5058_v55  ;;  %v8260_v20 = vpop.permute.xlu1 %8259  ;;  %v13591_v0 = vpop.permute.xlu0 %8261  ;;  %v7144_v55 = vmul.f32 %v7127_v59, %v11792_v1 }
0x14fc   :  { %8662 = vmatprep.subr.mxu1 %v4922_v54  ;;  %6988 = vrot.lane.b32.xlu1 %v6973_v5, %s15169_s15  ;;  %v8276_v37 = vsel %vm390_vm0, %v8260_v20, %v13591_v0  ;;  %v7403_v5 = vsel %vm670_vm2, %v13013_v19, %v13084_v32  ;;  %v15300_v54 = vld [vmem:[#allocation14_spill] sm:$0xff] }
0x14fd   :  { %8663 = vmatpush1.msra.mxu1 %v4921_v31  ;;  %7298 = vrot.lane.b32.xlu0 %v7280_v12, %s9132_s21  ;;  %v7404_v59 = vsel %vm670_vm2, %v13084_v32, %v15300_v54  ;;  %v7420_v17 = vmul.f32 %v7403_v5, %v11801_v58  ;;  %v7143_v32 = vmul.f32 %v13066_v28, %v11786_v46  ;;  %v15303_v5 = vld [vmem:[#allocation117_spill] sm:$0xff] }
0x14fe   :  { %8664 = vmatprep.subr.mxu1 %v4785_v27  ;;  %8605 = vmatprep.subr.mxu0 %v8276_v37  ;;  %v7421_v26 = vmul.f32 %v7404_v59, %v11803_v47  ;;  %v15301_v27 = vld [vmem:[#allocation51_spill] sm:$0xff] }
0x14ff   :  { %8665 = vmatpush1.msra.mxu1 %v4784_v43  ;;  %v13614_v12 = vpop.permute.xlu1 %7669  ;;  %v13616_v25 = vpop.permute.xlu0 %7671 }
0x1500   :  { %7163 = vrot.lane.b32.xlu1 %v7144_v55, %s9131_s18  ;;  %v6990_v55 = vsel %vm15302_vm7, %v15301_v27, %v13096_v34  ;;  %vm15317_vm7 = vmmov %vm15304_vm6 }
0x1501   :  { %7165 = vrot.lane.b32.xlu0 %v7145_v15, %s9131_s18  ;;  %v7007_v28 = vmul.f32 %v6990_v55, %v11792_v1 }
0x1503   :  { %v13625_v31 = vpop.permute.xlu1 %7947  ;;  %v8258_v19 = vpop.permute.xlu0 %8257 }
0x1504   :  { %7441 = vrot.lane.b32.xlu1 %v7420_v17, %s14912_s26  ;;  %v8275_v37 = vsel %vm390_vm0, %v8258_v19, %v8260_v20  ;;  %v6991_v20 = vsel %vm15304_vm6, %v13096_v34, %v15303_v5  ;;  %v15305_v17 = vld [vmem:[#allocation115_spill] sm:$0xff]  ;;  %v15306_v34 = vld [vmem:[#allocation37_spill] sm:$0xff] }
0x1505   :  { %7443 = vrot.lane.b32.xlu0 %v7421_v26, %s14912_s26  ;;  %8606 = vmatpush2.msra.mxu0 %v8275_v37  ;;  %v7008_v59 = vmul.f32 %v6991_v20, %v11794_v42  ;;  %v7266_v26 = vsel %vm530_vm1, %v13050_v36, %v15305_v17  ;;  %v15307_v36 = vld [vmem:[#allocation58_spill] sm:$0xff] }
0x1506   :  { %v6853_v23 = vsel %vm15308_vm15, %v15307_v36, %v13128_v16  ;;  %vm15321_vm15 = vmmov %vm15309_vm12 }
0x1507   :  { %v8123_v43 = vpop.permute.xlu1 %8122  ;;  %v13637_v15 = vpop.permute.xlu0 %8124 }
0x1508   :  { %6851 = vrot.lane.b32.xlu1 %v6836_v45, %s15188_s1  ;;  %v8139_v30 = vsel %vm530_vm1, %v8123_v43, %v13637_v15  ;;  %v7267_v45 = vsel %vm530_vm1, %v15305_v17, %v15306_v34  ;;  %v6854_v17 = vsel %vm15309_vm12, %v13128_v16, %v13130_v48 }
0x1509   :  { %7161 = vrot.lane.b32.xlu0 %v7143_v32, %s9131_s18  ;;  %8607 = vmatprep.subr.mxu0 %v8139_v30  ;;  %v7283_v32 = vmul.f32 %v7266_v26, %v11801_v58  ;;  %v7284_v55 = vmul.f32 %v7267_v45, %v11803_v47  ;;  %v6871_v16 = vmul.f32 %v6854_v17, %v11794_v42 }
0x150b   :  { %v13651_v19 = vpop.permute.xlu1 %7532  ;;  %v13653_v37 = vpop.permute.xlu0 %7534 }
0x150c   :  { %7026 = vrot.lane.b32.xlu1 %v7007_v28, %s9136_s25  ;;  %v7006_v28 = vmul.f32 %v15301_v27, %v11786_v46 }
0x150d   :  { %7028 = vrot.lane.b32.xlu0 %v7008_v59, %s9136_s25  ;;  %v6870_v59 = vmul.f32 %v6853_v23, %v11792_v1  ;;  %v13687_v1 = vld [vmem:[%s14452_s7 + $0x8] sm:$0xff]  ;;  %v7130_v23 = vsel %vm390_vm0, %v15310_v18, %v13140_v6 }
0x150e   :  { %8627 = vmatprep.mubr.f32.mxu0 %v13687_v1  ;;  %8698 = vmatprep.mubr.f32.mxu1 %v13687_v1 }
0x150f   :  { %v13662_v20 = vpop.permute.xlu1 %7810  ;;  %v8121_v30 = vpop.permute.xlu0 %8120 }
0x1510   :  { %7304 = vrot.lane.b32.xlu1 %v7283_v32, %s9132_s21  ;;  %v8138_v49 = vsel %vm530_vm1, %v8121_v30, %v8123_v43  ;;  %v7129_v32 = vsel %vm390_vm0, %v13076_v63, %v15310_v18  ;;  %v7147_v30 = vmul.f32 %v7130_v23, %v11803_v47  ;;  %v6869_v18 = vmul.f32 %v15307_v36, %v11786_v46 }
0x1511   :  { %7306 = vrot.lane.b32.xlu0 %v7284_v55, %s9132_s21  ;;  %8608 = vmatpush2.msra.mxu0 %v8138_v49  ;;  %v7146_v63 = vmul.f32 %v7129_v32, %v11801_v58  ;;  %v6992_v36 = vsel %vm15317_vm7, %v15303_v5, %v13162_v21  ;;  %v15319_v5 = vld [vmem:[#allocation9_spill] sm:$0xff]  ;;  %vm15326_vm7 = vcmask 1039360  }
0x1513   :  { %v7986_v26 = vpop.permute.xlu1 %7985  ;;  %v13676_v45 = vpop.permute.xlu0 %7987 }
0x1514   :  { %7024 = vrot.lane.b32.xlu1 %v7006_v28, %s9136_s25  ;;  %v8002_v49 = vsel %vm670_vm2, %v7986_v26, %v13676_v45  ;;  %v15312_v28 = vld [vmem:[#allocation25_spill] sm:$0xff] }
0x1515   :  { %6889 = vrot.lane.b32.xlu0 %v6870_v59, %s15170_s28  ;;  %8609 = vmatprep.subr.mxu0 %v8002_v49  ;;  %v15313_v59 = vld [vmem:[#allocation116_spill] sm:$0xff] }
0x1516   :  { %v6720_v17 = vsel %vm1974_vm14, %v15313_v59, %v15312_v28  ;;  %v6993_v59 = vsel %vm15304_vm6, %v13162_v21, %v13164_v38  ;;  %vm15327_vm6 = vmmov %vm15326_vm7 }
0x1517   :  { %v8264_v27 = vpop.permute.xlu1 %8263  ;;  %v13697_v43 = vpop.permute.xlu0 %8265 }
0x1518   :  { %15311 = vst [vmem:[#allocation4_spill] sm:$0xff] %v13697_v43  ;;  %6891 = vrot.lane.b32.xlu1 %v6871_v16, %s15170_s28  ;;  %v8278_v55 = vsel %vm390_vm0, %v8264_v27, %v13697_v43  ;;  %v8277_v42 = vsel %vm390_vm0, %v13591_v0, %v8264_v27  ;;  %v15314_v16 = vld [vmem:[#allocation49_spill] sm:$0xff]  ;;  %v15316_v27 = vld [vmem:[#allocation108_spill] sm:$0xff] }
0x1519   :  { %7167 = vrot.lane.b32.xlu0 %v7146_v63, %s9131_s18  ;;  %8676 = vmatprep.subr.mxu1 %v8278_v55  ;;  %v6721_v0 = vsel %vm1974_vm14, %v15312_v28, %v15314_v16  ;;  %v15315_v63 = vld [vmem:[#allocation59_spill] sm:$0xff]  ;;  %v7010_v28 = vmul.f32 %v6993_v59, %v11803_v47 }
0x151a   :  { %8677 = vmatpush2.msra.mxu1 %v8277_v42  ;;  %v6737_v23 = vmul.f32 %v6720_v17, %v15315_v63  ;;  %v6738_v46 = vmul.f32 %v6721_v0, %v15316_v27  ;;  %v15318_v17 = vld [vmem:[#allocation72_spill] sm:$0xff] }
0x151b   :  { %v13711_v32 = vpop.permute.xlu1 %7395  ;;  %v13713_v49 = vpop.permute.xlu0 %7397  ;;  %v6583_v0 = vsel %vm2114_vm13, %v15319_v5, %v15318_v17  ;;  %v6584_v21 = vsel %vm2114_vm13, %v15318_v17, %v13174_v4  ;;  %v15323_v17 = vld [vmem:[#allocation23_spill] sm:$0xff] }
0x151c   :  { %7169 = vrot.lane.b32.xlu1 %v7147_v30, %s9131_s18 }
0x151d   :  { %6887 = vrot.lane.b32.xlu0 %v6869_v18, %s15170_s28  ;;  %v7009_v18 = vmul.f32 %v6992_v36, %v11801_v58  ;;  %v15320_v36 = vld [vmem:[#allocation40_spill] sm:$0xff] }
0x151f   :  { %v13725_v55 = vpop.permute.xlu1 %7673  ;;  %v7984_v42 = vpop.permute.xlu0 %7983 }
0x1520   :  { %6760 = vrot.lane.b32.xlu1 %v6737_v23, %s15174_s6  ;;  %v8001_v30 = vsel %vm670_vm2, %v7984_v42, %v7986_v26  ;;  %v6600_v23 = vmul.f32 %v6583_v0, %v15315_v63  ;;  %v6855_v42 = vsel %vm15321_vm15, %v13130_v48, %v15320_v36  ;;  %vm15337_vm15 = vmmov %vm15327_vm6 }
0x1521   :  { %6762 = vrot.lane.b32.xlu0 %v6738_v46, %s15174_s6  ;;  %8610 = vmatpush2.msra.mxu0 %v8001_v30  ;;  %v6601_v46 = vmul.f32 %v6584_v21, %v15316_v27  ;;  %v6872_v48 = vmul.f32 %v6855_v42, %v11801_v58  ;;  %v6722_v21 = vsel %vm1974_vm14, %v15314_v16, %v13196_v60  ;;  %v15325_v58 = vld [vmem:[#allocation125_spill] sm:$0xff] }
0x1522   :  { %v6378_v42 = vsel %vm15326_vm7, %v15325_v58, %v13198_v10  ;;  %v6379_v16 = vsel %vm15327_vm6, %v13198_v10, %v13210_v51  ;;  %vm15342_vm6 = vcmask 580608  }
0x1523   :  { %v7849_v43 = vpop.permute.xlu1 %7848  ;;  %v13738_v44 = vpop.permute.xlu0 %7850 }
0x1524   :  { %7030 = vrot.lane.b32.xlu1 %v7009_v18, %s9136_s25  ;;  %v7865_v26 = vsel %vm810_vm3, %v7849_v43, %v13738_v44  ;;  %v6856_v18 = vsel %vm15309_vm12, %v15320_v36, %v15323_v17  ;;  %v6740_v36 = vmul.f32 0.0, %v13196_v60  ;;  %v6395_v60 = vmul.f32 %v6378_v42, %v11803_v47  ;;  %v15330_v42 = vld [vmem:[#allocation123_spill] sm:$0xff] }
0x1525   :  { %7032 = vrot.lane.b32.xlu0 %v7010_v28, %s9136_s25  ;;  %8611 = vmatprep.subr.mxu0 %v7865_v26  ;;  %v6873_v0 = vmul.f32 %v6856_v18, %v11803_v47  ;;  %vm15340_vm12 = vcmask 588800  }
0x1526   :  { %vm15341_vm7 = vmmov %vm15340_vm12 }
0x1527   :  { %v8127_v59 = vpop.permute.xlu1 %8126  ;;  %v13752_v30 = vpop.permute.xlu0 %8128 }
0x1528   :  { %15322 = vst [vmem:[#allocation128_spill] sm:$0xff] %v13752_v30  ;;  %6623 = vrot.lane.b32.xlu1 %v6600_v23, %s15173_s3  ;;  %v8141_v28 = vsel %vm530_vm1, %v8127_v59, %v13752_v30  ;;  %v8140_v5 = vsel %vm530_vm1, %v13637_v15, %v8127_v59  ;;  %v15324_v15 = vld [vmem:[#allocation65_spill] sm:$0xff]  ;;  %v15334_v30 = vld [vmem:[#allocation20_spill] sm:$0xff] }
0x1529   :  { %6625 = vrot.lane.b32.xlu0 %v6601_v46, %s15173_s3  ;;  %8678 = vmatprep.subr.mxu1 %v8141_v28  ;;  %v6739_v46 = vmul.f32 %v6722_v21, %v15324_v15 }
0x152a   :  { %8679 = vmatpush2.msra.mxu1 %v8140_v5  ;;  %v6396_v5 = vmul.f32 %v6379_v16, %v15315_v63 }
0x152b   :  { %v13768_v26 = vpop.permute.xlu1 %7258  ;;  %v13770_v23 = vpop.permute.xlu0 %7260 }
0x152c   :  { %6893 = vrot.lane.b32.xlu1 %v6872_v48, %s15170_s28  ;;  %v15328_v48 = vld [vmem:[#allocation17_spill] sm:$0xff] }
0x152d   :  { %6895 = vrot.lane.b32.xlu0 %v6873_v0, %s15170_s28  ;;  %v6585_v0 = vsel %vm2114_vm13, %v13174_v4, %v15328_v48 }
0x152f   :  { %v13779_v59 = vpop.permute.xlu1 %7536  ;;  %v7847_v18 = vpop.permute.xlu0 %7846 }
0x1530   :  { %6764 = vrot.lane.b32.xlu1 %v6739_v46, %s15174_s6  ;;  %v7864_v28 = vsel %vm810_vm3, %v7847_v18, %v7849_v43  ;;  %v6602_v43 = vmul.f32 %v6585_v0, %v15324_v15  ;;  %v6603_v46 = vmul.f32 0.0, %v15328_v48 }
0x1531   :  { %6766 = vrot.lane.b32.xlu0 %v6740_v36, %s15174_s6  ;;  %8612 = vmatpush2.msra.mxu0 %v7864_v28  ;;  %v15329_v36 = vld [vmem:[#allocation31_spill] sm:$0xff] }
0x1532   :  { %v6241_v18 = vsel %vm1921_vm11, %v15330_v42, %v15329_v36  ;;  %v15332_v28 = vld [vmem:[#allocation67_spill] sm:$0xff]  ;;  %v15333_v42 = vld [vmem:[#allocation48_spill] sm:$0xff] }
0x1533   :  { %v7712_v21 = vpop.permute.xlu1 %7711  ;;  %v13792_v58 = vpop.permute.xlu0 %7713  ;;  %v6258_v48 = vmul.f32 %v6241_v18, %v11803_v47 }
0x1534   :  { %6418 = vrot.lane.b32.xlu1 %v6395_v60, %s15172_s4  ;;  %v7728_v10 = vsel %vm950_vm4, %v7712_v21, %v13792_v58  ;;  %v6242_v60 = vsel %vm1921_vm11, %v15329_v36, %v15332_v28  ;;  %v6104_v36 = vsel %vm1781_vm10, %v15334_v30, %v15333_v42 }
0x1535   :  { %6420 = vrot.lane.b32.xlu0 %v6396_v5, %s15172_s4  ;;  %8613 = vmatprep.subr.mxu0 %v7728_v10  ;;  %v6259_v10 = vmul.f32 %v6242_v60, %v15315_v63 }
0x1537   :  { %v7990_v4 = vpop.permute.xlu1 %7989  ;;  %v13803_v16 = vpop.permute.xlu0 %7991 }
0x1538   :  { %15331 = vst [vmem:[#allocation121_spill] sm:$0xff] %v13803_v16  ;;  %6627 = vrot.lane.b32.xlu1 %v6602_v43, %s15173_s3  ;;  %v8004_v5 = vsel %vm670_vm2, %v7990_v4, %v13803_v16  ;;  %v8003_v0 = vsel %vm670_vm2, %v13676_v45, %v7990_v4  ;;  %v15335_v16 = vld [vmem:[#allocation7_spill] sm:$0xff]  ;;  %v15336_v4 = vld [vmem:[#allocation130_spill] sm:$0xff] }
0x1539   :  { %6629 = vrot.lane.b32.xlu0 %v6603_v46, %s15173_s3  ;;  %8680 = vmatprep.subr.mxu1 %v8004_v5  ;;  %v6105_v45 = vsel %vm1781_vm10, %v15333_v42, %v15335_v16  ;;  %v6121_v46 = vmul.f32 %v6104_v36, %v11803_v47  ;;  %v6380_v30 = vsel %vm15337_vm15, %v13210_v51, %v15336_v4  ;;  %vm15343_vm15 = vmmov %vm15342_vm6 }
0x153a   :  { %8681 = vmatpush2.msra.mxu1 %v8003_v0  ;;  %v6122_v18 = vmul.f32 %v6105_v45, %v15315_v63  ;;  %v6243_v42 = vsel %vm1921_vm11, %v15332_v28, %v13301_v57  ;;  %v6106_v28 = vsel %vm1781_vm10, %v15335_v16, %v13341_v29  ;;  %v15338_v16 = vld [vmem:[#allocation36_spill] sm:$0xff] }
0x153b   :  { %v13819_v24 = vpop.permute.xlu1 %7121  ;;  %v13821_v43 = vpop.permute.xlu0 %7123  ;;  %v6260_v45 = vmul.f32 %v6243_v42, %v15316_v27 }
0x153c   :  { %6281 = vrot.lane.b32.xlu1 %v6258_v48, %s15171_s0  ;;  %v6397_v48 = vmul.f32 %v6380_v30, %v15316_v27 }
0x153d   :  { %6283 = vrot.lane.b32.xlu0 %v6259_v10, %s15171_s0  ;;  %v6398_v10 = vmul.f32 %v15336_v4, %v15324_v15 }
0x153f   :  { %v13833_v60 = vpop.permute.xlu1 %7399 }
0x1540   :  { %6144 = vrot.lane.b32.xlu1 %v6121_v46, %s15188_s1  ;;  %v7710_v5 = vpop.permute.xlu0 %7709  ;;  %v6261_v46 = vmul.f32 %v13301_v57, %v15324_v15  ;;  %v6124_v57 = vmul.f32 %v13341_v29, %v15324_v15 }
0x1541   :  { %6146 = vrot.lane.b32.xlu0 %v6122_v18, %s15188_s1  ;;  %v7727_v0 = vsel %vm950_vm4, %v7710_v5, %v7712_v21 }
0x1542   :  { %8614 = vmatpush2.msra.mxu0 %v7727_v0  ;;  %v6123_v0 = vmul.f32 %v6106_v28, %v15316_v27 }
0x1543   :  { %v7575_v51 = vpop.permute.xlu1 %7574 }
0x1544   :  { %6422 = vrot.lane.b32.xlu1 %v6397_v48, %s15172_s4  ;;  %v13845_v36 = vpop.permute.xlu0 %7576  ;;  %v8227_v48 = vsel %vm443_vm8, %v15338_v16, %v13450_v40 }
0x1545   :  { %6424 = vrot.lane.b32.xlu0 %v6398_v10, %s15172_s4  ;;  %v7591_v21 = vsel %vm863_vm5, %v7575_v51, %v13845_v36 }
0x1546   :  { %8615 = vmatprep.subr.mxu0 %v7591_v21  ;;  %v8244_v21 = vmul.f32 %v8227_v48, %v15315_v63 }
0x1547   :  { %v7853_v18 = vpop.permute.xlu1 %7852 }
0x1548   :  { %6285 = vrot.lane.b32.xlu1 %v6260_v45, %s15171_s0  ;;  %v13857_v4 = vpop.permute.xlu0 %7854  ;;  %v7866_v30 = vsel %vm810_vm3, %v13738_v44, %v7853_v18  ;;  %v8228_v44 = vsel %vm443_vm8, %v13450_v40, %v13455_v56  ;;  %v15339_v45 = vld [vmem:[#allocation120_spill] sm:$0xff]  ;;  %v8091_v40 = vsel %vm15341_vm7, %v13479_v33, %v13481_v7 }
0x1549   :  { %6287 = vrot.lane.b32.xlu0 %v6261_v46, %s15171_s0  ;;  %v7867_v5 = vsel %vm810_vm3, %v7853_v18, %v13857_v4  ;;  %v8245_v29 = vmul.f32 %v8228_v44, %v15316_v27  ;;  %v8090_v46 = vsel %vm15340_vm12, %v15339_v45, %v13479_v33  ;;  %v7954_v33 = vsel %vm15343_vm15, %v13509_v50, %v13511_v2  ;;  %vm15344_vm12 = vmmov %vm15342_vm6 }
0x154a   :  { %8682 = vmatprep.subr.mxu1 %v7867_v5  ;;  %v8107_v5 = vmul.f32 %v8090_v46, %v15315_v63  ;;  %vm15345_vm15 = vmmov %vm15342_vm6 }
0x154b   :  { %8683 = vmatpush2.msra.mxu1 %v7866_v30  ;;  %v13870_v10 = vpop.permute.xlu1 %6984 }
0x154c   :  { %6148 = vrot.lane.b32.xlu1 %v6123_v0, %s15188_s1  ;;  %v13876_v42 = vpop.permute.xlu0 %6986  ;;  %v8108_v0 = vmul.f32 %v8091_v40, %v15316_v27 }
0x154d   :  { %6150 = vrot.lane.b32.xlu0 %v6124_v57, %s15188_s1  ;;  %v7953_v57 = vsel %vm15342_vm6, %v12965_v14, %v13509_v50  ;;  %v8229_v14 = vsel %vm443_vm8, %v13455_v56, %v13543_v22  ;;  %v7816_v56 = vsel %vm863_vm5, %v13000_v41, %v13545_v3  ;;  %v8092_v41 = vsel %vm15341_vm7, %v13481_v7, %v13568_v9 }
0x154e   :  { %v7970_v44 = vmul.f32 %v7953_v57, %v15315_v63  ;;  %v8246_v40 = vmul.f32 %v8229_v14, %v15324_v15  ;;  %v8109_v57 = vmul.f32 %v8092_v41, %v15324_v15  ;;  %v7680_v7 = vsel %vm950_vm4, %v13614_v12, %v13616_v25 }
0x154f   :  { %v13884_v28 = vpop.permute.xlu1 %7262 }
0x1550   :  { %8267 = vrot.lane.b32.xlu1 %v8244_v21, %s9127_s17  ;;  %v7573_v18 = vpop.permute.xlu0 %7572  ;;  %v7971_v21 = vmul.f32 %v7954_v33, %v15316_v27 }
0x1551   :  { %8269 = vrot.lane.b32.xlu0 %v8245_v29, %s9127_s17  ;;  %v7590_v30 = vsel %vm863_vm5, %v7573_v18, %v7575_v51  ;;  %v8247_v18 = vmul.f32 0.0, %v13543_v22 }
0x1552   :  { %8616 = vmatpush2.msra.mxu0 %v7590_v30  ;;  %v7817_v30 = vsel %vm863_vm5, %v13545_v3, %v13566_v35 }
0x1553   :  { %v7438_v16 = vpop.permute.xlu1 %7437  ;;  %v7834_v22 = vmul.f32 %v7817_v30, %v15316_v27  ;;  %v7543_v30 = vsel %vm810_vm3, %v13651_v19, %v13653_v37 }
0x1554   :  { %8130 = vrot.lane.b32.xlu1 %v8107_v5, %s9128_s22  ;;  %v13901_v48 = vpop.permute.xlu0 %7439 }
0x1555   :  { %8132 = vrot.lane.b32.xlu0 %v8108_v0, %s9128_s22  ;;  %v7454_v51 = vsel %vm15344_vm12, %v7438_v16, %v13901_v48  ;;  %v7833_v0 = vmul.f32 %v7816_v56, %v15315_v63  ;;  %vm15346_vm12 = vmmov %vm15341_vm7 }
0x1556   :  { %8617 = vmatprep.subr.mxu0 %v7454_v51  ;;  %v8110_v51 = vmul.f32 0.0, %v13568_v9  ;;  %v7697_v9 = vmul.f32 %v7680_v7, %v15316_v27 }
0x1557   :  { %v7716_v29 = vpop.permute.xlu1 %7715 }
0x1558   :  { %7993 = vrot.lane.b32.xlu1 %v7970_v44, %s14905_s24  ;;  %v13912_v50 = vpop.permute.xlu0 %7717  ;;  %v7729_v45 = vsel %vm950_vm4, %v13792_v58, %v7716_v29  ;;  %v7679_v44 = vsel %vm950_vm4, %v13027_v61, %v13614_v12  ;;  %v7955_v61 = vsel %vm15345_vm15, %v13511_v2, %v13625_v31  ;;  %vm15347_vm15 = vmmov %vm15342_vm6 }
0x1559   :  { %7995 = vrot.lane.b32.xlu0 %v7971_v21, %s14905_s24  ;;  %v7730_v46 = vsel %vm950_vm4, %v7716_v29, %v13912_v50  ;;  %v7696_v14 = vmul.f32 %v7679_v44, %v15315_v63  ;;  %v7405_v44 = vsel %vm670_vm2, %v15300_v54, %v13711_v32  ;;  %v7681_v54 = vsel %vm950_vm4, %v13616_v25, %v13725_v55 }
0x155a   :  { %8684 = vmatprep.subr.mxu1 %v7730_v46  ;;  %v7699_v25 = vmul.f32 0.0, %v13725_v55 }
0x155b   :  { %8685 = vmatpush2.msra.mxu1 %v7729_v45 }
0x155c   :  { %8271 = vrot.lane.b32.xlu1 %v8246_v40, %s9127_s17  ;;  %v13928_v58 = vpop.permute.xlu1 %6847  ;;  %v7973_v40 = vmul.f32 0.0, %v13625_v31 }
0x155d   :  { %8273 = vrot.lane.b32.xlu0 %v8247_v18, %s9127_s17  ;;  %v13931_v5 = vpop.permute.xlu0 %6849  ;;  %v7542_v18 = vsel %vm810_vm3, %v13064_v8, %v13651_v19 }
0x155e   :  { %v7559_v31 = vmul.f32 %v7542_v18, %v15315_v63 }
0x1560   :  { %7856 = vrot.lane.b32.xlu1 %v7833_v0, %s14913_s20 }
0x1561   :  { %7858 = vrot.lane.b32.xlu0 %v7834_v22, %s14913_s20  ;;  %v13940_v3 = vpop.permute.xlu1 %7125  ;;  %v7560_v22 = vmul.f32 %v7543_v30, %v15316_v27 }
0x1562   :  { %v7436_v33 = vpop.permute.xlu0 %7435 }
0x1563   :  { %v7453_v21 = vsel %vm15342_vm6, %v7436_v33, %v7438_v16  ;;  %v7972_v16 = vmul.f32 %v7955_v61, %v15324_v15 }
0x1564   :  { %8134 = vrot.lane.b32.xlu1 %v8109_v57, %s9128_s22  ;;  %8618 = vmatpush2.msra.mxu0 %v7453_v21 }
0x1565   :  { %8136 = vrot.lane.b32.xlu0 %v8110_v51, %s9128_s22  ;;  %v7836_v51 = vmul.f32 0.0, %v13662_v20 }
0x1566   :  { %v7301_v29 = vpop.permute.xlu1 %7300 }
0x1567   :  { %v13958_v45 = vpop.permute.xlu0 %7302 }
0x1568   :  { %7719 = vrot.lane.b32.xlu1 %v7696_v14, %s14921_s27  ;;  %v7317_v12 = vsel %vm15346_vm12, %v7301_v29, %v13958_v45  ;;  %vm15348_vm12 = vmmov %vm15341_vm7 }
0x1569   :  { %7721 = vrot.lane.b32.xlu0 %v7697_v9, %s14921_s27  ;;  %8619 = vmatprep.subr.mxu0 %v7317_v12  ;;  %v7698_v12 = vmul.f32 %v7681_v54, %v15324_v15 }
0x156a   :  { %v7579_v46 = vpop.permute.xlu1 %7578 }
0x156b   :  { %v13969_v2 = vpop.permute.xlu0 %7580  ;;  %v7592_v56 = vsel %vm863_vm5, %v13845_v36, %v7579_v46  ;;  %v7818_v36 = vsel %vm863_vm5, %v13566_v35, %v13662_v20  ;;  %v7406_v35 = vsel %vm670_vm2, %v13711_v32, %v13713_v49  ;;  %v7422_v20 = vmul.f32 %v7405_v44, %v15315_v63 }
0x156c   :  { %7997 = vrot.lane.b32.xlu1 %v7972_v16, %s14905_s24  ;;  %v7593_v0 = vsel %vm863_vm5, %v7579_v46, %v13969_v2  ;;  %v7835_v57 = vmul.f32 %v7818_v36, %v15324_v15  ;;  %v7562_v36 = vmul.f32 0.0, %v13779_v59 }
0x156d   :  { %7999 = vrot.lane.b32.xlu0 %v7973_v40, %s14905_s24  ;;  %8686 = vmatprep.subr.mxu1 %v7593_v0  ;;  %v7269_v40 = vsel %vm530_vm1, %v13768_v26, %v13770_v23 }
0x156e   :  { %8687 = vmatpush2.msra.mxu1 %v7592_v56  ;;  %v13981_v8 = vpop.permute.xlu1 %6988  ;;  %v7286_v55 = vmul.f32 %v7269_v40, %v15316_v27 }
0x156f   :  { %v7299_v19 = vpop.permute.xlu0 %7298 }
0x1570   :  { %v7316_v41 = vsel %vm15341_vm7, %v7299_v19, %v7301_v29  ;;  %7582 = vrot.lane.b32.xlu1 %v7559_v31, %s14920_s19  ;;  %v7423_v29 = vmul.f32 %v7406_v35, %v15316_v27  ;;  %v7131_v19 = vsel %vm390_vm0, %v13140_v6, %v13819_v24 }
0x1571   :  { %7584 = vrot.lane.b32.xlu0 %v7560_v22, %s14920_s19  ;;  %8620 = vmatpush2.msra.mxu0 %v7316_v41 }
0x1572   :  { %v7164_v33 = vpop.permute.xlu1 %7163 }
0x1573   :  { %v13995_v21 = vpop.permute.xlu0 %7165 }
0x1574   :  { %7860 = vrot.lane.b32.xlu1 %v7835_v57, %s14913_s20  ;;  %v7180_v7 = vsel %vm443_vm8, %v7164_v33, %v13995_v21  ;;  %v7132_v57 = vsel %vm390_vm0, %v13819_v24, %v13821_v43 }
0x1575   :  { %7862 = vrot.lane.b32.xlu0 %v7836_v51, %s14913_s20  ;;  %8621 = vmatprep.subr.mxu0 %v7180_v7  ;;  %v7407_v51 = vsel %vm670_vm2, %v13713_v49, %v13833_v60 }
0x1576   :  { %v7442_v14 = vpop.permute.xlu1 %7441  ;;  %v7424_v35 = vmul.f32 %v7407_v51, %v15324_v15 }
0x1577   :  { %v7455_v32 = vsel %vm15342_vm6, %v13901_v48, %v7442_v14  ;;  %v14011_v9 = vpop.permute.xlu0 %7443  ;;  %v7268_v48 = vsel %vm530_vm1, %v15306_v34, %v13768_v26  ;;  %v7544_v34 = vsel %vm810_vm3, %v13653_v37, %v13779_v59  ;;  %v7148_v59 = vmul.f32 %v7131_v19, %v15315_v63 }
0x1578   :  { %7445 = vrot.lane.b32.xlu1 %v7422_v20, %s14912_s26  ;;  %v7456_v61 = vsel %vm15347_vm15, %v7442_v14, %v14011_v9  ;;  %v7285_v56 = vmul.f32 %v7268_v48, %v15315_v63  ;;  %v7561_v31 = vmul.f32 %v7544_v34, %v15324_v15  ;;  %v7425_v20 = vmul.f32 0.0, %v13833_v60 }
0x1579   :  { %7447 = vrot.lane.b32.xlu0 %v7423_v29, %s14912_s26  ;;  %8688 = vmatprep.subr.mxu1 %v7456_v61  ;;  %vm15349_vm6 = vcmask 72704  }
0x157a   :  { %8689 = vmatpush2.msra.mxu1 %v7455_v32  ;;  %v14018_v16 = vpop.permute.xlu1 %6851  ;;  %v6994_v14 = vsel %vm15349_vm6, %v13164_v38, %v13870_v10  ;;  %vm15350_vm15 = vmmov %vm15349_vm6  ;;  %v7270_v38 = vsel %vm530_vm1, %v13770_v23, %v13884_v28 }
0x157b   :  { %v7162_v46 = vpop.permute.xlu0 %7161  ;;  %v6995_v54 = vsel %vm15350_vm15, %v13870_v10, %v13876_v42  ;;  %v7011_v32 = vmul.f32 %v6994_v14, %v15315_v63  ;;  %v14091_v10 = vld [vmem:[%s14452_s7] sm:$0xff]  ;;  %v7287_v23 = vmul.f32 %v7270_v38, %v15324_v15  ;;  %vm15354_vm15 = vcmask 1039360  }
0x157c   :  { %v7179_v18 = vsel %vm443_vm8, %v7162_v46, %v7164_v33  ;;  %7723 = vrot.lane.b32.xlu1 %v7698_v12, %s14921_s27  ;;  %v7012_v61 = vmul.f32 %v6995_v54, %v15316_v27 }
0x157d   :  { %7725 = vrot.lane.b32.xlu0 %v7699_v25, %s14921_s27  ;;  %8622 = vmatpush2.msra.mxu0 %v7179_v18  ;;  %v7288_v18 = vmul.f32 0.0, %v13884_v28 }
0x157e   :  { %v7027_v30 = vpop.permute.xlu1 %7026 }
0x157f   :  { %v14035_v0 = vpop.permute.xlu0 %7028 }
0x1580   :  { %7308 = vrot.lane.b32.xlu1 %v7285_v56, %s9132_s21  ;;  %v7043_v26 = vsel %vm1641_vm9, %v7027_v30, %v14035_v0 }
0x1581   :  { %7310 = vrot.lane.b32.xlu0 %v7286_v55, %s9132_s21  ;;  %8623 = vmatprep.subr.mxu0 %v7043_v26  ;;  %v7133_v26 = vsel %vm390_vm0, %v13821_v43, %v13940_v3 }
0x1582   :  { %v7305_v22 = vpop.permute.xlu1 %7304  ;;  %v7150_v19 = vmul.f32 %v7133_v26, %v15324_v15  ;;  %v15365_v26 = vld [vmem:[#allocation127_spill] sm:$0xff] }
0x1583   :  { %v7318_v37 = vsel %vm15348_vm12, %v13958_v45, %v7305_v22  ;;  %v14048_v41 = vpop.permute.xlu0 %7306  ;;  %v7149_v45 = vmul.f32 %v7132_v57, %v15316_v27  ;;  %vm15351_vm12 = vcmask 64512   ;;  %v7151_v57 = vmul.f32 0.0, %v13940_v3 }
0x1584   :  { %7586 = vrot.lane.b32.xlu1 %v7561_v31, %s14920_s19  ;;  %v7319_v33 = vsel %vm15341_vm7, %v7305_v22, %v14048_v41  ;;  %v6857_v56 = vsel %vm15351_vm12, %v15323_v17, %v13928_v58  ;;  %vm15352_vm7 = vmmov %vm15351_vm12 }
0x1585   :  { %7588 = vrot.lane.b32.xlu0 %v7562_v36, %s14920_s19  ;;  %8690 = vmatprep.subr.mxu1 %v7319_v33  ;;  %v6874_v28 = vmul.f32 %v6857_v56, %v15315_v63  ;;  %v6485_v36 = vrot.slane %v13270_v39, %v9241_v13  ;;  %v6996_v33 = vsel %vm15349_vm6, %v13876_v42, %v13981_v8  ;;  %vm15355_vm12 = vmmov %vm15354_vm15  ;;  %v7014_v42 = vmul.f32 0.0, %v13981_v8 }
0x1586   :  { %8691 = vmatpush2.msra.mxu1 %v7318_v37  ;;  %v7025_v6 = vpop.permute.xlu1 %7024  ;;  %v15353_v37 = vld [vmem:[#allocation8_spill] sm:$0xff]  ;;  %v7013_v51 = vmul.f32 %v6996_v33, %v15324_v15 }
0x1587   :  { %v7042_v24 = vsel %vm1641_vm9, %v7025_v6, %v7027_v30  ;;  %v6890_v44 = vpop.permute.xlu0 %6889 }
0x1588   :  { %7171 = vrot.lane.b32.xlu1 %v7148_v59, %s9131_s18  ;;  %8624 = vmatpush2.msra.mxu0 %v7042_v24 }
0x1589   :  { %7173 = vrot.lane.b32.xlu0 %v7149_v45, %s9131_s18  ;;  %v6507_v45 = vmul.f32 %v6485_v36, %v15315_v63 }
0x158a   :  { %v14066_v7 = vpop.permute.xlu1 %6891 }
0x158b   :  { %v7168_v29 = vpop.permute.xlu0 %7167  ;;  %v6906_v49 = vsel %vm1781_vm10, %v6890_v44, %v14066_v7 }
0x158c   :  { %7449 = vrot.lane.b32.xlu1 %v7424_v35, %s14912_s26  ;;  %8625 = vmatprep.subr.mxu0 %v6906_v49  ;;  %v7181_v46 = vsel %vm443_vm8, %v13995_v21, %v7168_v29  ;;  %v6858_v21 = vsel %vm15352_vm7, %v13928_v58, %v13931_v5  ;;  %v15356_v49 = vld [vmem:[#allocation5_spill] sm:$0xff] }
0x158d   :  { %7451 = vrot.lane.b32.xlu0 %v7425_v20, %s14912_s26 }
0x158e   :  { %v14080_v60 = vpop.permute.xlu1 %7169 }
0x158f   :  { %v6888_v12 = vpop.permute.xlu0 %6887  ;;  %v7182_v25 = vsel %vm443_vm8, %v7168_v29, %v14080_v60  ;;  %v8557_v29 = vld [vmem:[%s14453_s8] sm:$0xff] }
0x1590   :  { %v6905_v48 = vsel %vm1781_vm10, %v6888_v12, %v6890_v44  ;;  %7034 = vrot.lane.b32.xlu1 %v7011_v32, %s9136_s25  ;;  %8692 = vmatprep.subr.mxu1 %v7182_v25  ;;  %v15357_v12 = vld [vmem:[#allocation10_spill] sm:$0xff] }
0x1591   :  { %7036 = vrot.lane.b32.xlu0 %v7012_v61, %s9136_s25  ;;  %8626 = vmatpush2.msra.mxu0 %v6905_v48  ;;  %v6489_v25 = vrot.slane %v13270_v39, %v15357_v12 }
0x1592   :  { %8693 = vmatpush2.msra.mxu1 %v7181_v46  ;;  %v6761_v40 = vpop.permute.xlu1 %6760  ;;  %8628 = vmatmul.mubr.f32.vlgmr.msra.gmra.mxu0 %v14091_v10 }
0x1593   :  { %v6772_v30 = vsel %vm1921_vm11, %v13299_v53, %v6761_v40  ;;  %v6763_v55 = vpop.permute.xlu0 %6762  ;;  %8769 = vmatprep.mubr.f32.mxu0 %v13687_v1  ;;  %v6875_v53 = vmul.f32 %v6858_v21, %v15316_v27  ;;  %v6508_v56 = vmul.f32 %v6489_v25, %v15316_v27 }
0x1594   :  { %7312 = vrot.lane.b32.xlu1 %v7287_v23, %s9132_s21  ;;  %v6773_v34 = vsel %vm1921_vm11, %v6761_v40, %v6763_v55 }
0x1595   :  { %7314 = vrot.lane.b32.xlu0 %v7288_v18, %s9132_s21  ;;  %8705 = vmatprep.subr.mxu0 %v6773_v34  ;;  %v15361_v34 = vld [vmem:[#allocation6_spill] sm:$0xff] }
0x1596   :  { %8706 = vmatpush1.msra.mxu0 %v6772_v30  ;;  %v7031_v17 = vpop.permute.xlu1 %7030  ;;  %v15360_v30 = vld [vmem:[#allocation119_spill] sm:$0xff] }
0x1597   :  { %v7044_v58 = vsel %vm1641_vm9, %v14035_v0, %v7031_v17  ;;  %v14120_v31 = vpop.permute.xlu0 %7032  ;;  %v6481_v0 = vrot.slane %v13270_v39, %v15353_v37  ;;  %v15369_v37 = vld [vmem:[#allocation44_spill] sm:$0xff] }
0x1598   :  { %6897 = vrot.lane.b32.xlu1 %v6874_v28, %s15170_s28  ;;  %v7045_v22 = vsel %vm1641_vm9, %v7031_v17, %v14120_v31 }
0x1599   :  { %6899 = vrot.lane.b32.xlu0 %v6875_v53, %s15170_s28  ;;  %8694 = vmatprep.subr.mxu1 %v7045_v22  ;;  %v6506_v24 = vmul.f32 %v6481_v0, %v11803_v47  ;;  %v15364_v53 = vld [vmem:[#allocation124_spill] sm:$0xff]  ;;  %v15370_v0 = vld [vmem:[#allocation46_spill] sm:$0xff] }
0x159a   :  { %8695 = vmatpush2.msra.mxu1 %v7044_v58  ;;  %v6624_v43 = vpop.permute.xlu1 %6623 }
0x159b   :  { %v6635_v59 = vsel %vm15354_vm15, %v13329_v11, %v6624_v43  ;;  %v6626_v6 = vpop.permute.xlu0 %6625  ;;  %v6859_v11 = vsel %vm15352_vm7, %v13931_v5, %v14018_v16  ;;  %v6877_v5 = vmul.f32 0.0, %v14018_v16  ;;  %vm15362_vm15 = vmmov %vm15352_vm7 }
0x159c   :  { %7175 = vrot.lane.b32.xlu1 %v7150_v19, %s9131_s18  ;;  %v6636_v13 = vsel %vm15355_vm12, %v6624_v43, %v6626_v6  ;;  %v6876_v47 = vmul.f32 %v6859_v11, %v15324_v15  ;;  %v15367_v19 = vld [vmem:[#allocation126_spill] sm:$0xff]  ;;  %v15374_v11 = vld [vmem:[#allocation32_spill] sm:$0xff] }
0x159d   :  { %7177 = vrot.lane.b32.xlu0 %v7151_v57, %s9131_s18  ;;  %8707 = vmatprep.subr.mxu0 %v6636_v13  ;;  %v5883_v57 = vsel %vm390_vm0, %v15370_v0, %v15369_v37 }
0x159e   :  { %8708 = vmatpush1.msra.mxu0 %v6635_v59  ;;  %v6894_v3 = vpop.permute.xlu1 %6893  ;;  %v15371_v59 = vld [vmem:[#allocation55_spill] sm:$0xff] }
0x159f   :  { %v6907_v44 = vsel %vm1781_vm10, %v14066_v7, %v6894_v3  ;;  %8709 = vmatprep.subr.mxu0 %v6507_v45  ;;  %v14149_v35 = vpop.permute.xlu0 %6895  ;;  %v15372_v45 = vld [vmem:[#allocation30_spill] sm:$0xff] }
0x15a0   :  { %8710 = vmatpush1.msra.mxu0 %v6506_v24  ;;  %7038 = vrot.lane.b32.xlu1 %v7013_v51, %s9136_s25  ;;  %v6908_v63 = vsel %vm1781_vm10, %v6894_v3, %v14149_v35  ;;  %v15373_v51 = vld [vmem:[#allocation27_spill] sm:$0xff] }
0x15a1   :  { %7040 = vrot.lane.b32.xlu0 %v7014_v42, %s9136_s25  ;;  %8696 = vmatprep.subr.mxu1 %v6908_v63  ;;  %v5746_v3 = vsel %vm530_vm1, %v15373_v51, %v15372_v45  ;;  %v15375_v63 = vld [vmem:[#allocation77_spill] sm:$0xff] }
0x15a2   :  { %8697 = vmatpush2.msra.mxu1 %v6907_v44  ;;  %v6765_v8 = vpop.permute.xlu1 %6764  ;;  %v5745_v44 = vsel %vm530_vm1, %v15374_v11, %v15373_v51  ;;  %v15404_v51 = vld [vmem:[#allocation41_spill] sm:$0xff] }
0x15a3   :  { %v6774_v7 = vsel %vm1921_vm11, %v6763_v55, %v6765_v8  ;;  %v6767_v20 = vpop.permute.xlu0 %6766  ;;  %8699 = vmatmul.mubr.f32.vlgmr.msra.gmra.mxu1 %v14091_v10 }
0x15a4   :  { %6901 = vrot.lane.b32.xlu1 %v6876_v47, %s15170_s28  ;;  %v6775_v14 = vsel %vm1921_vm11, %v6765_v8, %v6767_v20  ;;  %8840 = vmatprep.mubr.f32.mxu1 %v13687_v1  ;;  %v6493_v1 = vrot.slane %v13270_v39, %v14884_v52  ;;  %vm15358_vm11 = vmmov %vm15355_vm12  ;;  %v15376_v47 = vld [vmem:[#allocation43_spill] sm:$0xff] }
0x15a5   :  { %6903 = vrot.lane.b32.xlu0 %v6877_v5, %s15170_s28  ;;  %8776 = vmatprep.subr.mxu1 %v6775_v14  ;;  %vm15359_vm6 = vmmov %vm15358_vm11  ;;  %v5609_v8 = vsel %vm670_vm2, %v15376_v47, %v15375_v63 }
0x15a6   :  { %8777 = vmatpush1.msra.mxu1 %v6774_v7  ;;  %v6419_v16 = vpop.permute.xlu1 %6418  ;;  %v6509_v40 = vmul.f32 %v6493_v1, %v15324_v15  ;;  %vm15363_vm12 = vmmov %vm15352_vm7  ;;  %vm15366_vm7 = vcmask 72704   ;;  %v15377_v7 = vld [vmem:[#allocation42_spill] sm:$0xff]  ;;  %v15381_v1 = vld [vmem:[#allocation68_spill] sm:$0xff] }
0x15a7   :  { %v6430_v54 = vsel %vm2114_vm13, %v15356_v49, %v6419_v16  ;;  %v6421_v32 = vpop.permute.xlu0 %6420  ;;  %v6020_v58 = vsel %vm15366_vm7, %v15365_v26, %v15364_v53  ;;  %v5608_v20 = vsel %vm670_vm2, %v15377_v7, %v15376_v47  ;;  %v15409_v47 = vld [vmem:[#allocation75_spill] sm:$0xff] }
0x15a8   :  { %v6431_v61 = vsel %vm2114_vm13, %v6419_v16, %v6421_v32  ;;  %8560 = vperm.xlu1 %9098, %v8557_v29   ;;  %v15378_v29 = vld [vmem:[#allocation85_spill] sm:$0xff]  ;;  %v15379_v16 = vld [vmem:[#allocation87_spill] sm:$0xff] }
0x15a9   :  { %8711 = vmatprep.subr.mxu0 %v6431_v61  ;;  %v5472_v49 = vsel %vm810_vm3, %v15379_v16, %v15378_v29  ;;  %v5471_v61 = vsel %vm810_vm3, %v15283_v62, %v15379_v16  ;;  %v15411_v16 = vld [vmem:[#allocation53_spill] sm:$0xff] }
0x15aa   :  { %8712 = vmatpush1.msra.mxu0 %v6430_v54  ;;  %v6628_v38 = vpop.permute.xlu1 %6627 }
0x15ab   :  { %v6637_v48 = vsel %vm15358_vm11, %v6626_v6, %v6628_v38  ;;  %v6630_v46 = vpop.permute.xlu0 %6629  ;;  %vm15368_vm11 = vmmov %vm15366_vm7  ;;  %v5882_v6 = vsel %vm390_vm0, %v15371_v59, %v15370_v0  ;;  %v15400_v0 = vld [vmem:[#allocation99_spill] sm:$0xff]  ;;  %v15403_v59 = vld [vmem:[#allocation64_spill] sm:$0xff] }
0x15ac   :  { %v6638_v23 = vsel %vm15359_vm6, %v6628_v38, %v6630_v46  ;;  %v6019_v43 = vsel %vm15368_vm11, %v15367_v19, %v15365_v26  ;;  %v15382_v38 = vld [vmem:[#allocation95_spill] sm:$0xff]  ;;  %vm15389_vm6 = vmmov %vm15366_vm7  ;;  %v15396_v26 = vld [vmem:[#allocation16_spill] sm:$0xff]  ;;  %vm15401_vm11 = vcmask 588800  }
0x15ad   :  { %8778 = vmatprep.subr.mxu1 %v6638_v23  ;;  %v5335_v12 = vsel %vm950_vm4, %v15382_v38, %v15381_v1 }
0x15ae   :  { %8779 = vmatpush1.msra.mxu1 %v6637_v48  ;;  %v6282_v18 = vpop.permute.xlu1 %6281  ;;  %v15384_v48 = vld [vmem:[#allocation97_spill] sm:$0xff] }
0x15af   :  { %v6293_v52 = vsel %vm1974_vm14, %v15360_v30, %v6282_v18  ;;  %8780 = vmatprep.subr.mxu1 %v6509_v40  ;;  %v6284_v55 = vpop.permute.xlu0 %6283  ;;  %v5334_v46 = vsel %vm950_vm4, %v15384_v48, %v15382_v38  ;;  %v15385_v40 = vld [vmem:[#allocation80_spill] sm:$0xff]  ;;  %v15388_v30 = vld [vmem:[#allocation122_spill] sm:$0xff]  ;;  %v15415_v48 = vld [vmem:[#allocation69_spill] sm:$0xff] }
0x15b0   :  { %8781 = vmatpush1.msra.mxu1 %v6508_v56  ;;  %v6294_v39 = vsel %vm1974_vm14, %v6282_v18, %v6284_v55  ;;  %v15386_v18 = vld [vmem:[#allocation79_spill] sm:$0xff]  ;;  %v15387_v56 = vld [vmem:[#allocation118_spill] sm:$0xff] }
0x15b1   :  { %8713 = vmatprep.subr.mxu0 %v6294_v39  ;;  %v5198_v62 = vsel %vm863_vm5, %v15386_v18, %v15385_v40  ;;  %v15390_v39 = vld [vmem:[#allocation84_spill] sm:$0xff] }
0x15b2   :  { %8714 = vmatpush1.msra.mxu0 %v6293_v52  ;;  %v6145_v21 = vpop.permute.xlu1 %6144  ;;  %v6022_v52 = vsel %vm15389_vm6, %v15388_v30, %v15387_v56 }
0x15b3   :  { %v6156_v28 = vsel %vm15362_vm15, %v15361_v34, %v6145_v21  ;;  %v6147_v17 = vpop.permute.xlu0 %6146  ;;  %vm15391_vm15 = vmmov %vm15389_vm6 }
0x15b4   :  { %v6157_v15 = vsel %vm15363_vm12, %v6145_v21, %v6147_v17  ;;  %v5197_v21 = vsel %vm863_vm5, %v15390_v39, %v15386_v18  ;;  %v6021_v34 = vsel %vm15391_vm15, %v15364_v53, %v15388_v30  ;;  %v5884_v53 = vsel %vm390_vm0, %v15369_v37, %v15396_v26  ;;  %v15416_v18 = vld [vmem:[#allocation128_spill] sm:$0xff]  ;;  %v15417_v30 = vld [vmem:[#allocation101_spill] sm:$0xff]  ;;  %vm15426_vm15 = vmmov %vm15401_vm11 }
0x15b5   :  { %8715 = vmatprep.subr.mxu0 %v6157_v15  ;;  %v5747_v37 = vsel %vm530_vm1, %v15372_v45, %v15403_v59  ;;  %v5610_v45 = vsel %vm670_vm2, %v15375_v63, %v15409_v47 }
0x15b6   :  { %8716 = vmatpush1.msra.mxu0 %v6156_v28  ;;  %v6423_v27 = vpop.permute.xlu1 %6422  ;;  %v15392_v28 = vld [vmem:[#allocation89_spill] sm:$0xff] }
0x15b7   :  { %v6432_v22 = vsel %vm2114_vm13, %v6421_v32, %v6423_v27  ;;  %8717 = vmatprep.subr.mxu0 %v6020_v58  ;;  %v6425_v36 = vpop.permute.xlu0 %6424 }
0x15b8   :  { %8718 = vmatpush1.msra.mxu0 %v6019_v43  ;;  %v6433_v33 = vsel %vm2114_vm13, %v6423_v27, %v6425_v36  ;;  %vm15380_vm13 = vmmov %vm15363_vm12  ;;  %v15395_v27 = vld [vmem:[#allocation39_spill] sm:$0xff]  ;;  %v15399_v43 = vld [vmem:[#allocation100_spill] sm:$0xff] }
0x15b9   :  { %8719 = vmatprep.subr.mxu0 %v5883_v57  ;;  %8782 = vmatprep.subr.mxu1 %v6433_v33  ;;  %v5885_v58 = vsel %vm390_vm0, %v15396_v26, %v15395_v27  ;;  %v4924_v57 = vsel %vm15401_vm11, %v15400_v0, %v15399_v43  ;;  %v15402_v33 = vld [vmem:[#allocation62_spill] sm:$0xff] }
0x15ba   :  { %8720 = vmatpush1.msra.mxu0 %v5882_v6  ;;  %8783 = vmatpush1.msra.mxu1 %v6432_v22  ;;  %v6286_v13 = vpop.permute.xlu1 %6285  ;;  %v15397_v22 = vld [vmem:[#allocation113_spill] sm:$0xff]  ;;  %v5748_v6 = vsel %vm530_vm1, %v15403_v59, %v15402_v33  ;;  %v15421_v27 = vld [vmem:[#allocation90_spill] sm:$0xff]  ;;  %v15428_v59 = vld [vmem:[#allocation103_spill] sm:$0xff] }
0x15bb   :  { %v6295_v24 = vsel %vm1974_vm14, %v6284_v55, %v6286_v13  ;;  %8721 = vmatprep.subr.mxu0 %v5746_v3  ;;  %v6288_v42 = vpop.permute.xlu0 %6287 }
0x15bc   :  { %8722 = vmatpush1.msra.mxu0 %v5745_v44  ;;  %v6296_v5 = vsel %vm1974_vm14, %v6286_v13, %v6288_v42  ;;  %vm15383_vm14 = vmmov %vm15363_vm12  ;;  %vm15394_vm12 = vcmask 580608   ;;  %v15407_v42 = vld [vmem:[#allocation18_spill] sm:$0xff]  ;;  %v15408_v44 = vld [vmem:[#allocation35_spill] sm:$0xff] }
0x15bd   :  { %8723 = vmatprep.subr.mxu0 %v5609_v8  ;;  %8784 = vmatprep.subr.mxu1 %v6296_v5  ;;  %vm15398_vm7 = vmmov %vm15394_vm12  ;;  %v5611_v8 = vsel %vm670_vm2, %v15409_v47, %v15408_v44  ;;  %v15410_v5 = vld [vmem:[#allocation13_spill] sm:$0xff] }
0x15be   :  { %8724 = vmatpush1.msra.mxu0 %v5608_v20  ;;  %8785 = vmatpush1.msra.mxu1 %v6295_v24  ;;  %v6149_v14 = vpop.permute.xlu1 %6148  ;;  %v15406_v24 = vld [vmem:[#allocation109_spill] sm:$0xff]  ;;  %v4786_v7 = vsel %vm443_vm8, %v15410_v5, %v15407_v42  ;;  %vm15423_vm6 = vmmov %vm15398_vm7 }
0x15bf   :  { %v6158_v54 = vsel %vm15380_vm13, %v6147_v17, %v6149_v14  ;;  %8725 = vmatprep.subr.mxu0 %v5472_v49  ;;  %v6151_v32 = vpop.permute.xlu0 %6150  ;;  %v15393_v17 = vld [vmem:[#allocation94_spill] sm:$0xff]  ;;  %vm15405_vm13 = vmmov %vm15401_vm11  ;;  %v4787_v11 = vsel %vm443_vm8, %v15407_v42, %v15406_v24  ;;  %v15412_v49 = vld [vmem:[#allocation52_spill] sm:$0xff] }
0x15c0   :  { %8726 = vmatpush1.msra.mxu0 %v5471_v61  ;;  %v6159_v25 = vsel %vm15383_vm14, %v6149_v14, %v6151_v32  ;;  %v5061_v15 = vsel %vm15394_vm12, %v15393_v17, %v15392_v28  ;;  %v5060_v36 = vsel %vm15398_vm7, %v15397_v22, %v15393_v17  ;;  %v4923_v3 = vsel %vm15405_vm13, %v15404_v51, %v15400_v0  ;;  %v15413_v32 = vld [vmem:[#allocation4_spill] sm:$0xff]  ;;  %vm15422_vm14 = vmmov %vm15398_vm7 }
0x15c1   :  { %8727 = vmatprep.subr.mxu0 %v5335_v12  ;;  %8786 = vmatprep.subr.mxu1 %v6159_v25  ;;  %v5473_v63 = vsel %vm810_vm3, %v15378_v29, %v15412_v49  ;;  %v15414_v25 = vld [vmem:[#allocation66_spill] sm:$0xff]  ;;  %vm15427_vm12 = vmmov %vm15401_vm11 }
0x15c2   :  { %8728 = vmatpush1.msra.mxu0 %v5334_v46  ;;  %8787 = vmatpush1.msra.mxu1 %v6158_v54  ;;  %v8268_v23 = vpop.permute.xlu1 %8267  ;;  %v5474_v54 = vsel %vm810_vm3, %v15412_v49, %v15411_v16  ;;  %v5337_v46 = vsel %vm950_vm4, %v15415_v48, %v15414_v25 }
0x15c3   :  { %8729 = vmatprep.subr.mxu0 %v5198_v62  ;;  %8788 = vmatprep.subr.mxu1 %v6022_v52  ;;  %v14231_v55 = vpop.permute.xlu0 %8269  ;;  %v8279_v61 = vsel %vm390_vm0, %v15413_v32, %v8268_v23  ;;  %v15418_v52 = vld [vmem:[#allocation78_spill] sm:$0xff] }
0x15c4   :  { %8730 = vmatpush1.msra.mxu0 %v5197_v21  ;;  %8789 = vmatpush1.msra.mxu1 %v6021_v34  ;;  %v8280_v14 = vsel %vm390_vm0, %v8268_v23, %v14231_v55  ;;  %v5336_v23 = vsel %vm950_vm4, %v15381_v1, %v15415_v48  ;;  %v5200_v39 = vsel %vm863_vm5, %v15418_v52, %v15417_v30  ;;  %v15419_v21 = vld [vmem:[#allocation121_spill] sm:$0xff]  ;;  %v15420_v1 = vld [vmem:[#allocation88_spill] sm:$0xff] }
0x15c5   :  { %8731 = vmatprep.subr.mxu0 %v5061_v15  ;;  %8790 = vmatprep.subr.mxu1 %v5885_v58  ;;  %v5199_v15 = vsel %vm863_vm5, %v15385_v40, %v15418_v52  ;;  %v5063_v26 = vsel %vm15422_vm14, %v15421_v27, %v15420_v1  ;;  %v5062_v58 = vsel %vm15423_vm6, %v15392_v28, %v15421_v27  ;;  %v15429_v28 = vld [vmem:[#allocation106_spill] sm:$0xff] }
0x15c6   :  { %8732 = vmatpush1.msra.mxu0 %v5060_v36  ;;  %8791 = vmatpush1.msra.mxu1 %v5884_v53  ;;  %v8131_v19 = vpop.permute.xlu1 %8130  ;;  %v15424_v36 = vld [vmem:[#allocation57_spill] sm:$0xff]  ;;  %v15425_v53 = vld [vmem:[#allocation56_spill] sm:$0xff]  ;;  %v4788_v51 = vsel %vm443_vm8, %v15406_v24, %v15429_v28 }
0x15c7   :  { %8733 = vmatprep.subr.mxu0 %v4924_v57  ;;  %8792 = vmatprep.subr.mxu1 %v5748_v6  ;;  %v14257_v13 = vpop.permute.xlu0 %8132  ;;  %v8142_v62 = vsel %vm530_vm1, %v15416_v18, %v8131_v19  ;;  %v4925_v57 = vsel %vm15427_vm12, %v15399_v43, %v15425_v53  ;;  %v4789_v6 = vsel %vm443_vm8, %v15429_v28, %v15428_v59 }
0x15c8   :  { %8734 = vmatpush1.msra.mxu0 %v4923_v3  ;;  %8793 = vmatpush1.msra.mxu1 %v5747_v37  ;;  %v8143_v12 = vsel %vm530_vm1, %v8131_v19, %v14257_v13  ;;  %v4926_v19 = vsel %vm15426_vm15, %v15425_v53, %v15424_v36 }
0x15c9   :  { %8735 = vmatprep.subr.mxu0 %v4787_v11  ;;  %8794 = vmatprep.subr.mxu1 %v5611_v8 }
0x15ca   :  { %8736 = vmatpush1.msra.mxu0 %v4786_v7  ;;  %8795 = vmatpush1.msra.mxu1 %v5610_v45  ;;  %v7994_v20 = vpop.permute.xlu1 %7993 }
0x15cb   :  { %8747 = vmatprep.subr.mxu0 %v8280_v14  ;;  %8796 = vmatprep.subr.mxu1 %v5474_v54  ;;  %v7996_v38 = vpop.permute.xlu0 %7995  ;;  %v8005_v34 = vsel %vm670_vm2, %v15419_v21, %v7994_v20 }
0x15cc   :  { %8748 = vmatpush2.msra.mxu0 %v8279_v61  ;;  %8797 = vmatpush1.msra.mxu1 %v5473_v63  ;;  %v8006_v56 = vsel %vm670_vm2, %v7994_v20, %v7996_v38 }
0x15cd   :  { %8749 = vmatprep.subr.mxu0 %v8143_v12  ;;  %8798 = vmatprep.subr.mxu1 %v5337_v46 }
0x15ce   :  { %8750 = vmatpush2.msra.mxu0 %v8142_v62  ;;  %8799 = vmatpush1.msra.mxu1 %v5336_v23  ;;  %v8272_v29 = vpop.permute.xlu1 %8271 }
0x15cf   :  { %8751 = vmatprep.subr.mxu0 %v8006_v56  ;;  %8800 = vmatprep.subr.mxu1 %v5200_v39  ;;  %v8274_v17 = vpop.permute.xlu0 %8273  ;;  %v8281_v43 = vsel %vm390_vm0, %v14231_v55, %v8272_v29 }
0x15d0   :  { %8752 = vmatpush2.msra.mxu0 %v8005_v34  ;;  %8801 = vmatpush1.msra.mxu1 %v5199_v15  ;;  %v8282_v3 = vsel %vm390_vm0, %v8272_v29, %v8274_v17  ;;  %vm15430_vm0 = vmmov %vm15423_vm6 }
0x15d1   :  { %8802 = vmatprep.subr.mxu1 %v5063_v26  ;;  %vm15435_vm7 = vmmov %vm15430_vm0 }
0x15d2   :  { %8803 = vmatpush1.msra.mxu1 %v5062_v58  ;;  %v7857_v22 = vpop.permute.xlu1 %7856 }
0x15d3   :  { %v7868_v40 = vsel %vm810_vm3, %v13857_v4, %v7857_v22  ;;  %8804 = vmatprep.subr.mxu1 %v4926_v19  ;;  %v7859_v0 = vpop.permute.xlu0 %7858 }
0x15d4   :  { %8805 = vmatpush1.msra.mxu1 %v4925_v57  ;;  %v7869_v33 = vsel %vm810_vm3, %v7857_v22, %v7859_v0 }
0x15d5   :  { %8753 = vmatprep.subr.mxu0 %v7869_v33  ;;  %8806 = vmatprep.subr.mxu1 %v4789_v6 }
0x15d6   :  { %8754 = vmatpush2.msra.mxu0 %v7868_v40  ;;  %8807 = vmatpush1.msra.mxu1 %v4788_v51  ;;  %v8135_v4 = vpop.permute.xlu1 %8134 }
0x15d7   :  { %v8144_v37 = vsel %vm530_vm1, %v14257_v13, %v8135_v4  ;;  %8818 = vmatprep.subr.mxu1 %v8282_v3  ;;  %v8137_v42 = vpop.permute.xlu0 %8136 }
0x15d8   :  { %8819 = vmatpush2.msra.mxu1 %v8281_v43  ;;  %v8145_v11 = vsel %vm530_vm1, %v8135_v4, %v8137_v42  ;;  %vm15431_vm1 = vmmov %vm15430_vm0 }
0x15d9   :  { %8820 = vmatprep.subr.mxu1 %v8145_v11 }
0x15da   :  { %8821 = vmatpush2.msra.mxu1 %v8144_v37  ;;  %v7720_v44 = vpop.permute.xlu1 %7719 }
0x15db   :  { %v7731_v24 = vsel %vm950_vm4, %v13912_v50, %v7720_v44  ;;  %v7722_v47 = vpop.permute.xlu0 %7721 }
0x15dc   :  { %v7732_v8 = vsel %vm950_vm4, %v7720_v44, %v7722_v47 }
0x15dd   :  { %8755 = vmatprep.subr.mxu0 %v7732_v8 }
0x15de   :  { %8756 = vmatpush2.msra.mxu0 %v7731_v24  ;;  %v7998_v55 = vpop.permute.xlu1 %7997 }
0x15df   :  { %v8007_v5 = vsel %vm670_vm2, %v7996_v38, %v7998_v55  ;;  %v8000_v13 = vpop.permute.xlu0 %7999 }
0x15e0   :  { %v8008_v7 = vsel %vm670_vm2, %v7998_v55, %v8000_v13  ;;  %vm15432_vm2 = vmmov %vm15401_vm11 }
0x15e1   :  { %8822 = vmatprep.subr.mxu1 %v8008_v7  ;;  %vm15437_vm11 = vmmov %vm15432_vm2 }
0x15e2   :  { %8823 = vmatpush2.msra.mxu1 %v8007_v5  ;;  %v7583_v45 = vpop.permute.xlu1 %7582 }
0x15e3   :  { %v7594_v20 = vsel %vm863_vm5, %v13969_v2, %v7583_v45  ;;  %v7585_v14 = vpop.permute.xlu0 %7584 }
0x15e4   :  { %v7595_v50 = vsel %vm863_vm5, %v7583_v45, %v7585_v14 }
0x15e5   :  { %8757 = vmatprep.subr.mxu0 %v7595_v50 }
0x15e6   :  { %8758 = vmatpush2.msra.mxu0 %v7594_v20  ;;  %v7861_v16 = vpop.permute.xlu1 %7860 }
0x15e7   :  { %v7870_v49 = vsel %vm810_vm3, %v7859_v0, %v7861_v16  ;;  %v7863_v54 = vpop.permute.xlu0 %7862 }
0x15e8   :  { %v7871_v32 = vsel %vm810_vm3, %v7861_v16, %v7863_v54  ;;  %vm15433_vm3 = vmmov %vm15432_vm2 }
0x15e9   :  { %8824 = vmatprep.subr.mxu1 %v7871_v32 }
0x15ea   :  { %8825 = vmatpush2.msra.mxu1 %v7870_v49  ;;  %v7446_v61 = vpop.permute.xlu1 %7445 }
0x15eb   :  { %v7457_v38 = vsel %vm15430_vm0, %v14011_v9, %v7446_v61  ;;  %v7448_v63 = vpop.permute.xlu0 %7447 }
0x15ec   :  { %v7458_v2 = vsel %vm15431_vm1, %v7446_v61, %v7448_v63 }
0x15ed   :  { %8759 = vmatprep.subr.mxu0 %v7458_v2 }
0x15ee   :  { %8760 = vmatpush2.msra.mxu0 %v7457_v38  ;;  %v7724_v12 = vpop.permute.xlu1 %7723 }
0x15ef   :  { %v7733_v25 = vsel %vm950_vm4, %v7722_v47, %v7724_v12  ;;  %v7726_v48 = vpop.permute.xlu0 %7725 }
0x15f0   :  { %v7734_v46 = vsel %vm950_vm4, %v7724_v12, %v7726_v48  ;;  %vm15434_vm4 = vmmov %vm15430_vm0 }
0x15f1   :  { %8826 = vmatprep.subr.mxu1 %v7734_v46 }
0x15f2   :  { %8827 = vmatpush2.msra.mxu1 %v7733_v25  ;;  %v7309_v18 = vpop.permute.xlu1 %7308 }
0x15f3   :  { %v7320_v62 = vsel %vm15432_vm2, %v14048_v41, %v7309_v18  ;;  %v7311_v23 = vpop.permute.xlu0 %7310 }
0x15f4   :  { %v7321_v9 = vsel %vm15433_vm3, %v7309_v18, %v7311_v23 }
0x15f5   :  { %8761 = vmatprep.subr.mxu0 %v7321_v9 }
0x15f6   :  { %8762 = vmatpush2.msra.mxu0 %v7320_v62  ;;  %v7587_v29 = vpop.permute.xlu1 %7586 }
0x15f7   :  { %v7596_v56 = vsel %vm863_vm5, %v7585_v14, %v7587_v29  ;;  %v7589_v30 = vpop.permute.xlu0 %7588 }
0x15f8   :  { %v7597_v52 = vsel %vm863_vm5, %v7587_v29, %v7589_v30  ;;  %vm15436_vm5 = vmmov %vm15432_vm2 }
0x15f9   :  { %8828 = vmatprep.subr.mxu1 %v7597_v52 }
0x15fa   :  { %8829 = vmatpush2.msra.mxu1 %v7596_v56  ;;  %v7172_v39 = vpop.permute.xlu1 %7171 }
0x15fb   :  { %v7183_v21 = vsel %vm443_vm8, %v14080_v60, %v7172_v39  ;;  %v7174_v34 = vpop.permute.xlu0 %7173 }
0x15fc   :  { %v7184_v41 = vsel %vm443_vm8, %v7172_v39, %v7174_v34 }
0x15fd   :  { %8763 = vmatprep.subr.mxu0 %v7184_v41 }
0x15fe   :  { %8764 = vmatpush2.msra.mxu0 %v7183_v21  ;;  %v7450_v17 = vpop.permute.xlu1 %7449 }
0x15ff   :  { %v7459_v15 = vsel %vm15434_vm4, %v7448_v63, %v7450_v17  ;;  %v7452_v1 = vpop.permute.xlu0 %7451 }
0x1600   :  { %v7460_v27 = vsel %vm15435_vm7, %v7450_v17, %v7452_v1 }
0x1601   :  { %8830 = vmatprep.subr.mxu1 %v7460_v27 }
0x1602   :  { %8831 = vmatpush2.msra.mxu1 %v7459_v15  ;;  %v7035_v26 = vpop.permute.xlu1 %7034 }
0x1603   :  { %v7046_v58 = vsel %vm1641_vm9, %v14120_v31, %v7035_v26  ;;  %v7037_v22 = vpop.permute.xlu0 %7036 }
0x1604   :  { %v7047_v60 = vsel %vm1641_vm9, %v7035_v26, %v7037_v22 }
0x1605   :  { %8765 = vmatprep.subr.mxu0 %v7047_v60 }
0x1606   :  { %8766 = vmatpush2.msra.mxu0 %v7046_v58  ;;  %v7313_v36 = vpop.permute.xlu1 %7312 }
0x1607   :  { %v7322_v53 = vsel %vm15436_vm5, %v7311_v23, %v7313_v36  ;;  %v7315_v19 = vpop.permute.xlu0 %7314 }
0x1608   :  { %v7323_v40 = vsel %vm15437_vm11, %v7313_v36, %v7315_v19  ;;  %v8877_v19 = vld [vmem:[%s14454_s9] sm:$0xff] }
0x1609   :  { %8832 = vmatprep.subr.mxu1 %v7323_v40 }
0x160a   :  { %8833 = vmatpush2.msra.mxu1 %v7322_v53  ;;  %v6898_v0 = vpop.permute.xlu1 %6897 }
0x160b   :  { %v6909_v57 = vsel %vm1781_vm10, %v14149_v35, %v6898_v0  ;;  %v6900_v33 = vpop.permute.xlu0 %6899 }
0x160c   :  { %v6910_v31 = vsel %vm1781_vm10, %v6898_v0, %v6900_v33 }
0x160d   :  { %8767 = vmatprep.subr.mxu0 %v6910_v31 }
0x160e   :  { %8768 = vmatpush2.msra.mxu0 %v6909_v57  ;;  %v7176_v59 = vpop.permute.xlu1 %7175  ;;  %v8881_v57 = vld [vmem:[%s14455_s10] sm:$0xff] }
0x160f   :  { %v7185_v28 = vsel %vm443_vm8, %v7174_v34, %v7176_v59  ;;  %8770 = vmatmul.mubr.f32.vlgmr.msra.gmra.mxu0 %v14091_v10  ;;  %v7178_v6 = vpop.permute.xlu0 %7177 }
0x1610   :  { %v7186_v51 = vsel %vm443_vm8, %v7176_v59, %v7178_v6  ;;  %v15438_v59 = vmov 1   ;;  %v8928_v6 = vld [vmem:[%s14457_s12] sm:$0xff] }
0x1611   :  { %8834 = vmatprep.subr.mxu1 %v7186_v51  ;;  %v15439_v51 = vmov 0  }
0x1612   :  { %8835 = vmatpush2.msra.mxu1 %v7185_v28  ;;  %v7039_v4 = vpop.permute.xlu1 %7038  ;;  %v8918_v28 = vld [vmem:[%s14456_s11] sm:$0xff] }
0x1613   :  { %v7048_v3 = vsel %vm1641_vm9, %v7037_v22, %v7039_v4  ;;  %v7041_v43 = vpop.permute.xlu0 %7040 }
0x1614   :  { %v7049_v35 = vsel %vm1641_vm9, %v7039_v4, %v7041_v43 }
0x1615   :  { %8836 = vmatprep.subr.mxu1 %v7049_v35 }
0x1616   :  { %8837 = vmatpush2.msra.mxu1 %v7048_v3  ;;  %v6902_v37 = vpop.permute.xlu1 %6901 }
0x1617   :  { %v6911_v42 = vsel %vm1781_vm10, %v6900_v33, %v6902_v37  ;;  %v6904_v11 = vpop.permute.xlu0 %6903 }
0x1618   :  { %v6912_v44 = vsel %vm1781_vm10, %v6902_v37, %v6904_v11 }
0x1619   :  { %8838 = vmatprep.subr.mxu1 %v6912_v44 }
0x161a   :  { %8839 = vmatpush2.msra.mxu1 %v6911_v42 }
0x161b   :  { %8841 = vmatmul.mubr.f32.vlgmr.msra.gmra.mxu1 %v14091_v10 }
0x1623   :  { %v8561_v47 = vpop.permute.xlu1 %8560 }
0x1652   :  { %v8629_v24 = vpop.f32.mrf.mxu0 }
0x1653   :  { %v14374_v55 = vadd.f32 %v8629_v24, %v8561_v47 }
0x1654   :  { %v8631_v8 = vpop.f32.mrf.mxu0 }
0x1655   :  { %v14376_v5 = vadd.f32 %v8631_v8, %v8561_v47  ;;  %v8857_v7 = vmul.f32 %v14374_v55, %v14374_v55 }
0x1657   :  { %v8858_v45 = vmul.f32 %v14376_v5, %v14376_v5  ;;  %v8847_v10 = vadd.f32 %v14376_v5, %v14374_v55 }
0x1659   :  { %v8865_v16 = vadd.f32 %v8858_v45, %v8857_v7 }
0x1663   :  { %v8700_v13 = vpop.f32.mrf.mxu1 }
0x1664   :  { %v14382_v20 = vadd.f32 %v8700_v13, %v8561_v47 }
0x1665   :  { %v8702_v14 = vpop.f32.mrf.mxu1 }
0x1666   :  { %v8859_v49 = vmul.f32 %v14382_v20, %v14382_v20  ;;  %v8703_v54 = vadd.f32 %v8702_v14, %v8561_v47  ;;  %v8848_v32 = vadd.f32 %v8847_v10, %v14382_v20 }
0x1668   :  { %v8866_v63 = vadd.f32 %v8865_v16, %v8859_v49  ;;  %v8860_v2 = vmul.f32 %v8703_v54, %v8703_v54  ;;  %v8849_v12 = vadd.f32 %v8848_v32, %v8703_v54 }
0x166a   :  { %v8867_v46 = vadd.f32 %v8866_v63, %v8860_v2 }
0x16cf   :  { %v8771_v50 = vpop.f32.mrf.mxu0 }
0x16d0   :  { %v14389_v61 = vadd.f32 %v8771_v50, %v8561_v47 }
0x16d1   :  { %v8773_v38 = vpop.f32.mrf.mxu0 }
0x16d2   :  { %v8861_v25 = vmul.f32 %v14389_v61, %v14389_v61  ;;  %v14393_v48 = vadd.f32 %v8773_v38, %v8561_v47  ;;  %v8850_v18 = vadd.f32 %v8849_v12, %v14389_v61 }
0x16d4   :  { %v8868_v62 = vadd.f32 %v8867_v46, %v8861_v25  ;;  %v8862_v23 = vmul.f32 %v14393_v48, %v14393_v48  ;;  %v8851_v29 = vadd.f32 %v8850_v18, %v14393_v48 }
0x16d6   :  { %v8869_v52 = vadd.f32 %v8868_v62, %v8862_v23 }
0x16db   :  { %v8842_v9 = vpop.f32.mrf.mxu1 }
0x16dc   :  { %v8843_v56 = vadd.f32 %v8842_v9, %v8561_v47 }
0x16dd   :  { %v8844_v30 = vpop.f32.mrf.mxu1 }
0x16de   :  { %v8852_v39 = vadd.f32 %v8851_v29, %v8843_v56  ;;  %v8863_v21 = vmul.f32 %v8843_v56, %v8843_v56  ;;  %v8845_v34 = vadd.f32 %v8844_v30, %v8561_v47 }
0x16e0   :  { %v8864_v41 = vmul.f32 %v8845_v34, %v8845_v34  ;;  %v8853_v17 = vadd.f32 %v8852_v39, %v8845_v34  ;;  %v8870_v15 = vadd.f32 %v8869_v52, %v8863_v21 }
0x16e2   :  { %8854 = vadd.xlane.f32.xlu0 %v8853_v17  ;;  %v8871_v1 = vadd.f32 %v8870_v15, %v8864_v41 }
0x16e4   :  { %8872 = vadd.xlane.f32.xlu1 %v8871_v1 }
0x176b   :  { %v8855_v27 = vpop.xlane.xlu0 %8854 }
0x176c   :  { %v8856_v26 = vmul.f32 0.0009765625, %v8855_v27 }
0x176d   :  { %v8873_v58 = vpop.xlane.xlu1 %8872 }
0x176e   :  { %v8875_v22 = vmul.f32 %v8856_v26, %v8856_v26  ;;  %v8874_v60 = vmul.f32 0.0009765625, %v8873_v58 }
0x1770   :  { %v8876_v36 = vsub.f32 %v8874_v60, %v8875_v22 }
0x1772   :  { %v8878_v53 = vadd.f32 1e-05, %v8876_v36 }
0x1774   :  { %9105 = vrsqrt.f32 %v8878_v53 }
0x1781   :  { %v9106_v40 = vpop.eup %9105 }
0x1782   :  { %v8880_v0 = vmul.f32 %v9106_v40, %v8877_v19 }
0x1784   :  { %8886 = vperm.xlu0 %9096, %v8880_v0   ;;  %v8882_v33 = vmul.f32 %v8880_v0, %v8856_v26 }
0x1786   :  { %v8883_v31 = vsub.f32 %v8881_v57, %v8882_v33 }
0x1788   :  { %8899 = vperm.xlu1 %9098, %v8883_v31   ;;  %9102 = vset.pattern.permute.xlu0 %v15438_v59 }
0x178c   :  { %8921 = vperm.xlu1 %9098, %v8918_v28  }
0x1790   :  { %9099 = vset.pattern.permute.xlu1 %v15438_v59 }
0x1791   :  { %8945 = vperm.xlu1 %9099, %v8918_v28  }
0x1795   :  { %9100 = vset.pattern.permute.xlu1 %v15439_v51 }
0x1796   :  { %8931 = vperm.xlu1 %9100, %v8928_v6  }
0x179a   :  { %9101 = vset.pattern.permute.xlu1 %v15438_v59 }
0x179b   :  { %8955 = vperm.xlu1 %9101, %v8928_v6  }
0x17ff   :  { %v8887_v4 = vpop.permute.xlu0 %8886 }
0x1800   :  { %v8889_v43 = vmul.f32 %v8887_v4, %v14374_v55  ;;  %v8890_v35 = vmul.f32 %v8887_v4, %v14376_v5  ;;  %v8891_v37 = vmul.f32 %v8887_v4, %v14382_v20  ;;  %v8892_v42 = vmul.f32 %v8887_v4, %v8703_v54 }
0x1801   :  { %v8893_v50 = vmul.f32 %v8887_v4, %v14389_v61  ;;  %v8894_v16 = vmul.f32 %v8887_v4, %v14393_v48  ;;  %v8895_v55 = vmul.f32 %v8887_v4, %v8843_v56  ;;  %v8896_v49 = vmul.f32 %v8887_v4, %v8845_v34 }
0x1803   :  { %v8900_v3 = vpop.permute.xlu1 %8899 }
0x1804   :  { %v8902_v44 = vadd.f32 %v8900_v3, %v8889_v43  ;;  %v8903_v24 = vadd.f32 %v8900_v3, %v8890_v35  ;;  %v8904_v47 = vadd.f32 %v8900_v3, %v8891_v37  ;;  %v8905_v8 = vadd.f32 %v8900_v3, %v8892_v42 }
0x1805   :  { %v8906_v5 = vadd.f32 %v8900_v3, %v8893_v50  ;;  %v8907_v32 = vadd.f32 %v8900_v3, %v8894_v16  ;;  %v8908_v20 = vadd.f32 %v8900_v3, %v8895_v55  ;;  %v8909_v54 = vadd.f32 %v8900_v3, %v8896_v49 }
0x1806   :  { %v8910_v13 = vmax.f32 %v8902_v44, 0.0  ;;  %v8911_v7 = vmax.f32 %v8903_v24, 0.0  ;;  %v8912_v45 = vmax.f32 %v8904_v47, 0.0  ;;  %v8913_v14 = vmax.f32 %v8905_v8, 0.0 }
0x1807   :  { %v8922_v11 = vpop.permute.xlu1 %8921  ;;  %v8914_v9 = vmax.f32 %v8906_v5, 0.0  ;;  %v8915_v29 = vmax.f32 %v8907_v32, 0.0  ;;  %v8916_v61 = vmax.f32 %v8908_v20, 0.0  ;;  %v8917_v30 = vmax.f32 %v8909_v54, 0.0 }
0x1808   :  { %v8924_v38 = vmul.f32 %v8922_v11, %v8910_v13  ;;  %v8925_v63 = vmul.f32 %v8922_v11, %v8911_v7  ;;  %v8926_v2 = vmul.f32 %v8922_v11, %v8912_v45  ;;  %v8927_v12 = vmul.f32 %v8922_v11, %v8913_v14 }
0x180c   :  { %v8946_v10 = vpop.permute.xlu1 %8945 }
0x180d   :  { %v8948_v48 = vmul.f32 %v8946_v10, %v8914_v9  ;;  %v8949_v56 = vmul.f32 %v8946_v10, %v8915_v29  ;;  %v8950_v52 = vmul.f32 %v8946_v10, %v8916_v61  ;;  %v8951_v39 = vmul.f32 %v8946_v10, %v8917_v30 }
0x1811   :  { %v8932_v25 = vpop.permute.xlu1 %8931 }
0x1812   :  { %v8934_v46 = vadd.f32 %v8932_v25, %v8924_v38  ;;  %v8935_v18 = vadd.f32 %v8932_v25, %v8925_v63  ;;  %v8936_v62 = vadd.f32 %v8932_v25, %v8926_v2  ;;  %v8937_v23 = vadd.f32 %v8932_v25, %v8927_v12 }
0x1814   :  { %8938 = vst [vmem:[%s14458_s14] sm:$0xff] %v8934_v46  ;;  %8939 = vst [vmem:[%s14458_s14 + $0x8] sm:$0xff] %v8935_v18 }
0x1815   :  { %8940 = vst [vmem:[%s14458_s14 + $0x10] sm:$0xff] %v8936_v62  ;;  %8941 = vst [vmem:[%s14458_s14 + $0x18] sm:$0xff] %v8937_v23 }
0x1816   :  { %v8956_v21 = vpop.permute.xlu1 %8955 }
0x1817   :  { %v8958_v34 = vadd.f32 %v8956_v21, %v8948_v48  ;;  %v8959_v41 = vadd.f32 %v8956_v21, %v8949_v56  ;;  %v8960_v17 = vadd.f32 %v8956_v21, %v8950_v52  ;;  %v8961_v15 = vadd.f32 %v8956_v21, %v8951_v39 }
0x1819   :  { %8962 = vst [vmem:[%s14458_s14 + $0x20] sm:$0xff] %v8958_v34  ;;  %8963 = vst [vmem:[%s14458_s14 + $0x28] sm:$0xff] %v8959_v41 }
0x181a   :  { %8964 = vst [vmem:[%s14458_s14 + $0x30] sm:$0xff] %v8960_v17  ;;  %8965 = vst [vmem:[%s14458_s14 + $0x38] sm:$0xff] %v8961_v15 }

</bundles_post_ra>
